<compile_context>
chip_gen: v7x
topology: tpu7x:2x2x1
jax: 0.10.0
libtpu: 0.0.40
codegen_flags: <defaults>
</compile_context>

<pallas_src>
import functools
import math

import jax
import jax.numpy as jnp
from jax.experimental import pallas as pl
from jax.experimental.pallas import tpu as pltpu

NUM_CLASS = 10
IN_CH = 3                       # assumed RGB input for FeatureBlock
PAD_IN = 8                      # first conv input channels zero-padded 3 -> 8
VMEM_LIMIT = 48 * 1024 * 1024   # fits v7x's 64 MiB physical VMEM; fine on v5e/v6e


def _pick_tm(m):
    """Largest row tile dividing M.  For small M prefer >= 2 blocks so the
    BlockSpec pipeline (and megacore 'parallel' sharding) has work."""
    if m > 512:
        for tm in (512, 256, 128, 64, 32, 16, 8):
            if m % tm == 0:
                return tm
        return m
    for tm in (256, 128, 64, 32, 16, 8):
        if m % tm == 0 and m // tm >= 2:
            return tm
    return m


# ---------------------------------------------------------------------------
# Fused multi-operand matmul + bias (+ReLU) Pallas kernel
# ---------------------------------------------------------------------------
def _fused_mm_kernel(*refs, n_terms, relu):
    """refs = (a_0..a_{T-1}, w_0..w_{T-1}, bias, out).
    Computes act(sum_t a_t @ w_t + bias) for one (TM, N) output tile.
    bf16 operands, f32 MXU accumulation, epilogue fused, cast at store."""
    a_refs = refs[:n_terms]
    w_refs = refs[n_terms:2 * n_terms]
    b_ref = refs[2 * n_terms]
    o_ref = refs[2 * n_terms + 1]

    acc = jnp.dot(a_refs[0][...], w_refs[0][...],
                  preferred_element_type=jnp.float32)
    for t in range(1, n_terms):
        acc += jnp.dot(a_refs[t][...], w_refs[t][...],
                       preferred_element_type=jnp.float32)
    acc = acc + b_ref[...]
    if relu:
        acc = jnp.maximum(acc, 0.0)
    o_ref[...] = acc.astype(o_ref.dtype)


def fused_matmul_bias(terms, bias, *, relu, out_dtype=jnp.bfloat16):
    """terms: list of (A:(M,K_i), W:(K_i,N)).  Returns act(sum A@W + b), (M,N).

    Tiled over M only (each K_i fits comfortably in a VMEM block); the weights
    and bias stay resident across the grid (constant index_map => single DMA)."""
    n_terms = len(terms)
    M = terms[0][0].shape[0]
    N = terms[0][1].shape[1]
    tm = _pick_tm(M)
    grid = (M // tm,)

    a_list = [a.astype(jnp.bfloat16) for a, _ in terms]
    w_list = [w.astype(jnp.bfloat16) for _, w in terms]
    b2 = bias.reshape(1, N).astype(jnp.float32)

    in_specs = (
        [pl.BlockSpec((tm, a.shape[1]), lambda i: (i, 0)) for a in a_list]
        + [pl.BlockSpec(w.shape, lambda i: (0, 0)) for w in w_list]
        + [pl.BlockSpec((1, N), lambda i: (0, 0))]
    )
    out_specs = pl.BlockSpec((tm, N), lambda i: (i, 0))

    flops = 2 * M * N * sum(a.shape[1] for a in a_list)
    out_bytes = M * N * (2 if out_dtype == jnp.bfloat16 else 4)
    bytes_accessed = (sum(a.size * 2 for a in a_list)
                      + sum(w.size * 2 for w in w_list)
                      + 4 * N + out_bytes)

    return pl.pallas_call(
        functools.partial(_fused_mm_kernel, n_terms=n_terms, relu=relu),
        out_shape=jax.ShapeDtypeStruct((M, N), out_dtype),
        grid=grid,
        in_specs=in_specs,
        out_specs=out_specs,
        compiler_params=pltpu.CompilerParams(
            dimension_semantics=("parallel",),
            vmem_limit_bytes=VMEM_LIMIT),
        cost_estimate=pl.CostEstimate(
            flops=int(flops), transcendentals=0,
            bytes_accessed=int(bytes_accessed)),
    )(*a_list, *w_list, b2)


# ---------------------------------------------------------------------------
# MaxPool2d(2,2) — tiled 4-way elementwise max, multi-tensor in one call
# ---------------------------------------------------------------------------
def _maxpool_kernel(*refs, n_out):
    """refs = (a0,b0,c0,d0, a1,b1,c1,d1, ..., out0, out1, ...)."""
    for t in range(n_out):
        a, b, c, d = refs[4 * t:4 * t + 4]
        refs[4 * n_out + t][...] = jnp.maximum(
            jnp.maximum(a[...], b[...]), jnp.maximum(c[...], d[...]))


def pallas_maxpool2x2(*xs):
    """nn.MaxPool2d(2, 2) on one or more NHWC tensors sharing (N, H, W).
    All tensors are pooled inside ONE pallas_call (pooling a channel-concat
    commutes with pooling the pieces), saving kernel launches.  Returns a
    tuple of pooled tensors (bf16)."""
    N, H, W, _ = xs[0].shape
    Ho, Wo = H // 2, W // 2
    M = N * Ho * Wo
    tm = _pick_tm(M)
    n_out = len(xs)

    parts, in_specs, out_shapes, out_specs = [], [], [], []
    total_c = 0
    for x in xs:
        assert x.shape[:3] == (N, H, W)
        C = x.shape[-1]
        total_c += C
        for dy in (0, 1):
            for dx in (0, 1):
                parts.append(
                    x[:, dy::2, dx::2, :].reshape(M, C).astype(jnp.bfloat16))
        in_specs += [pl.BlockSpec((tm, C), lambda i: (i, 0))] * 4
        out_shapes.append(jax.ShapeDtypeStruct((M, C), jnp.bfloat16))
        out_specs.append(pl.BlockSpec((tm, C), lambda i: (i, 0)))

    outs = pl.pallas_call(
        functools.partial(_maxpool_kernel, n_out=n_out),
        out_shape=tuple(out_shapes),
        grid=(M // tm,),
        in_specs=in_specs,
        out_specs=tuple(out_specs),
        compiler_params=pltpu.CompilerParams(
            dimension_semantics=("parallel",),
            vmem_limit_bytes=VMEM_LIMIT),
        cost_estimate=pl.CostEstimate(
            flops=3 * M * total_c, transcendentals=0,
            bytes_accessed=5 * M * total_c * 2),
    )(*parts)
    return tuple(o.reshape(N, Ho, Wo, -1) for o in outs)


# ---------------------------------------------------------------------------
# Conv = im2col (XLA glue, bf16) + fused Pallas matmul
# ---------------------------------------------------------------------------
def _im2col(x, kh=3, kw=3, stride=1, pad=1):
    """x: (N,H,W,C) -> patches (N*Ho*Wo, kh*kw*C) with (dy,dx,Cin) ordering."""
    xp = jnp.pad(x, ((0, 0), (pad, pad), (pad, pad), (0, 0)))
    N, Hp, Wp, C = xp.shape
    Ho = (Hp - kh) // stride + 1
    Wo = (Wp - kw) // stride + 1
    cols = []
    for dy in range(kh):
        for dx in range(kw):
            cols.append(xp[:, dy:dy + stride * Ho:stride,
                           dx:dx + stride * Wo:stride, :])
    patches = jnp.concatenate(cols, axis=-1)              # (N,Ho,Wo,kh*kw*C)
    return patches.reshape(N * Ho * Wo, kh * kw * C), (N, Ho, Wo)


def conv_bn_relu(x, w2d, b, *, stride=1, relu=True):
    """3x3 conv (pad=1) + folded-BN bias + optional ReLU.  NHWC bf16 in/out."""
    patches, (N, Ho, Wo) = _im2col(x, stride=stride)
    out = fused_matmul_bias([(patches, w2d)], b, relu=relu)
    return out.reshape(N, Ho, Wo, -1)


def conv_bn_relu_dual(x1, x2, w1, w2, b, *, stride=1, relu=True):
    """3x3 conv over torch.concat((x1, x2), dim=channels) WITHOUT materializing
    the concat: split-K accumulation of two matmuls in one kernel."""
    p1, (N, Ho, Wo) = _im2col(x1, stride=stride)
    p2, _ = _im2col(x2, stride=stride)
    out = fused_matmul_bias([(p1, w1), (p2, w2)], b, relu=relu)
    return out.reshape(N, Ho, Wo, -1)


# ---------------------------------------------------------------------------
# Parameters (deterministic synthetic init; BN folded to identity)
# ---------------------------------------------------------------------------
def make_params(key):
    keys = list(jax.random.split(key, 64))
    it = iter(keys)
    p = {}

    def conv_w(cin, cout):
        return (jax.random.normal(next(it), (3, 3, cin, cout), jnp.float32)
                * (1.0 / math.sqrt(9.0 * cin)))

    def bias(cout):
        return 0.01 * jax.random.normal(next(it), (cout,), jnp.float32)

    def conv(name, cin, cout):
        p[name] = (conv_w(cin, cout).reshape(9 * cin, cout), bias(cout))

    def conv_dual(name, cin1, cin2, cout):
        # weights for conv over concat((x1, x2), channels), split per branch
        p[name] = (conv_w(cin1, cout).reshape(9 * cin1, cout),
                   conv_w(cin2, cout).reshape(9 * cin2, cout),
                   bias(cout))

    # FeatureBlock(64): conv3x3 IN_CH->64 (+BN+ReLU); cin zero-padded to PAD_IN
    wf = conv_w(IN_CH, 64)
    wf = jnp.pad(wf, ((0, 0), (0, 0), (0, PAD_IN - IN_CH), (0, 0)))
    p["feature"] = (wf.reshape(9 * PAD_IN, 64), bias(64))

    # ConvolutionBlock(stride, cout): conv3x3 + BN + ReLU
    conv("cb1", 64, 64)         # ConvolutionBlock(1, 64, first=True)
    conv("cb2", 64, 128)        # ConvolutionBlock(2, 128)
    conv("cb3", 128, 128)       # ConvolutionBlock(2, 128)
    conv("cb4", 128, 128)       # ConvolutionBlock(2, 128)

    # DDModel(c): two conv3x3+BN+ReLU layers (in->c, c->c)
    conv("db1_0", 64, 64);  conv("db1_1", 64, 64)              # db1 = DDModel(64)
    conv_dual("db2a_0", 64, 64, 64); conv("db2a_1", 64, 64)    # db2: DDModel(64) on concat
    conv("db2b_0", 64, 128); conv("db2b_1", 128, 128)          # db2: DDModel(128)
    conv_dual("db3_0", 128, 128, 128); conv("db3_1", 128, 128) # db3: DDModel(128) on concat
    conv_dual("db4_0", 128, 128, 128); conv("db4_1", 128, 128) # db4: DDModel(128) on concat

    # ClassifierBlock(num_class, 1024): AdaptiveAvgPool2d((2,2)) -> Linear
    # FC weight split per concat branch (first 512 rows <-> x, last 512 <-> y)
    p["fc"] = (jax.random.normal(next(it), (512, NUM_CLASS), jnp.float32)
               * (1.0 / math.sqrt(1024.0)),
               jax.random.normal(next(it), (512, NUM_CLASS), jnp.float32)
               * (1.0 / math.sqrt(1024.0)),
               bias(NUM_CLASS))
    return p


# ---------------------------------------------------------------------------
# Forward pass (mirrors TDSNet.forward; channel concats folded into kernels)
# ---------------------------------------------------------------------------
def tdsnet_forward(params, x_nchw):
    def cbr(name, x, stride=1):
        w, b = params[name]
        return conv_bn_relu(x, w, b, stride=stride, relu=True)

    def cbr2(name, xa, xb, stride=1):
        w1, w2, b = params[name]
        return conv_bn_relu_dual(xa, xb, w1, w2, b, stride=stride, relu=True)

    x = jnp.transpose(x_nchw, (0, 2, 3, 1)).astype(jnp.bfloat16)   # -> NHWC
    x = jnp.pad(x, ((0, 0), (0, 0), (0, 0), (0, PAD_IN - x.shape[-1])))

    x = cbr("feature", x)                                 # featureBlock, 64ch
    y = cbr("cb1", x)                                     # cb1, 64ch
    x = cbr("db1_1", cbr("db1_0", x))                     # db1, 64ch
    xs = y                                                # cat(x, y) kept as pair
    y = cbr("cb2", y, stride=2)                           # cb2 -> 128ch, /2

    # db2: DDModel(64) on cat -> MaxPool -> DDModel(128)
    x = cbr("db2a_1", cbr2("db2a_0", x, xs))
    (x,) = pallas_maxpool2x2(x)
    x = cbr("db2b_1", cbr("db2b_0", x))                   # 128ch, /2
    xs = y                                                # cat(x, y) as pair
    y = cbr("cb3", y, stride=2)                           # cb3 -> 128ch, /4

    # db3: MaxPool on cat -> DDModel(128)   (pool commutes with channel concat;
    # both halves pooled in one fused pallas_call)
    x, xs = pallas_maxpool2x2(x, xs)
    x = cbr("db3_1", cbr2("db3_0", x, xs))                # 128ch, /4
    xs = y                                                # cat(x, y) as pair
    y = cbr("cb4", y, stride=2)                           # cb4 -> 128ch, /8

    # db4: MaxPool on cat -> DDModel(128)
    x, xs = pallas_maxpool2x2(x, xs)
    x = cbr("db4_1", cbr2("db4_0", x, xs))                # 128ch, /8
    # final cat(x, y) folded into the split classifier matmul below

    # ClassifierBlock: AdaptiveAvgPool2d((2,2)) -> flatten (NCHW order) -> FC
    def pooled_flat(z):
        N, H, W, C = z.shape
        z = z.reshape(N, 2, H // 2, 2, W // 2, C).mean(axis=(2, 4))  # (N,2,2,C)
        return jnp.transpose(z, (0, 3, 1, 2)).reshape(N, C * 4)      # c*4+h*2+w

    xf = pooled_flat(x)                                   # (N, 512)  <- x channels
    yf = pooled_flat(y)                                   # (N, 512)  <- y channels
    wfx, wfy, bf = params["fc"]
    return fused_matmul_bias([(xf, wfx), (yf, wfy)], bf, relu=False,
                             out_dtype=jnp.float32)       # (N, num_class)


if __name__ == "__main__":
    key = jax.random.PRNGKey(0)
    kp, kx = jax.random.split(key)
    params = make_params(kp)
    # Small, shape-consistent example input in PyTorch NCHW convention.
    x = jax.random.normal(kx, (2, IN_CH, 16, 16), jnp.float32)

    fwd = jax.jit(lambda xx: tdsnet_forward(params, xx))
    out = fwd(x)
    out = jax.block_until_ready(out)
    assert out.shape == (2, NUM_CLASS), out.shape
    assert jnp.all(jnp.isfinite(out))
    print("KERNEL_OK")
</pallas_src>

<mosaic_0001>
module attributes {stable_mosaic.version = 11 : i64} {
  func.func @_fused_mm_kernel(%arg0: i32, %arg1: memref<256x72xbf16, #tpu.memory_space<vmem>>, %arg2: memref<72x64xbf16, #tpu.memory_space<vmem>>, %arg3: memref<1x64xf32, #tpu.memory_space<vmem>>, %arg4: memref<256x64xbf16, #tpu.memory_space<vmem>>) attributes {dimension_semantics = [#tpu.dimension_semantics<parallel>], iteration_bounds = array<i64: 2>, scalar_prefetch = 0 : i64, scratch_operands = 0 : i64, tpu.core_type = #tpu.core_type<tc>, window_params = [{transform_indices = @transform_0, window_bounds = array<i64: 256, 72>}, {pipeline_mode = #tpu.pipeline_mode<synchronous>, transform_indices = @transform_1, window_bounds = array<i64: 72, 64>}, {pipeline_mode = #tpu.pipeline_mode<synchronous>, transform_indices = @transform_2, window_bounds = array<i64: 1, 64>}, {transform_indices = @transform_3, window_bounds = array<i64: 256, 64>}]} {
    %c0 = arith.constant 0 : index
    %c0_0 = arith.constant 0 : index
    %0 = vector.load %arg1[%c0, %c0_0] : memref<256x72xbf16, #tpu.memory_space<vmem>>, vector<256x72xbf16>
    %c0_1 = arith.constant 0 : index
    %c0_2 = arith.constant 0 : index
    %1 = vector.load %arg2[%c0_1, %c0_2] : memref<72x64xbf16, #tpu.memory_space<vmem>>, vector<72x64xbf16>
    %cst = arith.constant dense<0.000000e+00> : vector<256x64xf32>
    %2 = tpu.matmul %0, %1, %cst {dimension_numbers = #tpu.dot_dimension_numbers<[1], [0], [0], [1], [0, 0, 1, 1], [], []>} : vector<256x72xbf16>, vector<72x64xbf16>, vector<256x64xf32> -> vector<256x64xf32>
    %c0_3 = arith.constant 0 : index
    %c0_4 = arith.constant 0 : index
    %3 = vector.load %arg3[%c0_3, %c0_4] : memref<1x64xf32, #tpu.memory_space<vmem>>, vector<1x64xf32>
    %4 = vector.broadcast %3 : vector<1x64xf32> to vector<256x64xf32>
    %5 = arith.addf %2, %4 : vector<256x64xf32>
    %cst_5 = arith.constant 0.000000e+00 : f32
    %6 = vector.broadcast %cst_5 : f32 to vector<256x64xf32>
    %7 = arith.maximumf %5, %6 : vector<256x64xf32>
    %8 = arith.truncf %7 : vector<256x64xf32> to vector<256x64xbf16>
    %c0_6 = arith.constant 0 : index
    %c0_7 = arith.constant 0 : index
    %9 = vector.load %arg4[%c0_6, %c0_7] : memref<256x64xbf16, #tpu.memory_space<vmem>>, vector<256x64xbf16>
    tpu.vector_store %arg4[%c0_6, %c0_7], %8 {strides = array<i32>} : memref<256x64xbf16, #tpu.memory_space<vmem>>, vector<256x64xbf16>,
    return
  }
  func.func @transform_0(%arg0: i32) -> (i32, i32) {
    %c0_i32 = arith.constant 0 : i32
    %c0_i32_0 = arith.constant 0 : i32
    return %arg0, %c0_i32 : i32, i32
  }
  func.func @transform_1(%arg0: i32) -> (i32, i32) {
    %c0_i32 = arith.constant 0 : i32
    %c0_i32_0 = arith.constant 0 : i32
    %c0_i32_1 = arith.constant 0 : i32
    return %c0_i32, %c0_i32_0 : i32, i32
  }
  func.func @transform_2(%arg0: i32) -> (i32, i32) {
    %c0_i32 = arith.constant 0 : i32
    %c0_i32_0 = arith.constant 0 : i32
    %c0_i32_1 = arith.constant 0 : i32
    return %c0_i32, %c0_i32_0 : i32, i32
  }
  func.func @transform_3(%arg0: i32) -> (i32, i32) {
    %c0_i32 = arith.constant 0 : i32
    %c0_i32_0 = arith.constant 0 : i32
    return %arg0, %c0_i32 : i32, i32
  }
}

module attributes {stable_mosaic.version = 11 : i64} {
  func.func @_fused_mm_kernel(%arg0: i32, %arg1: memref<256x576xbf16, #tpu.memory_space<vmem>>, %arg2: memref<576x64xbf16, #tpu.memory_space<vmem>>, %arg3: memref<1x64xf32, #tpu.memory_space<vmem>>, %arg4: memref<256x64xbf16, #tpu.memory_space<vmem>>) attributes {dimension_semantics = [#tpu.dimension_semantics<parallel>], iteration_bounds = array<i64: 2>, scalar_prefetch = 0 : i64, scratch_operands = 0 : i64, tpu.core_type = #tpu.core_type<tc>, window_params = [{transform_indices = @transform_0, window_bounds = array<i64: 256, 576>}, {pipeline_mode = #tpu.pipeline_mode<synchronous>, transform_indices = @transform_1, window_bounds = array<i64: 576, 64>}, {pipeline_mode = #tpu.pipeline_mode<synchronous>, transform_indices = @transform_2, window_bounds = array<i64: 1, 64>}, {transform_indices = @transform_3, window_bounds = array<i64: 256, 64>}]} {
    %c0 = arith.constant 0 : index
    %c0_0 = arith.constant 0 : index
    %0 = vector.load %arg1[%c0, %c0_0] : memref<256x576xbf16, #tpu.memory_space<vmem>>, vector<256x576xbf16>
    %c0_1 = arith.constant 0 : index
    %c0_2 = arith.constant 0 : index
    %1 = vector.load %arg2[%c0_1, %c0_2] : memref<576x64xbf16, #tpu.memory_space<vmem>>, vector<576x64xbf16>
    %cst = arith.constant dense<0.000000e+00> : vector<256x64xf32>
    %2 = tpu.matmul %0, %1, %cst {dimension_numbers = #tpu.dot_dimension_numbers<[1], [0], [0], [1], [0, 0, 1, 1], [], []>} : vector<256x576xbf16>, vector<576x64xbf16>, vector<256x64xf32> -> vector<256x64xf32>
    %c0_3 = arith.constant 0 : index
    %c0_4 = arith.constant 0 : index
    %3 = vector.load %arg3[%c0_3, %c0_4] : memref<1x64xf32, #tpu.memory_space<vmem>>, vector<1x64xf32>
    %4 = vector.broadcast %3 : vector<1x64xf32> to vector<256x64xf32>
    %5 = arith.addf %2, %4 : vector<256x64xf32>
    %cst_5 = arith.constant 0.000000e+00 : f32
    %6 = vector.broadcast %cst_5 : f32 to vector<256x64xf32>
    %7 = arith.maximumf %5, %6 : vector<256x64xf32>
    %8 = arith.truncf %7 : vector<256x64xf32> to vector<256x64xbf16>
    %c0_6 = arith.constant 0 : index
    %c0_7 = arith.constant 0 : index
    %9 = vector.load %arg4[%c0_6, %c0_7] : memref<256x64xbf16, #tpu.memory_space<vmem>>, vector<256x64xbf16>
    tpu.vector_store %arg4[%c0_6, %c0_7], %8 {strides = array<i32>} : memref<256x64xbf16, #tpu.memory_space<vmem>>, vector<256x64xbf16>,
    return
  }
  func.func @transform_0(%arg0: i32) -> (i32, i32) {
    %c0_i32 = arith.constant 0 : i32
    %c0_i32_0 = arith.constant 0 : i32
    return %arg0, %c0_i32 : i32, i32
  }
  func.func @transform_1(%arg0: i32) -> (i32, i32) {
    %c0_i32 = arith.constant 0 : i32
    %c0_i32_0 = arith.constant 0 : i32
    %c0_i32_1 = arith.constant 0 : i32
    return %c0_i32, %c0_i32_0 : i32, i32
  }
  func.func @transform_2(%arg0: i32) -> (i32, i32) {
    %c0_i32 = arith.constant 0 : i32
    %c0_i32_0 = arith.constant 0 : i32
    %c0_i32_1 = arith.constant 0 : i32
    return %c0_i32, %c0_i32_0 : i32, i32
  }
  func.func @transform_3(%arg0: i32) -> (i32, i32) {
    %c0_i32 = arith.constant 0 : i32
    %c0_i32_0 = arith.constant 0 : i32
    return %arg0, %c0_i32 : i32, i32
  }
}

module attributes {stable_mosaic.version = 11 : i64} {
  func.func @_fused_mm_kernel(%arg0: i32, %arg1: memref<256x576xbf16, #tpu.memory_space<vmem>>, %arg2: memref<256x576xbf16, #tpu.memory_space<vmem>>, %arg3: memref<576x64xbf16, #tpu.memory_space<vmem>>, %arg4: memref<576x64xbf16, #tpu.memory_space<vmem>>, %arg5: memref<1x64xf32, #tpu.memory_space<vmem>>, %arg6: memref<256x64xbf16, #tpu.memory_space<vmem>>) attributes {dimension_semantics = [#tpu.dimension_semantics<parallel>], iteration_bounds = array<i64: 2>, scalar_prefetch = 0 : i64, scratch_operands = 0 : i64, tpu.core_type = #tpu.core_type<tc>, window_params = [{transform_indices = @transform_0, window_bounds = array<i64: 256, 576>}, {transform_indices = @transform_1, window_bounds = array<i64: 256, 576>}, {pipeline_mode = #tpu.pipeline_mode<synchronous>, transform_indices = @transform_2, window_bounds = array<i64: 576, 64>}, {pipeline_mode = #tpu.pipeline_mode<synchronous>, transform_indices = @transform_3, window_bounds = array<i64: 576, 64>}, {pipeline_mode = #tpu.pipeline_mode<synchronous>, transform_indices = @transform_4, window_bounds = array<i64: 1, 64>}, {transform_indices = @transform_5, window_bounds = array<i64: 256, 64>}]} {
    %c0 = arith.constant 0 : index
    %c0_0 = arith.constant 0 : index
    %0 = vector.load %arg1[%c0, %c0_0] : memref<256x576xbf16, #tpu.memory_space<vmem>>, vector<256x576xbf16>
    %c0_1 = arith.constant 0 : index
    %c0_2 = arith.constant 0 : index
    %1 = vector.load %arg3[%c0_1, %c0_2] : memref<576x64xbf16, #tpu.memory_space<vmem>>, vector<576x64xbf16>
    %cst = arith.constant dense<0.000000e+00> : vector<256x64xf32>
    %2 = tpu.matmul %0, %1, %cst {dimension_numbers = #tpu.dot_dimension_numbers<[1], [0], [0], [1], [0, 0, 1, 1], [], []>} : vector<256x576xbf16>, vector<576x64xbf16>, vector<256x64xf32> -> vector<256x64xf32>
    %c0_3 = arith.constant 0 : index
    %c0_4 = arith.constant 0 : index
    %3 = vector.load %arg2[%c0_3, %c0_4] : memref<256x576xbf16, #tpu.memory_space<vmem>>, vector<256x576xbf16>
    %c0_5 = arith.constant 0 : index
    %c0_6 = arith.constant 0 : index
    %4 = vector.load %arg4[%c0_5, %c0_6] : memref<576x64xbf16, #tpu.memory_space<vmem>>, vector<576x64xbf16>
    %cst_7 = arith.constant dense<0.000000e+00> : vector<256x64xf32>
    %5 = tpu.matmul %3, %4, %cst_7 {dimension_numbers = #tpu.dot_dimension_numbers<[1], [0], [0], [1], [0, 0, 1, 1], [], []>} : vector<256x576xbf16>, vector<576x64xbf16>, vector<256x64xf32> -> vector<256x64xf32>
    %6 = arith.addf %2, %5 : vector<256x64xf32>
    %c0_8 = arith.constant 0 : index
    %c0_9 = arith.constant 0 : index
    %7 = vector.load %arg5[%c0_8, %c0_9] : memref<1x64xf32, #tpu.memory_space<vmem>>, vector<1x64xf32>
    %8 = vector.broadcast %7 : vector<1x64xf32> to vector<256x64xf32>
    %9 = arith.addf %6, %8 : vector<256x64xf32>
    %cst_10 = arith.constant 0.000000e+00 : f32
    %10 = vector.broadcast %cst_10 : f32 to vector<256x64xf32>
    %11 = arith.maximumf %9, %10 : vector<256x64xf32>
    %12 = arith.truncf %11 : vector<256x64xf32> to vector<256x64xbf16>
    %c0_11 = arith.constant 0 : index
    %c0_12 = arith.constant 0 : index
    %13 = vector.load %arg6[%c0_11, %c0_12] : memref<256x64xbf16, #tpu.memory_space<vmem>>, vector<256x64xbf16>
    tpu.vector_store %arg6[%c0_11, %c0_12], %12 {strides = array<i32>} : memref<256x64xbf16, #tpu.memory_space<vmem>>, vector<256x64xbf16>,
    return
  }
  func.func @transform_0(%arg0: i32) -> (i32, i32) {
    %c0_i32 = arith.constant 0 : i32
    %c0_i32_0 = arith.constant 0 : i32
    return %arg0, %c0_i32 : i32, i32
  }
  func.func @transform_1(%arg0: i32) -> (i32, i32) {
    %c0_i32 = arith.constant 0 : i32
    %c0_i32_0 = arith.constant 0 : i32
    return %arg0, %c0_i32 : i32, i32
  }
  func.func @transform_2(%arg0: i32) -> (i32, i32) {
    %c0_i32 = arith.constant 0 : i32
    %c0_i32_0 = arith.constant 0 : i32
    %c0_i32_1 = arith.constant 0 : i32
    return %c0_i32, %c0_i32_0 : i32, i32
  }
  func.func @transform_3(%arg0: i32) -> (i32, i32) {
    %c0_i32 = arith.constant 0 : i32
    %c0_i32_0 = arith.constant 0 : i32
    %c0_i32_1 = arith.constant 0 : i32
    return %c0_i32, %c0_i32_0 : i32, i32
  }
  func.func @transform_4(%arg0: i32) -> (i32, i32) {
    %c0_i32 = arith.constant 0 : i32
    %c0_i32_0 = arith.constant 0 : i32
    %c0_i32_1 = arith.constant 0 : i32
    return %c0_i32, %c0_i32_0 : i32, i32
  }
  func.func @transform_5(%arg0: i32) -> (i32, i32) {
    %c0_i32 = arith.constant 0 : i32
    %c0_i32_0 = arith.constant 0 : i32
    return %arg0, %c0_i32 : i32, i32
  }
}

module attributes {stable_mosaic.version = 11 : i64} {
  func.func @_maxpool_kernel(%arg0: i32, %arg1: memref<64x64xbf16, #tpu.memory_space<vmem>>, %arg2: memref<64x64xbf16, #tpu.memory_space<vmem>>, %arg3: memref<64x64xbf16, #tpu.memory_space<vmem>>, %arg4: memref<64x64xbf16, #tpu.memory_space<vmem>>, %arg5: memref<64x64xbf16, #tpu.memory_space<vmem>>) attributes {dimension_semantics = [#tpu.dimension_semantics<parallel>], iteration_bounds = array<i64: 2>, scalar_prefetch = 0 : i64, scratch_operands = 0 : i64, tpu.core_type = #tpu.core_type<tc>, window_params = [{transform_indices = @transform_0, window_bounds = array<i64: 64, 64>}, {transform_indices = @transform_1, window_bounds = array<i64: 64, 64>}, {transform_indices = @transform_2, window_bounds = array<i64: 64, 64>}, {transform_indices = @transform_3, window_bounds = array<i64: 64, 64>}, {transform_indices = @transform_4, window_bounds = array<i64: 64, 64>}]} {
    %c0 = arith.constant 0 : index
    %c0_0 = arith.constant 0 : index
    %0 = vector.load %arg1[%c0, %c0_0] : memref<64x64xbf16, #tpu.memory_space<vmem>>, vector<64x64xbf16>
    %c0_1 = arith.constant 0 : index
    %c0_2 = arith.constant 0 : index
    %1 = vector.load %arg2[%c0_1, %c0_2] : memref<64x64xbf16, #tpu.memory_space<vmem>>, vector<64x64xbf16>
    %2 = arith.maximumf %0, %1 : vector<64x64xbf16>
    %c0_3 = arith.constant 0 : index
    %c0_4 = arith.constant 0 : index
    %3 = vector.load %arg3[%c0_3, %c0_4] : memref<64x64xbf16, #tpu.memory_space<vmem>>, vector<64x64xbf16>
    %c0_5 = arith.constant 0 : index
    %c0_6 = arith.constant 0 : index
    %4 = vector.load %arg4[%c0_5, %c0_6] : memref<64x64xbf16, #tpu.memory_space<vmem>>, vector<64x64xbf16>
    %5 = arith.maximumf %3, %4 : vector<64x64xbf16>
    %6 = arith.maximumf %2, %5 : vector<64x64xbf16>
    %c0_7 = arith.constant 0 : index
    %c0_8 = arith.constant 0 : index
    %7 = vector.load %arg5[%c0_7, %c0_8] : memref<64x64xbf16, #tpu.memory_space<vmem>>, vector<64x64xbf16>
    tpu.vector_store %arg5[%c0_7, %c0_8], %6 {strides = array<i32>} : memref<64x64xbf16, #tpu.memory_space<vmem>>, vector<64x64xbf16>,
    return
  }
  func.func @transform_0(%arg0: i32) -> (i32, i32) {
    %c0_i32 = arith.constant 0 : i32
    %c0_i32_0 = arith.constant 0 : i32
    return %arg0, %c0_i32 : i32, i32
  }
  func.func @transform_1(%arg0: i32) -> (i32, i32) {
    %c0_i32 = arith.constant 0 : i32
    %c0_i32_0 = arith.constant 0 : i32
    return %arg0, %c0_i32 : i32, i32
  }
  func.func @transform_2(%arg0: i32) -> (i32, i32) {
    %c0_i32 = arith.constant 0 : i32
    %c0_i32_0 = arith.constant 0 : i32
    return %arg0, %c0_i32 : i32, i32
  }
  func.func @transform_3(%arg0: i32) -> (i32, i32) {
    %c0_i32 = arith.constant 0 : i32
    %c0_i32_0 = arith.constant 0 : i32
    return %arg0, %c0_i32 : i32, i32
  }
  func.func @transform_4(%arg0: i32) -> (i32, i32) {
    %c0_i32 = arith.constant 0 : i32
    %c0_i32_0 = arith.constant 0 : i32
    return %arg0, %c0_i32 : i32, i32
  }
}

module attributes {stable_mosaic.version = 11 : i64} {
  func.func @_fused_mm_kernel(%arg0: i32, %arg1: memref<64x576xbf16, #tpu.memory_space<vmem>>, %arg2: memref<576x128xbf16, #tpu.memory_space<vmem>>, %arg3: memref<1x128xf32, #tpu.memory_space<vmem>>, %arg4: memref<64x128xbf16, #tpu.memory_space<vmem>>) attributes {dimension_semantics = [#tpu.dimension_semantics<parallel>], iteration_bounds = array<i64: 2>, scalar_prefetch = 0 : i64, scratch_operands = 0 : i64, tpu.core_type = #tpu.core_type<tc>, window_params = [{transform_indices = @transform_0, window_bounds = array<i64: 64, 576>}, {pipeline_mode = #tpu.pipeline_mode<synchronous>, transform_indices = @transform_1, window_bounds = array<i64: 576, 128>}, {pipeline_mode = #tpu.pipeline_mode<synchronous>, transform_indices = @transform_2, window_bounds = array<i64: 1, 128>}, {transform_indices = @transform_3, window_bounds = array<i64: 64, 128>}]} {
    %c0 = arith.constant 0 : index
    %c0_0 = arith.constant 0 : index
    %0 = vector.load %arg1[%c0, %c0_0] : memref<64x576xbf16, #tpu.memory_space<vmem>>, vector<64x576xbf16>
    %c0_1 = arith.constant 0 : index
    %c0_2 = arith.constant 0 : index
    %1 = vector.load %arg2[%c0_1, %c0_2] : memref<576x128xbf16, #tpu.memory_space<vmem>>, vector<576x128xbf16>
    %cst = arith.constant dense<0.000000e+00> : vector<64x128xf32>
    %2 = tpu.matmul %0, %1, %cst {dimension_numbers = #tpu.dot_dimension_numbers<[1], [0], [0], [1], [0, 0, 1, 1], [], []>} : vector<64x576xbf16>, vector<576x128xbf16>, vector<64x128xf32> -> vector<64x128xf32>
    %c0_3 = arith.constant 0 : index
    %c0_4 = arith.constant 0 : index
    %3 = vector.load %arg3[%c0_3, %c0_4] : memref<1x128xf32, #tpu.memory_space<vmem>>, vector<1x128xf32>
    %4 = vector.broadcast %3 : vector<1x128xf32> to vector<64x128xf32>
    %5 = arith.addf %2, %4 : vector<64x128xf32>
    %cst_5 = arith.constant 0.000000e+00 : f32
    %6 = vector.broadcast %cst_5 : f32 to vector<64x128xf32>
    %7 = arith.maximumf %5, %6 : vector<64x128xf32>
    %8 = arith.truncf %7 : vector<64x128xf32> to vector<64x128xbf16>
    %c0_6 = arith.constant 0 : index
    %c0_7 = arith.constant 0 : index
    %9 = vector.load %arg4[%c0_6, %c0_7] : memref<64x128xbf16, #tpu.memory_space<vmem>>, vector<64x128xbf16>
    tpu.vector_store %arg4[%c0_6, %c0_7], %8 {strides = array<i32>} : memref<64x128xbf16, #tpu.memory_space<vmem>>, vector<64x128xbf16>,
    return
  }
  func.func @transform_0(%arg0: i32) -> (i32, i32) {
    %c0_i32 = arith.constant 0 : i32
    %c0_i32_0 = arith.constant 0 : i32
    return %arg0, %c0_i32 : i32, i32
  }
  func.func @transform_1(%arg0: i32) -> (i32, i32) {
    %c0_i32 = arith.constant 0 : i32
    %c0_i32_0 = arith.constant 0 : i32
    %c0_i32_1 = arith.constant 0 : i32
    return %c0_i32, %c0_i32_0 : i32, i32
  }
  func.func @transform_2(%arg0: i32) -> (i32, i32) {
    %c0_i32 = arith.constant 0 : i32
    %c0_i32_0 = arith.constant 0 : i32
    %c0_i32_1 = arith.constant 0 : i32
    return %c0_i32, %c0_i32_0 : i32, i32
  }
  func.func @transform_3(%arg0: i32) -> (i32, i32) {
    %c0_i32 = arith.constant 0 : i32
    %c0_i32_0 = arith.constant 0 : i32
    return %arg0, %c0_i32 : i32, i32
  }
}

module attributes {stable_mosaic.version = 11 : i64} {
  func.func @_fused_mm_kernel(%arg0: i32, %arg1: memref<64x1152xbf16, #tpu.memory_space<vmem>>, %arg2: memref<1152x128xbf16, #tpu.memory_space<vmem>>, %arg3: memref<1x128xf32, #tpu.memory_space<vmem>>, %arg4: memref<64x128xbf16, #tpu.memory_space<vmem>>) attributes {dimension_semantics = [#tpu.dimension_semantics<parallel>], iteration_bounds = array<i64: 2>, scalar_prefetch = 0 : i64, scratch_operands = 0 : i64, tpu.core_type = #tpu.core_type<tc>, window_params = [{transform_indices = @transform_0, window_bounds = array<i64: 64, 1152>}, {pipeline_mode = #tpu.pipeline_mode<synchronous>, transform_indices = @transform_1, window_bounds = array<i64: 1152, 128>}, {pipeline_mode = #tpu.pipeline_mode<synchronous>, transform_indices = @transform_2, window_bounds = array<i64: 1, 128>}, {transform_indices = @transform_3, window_bounds = array<i64: 64, 128>}]} {
    %c0 = arith.constant 0 : index
    %c0_0 = arith.constant 0 : index
    %0 = vector.load %arg1[%c0, %c0_0] : memref<64x1152xbf16, #tpu.memory_space<vmem>>, vector<64x1152xbf16>
    %c0_1 = arith.constant 0 : index
    %c0_2 = arith.constant 0 : index
    %1 = vector.load %arg2[%c0_1, %c0_2] : memref<1152x128xbf16, #tpu.memory_space<vmem>>, vector<1152x128xbf16>
    %cst = arith.constant dense<0.000000e+00> : vector<64x128xf32>
    %2 = tpu.matmul %0, %1, %cst {dimension_numbers = #tpu.dot_dimension_numbers<[1], [0], [0], [1], [0, 0, 1, 1], [], []>} : vector<64x1152xbf16>, vector<1152x128xbf16>, vector<64x128xf32> -> vector<64x128xf32>
    %c0_3 = arith.constant 0 : index
    %c0_4 = arith.constant 0 : index
    %3 = vector.load %arg3[%c0_3, %c0_4] : memref<1x128xf32, #tpu.memory_space<vmem>>, vector<1x128xf32>
    %4 = vector.broadcast %3 : vector<1x128xf32> to vector<64x128xf32>
    %5 = arith.addf %2, %4 : vector<64x128xf32>
    %cst_5 = arith.constant 0.000000e+00 : f32
    %6 = vector.broadcast %cst_5 : f32 to vector<64x128xf32>
    %7 = arith.maximumf %5, %6 : vector<64x128xf32>
    %8 = arith.truncf %7 : vector<64x128xf32> to vector<64x128xbf16>
    %c0_6 = arith.constant 0 : index
    %c0_7 = arith.constant 0 : index
    %9 = vector.load %arg4[%c0_6, %c0_7] : memref<64x128xbf16, #tpu.memory_space<vmem>>, vector<64x128xbf16>
    tpu.vector_store %arg4[%c0_6, %c0_7], %8 {strides = array<i32>} : memref<64x128xbf16, #tpu.memory_space<vmem>>, vector<64x128xbf16>,
    return
  }
  func.func @transform_0(%arg0: i32) -> (i32, i32) {
    %c0_i32 = arith.constant 0 : i32
    %c0_i32_0 = arith.constant 0 : i32
    return %arg0, %c0_i32 : i32, i32
  }
  func.func @transform_1(%arg0: i32) -> (i32, i32) {
    %c0_i32 = arith.constant 0 : i32
    %c0_i32_0 = arith.constant 0 : i32
    %c0_i32_1 = arith.constant 0 : i32
    return %c0_i32, %c0_i32_0 : i32, i32
  }
  func.func @transform_2(%arg0: i32) -> (i32, i32) {
    %c0_i32 = arith.constant 0 : i32
    %c0_i32_0 = arith.constant 0 : i32
    %c0_i32_1 = arith.constant 0 : i32
    return %c0_i32, %c0_i32_0 : i32, i32
  }
  func.func @transform_3(%arg0: i32) -> (i32, i32) {
    %c0_i32 = arith.constant 0 : i32
    %c0_i32_0 = arith.constant 0 : i32
    return %arg0, %c0_i32 : i32, i32
  }
}

module attributes {stable_mosaic.version = 11 : i64} {
  func.func @_maxpool_kernel(%arg0: i32, %arg1: memref<16x128xbf16, #tpu.memory_space<vmem>>, %arg2: memref<16x128xbf16, #tpu.memory_space<vmem>>, %arg3: memref<16x128xbf16, #tpu.memory_space<vmem>>, %arg4: memref<16x128xbf16, #tpu.memory_space<vmem>>, %arg5: memref<16x128xbf16, #tpu.memory_space<vmem>>, %arg6: memref<16x128xbf16, #tpu.memory_space<vmem>>, %arg7: memref<16x128xbf16, #tpu.memory_space<vmem>>, %arg8: memref<16x128xbf16, #tpu.memory_space<vmem>>, %arg9: memref<16x128xbf16, #tpu.memory_space<vmem>>, %arg10: memref<16x128xbf16, #tpu.memory_space<vmem>>) attributes {dimension_semantics = [#tpu.dimension_semantics<parallel>], iteration_bounds = array<i64: 2>, scalar_prefetch = 0 : i64, scratch_operands = 0 : i64, tpu.core_type = #tpu.core_type<tc>, window_params = [{transform_indices = @transform_0, window_bounds = array<i64: 16, 128>}, {transform_indices = @transform_1, window_bounds = array<i64: 16, 128>}, {transform_indices = @transform_2, window_bounds = array<i64: 16, 128>}, {transform_indices = @transform_3, window_bounds = array<i64: 16, 128>}, {transform_indices = @transform_4, window_bounds = array<i64: 16, 128>}, {transform_indices = @transform_5, window_bounds = array<i64: 16, 128>}, {transform_indices = @transform_6, window_bounds = array<i64: 16, 128>}, {transform_indices = @transform_7, window_bounds = array<i64: 16, 128>}, {transform_indices = @transform_8, window_bounds = array<i64: 16, 128>}, {transform_indices = @transform_9, window_bounds = array<i64: 16, 128>}]} {
    %c0 = arith.constant 0 : index
    %c0_0 = arith.constant 0 : index
    %0 = vector.load %arg1[%c0, %c0_0] : memref<16x128xbf16, #tpu.memory_space<vmem>>, vector<16x128xbf16>
    %c0_1 = arith.constant 0 : index
    %c0_2 = arith.constant 0 : index
    %1 = vector.load %arg2[%c0_1, %c0_2] : memref<16x128xbf16, #tpu.memory_space<vmem>>, vector<16x128xbf16>
    %2 = arith.maximumf %0, %1 : vector<16x128xbf16>
    %c0_3 = arith.constant 0 : index
    %c0_4 = arith.constant 0 : index
    %3 = vector.load %arg3[%c0_3, %c0_4] : memref<16x128xbf16, #tpu.memory_space<vmem>>, vector<16x128xbf16>
    %c0_5 = arith.constant 0 : index
    %c0_6 = arith.constant 0 : index
    %4 = vector.load %arg4[%c0_5, %c0_6] : memref<16x128xbf16, #tpu.memory_space<vmem>>, vector<16x128xbf16>
    %5 = arith.maximumf %3, %4 : vector<16x128xbf16>
    %6 = arith.maximumf %2, %5 : vector<16x128xbf16>
    %c0_7 = arith.constant 0 : index
    %c0_8 = arith.constant 0 : index
    %7 = vector.load %arg9[%c0_7, %c0_8] : memref<16x128xbf16, #tpu.memory_space<vmem>>, vector<16x128xbf16>
    tpu.vector_store %arg9[%c0_7, %c0_8], %6 {strides = array<i32>} : memref<16x128xbf16, #tpu.memory_space<vmem>>, vector<16x128xbf16>,
    %c0_9 = arith.constant 0 : index
    %c0_10 = arith.constant 0 : index
    %8 = vector.load %arg5[%c0_9, %c0_10] : memref<16x128xbf16, #tpu.memory_space<vmem>>, vector<16x128xbf16>
    %c0_11 = arith.constant 0 : index
    %c0_12 = arith.constant 0 : index
    %9 = vector.load %arg6[%c0_11, %c0_12] : memref<16x128xbf16, #tpu.memory_space<vmem>>, vector<16x128xbf16>
    %10 = arith.maximumf %8, %9 : vector<16x128xbf16>
    %c0_13 = arith.constant 0 : index
    %c0_14 = arith.constant 0 : index
    %11 = vector.load %arg7[%c0_13, %c0_14] : memref<16x128xbf16, #tpu.memory_space<vmem>>, vector<16x128xbf16>
    %c0_15 = arith.constant 0 : index
    %c0_16 = arith.constant 0 : index
    %12 = vector.load %arg8[%c0_15, %c0_16] : memref<16x128xbf16, #tpu.memory_space<vmem>>, vector<16x128xbf16>
    %13 = arith.maximumf %11, %12 : vector<16x128xbf16>
    %14 = arith.maximumf %10, %13 : vector<16x128xbf16>
    %c0_17 = arith.constant 0 : index
    %c0_18 = arith.constant 0 : index
    %15 = vector.load %arg10[%c0_17, %c0_18] : memref<16x128xbf16, #tpu.memory_space<vmem>>, vector<16x128xbf16>
    tpu.vector_store %arg10[%c0_17, %c0_18], %14 {strides = array<i32>} : memref<16x128xbf16, #tpu.memory_space<vmem>>, vector<16x128xbf16>,
    return
  }
  func.func @transform_0(%arg0: i32) -> (i32, i32) {
    %c0_i32 = arith.constant 0 : i32
    %c0_i32_0 = arith.constant 0 : i32
    return %arg0, %c0_i32 : i32, i32
  }
  func.func @transform_1(%arg0: i32) -> (i32, i32) {
    %c0_i32 = arith.constant 0 : i32
    %c0_i32_0 = arith.constant 0 : i32
    return %arg0, %c0_i32 : i32, i32
  }
  func.func @transform_2(%arg0: i32) -> (i32, i32) {
    %c0_i32 = arith.constant 0 : i32
    %c0_i32_0 = arith.constant 0 : i32
    return %arg0, %c0_i32 : i32, i32
  }
  func.func @transform_3(%arg0: i32) -> (i32, i32) {
    %c0_i32 = arith.constant 0 : i32
    %c0_i32_0 = arith.constant 0 : i32
    return %arg0, %c0_i32 : i32, i32
  }
  func.func @transform_4(%arg0: i32) -> (i32, i32) {
    %c0_i32 = arith.constant 0 : i32
    %c0_i32_0 = arith.constant 0 : i32
    return %arg0, %c0_i32 : i32, i32
  }
  func.func @transform_5(%arg0: i32) -> (i32, i32) {
    %c0_i32 = arith.constant 0 : i32
    %c0_i32_0 = arith.constant 0 : i32
    return %arg0, %c0_i32 : i32, i32
  }
  func.func @transform_6(%arg0: i32) -> (i32, i32) {
    %c0_i32 = arith.constant 0 : i32
    %c0_i32_0 = arith.constant 0 : i32
    return %arg0, %c0_i32 : i32, i32
  }
  func.func @transform_7(%arg0: i32) -> (i32, i32) {
    %c0_i32 = arith.constant 0 : i32
    %c0_i32_0 = arith.constant 0 : i32
    return %arg0, %c0_i32 : i32, i32
  }
  func.func @transform_8(%arg0: i32) -> (i32, i32) {
    %c0_i32 = arith.constant 0 : i32
    %c0_i32_0 = arith.constant 0 : i32
    return %arg0, %c0_i32 : i32, i32
  }
  func.func @transform_9(%arg0: i32) -> (i32, i32) {
    %c0_i32 = arith.constant 0 : i32
    %c0_i32_0 = arith.constant 0 : i32
    return %arg0, %c0_i32 : i32, i32
  }
}

module attributes {stable_mosaic.version = 11 : i64} {
  func.func @_fused_mm_kernel(%arg0: i32, %arg1: memref<16x1152xbf16, #tpu.memory_space<vmem>>, %arg2: memref<1152x128xbf16, #tpu.memory_space<vmem>>, %arg3: memref<1x128xf32, #tpu.memory_space<vmem>>, %arg4: memref<16x128xbf16, #tpu.memory_space<vmem>>) attributes {dimension_semantics = [#tpu.dimension_semantics<parallel>], iteration_bounds = array<i64: 2>, scalar_prefetch = 0 : i64, scratch_operands = 0 : i64, tpu.core_type = #tpu.core_type<tc>, window_params = [{transform_indices = @transform_0, window_bounds = array<i64: 16, 1152>}, {pipeline_mode = #tpu.pipeline_mode<synchronous>, transform_indices = @transform_1, window_bounds = array<i64: 1152, 128>}, {pipeline_mode = #tpu.pipeline_mode<synchronous>, transform_indices = @transform_2, window_bounds = array<i64: 1, 128>}, {transform_indices = @transform_3, window_bounds = array<i64: 16, 128>}]} {
    %c0 = arith.constant 0 : index
    %c0_0 = arith.constant 0 : index
    %0 = vector.load %arg1[%c0, %c0_0] : memref<16x1152xbf16, #tpu.memory_space<vmem>>, vector<16x1152xbf16>
    %c0_1 = arith.constant 0 : index
    %c0_2 = arith.constant 0 : index
    %1 = vector.load %arg2[%c0_1, %c0_2] : memref<1152x128xbf16, #tpu.memory_space<vmem>>, vector<1152x128xbf16>
    %cst = arith.constant dense<0.000000e+00> : vector<16x128xf32>
    %2 = tpu.matmul %0, %1, %cst {dimension_numbers = #tpu.dot_dimension_numbers<[1], [0], [0], [1], [0, 0, 1, 1], [], []>} : vector<16x1152xbf16>, vector<1152x128xbf16>, vector<16x128xf32> -> vector<16x128xf32>
    %c0_3 = arith.constant 0 : index
    %c0_4 = arith.constant 0 : index
    %3 = vector.load %arg3[%c0_3, %c0_4] : memref<1x128xf32, #tpu.memory_space<vmem>>, vector<1x128xf32>
    %4 = vector.broadcast %3 : vector<1x128xf32> to vector<16x128xf32>
    %5 = arith.addf %2, %4 : vector<16x128xf32>
    %cst_5 = arith.constant 0.000000e+00 : f32
    %6 = vector.broadcast %cst_5 : f32 to vector<16x128xf32>
    %7 = arith.maximumf %5, %6 : vector<16x128xf32>
    %8 = arith.truncf %7 : vector<16x128xf32> to vector<16x128xbf16>
    %c0_6 = arith.constant 0 : index
    %c0_7 = arith.constant 0 : index
    %9 = vector.load %arg4[%c0_6, %c0_7] : memref<16x128xbf16, #tpu.memory_space<vmem>>, vector<16x128xbf16>
    tpu.vector_store %arg4[%c0_6, %c0_7], %8 {strides = array<i32>} : memref<16x128xbf16, #tpu.memory_space<vmem>>, vector<16x128xbf16>,
    return
  }
  func.func @transform_0(%arg0: i32) -> (i32, i32) {
    %c0_i32 = arith.constant 0 : i32
    %c0_i32_0 = arith.constant 0 : i32
    return %arg0, %c0_i32 : i32, i32
  }
  func.func @transform_1(%arg0: i32) -> (i32, i32) {
    %c0_i32 = arith.constant 0 : i32
    %c0_i32_0 = arith.constant 0 : i32
    %c0_i32_1 = arith.constant 0 : i32
    return %c0_i32, %c0_i32_0 : i32, i32
  }
  func.func @transform_2(%arg0: i32) -> (i32, i32) {
    %c0_i32 = arith.constant 0 : i32
    %c0_i32_0 = arith.constant 0 : i32
    %c0_i32_1 = arith.constant 0 : i32
    return %c0_i32, %c0_i32_0 : i32, i32
  }
  func.func @transform_3(%arg0: i32) -> (i32, i32) {
    %c0_i32 = arith.constant 0 : i32
    %c0_i32_0 = arith.constant 0 : i32
    return %arg0, %c0_i32 : i32, i32
  }
}

module attributes {stable_mosaic.version = 11 : i64} {
  func.func @_fused_mm_kernel(%arg0: i32, %arg1: memref<16x1152xbf16, #tpu.memory_space<vmem>>, %arg2: memref<16x1152xbf16, #tpu.memory_space<vmem>>, %arg3: memref<1152x128xbf16, #tpu.memory_space<vmem>>, %arg4: memref<1152x128xbf16, #tpu.memory_space<vmem>>, %arg5: memref<1x128xf32, #tpu.memory_space<vmem>>, %arg6: memref<16x128xbf16, #tpu.memory_space<vmem>>) attributes {dimension_semantics = [#tpu.dimension_semantics<parallel>], iteration_bounds = array<i64: 2>, scalar_prefetch = 0 : i64, scratch_operands = 0 : i64, tpu.core_type = #tpu.core_type<tc>, window_params = [{transform_indices = @transform_0, window_bounds = array<i64: 16, 1152>}, {transform_indices = @transform_1, window_bounds = array<i64: 16, 1152>}, {pipeline_mode = #tpu.pipeline_mode<synchronous>, transform_indices = @transform_2, window_bounds = array<i64: 1152, 128>}, {pipeline_mode = #tpu.pipeline_mode<synchronous>, transform_indices = @transform_3, window_bounds = array<i64: 1152, 128>}, {pipeline_mode = #tpu.pipeline_mode<synchronous>, transform_indices = @transform_4, window_bounds = array<i64: 1, 128>}, {transform_indices = @transform_5, window_bounds = array<i64: 16, 128>}]} {
    %c0 = arith.constant 0 : index
    %c0_0 = arith.constant 0 : index
    %0 = vector.load %arg1[%c0, %c0_0] : memref<16x1152xbf16, #tpu.memory_space<vmem>>, vector<16x1152xbf16>
    %c0_1 = arith.constant 0 : index
    %c0_2 = arith.constant 0 : index
    %1 = vector.load %arg3[%c0_1, %c0_2] : memref<1152x128xbf16, #tpu.memory_space<vmem>>, vector<1152x128xbf16>
    %cst = arith.constant dense<0.000000e+00> : vector<16x128xf32>
    %2 = tpu.matmul %0, %1, %cst {dimension_numbers = #tpu.dot_dimension_numbers<[1], [0], [0], [1], [0, 0, 1, 1], [], []>} : vector<16x1152xbf16>, vector<1152x128xbf16>, vector<16x128xf32> -> vector<16x128xf32>
    %c0_3 = arith.constant 0 : index
    %c0_4 = arith.constant 0 : index
    %3 = vector.load %arg2[%c0_3, %c0_4] : memref<16x1152xbf16, #tpu.memory_space<vmem>>, vector<16x1152xbf16>
    %c0_5 = arith.constant 0 : index
    %c0_6 = arith.constant 0 : index
    %4 = vector.load %arg4[%c0_5, %c0_6] : memref<1152x128xbf16, #tpu.memory_space<vmem>>, vector<1152x128xbf16>
    %cst_7 = arith.constant dense<0.000000e+00> : vector<16x128xf32>
    %5 = tpu.matmul %3, %4, %cst_7 {dimension_numbers = #tpu.dot_dimension_numbers<[1], [0], [0], [1], [0, 0, 1, 1], [], []>} : vector<16x1152xbf16>, vector<1152x128xbf16>, vector<16x128xf32> -> vector<16x128xf32>
    %6 = arith.addf %2, %5 : vector<16x128xf32>
    %c0_8 = arith.constant 0 : index
    %c0_9 = arith.constant 0 : index
    %7 = vector.load %arg5[%c0_8, %c0_9] : memref<1x128xf32, #tpu.memory_space<vmem>>, vector<1x128xf32>
    %8 = vector.broadcast %7 : vector<1x128xf32> to vector<16x128xf32>
    %9 = arith.addf %6, %8 : vector<16x128xf32>
    %cst_10 = arith.constant 0.000000e+00 : f32
    %10 = vector.broadcast %cst_10 : f32 to vector<16x128xf32>
    %11 = arith.maximumf %9, %10 : vector<16x128xf32>
    %12 = arith.truncf %11 : vector<16x128xf32> to vector<16x128xbf16>
    %c0_11 = arith.constant 0 : index
    %c0_12 = arith.constant 0 : index
    %13 = vector.load %arg6[%c0_11, %c0_12] : memref<16x128xbf16, #tpu.memory_space<vmem>>, vector<16x128xbf16>
    tpu.vector_store %arg6[%c0_11, %c0_12], %12 {strides = array<i32>} : memref<16x128xbf16, #tpu.memory_space<vmem>>, vector<16x128xbf16>,
    return
  }
  func.func @transform_0(%arg0: i32) -> (i32, i32) {
    %c0_i32 = arith.constant 0 : i32
    %c0_i32_0 = arith.constant 0 : i32
    return %arg0, %c0_i32 : i32, i32
  }
  func.func @transform_1(%arg0: i32) -> (i32, i32) {
    %c0_i32 = arith.constant 0 : i32
    %c0_i32_0 = arith.constant 0 : i32
    return %arg0, %c0_i32 : i32, i32
  }
  func.func @transform_2(%arg0: i32) -> (i32, i32) {
    %c0_i32 = arith.constant 0 : i32
    %c0_i32_0 = arith.constant 0 : i32
    %c0_i32_1 = arith.constant 0 : i32
    return %c0_i32, %c0_i32_0 : i32, i32
  }
  func.func @transform_3(%arg0: i32) -> (i32, i32) {
    %c0_i32 = arith.constant 0 : i32
    %c0_i32_0 = arith.constant 0 : i32
    %c0_i32_1 = arith.constant 0 : i32
    return %c0_i32, %c0_i32_0 : i32, i32
  }
  func.func @transform_4(%arg0: i32) -> (i32, i32) {
    %c0_i32 = arith.constant 0 : i32
    %c0_i32_0 = arith.constant 0 : i32
    %c0_i32_1 = arith.constant 0 : i32
    return %c0_i32, %c0_i32_0 : i32, i32
  }
  func.func @transform_5(%arg0: i32) -> (i32, i32) {
    %c0_i32 = arith.constant 0 : i32
    %c0_i32_0 = arith.constant 0 : i32
    return %arg0, %c0_i32 : i32, i32
  }
}

module attributes {stable_mosaic.version = 11 : i64} {
  func.func @_maxpool_kernel(%arg0: i32, %arg1: memref<8x128xbf16, #tpu.memory_space<vmem>>, %arg2: memref<8x128xbf16, #tpu.memory_space<vmem>>, %arg3: memref<8x128xbf16, #tpu.memory_space<vmem>>, %arg4: memref<8x128xbf16, #tpu.memory_space<vmem>>, %arg5: memref<8x128xbf16, #tpu.memory_space<vmem>>, %arg6: memref<8x128xbf16, #tpu.memory_space<vmem>>, %arg7: memref<8x128xbf16, #tpu.memory_space<vmem>>, %arg8: memref<8x128xbf16, #tpu.memory_space<vmem>>, %arg9: memref<8x128xbf16, #tpu.memory_space<vmem>>, %arg10: memref<8x128xbf16, #tpu.memory_space<vmem>>) attributes {dimension_semantics = [#tpu.dimension_semantics<parallel>], iteration_bounds = array<i64: 1>, scalar_prefetch = 0 : i64, scratch_operands = 0 : i64, tpu.core_type = #tpu.core_type<tc>, window_params = [{transform_indices = @transform_0, window_bounds = array<i64: 8, 128>}, {transform_indices = @transform_1, window_bounds = array<i64: 8, 128>}, {transform_indices = @transform_2, window_bounds = array<i64: 8, 128>}, {transform_indices = @transform_3, window_bounds = array<i64: 8, 128>}, {transform_indices = @transform_4, window_bounds = array<i64: 8, 128>}, {transform_indices = @transform_5, window_bounds = array<i64: 8, 128>}, {transform_indices = @transform_6, window_bounds = array<i64: 8, 128>}, {transform_indices = @transform_7, window_bounds = array<i64: 8, 128>}, {transform_indices = @transform_8, window_bounds = array<i64: 8, 128>}, {transform_indices = @transform_9, window_bounds = array<i64: 8, 128>}]} {
    %c0 = arith.constant 0 : index
    %c0_0 = arith.constant 0 : index
    %0 = vector.load %arg1[%c0, %c0_0] : memref<8x128xbf16, #tpu.memory_space<vmem>>, vector<8x128xbf16>
    %c0_1 = arith.constant 0 : index
    %c0_2 = arith.constant 0 : index
    %1 = vector.load %arg2[%c0_1, %c0_2] : memref<8x128xbf16, #tpu.memory_space<vmem>>, vector<8x128xbf16>
    %2 = arith.maximumf %0, %1 : vector<8x128xbf16>
    %c0_3 = arith.constant 0 : index
    %c0_4 = arith.constant 0 : index
    %3 = vector.load %arg3[%c0_3, %c0_4] : memref<8x128xbf16, #tpu.memory_space<vmem>>, vector<8x128xbf16>
    %c0_5 = arith.constant 0 : index
    %c0_6 = arith.constant 0 : index
    %4 = vector.load %arg4[%c0_5, %c0_6] : memref<8x128xbf16, #tpu.memory_space<vmem>>, vector<8x128xbf16>
    %5 = arith.maximumf %3, %4 : vector<8x128xbf16>
    %6 = arith.maximumf %2, %5 : vector<8x128xbf16>
    %c0_7 = arith.constant 0 : index
    %c0_8 = arith.constant 0 : index
    %7 = vector.load %arg9[%c0_7, %c0_8] : memref<8x128xbf16, #tpu.memory_space<vmem>>, vector<8x128xbf16>
    tpu.vector_store %arg9[%c0_7, %c0_8], %6 {strides = array<i32>} : memref<8x128xbf16, #tpu.memory_space<vmem>>, vector<8x128xbf16>,
    %c0_9 = arith.constant 0 : index
    %c0_10 = arith.constant 0 : index
    %8 = vector.load %arg5[%c0_9, %c0_10] : memref<8x128xbf16, #tpu.memory_space<vmem>>, vector<8x128xbf16>
    %c0_11 = arith.constant 0 : index
    %c0_12 = arith.constant 0 : index
    %9 = vector.load %arg6[%c0_11, %c0_12] : memref<8x128xbf16, #tpu.memory_space<vmem>>, vector<8x128xbf16>
    %10 = arith.maximumf %8, %9 : vector<8x128xbf16>
    %c0_13 = arith.constant 0 : index
    %c0_14 = arith.constant 0 : index
    %11 = vector.load %arg7[%c0_13, %c0_14] : memref<8x128xbf16, #tpu.memory_space<vmem>>, vector<8x128xbf16>
    %c0_15 = arith.constant 0 : index
    %c0_16 = arith.constant 0 : index
    %12 = vector.load %arg8[%c0_15, %c0_16] : memref<8x128xbf16, #tpu.memory_space<vmem>>, vector<8x128xbf16>
    %13 = arith.maximumf %11, %12 : vector<8x128xbf16>
    %14 = arith.maximumf %10, %13 : vector<8x128xbf16>
    %c0_17 = arith.constant 0 : index
    %c0_18 = arith.constant 0 : index
    %15 = vector.load %arg10[%c0_17, %c0_18] : memref<8x128xbf16, #tpu.memory_space<vmem>>, vector<8x128xbf16>
    tpu.vector_store %arg10[%c0_17, %c0_18], %14 {strides = array<i32>} : memref<8x128xbf16, #tpu.memory_space<vmem>>, vector<8x128xbf16>,
    return
  }
  func.func @transform_0(%arg0: i32) -> (i32, i32) {
    %c0_i32 = arith.constant 0 : i32
    %c0_i32_0 = arith.constant 0 : i32
    return %arg0, %c0_i32 : i32, i32
  }
  func.func @transform_1(%arg0: i32) -> (i32, i32) {
    %c0_i32 = arith.constant 0 : i32
    %c0_i32_0 = arith.constant 0 : i32
    return %arg0, %c0_i32 : i32, i32
  }
  func.func @transform_2(%arg0: i32) -> (i32, i32) {
    %c0_i32 = arith.constant 0 : i32
    %c0_i32_0 = arith.constant 0 : i32
    return %arg0, %c0_i32 : i32, i32
  }
  func.func @transform_3(%arg0: i32) -> (i32, i32) {
    %c0_i32 = arith.constant 0 : i32
    %c0_i32_0 = arith.constant 0 : i32
    return %arg0, %c0_i32 : i32, i32
  }
  func.func @transform_4(%arg0: i32) -> (i32, i32) {
    %c0_i32 = arith.constant 0 : i32
    %c0_i32_0 = arith.constant 0 : i32
    return %arg0, %c0_i32 : i32, i32
  }
  func.func @transform_5(%arg0: i32) -> (i32, i32) {
    %c0_i32 = arith.constant 0 : i32
    %c0_i32_0 = arith.constant 0 : i32
    return %arg0, %c0_i32 : i32, i32
  }
  func.func @transform_6(%arg0: i32) -> (i32, i32) {
    %c0_i32 = arith.constant 0 : i32
    %c0_i32_0 = arith.constant 0 : i32
    return %arg0, %c0_i32 : i32, i32
  }
  func.func @transform_7(%arg0: i32) -> (i32, i32) {
    %c0_i32 = arith.constant 0 : i32
    %c0_i32_0 = arith.constant 0 : i32
    return %arg0, %c0_i32 : i32, i32
  }
  func.func @transform_8(%arg0: i32) -> (i32, i32) {
    %c0_i32 = arith.constant 0 : i32
    %c0_i32_0 = arith.constant 0 : i32
    return %arg0, %c0_i32 : i32, i32
  }
  func.func @transform_9(%arg0: i32) -> (i32, i32) {
    %c0_i32 = arith.constant 0 : i32
    %c0_i32_0 = arith.constant 0 : i32
    return %arg0, %c0_i32 : i32, i32
  }
}

module attributes {stable_mosaic.version = 11 : i64} {
  func.func @_fused_mm_kernel(%arg0: i32, %arg1: memref<8x1152xbf16, #tpu.memory_space<vmem>>, %arg2: memref<1152x128xbf16, #tpu.memory_space<vmem>>, %arg3: memref<1x128xf32, #tpu.memory_space<vmem>>, %arg4: memref<8x128xbf16, #tpu.memory_space<vmem>>) attributes {dimension_semantics = [#tpu.dimension_semantics<parallel>], iteration_bounds = array<i64: 1>, scalar_prefetch = 0 : i64, scratch_operands = 0 : i64, tpu.core_type = #tpu.core_type<tc>, window_params = [{transform_indices = @transform_0, window_bounds = array<i64: 8, 1152>}, {pipeline_mode = #tpu.pipeline_mode<synchronous>, transform_indices = @transform_1, window_bounds = array<i64: 1152, 128>}, {pipeline_mode = #tpu.pipeline_mode<synchronous>, transform_indices = @transform_2, window_bounds = array<i64: 1, 128>}, {transform_indices = @transform_3, window_bounds = array<i64: 8, 128>}]} {
    %c0 = arith.constant 0 : index
    %c0_0 = arith.constant 0 : index
    %0 = vector.load %arg1[%c0, %c0_0] : memref<8x1152xbf16, #tpu.memory_space<vmem>>, vector<8x1152xbf16>
    %c0_1 = arith.constant 0 : index
    %c0_2 = arith.constant 0 : index
    %1 = vector.load %arg2[%c0_1, %c0_2] : memref<1152x128xbf16, #tpu.memory_space<vmem>>, vector<1152x128xbf16>
    %cst = arith.constant dense<0.000000e+00> : vector<8x128xf32>
    %2 = tpu.matmul %0, %1, %cst {dimension_numbers = #tpu.dot_dimension_numbers<[1], [0], [0], [1], [0, 0, 1, 1], [], []>} : vector<8x1152xbf16>, vector<1152x128xbf16>, vector<8x128xf32> -> vector<8x128xf32>
    %c0_3 = arith.constant 0 : index
    %c0_4 = arith.constant 0 : index
    %3 = vector.load %arg3[%c0_3, %c0_4] : memref<1x128xf32, #tpu.memory_space<vmem>>, vector<1x128xf32>
    %4 = vector.broadcast %3 : vector<1x128xf32> to vector<8x128xf32>
    %5 = arith.addf %2, %4 : vector<8x128xf32>
    %cst_5 = arith.constant 0.000000e+00 : f32
    %6 = vector.broadcast %cst_5 : f32 to vector<8x128xf32>
    %7 = arith.maximumf %5, %6 : vector<8x128xf32>
    %8 = arith.truncf %7 : vector<8x128xf32> to vector<8x128xbf16>
    %c0_6 = arith.constant 0 : index
    %c0_7 = arith.constant 0 : index
    %9 = vector.load %arg4[%c0_6, %c0_7] : memref<8x128xbf16, #tpu.memory_space<vmem>>, vector<8x128xbf16>
    tpu.vector_store %arg4[%c0_6, %c0_7], %8 {strides = array<i32>} : memref<8x128xbf16, #tpu.memory_space<vmem>>, vector<8x128xbf16>,
    return
  }
  func.func @transform_0(%arg0: i32) -> (i32, i32) {
    %c0_i32 = arith.constant 0 : i32
    %c0_i32_0 = arith.constant 0 : i32
    return %arg0, %c0_i32 : i32, i32
  }
  func.func @transform_1(%arg0: i32) -> (i32, i32) {
    %c0_i32 = arith.constant 0 : i32
    %c0_i32_0 = arith.constant 0 : i32
    %c0_i32_1 = arith.constant 0 : i32
    return %c0_i32, %c0_i32_0 : i32, i32
  }
  func.func @transform_2(%arg0: i32) -> (i32, i32) {
    %c0_i32 = arith.constant 0 : i32
    %c0_i32_0 = arith.constant 0 : i32
    %c0_i32_1 = arith.constant 0 : i32
    return %c0_i32, %c0_i32_0 : i32, i32
  }
  func.func @transform_3(%arg0: i32) -> (i32, i32) {
    %c0_i32 = arith.constant 0 : i32
    %c0_i32_0 = arith.constant 0 : i32
    return %arg0, %c0_i32 : i32, i32
  }
}

module attributes {stable_mosaic.version = 11 : i64} {
  func.func @_fused_mm_kernel(%arg0: i32, %arg1: memref<8x1152xbf16, #tpu.memory_space<vmem>>, %arg2: memref<8x1152xbf16, #tpu.memory_space<vmem>>, %arg3: memref<1152x128xbf16, #tpu.memory_space<vmem>>, %arg4: memref<1152x128xbf16, #tpu.memory_space<vmem>>, %arg5: memref<1x128xf32, #tpu.memory_space<vmem>>, %arg6: memref<8x128xbf16, #tpu.memory_space<vmem>>) attributes {dimension_semantics = [#tpu.dimension_semantics<parallel>], iteration_bounds = array<i64: 1>, scalar_prefetch = 0 : i64, scratch_operands = 0 : i64, tpu.core_type = #tpu.core_type<tc>, window_params = [{transform_indices = @transform_0, window_bounds = array<i64: 8, 1152>}, {transform_indices = @transform_1, window_bounds = array<i64: 8, 1152>}, {pipeline_mode = #tpu.pipeline_mode<synchronous>, transform_indices = @transform_2, window_bounds = array<i64: 1152, 128>}, {pipeline_mode = #tpu.pipeline_mode<synchronous>, transform_indices = @transform_3, window_bounds = array<i64: 1152, 128>}, {pipeline_mode = #tpu.pipeline_mode<synchronous>, transform_indices = @transform_4, window_bounds = array<i64: 1, 128>}, {transform_indices = @transform_5, window_bounds = array<i64: 8, 128>}]} {
    %c0 = arith.constant 0 : index
    %c0_0 = arith.constant 0 : index
    %0 = vector.load %arg1[%c0, %c0_0] : memref<8x1152xbf16, #tpu.memory_space<vmem>>, vector<8x1152xbf16>
    %c0_1 = arith.constant 0 : index
    %c0_2 = arith.constant 0 : index
    %1 = vector.load %arg3[%c0_1, %c0_2] : memref<1152x128xbf16, #tpu.memory_space<vmem>>, vector<1152x128xbf16>
    %cst = arith.constant dense<0.000000e+00> : vector<8x128xf32>
    %2 = tpu.matmul %0, %1, %cst {dimension_numbers = #tpu.dot_dimension_numbers<[1], [0], [0], [1], [0, 0, 1, 1], [], []>} : vector<8x1152xbf16>, vector<1152x128xbf16>, vector<8x128xf32> -> vector<8x128xf32>
    %c0_3 = arith.constant 0 : index
    %c0_4 = arith.constant 0 : index
    %3 = vector.load %arg2[%c0_3, %c0_4] : memref<8x1152xbf16, #tpu.memory_space<vmem>>, vector<8x1152xbf16>
    %c0_5 = arith.constant 0 : index
    %c0_6 = arith.constant 0 : index
    %4 = vector.load %arg4[%c0_5, %c0_6] : memref<1152x128xbf16, #tpu.memory_space<vmem>>, vector<1152x128xbf16>
    %cst_7 = arith.constant dense<0.000000e+00> : vector<8x128xf32>
    %5 = tpu.matmul %3, %4, %cst_7 {dimension_numbers = #tpu.dot_dimension_numbers<[1], [0], [0], [1], [0, 0, 1, 1], [], []>} : vector<8x1152xbf16>, vector<1152x128xbf16>, vector<8x128xf32> -> vector<8x128xf32>
    %6 = arith.addf %2, %5 : vector<8x128xf32>
    %c0_8 = arith.constant 0 : index
    %c0_9 = arith.constant 0 : index
    %7 = vector.load %arg5[%c0_8, %c0_9] : memref<1x128xf32, #tpu.memory_space<vmem>>, vector<1x128xf32>
    %8 = vector.broadcast %7 : vector<1x128xf32> to vector<8x128xf32>
    %9 = arith.addf %6, %8 : vector<8x128xf32>
    %cst_10 = arith.constant 0.000000e+00 : f32
    %10 = vector.broadcast %cst_10 : f32 to vector<8x128xf32>
    %11 = arith.maximumf %9, %10 : vector<8x128xf32>
    %12 = arith.truncf %11 : vector<8x128xf32> to vector<8x128xbf16>
    %c0_11 = arith.constant 0 : index
    %c0_12 = arith.constant 0 : index
    %13 = vector.load %arg6[%c0_11, %c0_12] : memref<8x128xbf16, #tpu.memory_space<vmem>>, vector<8x128xbf16>
    tpu.vector_store %arg6[%c0_11, %c0_12], %12 {strides = array<i32>} : memref<8x128xbf16, #tpu.memory_space<vmem>>, vector<8x128xbf16>,
    return
  }
  func.func @transform_0(%arg0: i32) -> (i32, i32) {
    %c0_i32 = arith.constant 0 : i32
    %c0_i32_0 = arith.constant 0 : i32
    return %arg0, %c0_i32 : i32, i32
  }
  func.func @transform_1(%arg0: i32) -> (i32, i32) {
    %c0_i32 = arith.constant 0 : i32
    %c0_i32_0 = arith.constant 0 : i32
    return %arg0, %c0_i32 : i32, i32
  }
  func.func @transform_2(%arg0: i32) -> (i32, i32) {
    %c0_i32 = arith.constant 0 : i32
    %c0_i32_0 = arith.constant 0 : i32
    %c0_i32_1 = arith.constant 0 : i32
    return %c0_i32, %c0_i32_0 : i32, i32
  }
  func.func @transform_3(%arg0: i32) -> (i32, i32) {
    %c0_i32 = arith.constant 0 : i32
    %c0_i32_0 = arith.constant 0 : i32
    %c0_i32_1 = arith.constant 0 : i32
    return %c0_i32, %c0_i32_0 : i32, i32
  }
  func.func @transform_4(%arg0: i32) -> (i32, i32) {
    %c0_i32 = arith.constant 0 : i32
    %c0_i32_0 = arith.constant 0 : i32
    %c0_i32_1 = arith.constant 0 : i32
    return %c0_i32, %c0_i32_0 : i32, i32
  }
  func.func @transform_5(%arg0: i32) -> (i32, i32) {
    %c0_i32 = arith.constant 0 : i32
    %c0_i32_0 = arith.constant 0 : i32
    return %arg0, %c0_i32 : i32, i32
  }
}

module attributes {stable_mosaic.version = 11 : i64} {
  func.func @_fused_mm_kernel(%arg0: i32, %arg1: memref<2x512xbf16, #tpu.memory_space<vmem>>, %arg2: memref<2x512xbf16, #tpu.memory_space<vmem>>, %arg3: memref<512x10xbf16, #tpu.memory_space<vmem>>, %arg4: memref<512x10xbf16, #tpu.memory_space<vmem>>, %arg5: memref<1x10xf32, #tpu.memory_space<vmem>>, %arg6: memref<2x10xf32, #tpu.memory_space<vmem>>) attributes {dimension_semantics = [#tpu.dimension_semantics<parallel>], iteration_bounds = array<i64: 1>, scalar_prefetch = 0 : i64, scratch_operands = 0 : i64, tpu.core_type = #tpu.core_type<tc>, window_params = [{transform_indices = @transform_0, window_bounds = array<i64: 2, 512>}, {transform_indices = @transform_1, window_bounds = array<i64: 2, 512>}, {pipeline_mode = #tpu.pipeline_mode<synchronous>, transform_indices = @transform_2, window_bounds = array<i64: 512, 10>}, {pipeline_mode = #tpu.pipeline_mode<synchronous>, transform_indices = @transform_3, window_bounds = array<i64: 512, 10>}, {pipeline_mode = #tpu.pipeline_mode<synchronous>, transform_indices = @transform_4, window_bounds = array<i64: 1, 10>}, {transform_indices = @transform_5, window_bounds = array<i64: 2, 10>}]} {
    %c0 = arith.constant 0 : index
    %c0_0 = arith.constant 0 : index
    %0 = vector.load %arg1[%c0, %c0_0] : memref<2x512xbf16, #tpu.memory_space<vmem>>, vector<2x512xbf16>
    %c0_1 = arith.constant 0 : index
    %c0_2 = arith.constant 0 : index
    %1 = vector.load %arg3[%c0_1, %c0_2] : memref<512x10xbf16, #tpu.memory_space<vmem>>, vector<512x10xbf16>
    %cst = arith.constant dense<0.000000e+00> : vector<2x10xf32>
    %2 = tpu.matmul %0, %1, %cst {dimension_numbers = #tpu.dot_dimension_numbers<[1], [0], [0], [1], [0, 0, 1, 1], [], []>} : vector<2x512xbf16>, vector<512x10xbf16>, vector<2x10xf32> -> vector<2x10xf32>
    %c0_3 = arith.constant 0 : index
    %c0_4 = arith.constant 0 : index
    %3 = vector.load %arg2[%c0_3, %c0_4] : memref<2x512xbf16, #tpu.memory_space<vmem>>, vector<2x512xbf16>
    %c0_5 = arith.constant 0 : index
    %c0_6 = arith.constant 0 : index
    %4 = vector.load %arg4[%c0_5, %c0_6] : memref<512x10xbf16, #tpu.memory_space<vmem>>, vector<512x10xbf16>
    %cst_7 = arith.constant dense<0.000000e+00> : vector<2x10xf32>
    %5 = tpu.matmul %3, %4, %cst_7 {dimension_numbers = #tpu.dot_dimension_numbers<[1], [0], [0], [1], [0, 0, 1, 1], [], []>} : vector<2x512xbf16>, vector<512x10xbf16>, vector<2x10xf32> -> vector<2x10xf32>
    %6 = arith.addf %2, %5 : vector<2x10xf32>
    %c0_8 = arith.constant 0 : index
    %c0_9 = arith.constant 0 : index
    %7 = vector.load %arg5[%c0_8, %c0_9] : memref<1x10xf32, #tpu.memory_space<vmem>>, vector<1x10xf32>
    %8 = vector.broadcast %7 : vector<1x10xf32> to vector<2x10xf32>
    %9 = arith.addf %6, %8 : vector<2x10xf32>
    %c0_10 = arith.constant 0 : index
    %c0_11 = arith.constant 0 : index
    %10 = vector.load %arg6[%c0_10, %c0_11] : memref<2x10xf32, #tpu.memory_space<vmem>>, vector<2x10xf32>
    tpu.vector_store %arg6[%c0_10, %c0_11], %9 {strides = array<i32>} : memref<2x10xf32, #tpu.memory_space<vmem>>, vector<2x10xf32>,
    return
  }
  func.func @transform_0(%arg0: i32) -> (i32, i32) {
    %c0_i32 = arith.constant 0 : i32
    %c0_i32_0 = arith.constant 0 : i32
    return %arg0, %c0_i32 : i32, i32
  }
  func.func @transform_1(%arg0: i32) -> (i32, i32) {
    %c0_i32 = arith.constant 0 : i32
    %c0_i32_0 = arith.constant 0 : i32
    return %arg0, %c0_i32 : i32, i32
  }
  func.func @transform_2(%arg0: i32) -> (i32, i32) {
    %c0_i32 = arith.constant 0 : i32
    %c0_i32_0 = arith.constant 0 : i32
    %c0_i32_1 = arith.constant 0 : i32
    return %c0_i32, %c0_i32_0 : i32, i32
  }
  func.func @transform_3(%arg0: i32) -> (i32, i32) {
    %c0_i32 = arith.constant 0 : i32
    %c0_i32_0 = arith.constant 0 : i32
    %c0_i32_1 = arith.constant 0 : i32
    return %c0_i32, %c0_i32_0 : i32, i32
  }
  func.func @transform_4(%arg0: i32) -> (i32, i32) {
    %c0_i32 = arith.constant 0 : i32
    %c0_i32_0 = arith.constant 0 : i32
    %c0_i32_1 = arith.constant 0 : i32
    return %c0_i32, %c0_i32_0 : i32, i32
  }
  func.func @transform_5(%arg0: i32) -> (i32, i32) {
    %c0_i32 = arith.constant 0 : i32
    %c0_i32_0 = arith.constant 0 : i32
    return %arg0, %c0_i32 : i32, i32
  }
}

</mosaic_0001>

<bundles_post_ra>
// kernel: _lambda_.19
= control target key start
LH: loop header
LB: loop body
LE: loop exit
PB: predicated region body
PF: predicated region fallthrough
CT: control target
= control target key end

     0   :  { %s1038_s12 = smov 0   ;;  %s1214_s0 = inlined_call_operand.vmem [shape: bf16[512,72], index: 0, kind: input, shape index: {}]   ;;  %s1215_s1 = inlined_call_operand.vmem [shape: bf16[72,64], index: 1, kind: input, shape index: {}]   ;;  %s1216_s2 = inlined_call_operand.vmem [shape: f32[1,64], index: 2, kind: input, shape index: {}]   ;;  %s1217_s3 = inlined_call_operand.vmem [shape: bf16[512,64], index: 3, kind: output, shape index: {}]  }
   0x1 LB: > { %s793_s13 = sadd.s32 4294967295, %s1016_s12   ;;  %p797_p0 = scmp.ge.s32.totalorder %s1016_s12, 1  ;;  %s1016_s12 = sphi %s1038_s12, %s13_s12  }
   0x2   : > { %p138_p1 = scmp.lt.s32.totalorder %s1016_s12, 3 }
   0x4   : > { %p139_p2 = pnand %p797_p0, %p138_p1 }
   0x5   : > { %v989_v0 = vld [vmem:[%s1215_s1] sm:$0xff] (!%p139_p2)   ;;  %v990_v1 = vld [vmem:[%s1215_s1 + $0x8] sm:$0xff] (!%p139_p2)   ;;  %s798_s18 = sshll.u32 (!%p139_p2), %s793_s13, 5  ;;  %v991_v2 = vld [vmem:[%s1215_s1 + $0x10] sm:$0xff] (!%p139_p2)   ;;  %vm330_vm0 = vcmask (!%p139_p2), 588800   ;;  %vm379_vm1 = vcmask (!%p139_p2), 1043456  }
   0x6   : > { %142 = sbr.rel (%p139_p2) target bundleno = 272 (0x110), region = 32  ;;  %927 = vmatprep.subr.bf16.mxu0 (!%p139_p2), %v989_v0  ;;  %969 = vmatprep.subr.bf16.mxu1 (!%p139_p2), %v989_v0  ;;  %p163_p3 = scmp.lt.s32.totalorder (!%p139_p2), %s798_s18, 63  ;;  %v992_v3 = vld [vmem:[%s1215_s1 + $0x18] sm:$0xff] (!%p139_p2)   ;;  %v993_v6 = vld [vmem:[%s1215_s1 + $0x20] ss:$0 sps:$4 sm:$0xff] (!%p139_p2)   ;;  %vm704_vm2 = vcmask (!%p139_p2), 519168  }
   0x7   : > { %928 = vmatpush3.bf16.msra.mxu0 (!%p139_p2), %v989_v0  ;;  %974 = vmatpush3.bf16.msra.mxu1 (!%p139_p2), %v989_v0  ;;  %v381_v7 = vsel (!%p139_p2), %vm379_vm1, %v993_v6, 0  ;;  %v1106_v22 = vld [vmem:[%s1216_s2] ss:$0 sm:$0xff] (!%p139_p2) }
   0x8   : > { %929 = vmatprep.subr.bf16.mxu0 (!%p139_p2), %v990_v1  ;;  %970 = vmatprep.subr.bf16.mxu1 (!%p139_p2), %v990_v1 }
   0xb   : > { %930 = vmatpush3.bf16.msra.mxu0 (!%p139_p2), %v990_v1  ;;  %975 = vmatpush3.bf16.msra.mxu1 (!%p139_p2), %v990_v1 }
   0xc   : > { %931 = vmatprep.subr.bf16.mxu0 (!%p139_p2), %v991_v2  ;;  %971 = vmatprep.subr.bf16.mxu1 (!%p139_p2), %v991_v2 }
   0xd   : > { %s1219_s18 = smov (!%p163_p3, %s798_s18), 63 }
   0xe   : > { %s799_s21 = sshll.u32 %s1219_s18, 2 }
   0xf   : > { %s1066_s26 = scalar_lea.vmem %s1214_s0, %s799_s21  ;;  %932 = vmatpush3.bf16.msra.mxu0 %v991_v2  ;;  %976 = vmatpush3.bf16.msra.mxu1 %v991_v2  ;;  %s1119_s6 = scalar_lea.vmem %s1217_s3, %s799_s21 }
  0x10   : > { %v994_v4 = vld [vmem:[%s1066_s26] sm:$0xff]   ;;  %933 = vmatprep.subr.bf16.mxu0 %v992_v3  ;;  %972 = vmatprep.subr.bf16.mxu1 %v992_v3  ;;  %v996_v8 = vld [vmem:[%s1066_s26 + $0x8] sm:$0xff]   ;;  %v998_v10 = vld [vmem:[%s1066_s26 + $0x10] sm:$0xff]  }
  0x11   : > { %v995_v5 = vld [vmem:[%s1066_s26 + $0x40] sm:$0xff]   ;;  %937 = vmatprep.mubr.msk.bf16.mxu0 %vm330_vm0, %v994_v4  ;;  %v997_v9 = vld [vmem:[%s1066_s26 + $0x48] sm:$0xff]   ;;  %v999_v11 = vld [vmem:[%s1066_s26 + $0x50] sm:$0xff]  }
  0x12   : > { %953 = vmatprep.mubr.msk.bf16.mxu1 %vm330_vm0, %v995_v5  ;;  %v1000_v12 = vld [vmem:[%s1066_s26 + $0x18] sm:$0xff]   ;;  %v1002_v14 = vld [vmem:[%s1066_s26 + $0x20] sm:$0xff]   ;;  %v1004_v16 = vld [vmem:[%s1066_s26 + $0x28] sm:$0xff]  }
  0x13   : > { %934 = vmatpush3.bf16.msra.mxu0 %v992_v3  ;;  %977 = vmatpush3.bf16.msra.mxu1 %v992_v3  ;;  %v1001_v13 = vld [vmem:[%s1066_s26 + $0x58] sm:$0xff]   ;;  %v1003_v15 = vld [vmem:[%s1066_s26 + $0x60] sm:$0xff]   ;;  %v1005_v17 = vld [vmem:[%s1066_s26 + $0x68] sm:$0xff]  }
  0x14   : > { %979 = vmatprep.subr.msk.bf16.mxu0 %vm379_vm1, %v993_v6  ;;  %980 = vmatprep.subr.msk.bf16.mxu1 %vm379_vm1, %v993_v6  ;;  %v1006_v18 = vld [vmem:[%s1066_s26 + $0x30] sm:$0xff]   ;;  %v1008_v20 = vld [vmem:[%s1066_s26 + $0x38] sm:$0xff]  }
  0x15   : > { %v1007_v19 = vld [vmem:[%s1066_s26 + $0x70] sm:$0xff]   ;;  %v1009_v21 = vld [vmem:[%s1066_s26 + $0x78] sm:$0xff]  }
  0x17   : > { %936 = vmatpush3.bf16.msra.mxu0 %v381_v7  ;;  %978 = vmatpush3.bf16.msra.mxu1 %v381_v7 }
  0x1a   : > { %938 = vmatmul.mubr.msk.bf16.vlgmr.msra.gmra.mrb[0].mxu0 %vm330_vm0, %v996_v8  ;;  %954 = vmatmul.mubr.msk.bf16.vlgmr.msra.gmra.mrb[0].mxu1 %vm330_vm0, %v997_v9 }
  0x1b   : > { %941 = vmatprep.mubr.msk.bf16.mxu0 %vm330_vm0, %v998_v10  ;;  %957 = vmatprep.mubr.msk.bf16.mxu1 %vm330_vm0, %v999_v11 }
  0x22   : > { %942 = vmatmul.mubr.msk.bf16.gmra.mrb[4].mxu0 %vm330_vm0, %v1000_v12  ;;  %958 = vmatmul.mubr.msk.bf16.gmra.mrb[4].mxu1 %vm330_vm0, %v1001_v13 }
  0x23   : > { %945 = vmatprep.mubr.msk.bf16.mxu0 %vm330_vm0, %v1002_v14  ;;  %961 = vmatprep.mubr.msk.bf16.mxu1 %vm330_vm0, %v1003_v15 }
  0x2a   : > { %946 = vmatmul.mubr.msk.bf16.gmra.mrb[8].mxu0 %vm330_vm0, %v1004_v16  ;;  %962 = vmatmul.mubr.msk.bf16.gmra.mrb[8].mxu1 %vm330_vm0, %v1005_v17 }
  0x2b   : > { %949 = vmatprep.mubr.msk.bf16.mxu0 %vm330_vm0, %v1006_v18  ;;  %965 = vmatprep.mubr.msk.bf16.mxu1 %vm330_vm0, %v1007_v19 }
  0x32   : > { %950 = vmatmul.mubr.msk.bf16.gmra.mrb[12].mxu0 %vm330_vm0, %v1008_v20  ;;  %966 = vmatmul.mubr.msk.bf16.gmra.mrb[12].mxu1 %vm330_vm0, %v1009_v21 }
  0xed   : > { %v939_v23 = vpop.f32.mrb[0].mxu0  ;;  %v955_v24 = vpop.f32.mrb[0].mxu1 }
  0xee   : > { %v426_v25 = vadd.f32 %v939_v23, %v1106_v22  ;;  %v490_v26 = vadd.f32 %v955_v24, %v1106_v22  ;;  %v417_v27 = vpop.f32.mrb[1].mxu0  ;;  %v481_v28 = vpop.f32.mrb[1].mxu1 }
  0xef   : > { %v418_v29 = vadd.f32 %v1106_v22, %v417_v27  ;;  %v482_v30 = vadd.f32 %v1106_v22, %v481_v28  ;;  %v940_v31 = vpop.f32.mrb[2].mxu0  ;;  %v956_v32 = vpop.f32.mrb[2].mxu1 }
  0xf0   : > { %v546_v33 = vmax.f32 %v426_v25, 0.0  ;;  %v562_v34 = vmax.f32 %v490_v26, 0.0  ;;  %v429_v35 = vadd.f32 %v940_v31, %v1106_v22  ;;  %v493_v36 = vadd.f32 %v956_v32, %v1106_v22  ;;  %v420_v37 = vpop.f32.mrb[3].mxu0  ;;  %v484_v38 = vpop.f32.mrb[3].mxu1 }
  0xf1   : > { %v544_v39 = vmax.f32 %v418_v29, 0.0  ;;  %v560_v40 = vmax.f32 %v482_v30, 0.0  ;;  %v421_v41 = vadd.f32 %v1106_v22, %v420_v37  ;;  %v485_v42 = vadd.f32 %v1106_v22, %v484_v38 }
  0xf2   : > { %v876_v43 = vpack.c.bf16 %v546_v33, %v546_v33  ;;  %v892_v44 = vpack.c.bf16 %v562_v34, %v562_v34  ;;  %v547_v45 = vmax.f32 %v429_v35, 0.0  ;;  %v563_v46 = vmax.f32 %v493_v36, 0.0 }
  0xf3   : > { %v874_v47 = vpack.c.bf16 %v544_v39, %v544_v39  ;;  %v890_v48 = vpack.c.bf16 %v560_v40, %v560_v40  ;;  %v545_v49 = vmax.f32 %v421_v41, 0.0  ;;  %v561_v50 = vmax.f32 %v485_v42, 0.0 }
  0xf4   : > { %707 = vst.msk [vmem:[%s1119_s6 + $0x8] sm:$0xf] %vm704_vm2, %v876_v43  ;;  %723 = vst.msk [vmem:[%s1119_s6 + $0x48] sm:$0xf] %vm704_vm2, %v892_v44  ;;  %v877_v51 = vpack.c.bf16 %v547_v45, %v547_v45  ;;  %v893_v52 = vpack.c.bf16 %v563_v46, %v563_v46 }
  0xf5   : > { %705 = vst.msk [vmem:[%s1119_s6] sm:$0xf] %vm704_vm2, %v874_v47  ;;  %721 = vst.msk [vmem:[%s1119_s6 + $0x40] sm:$0xf] %vm704_vm2, %v890_v48  ;;  %v875_v53 = vpack.c.bf16 %v545_v49, %v545_v49  ;;  %v891_v54 = vpack.c.bf16 %v561_v50, %v561_v50  ;;  %v943_v55 = vpop.f32.mrb[4].mxu0  ;;  %v959_v56 = vpop.f32.mrb[4].mxu1 }
  0xf6   : > { %708 = vst.msk [vmem:[%s1119_s6 + $0xc] sm:$0xf] %vm704_vm2, %v877_v51  ;;  %724 = vst.msk [vmem:[%s1119_s6 + $0x4c] sm:$0xf] %vm704_vm2, %v893_v52  ;;  %v442_v57 = vadd.f32 %v943_v55, %v1106_v22  ;;  %v506_v58 = vadd.f32 %v959_v56, %v1106_v22  ;;  %v433_v59 = vpop.f32.mrb[5].mxu0  ;;  %v497_v60 = vpop.f32.mrb[5].mxu1 }
  0xf7   : > { %706 = vst.msk [vmem:[%s1119_s6 + $0x4] sm:$0xf] %vm704_vm2, %v875_v53  ;;  %722 = vst.msk [vmem:[%s1119_s6 + $0x44] sm:$0xf] %vm704_vm2, %v891_v54  ;;  %v434_v61 = vadd.f32 %v1106_v22, %v433_v59  ;;  %v498_v62 = vadd.f32 %v1106_v22, %v497_v60  ;;  %v944_v63 = vpop.f32.mrb[6].mxu0  ;;  %v960_v0 = vpop.f32.mrb[6].mxu1 }
  0xf8   : > { %v550_v1 = vmax.f32 %v442_v57, 0.0  ;;  %v566_v2 = vmax.f32 %v506_v58, 0.0  ;;  %v445_v3 = vadd.f32 %v944_v63, %v1106_v22  ;;  %v509_v4 = vadd.f32 %v960_v0, %v1106_v22  ;;  %v436_v5 = vpop.f32.mrb[7].mxu0  ;;  %v500_v6 = vpop.f32.mrb[7].mxu1 }
  0xf9   : > { %v548_v7 = vmax.f32 %v434_v61, 0.0  ;;  %v564_v8 = vmax.f32 %v498_v62, 0.0  ;;  %v437_v9 = vadd.f32 %v1106_v22, %v436_v5  ;;  %v501_v10 = vadd.f32 %v1106_v22, %v500_v6 }
  0xfa   : > { %v880_v11 = vpack.c.bf16 %v550_v1, %v550_v1  ;;  %v896_v12 = vpack.c.bf16 %v566_v2, %v566_v2  ;;  %v551_v13 = vmax.f32 %v445_v3, 0.0  ;;  %v567_v14 = vmax.f32 %v509_v4, 0.0 }
  0xfb   : > { %v878_v15 = vpack.c.bf16 %v548_v7, %v548_v7  ;;  %v894_v16 = vpack.c.bf16 %v564_v8, %v564_v8  ;;  %v549_v17 = vmax.f32 %v437_v9, 0.0  ;;  %v565_v18 = vmax.f32 %v501_v10, 0.0 }
  0xfc   : > { %711 = vst.msk [vmem:[%s1119_s6 + $0x18] sm:$0xf] %vm704_vm2, %v880_v11  ;;  %727 = vst.msk [vmem:[%s1119_s6 + $0x58] sm:$0xf] %vm704_vm2, %v896_v12  ;;  %v881_v19 = vpack.c.bf16 %v551_v13, %v551_v13  ;;  %v897_v20 = vpack.c.bf16 %v567_v14, %v567_v14 }
  0xfd   : > { %709 = vst.msk [vmem:[%s1119_s6 + $0x10] sm:$0xf] %vm704_vm2, %v878_v15  ;;  %725 = vst.msk [vmem:[%s1119_s6 + $0x50] sm:$0xf] %vm704_vm2, %v894_v16  ;;  %v879_v21 = vpack.c.bf16 %v549_v17, %v549_v17  ;;  %v895_v23 = vpack.c.bf16 %v565_v18, %v565_v18  ;;  %v947_v24 = vpop.f32.mrb[8].mxu0  ;;  %v963_v25 = vpop.f32.mrb[8].mxu1 }
  0xfe   : > { %712 = vst.msk [vmem:[%s1119_s6 + $0x1c] sm:$0xf] %vm704_vm2, %v881_v19  ;;  %728 = vst.msk [vmem:[%s1119_s6 + $0x5c] sm:$0xf] %vm704_vm2, %v897_v20  ;;  %v458_v26 = vadd.f32 %v947_v24, %v1106_v22  ;;  %v522_v27 = vadd.f32 %v963_v25, %v1106_v22  ;;  %v449_v28 = vpop.f32.mrb[9].mxu0  ;;  %v513_v29 = vpop.f32.mrb[9].mxu1 }
  0xff   : > { %710 = vst.msk [vmem:[%s1119_s6 + $0x14] sm:$0xf] %vm704_vm2, %v879_v21  ;;  %726 = vst.msk [vmem:[%s1119_s6 + $0x54] sm:$0xf] %vm704_vm2, %v895_v23  ;;  %v450_v30 = vadd.f32 %v1106_v22, %v449_v28  ;;  %v514_v31 = vadd.f32 %v1106_v22, %v513_v29  ;;  %v948_v32 = vpop.f32.mrb[10].mxu0  ;;  %v964_v33 = vpop.f32.mrb[10].mxu1 }
 0x100   : > { %v554_v34 = vmax.f32 %v458_v26, 0.0  ;;  %v570_v35 = vmax.f32 %v522_v27, 0.0  ;;  %v461_v36 = vadd.f32 %v948_v32, %v1106_v22  ;;  %v525_v37 = vadd.f32 %v964_v33, %v1106_v22  ;;  %v452_v38 = vpop.f32.mrb[11].mxu0  ;;  %v516_v39 = vpop.f32.mrb[11].mxu1 }
 0x101   : > { %v552_v40 = vmax.f32 %v450_v30, 0.0  ;;  %v568_v41 = vmax.f32 %v514_v31, 0.0  ;;  %v453_v42 = vadd.f32 %v1106_v22, %v452_v38  ;;  %v517_v43 = vadd.f32 %v1106_v22, %v516_v39 }
 0x102   : > { %v884_v44 = vpack.c.bf16 %v554_v34, %v554_v34  ;;  %v900_v45 = vpack.c.bf16 %v570_v35, %v570_v35  ;;  %v555_v46 = vmax.f32 %v461_v36, 0.0  ;;  %v571_v47 = vmax.f32 %v525_v37, 0.0 }
 0x103   : > { %v882_v48 = vpack.c.bf16 %v552_v40, %v552_v40  ;;  %v898_v49 = vpack.c.bf16 %v568_v41, %v568_v41  ;;  %v553_v50 = vmax.f32 %v453_v42, 0.0  ;;  %v569_v51 = vmax.f32 %v517_v43, 0.0 }
 0x104   : > { %715 = vst.msk [vmem:[%s1119_s6 + $0x28] sm:$0xf] %vm704_vm2, %v884_v44  ;;  %731 = vst.msk [vmem:[%s1119_s6 + $0x68] sm:$0xf] %vm704_vm2, %v900_v45  ;;  %v885_v52 = vpack.c.bf16 %v555_v46, %v555_v46  ;;  %v901_v53 = vpack.c.bf16 %v571_v47, %v571_v47 }
 0x105   : > { %713 = vst.msk [vmem:[%s1119_s6 + $0x20] sm:$0xf] %vm704_vm2, %v882_v48  ;;  %729 = vst.msk [vmem:[%s1119_s6 + $0x60] sm:$0xf] %vm704_vm2, %v898_v49  ;;  %v883_v54 = vpack.c.bf16 %v553_v50, %v553_v50  ;;  %v899_v55 = vpack.c.bf16 %v569_v51, %v569_v51  ;;  %v951_v56 = vpop.f32.mrb[12].mxu0  ;;  %v967_v57 = vpop.f32.mrb[12].mxu1 }
 0x106   : > { %716 = vst.msk [vmem:[%s1119_s6 + $0x2c] sm:$0xf] %vm704_vm2, %v885_v52  ;;  %732 = vst.msk [vmem:[%s1119_s6 + $0x6c] sm:$0xf] %vm704_vm2, %v901_v53  ;;  %v474_v58 = vadd.f32 %v951_v56, %v1106_v22  ;;  %v538_v59 = vadd.f32 %v967_v57, %v1106_v22  ;;  %v465_v60 = vpop.f32.mrb[13].mxu0  ;;  %v529_v61 = vpop.f32.mrb[13].mxu1 }
 0x107   : > { %714 = vst.msk [vmem:[%s1119_s6 + $0x24] sm:$0xf] %vm704_vm2, %v883_v54  ;;  %730 = vst.msk [vmem:[%s1119_s6 + $0x64] sm:$0xf] %vm704_vm2, %v899_v55  ;;  %v466_v62 = vadd.f32 %v1106_v22, %v465_v60  ;;  %v530_v63 = vadd.f32 %v1106_v22, %v529_v61  ;;  %v952_v0 = vpop.f32.mrb[14].mxu0  ;;  %v968_v1 = vpop.f32.mrb[14].mxu1 }
 0x108   : > { %v558_v2 = vmax.f32 %v474_v58, 0.0  ;;  %v574_v3 = vmax.f32 %v538_v59, 0.0  ;;  %v477_v4 = vadd.f32 %v952_v0, %v1106_v22  ;;  %v541_v5 = vadd.f32 %v968_v1, %v1106_v22  ;;  %v468_v6 = vpop.f32.mrb[15].mxu0  ;;  %v532_v7 = vpop.f32.mrb[15].mxu1 }
 0x109   : > { %v556_v8 = vmax.f32 %v466_v62, 0.0  ;;  %v572_v9 = vmax.f32 %v530_v63, 0.0  ;;  %v469_v10 = vadd.f32 %v1106_v22, %v468_v6  ;;  %v533_v11 = vadd.f32 %v1106_v22, %v532_v7 }
 0x10a   : > { %v888_v12 = vpack.c.bf16 %v558_v2, %v558_v2  ;;  %v904_v13 = vpack.c.bf16 %v574_v3, %v574_v3  ;;  %v559_v14 = vmax.f32 %v477_v4, 0.0  ;;  %v575_v15 = vmax.f32 %v541_v5, 0.0 }
 0x10b   : > { %v886_v16 = vpack.c.bf16 %v556_v8, %v556_v8  ;;  %v902_v17 = vpack.c.bf16 %v572_v9, %v572_v9  ;;  %v557_v18 = vmax.f32 %v469_v10, 0.0  ;;  %v573_v19 = vmax.f32 %v533_v11, 0.0 }
 0x10c   : > { %719 = vst.msk [vmem:[%s1119_s6 + $0x38] sm:$0xf] %vm704_vm2, %v888_v12  ;;  %735 = vst.msk [vmem:[%s1119_s6 + $0x78] sm:$0xf] %vm704_vm2, %v904_v13  ;;  %v889_v20 = vpack.c.bf16 %v559_v14, %v559_v14  ;;  %v905_v21 = vpack.c.bf16 %v575_v15, %v575_v15 }
 0x10d   : > { %717 = vst.msk [vmem:[%s1119_s6 + $0x30] sm:$0xf] %vm704_vm2, %v886_v16  ;;  %733 = vst.msk [vmem:[%s1119_s6 + $0x70] sm:$0xf] %vm704_vm2, %v902_v17  ;;  %v887_v22 = vpack.c.bf16 %v557_v18, %v557_v18  ;;  %v903_v23 = vpack.c.bf16 %v573_v19, %v573_v19 }
 0x10e   : > { %720 = vst.msk [vmem:[%s1119_s6 + $0x3c] sm:$0xf] %vm704_vm2, %v889_v20  ;;  %736 = vst.msk [vmem:[%s1119_s6 + $0x7c] sm:$0xf] %vm704_vm2, %v905_v21 }
 0x10f   : > { %718 = vst.msk [vmem:[%s1119_s6 + $0x34] sm:$0xf] %vm704_vm2, %v887_v22  ;;  %734 = vst.msk [vmem:[%s1119_s6 + $0x74] sm:$0xf] %vm704_vm2, %v903_v23 }
 0x110 PF: > { %s13_s12 = sadd.s32 1, %s1016_s12  }
 0x111   : > { %p10_p4 = scmp.ge.s32.totalorder %s13_s12, 4  }
 0x113   :  { %12 = sbr.rel (!%p10_p4) target bundleno = 1 (0x1), region = 62 }

// kernel: _lambda_.21
= control target key start
LH: loop header
LB: loop body
LE: loop exit
PB: predicated region body
PF: predicated region fallthrough
CT: control target
= control target key end

     0   :  { %s2443_s12 = smov 0   ;;  %s2884_s0 = inlined_call_operand.vmem [shape: bf16[512,576], index: 0, kind: input, shape index: {}]   ;;  %s2885_s1 = inlined_call_operand.vmem [shape: bf16[576,64], index: 1, kind: input, shape index: {}]   ;;  %s2886_s2 = inlined_call_operand.vmem [shape: f32[1,64], index: 2, kind: input, shape index: {}]   ;;  %s2887_s3 = inlined_call_operand.vmem [shape: bf16[512,64], index: 3, kind: output, shape index: {}]  }
   0x1 LB: > { %s1750_s13 = sadd.s32 4294967295, %s2421_s12   ;;  %p1754_p0 = scmp.ge.s32.totalorder %s2421_s12, 1  ;;  %s2421_s12 = sphi %s2443_s12, %s13_s12  }
   0x2   : > { %p139_p1 = scmp.lt.s32.totalorder %s2421_s12, 3 }
   0x4   : > { %p140_p2 = pnand %p1754_p0, %p139_p1 }
   0x5   : > { %v2267_v0 = vld [vmem:[%s2885_s1 + $0x40] sm:$0xff] (!%p140_p2)   ;;  %s1755_s16 = sshll.u32 (!%p140_p2), %s1750_s13, 5  ;;  %v2269_v2 = vld [vmem:[%s2885_s1 + $0x48] sm:$0xff] (!%p140_p2)   ;;  %v2271_v4 = vld [vmem:[%s2885_s1 + $0x50] sm:$0xff] (!%p140_p2)   ;;  %vm969_vm0 = vcmask (!%p140_p2), 523264   ;;  %vm1661_vm1 = vcmask (!%p140_p2), 519168  }
   0x6   : > { %143 = sbr.rel (%p140_p2) target bundleno = 416 (0x1a0), region = 32  ;;  %v2268_v1 = vld [vmem:[%s2885_s1] sm:$0xff] (!%p140_p2)   ;;  %1958 = vmatprep.subr.bf16.mxu0 (!%p140_p2), %v2267_v0  ;;  %2242 = vmatprep.subr.bf16.mxu1 (!%p140_p2), %v2267_v0  ;;  %p165_p3 = scmp.lt.s32.totalorder (!%p140_p2), %s1755_s16, 63  ;;  %v2270_v3 = vld [vmem:[%s2885_s1 + $0x8] sm:$0xff] (!%p140_p2)   ;;  %v2272_v5 = vld [vmem:[%s2885_s1 + $0x10] sm:$0xff] (!%p140_p2)  }
   0x7   : > { %1959 = vmatpush3.bf16.msra.mxu0 (!%p140_p2), %v2268_v1  ;;  %2250 = vmatpush3.bf16.msra.mxu1 (!%p140_p2), %v2268_v1  ;;  %v2273_v6 = vld [vmem:[%s2885_s1 + $0x58] sm:$0xff] (!%p140_p2)   ;;  %v2275_v8 = vld [vmem:[%s2885_s1 + $0x60] sm:$0xff] (!%p140_p2)   ;;  %v2277_v10 = vld [vmem:[%s2885_s1 + $0x68] sm:$0xff] (!%p140_p2)  }
   0x8   : > { %1960 = vmatprep.subr.bf16.mxu0 (!%p140_p2), %v2269_v2  ;;  %2243 = vmatprep.subr.bf16.mxu1 (!%p140_p2), %v2269_v2  ;;  %v2274_v7 = vld [vmem:[%s2885_s1 + $0x18] sm:$0xff] (!%p140_p2)   ;;  %v2276_v9 = vld [vmem:[%s2885_s1 + $0x20] sm:$0xff] (!%p140_p2)   ;;  %v2278_v13 = vld [vmem:[%s2885_s1 + $0x28] sm:$0xff] (!%p140_p2)  }
   0x9   : > { %v2279_v14 = vld [vmem:[%s2885_s1 + $0x70] sm:$0xff] (!%p140_p2)   ;;  %v2281_v16 = vld [vmem:[%s2885_s1 + $0x78] sm:$0xff] (!%p140_p2)   ;;  %v2289_v18 = vld [vmem:[%s2885_s1 + $0xc0] sm:$0xff] (!%p140_p2)  }
   0xa   : > { %v2280_v15 = vld [vmem:[%s2885_s1 + $0x30] sm:$0xff] (!%p140_p2)   ;;  %v2282_v17 = vld [vmem:[%s2885_s1 + $0x38] sm:$0xff] (!%p140_p2)   ;;  %v2292_v19 = vld [vmem:[%s2885_s1 + $0x100] sm:$0xff] (!%p140_p2)  }
   0xb   : > { %1961 = vmatpush3.bf16.msra.mxu0 (!%p140_p2), %v2270_v3  ;;  %2251 = vmatpush3.bf16.msra.mxu1 (!%p140_p2), %v2270_v3  ;;  %v2290_v22 = vld [vmem:[%s2885_s1 + $0x80] sm:$0xff] (!%p140_p2)   ;;  %v2291_v23 = vld [vmem:[%s2885_s1 + $0xc8] sm:$0xff] (!%p140_p2)   ;;  %v2300_v28 = vld [vmem:[%s2885_s1 + $0xd0] sm:$0xff] (!%p140_p2)  }
   0xc   : > { %1962 = vmatprep.subr.bf16.mxu0 (!%p140_p2), %v2271_v4  ;;  %2244 = vmatprep.subr.bf16.mxu1 (!%p140_p2), %v2271_v4  ;;  %v2293_v26 = vld [vmem:[%s2885_s1 + $0x88] sm:$0xff] (!%p140_p2)   ;;  %v2301_v30 = vld [vmem:[%s2885_s1 + $0x90] sm:$0xff] (!%p140_p2)   ;;  %v2302_v31 = vld [vmem:[%s2885_s1 + $0xd8] sm:$0xff] (!%p140_p2)  }
   0xd   : > { %s2889_s16 = smov (!%p165_p3, %s1755_s16), 63  ;;  %v2303_v34 = vld [vmem:[%s2885_s1 + $0x98] sm:$0xff]   ;;  %v2323_v35 = vld [vmem:[%s2885_s1 + $0x108] sm:$0xff]   ;;  %v2310_v37 = vld [vmem:[%s2885_s1 + $0xe0] sm:$0xff]  }
   0xe   : > { %s2258_s29 = smul.u32 20, %s2889_s16  ;;  %v2311_v39 = vld [vmem:[%s2885_s1 + $0xa0] sm:$0xff]   ;;  %v2312_v40 = vld [vmem:[%s2885_s1 + $0xe8] sm:$0xff]   ;;  %v2320_v46 = vld [vmem:[%s2885_s1 + $0xf0] sm:$0xff]   ;;  %s1758_s19 = sshll.u32 %s2889_s16, 2 }
   0xf   : > { %1963 = vmatpush3.bf16.msra.mxu0 %v2272_v5  ;;  %2252 = vmatpush3.bf16.msra.mxu1 %v2272_v5  ;;  %v2313_v43 = vld [vmem:[%s2885_s1 + $0xa8] sm:$0xff]   ;;  %v2343_v47 = vld [vmem:[%s2885_s1 + $0x110] sm:$0xff]   ;;  %v2322_v49 = vld [vmem:[%s2885_s1 + $0xf8] sm:$0xff]   ;;  %s2756_s21 = scalar_lea.vmem %s2887_s3, %s1758_s19 }
  0x10   : > { %1964 = vmatprep.subr.bf16.mxu0 %v2273_v6  ;;  %2245 = vmatprep.subr.bf16.mxu1 %v2273_v6  ;;  %s2484_s9 = scalar_lea.vmem %s2884_s0, %s2258_s29  ;;  %v2321_v48 = vld [vmem:[%s2885_s1 + $0xb0] sm:$0xff]   ;;  %v2324_v52 = vld [vmem:[%s2885_s1 + $0xb8] sm:$0xff]  }
  0x11   : > { %v2285_v11 = vld [vmem:[%s2484_s9 + $0x4] ss:$20 sps:$4 sm:$0xff]   ;;  %v2283_v20 = vld [vmem:[%s2484_s9] ss:$20 sps:$4 sm:$0xff]   ;;  %v2298_v27 = vld [vmem:[%s2484_s9 + $0x28] ss:$20 sps:$4 sm:$0xff]  }
  0x12   : > { %v2288_v12 = vld [vmem:[%s2484_s9 + $0x1e4] ss:$20 sps:$4 sm:$0xff]   ;;  %1050 = vmatprep.mubr.bf16.mxu0 %v2285_v11  ;;  %v2286_v21 = vld [vmem:[%s2484_s9 + $0x1e0] ss:$20 sps:$4 sm:$0xff]   ;;  %v2299_v29 = vld [vmem:[%s2484_s9 + $0x208] ss:$20 sps:$4 sm:$0xff]  }
  0x13   : > { %1965 = vmatpush3.bf16.msra.mxu0 %v2274_v7  ;;  %2253 = vmatpush3.bf16.msra.mxu1 %v2274_v7  ;;  %v2294_v24 = vld [vmem:[%s2484_s9 + $0x2c] ss:$20 sps:$4 sm:$0xff]   ;;  %v2304_v32 = vld [vmem:[%s2484_s9 + $0x54] ss:$20 sps:$4 sm:$0xff]   ;;  %v2308_v36 = vld [vmem:[%s2484_s9 + $0x50] ss:$20 sps:$4 sm:$0xff]  }
  0x14   : > { %1966 = vmatprep.subr.bf16.mxu0 %v2275_v8  ;;  %2246 = vmatprep.subr.bf16.mxu1 %v2275_v8  ;;  %v2296_v25 = vld [vmem:[%s2484_s9 + $0x20c] ss:$20 sps:$4 sm:$0xff]   ;;  %v2306_v33 = vld [vmem:[%s2484_s9 + $0x234] ss:$20 sps:$4 sm:$0xff]   ;;  %v2309_v38 = vld [vmem:[%s2484_s9 + $0x230] ss:$20 sps:$4 sm:$0xff]  }
  0x15   : > { %1146 = vmatprep.mubr.bf16.mxu1 %v2288_v12  ;;  %v2314_v41 = vld [vmem:[%s2484_s9 + $0x7c] ss:$20 sps:$4 sm:$0xff]   ;;  %v2318_v44 = vld [vmem:[%s2484_s9 + $0x78] ss:$20 sps:$4 sm:$0xff]   ;;  %v2330_v54 = vld [vmem:[%s2484_s9 + $0xa0] ss:$20 sps:$4 sm:$0xff]  }
  0x16   : > { %v2316_v42 = vld [vmem:[%s2484_s9 + $0x25c] ss:$20 sps:$4 sm:$0xff]   ;;  %v2319_v45 = vld [vmem:[%s2484_s9 + $0x258] ss:$20 sps:$4 sm:$0xff]   ;;  %v2333_v57 = vld [vmem:[%s2484_s9 + $0x34] ss:$20 sps:$4 sm:$0xff]  }
  0x17   : > { %1967 = vmatpush3.bf16.msra.mxu0 %v2276_v9  ;;  %2254 = vmatpush3.bf16.msra.mxu1 %v2276_v9  ;;  %v2325_v50 = vld [vmem:[%s2484_s9 + $0xa4] ss:$20 sps:$4 sm:$0xff]   ;;  %v2329_v51 = vld [vmem:[%s2484_s9 + $0xc] ss:$20 sps:$4 sm:$0xff]   ;;  %v2327_v53 = vld [vmem:[%s2484_s9 + $0x8] ss:$20 sps:$4 sm:$0xff]  }
  0x18   : > { %1968 = vmatprep.subr.bf16.mxu0 %v2277_v10  ;;  %2247 = vmatprep.subr.bf16.mxu1 %v2277_v10  ;;  %v2331_v55 = vld [vmem:[%s2484_s9 + $0xcc] ss:$20 sps:$4 sm:$0xff]   ;;  %v2362_v56 = vld [vmem:[%s2885_s1 + $0x118] sm:$0xff]   ;;  %v2336_v59 = vld [vmem:[%s2484_s9 + $0x30] ss:$20 sps:$4 sm:$0xff]  }
  0x19   : > { %v2335_v58 = vld [vmem:[%s2484_s9 + $0xc8] ss:$20 sps:$4 sm:$0xff]   ;;  %v2341_v62 = vld [vmem:[%s2484_s9 + $0xf0] ss:$20 sps:$4 sm:$0xff]   ;;  %v2342_v63 = vld [vmem:[%s2484_s9 + $0x58] ss:$20 sps:$4 sm:$0xff]  }
  0x1a   : > { %v2337_v60 = vld [vmem:[%s2484_s9 + $0xf4] ss:$20 sps:$4 sm:$0xff]   ;;  %v2339_v61 = vld [vmem:[%s2484_s9 + $0x5c] ss:$20 sps:$4 sm:$0xff]   ;;  %v2346_v1 = vld [vmem:[%s2484_s9 + $0x84] ss:$20 sps:$4 sm:$0xff]  }
  0x1b   : > { %1969 = vmatpush3.bf16.msra.mxu0 %v2278_v13  ;;  %2255 = vmatpush3.bf16.msra.mxu1 %v2278_v13  ;;  %v2344_v0 = vld [vmem:[%s2484_s9 + $0x11c] ss:$20 sps:$4 sm:$0xff]   ;;  %v2348_v2 = vld [vmem:[%s2484_s9 + $0x118] ss:$20 sps:$4 sm:$0xff]   ;;  %v2349_v3 = vld [vmem:[%s2484_s9 + $0x80] ss:$20 sps:$4 sm:$0xff]  }
  0x1c   : > { %1970 = vmatprep.subr.bf16.mxu0 %v2279_v14  ;;  %2248 = vmatprep.subr.bf16.mxu1 %v2279_v14  ;;  %v2350_v4 = vld [vmem:[%s2484_s9 + $0x144] ss:$20 sps:$4 sm:$0xff]   ;;  %v2352_v5 = vld [vmem:[%s2484_s9 + $0xac] ss:$20 sps:$4 sm:$0xff]   ;;  %v2355_v7 = vld [vmem:[%s2484_s9 + $0xa8] ss:$20 sps:$4 sm:$0xff]  }
  0x1d   : > { %v2354_v6 = vld [vmem:[%s2484_s9 + $0x140] ss:$20 sps:$4 sm:$0xff]   ;;  %v2360_v10 = vld [vmem:[%s2484_s9 + $0x168] ss:$20 sps:$4 sm:$0xff]   ;;  %v2361_v11 = vld [vmem:[%s2484_s9 + $0xd0] ss:$20 sps:$4 sm:$0xff]  }
  0x1e   : > { %v2356_v8 = vld [vmem:[%s2484_s9 + $0x16c] ss:$20 sps:$4 sm:$0xff]   ;;  %v2358_v9 = vld [vmem:[%s2484_s9 + $0xd4] ss:$20 sps:$4 sm:$0xff]   ;;  %v2365_v13 = vld [vmem:[%s2484_s9 + $0xfc] ss:$20 sps:$4 sm:$0xff]  }
  0x1f   : > { %1971 = vmatpush3.bf16.msra.mxu0 %v2280_v15  ;;  %2256 = vmatpush3.bf16.msra.mxu1 %v2280_v15  ;;  %v2363_v12 = vld [vmem:[%s2484_s9 + $0x194] ss:$20 sps:$4 sm:$0xff]   ;;  %v2367_v14 = vld [vmem:[%s2484_s9 + $0x190] ss:$20 sps:$4 sm:$0xff]   ;;  %v2368_v15 = vld [vmem:[%s2484_s9 + $0xf8] ss:$20 sps:$4 sm:$0xff]  }
  0x20   : > { %1972 = vmatprep.subr.bf16.mxu0 %v2281_v16  ;;  %2249 = vmatprep.subr.bf16.mxu1 %v2281_v16  ;;  %v2369_v16 = vld [vmem:[%s2484_s9 + $0x1bc] ss:$20 sps:$4 sm:$0xff]  }
  0x23   : > { %1973 = vmatpush3.bf16.msra.mxu0 %v2282_v17  ;;  %2257 = vmatpush3.bf16.msra.mxu1 %v2282_v17  ;;  %v2371_v17 = vld [vmem:[%s2484_s9 + $0x124] ss:$20 sps:$4 sm:$0xff]  }
  0x24   : > { %2070 = vmatprep.subr.bf16.mxu1 %v2289_v18  ;;  %2202 = vmatprep.subr.bf16.mxu0 %v2292_v19  ;;  %v2373_v18 = vld [vmem:[%s2484_s9 + $0x1b8] ss:$20 sps:$4 sm:$0xff]  }
  0x26   : > { %1051 = vmatmul.mubr.bf16.vlgmr.msra.gmra.mrb[0].mxu0 %v2283_v20  ;;  %1147 = vmatmul.mubr.bf16.vlgmr.msra.gmra.mrb[0].mxu1 %v2286_v21  ;;  %v2375_v20 = vld [vmem:[%s2484_s9 + $0x14c] ss:$20 sps:$4 sm:$0xff]   ;;  %v2377_v21 = vld [vmem:[%s2484_s9 + $0x10] ss:$20 sps:$4 sm:$0xff]  }
  0x27   : > { %2071 = vmatpush3.bf16.msra.mxu1 %v2290_v22  ;;  %2203 = vmatpush3.bf16.msra.mxu0 %v2292_v19  ;;  %v2374_v19 = vld [vmem:[%s2484_s9 + $0x120] ss:$20 sps:$4 sm:$0xff]   ;;  %v2378_v22 = vld [vmem:[%s2484_s9 + $0x148] ss:$20 sps:$4 sm:$0xff]  }
  0x28   : > { %2072 = vmatprep.subr.bf16.mxu1 %v2291_v23  ;;  %1058 = vmatprep.mubr.bf16.mxu0 %v2294_v24  ;;  %v2379_v23 = vld [vmem:[%s2484_s9 + $0x38] ss:$20 sps:$4 sm:$0xff]   ;;  %v2380_v24 = vld [vmem:[%s2484_s9 + $0x174] ss:$20 sps:$4 sm:$0xff]  }
  0x29   : > { %1154 = vmatprep.mubr.bf16.mxu1 %v2296_v25  ;;  %2204 = vmatprep.subr.bf16.mxu0 %v2323_v35  ;;  %v2382_v25 = vld [vmem:[%s2484_s9 + $0x60] ss:$20 sps:$4 sm:$0xff]  }
  0x2b   : > { %2073 = vmatpush3.bf16.msra.mxu1 %v2293_v26  ;;  %2205 = vmatpush3.bf16.msra.mxu0 %v2323_v35  ;;  %v2383_v26 = vld [vmem:[%s2484_s9 + $0x170] ss:$20 sps:$4 sm:$0xff]   ;;  %v2394_v35 = vld [vmem:[%s2484_s9 + $0x128] ss:$20 sps:$4 sm:$0xff]  }
  0x2c   : > { %2074 = vmatprep.subr.bf16.mxu1 %v2300_v28  ;;  %2206 = vmatprep.subr.bf16.mxu0 %v2343_v47  ;;  %v2385_v28 = vld [vmem:[%s2484_s9 + $0x19c] ss:$20 sps:$4 sm:$0xff]  }
  0x2e   : > { %1059 = vmatmul.mubr.bf16.gmra.mrb[4].mxu0 %v2298_v27  ;;  %1155 = vmatmul.mubr.bf16.gmra.mrb[4].mxu1 %v2299_v29  ;;  %v2384_v27 = vld [vmem:[%s2484_s9 + $0x88] ss:$20 sps:$4 sm:$0xff]   ;;  %v2387_v29 = vld [vmem:[%s2484_s9 + $0xb0] ss:$20 sps:$4 sm:$0xff]  }
  0x2f   : > { %2075 = vmatpush3.bf16.msra.mxu1 %v2301_v30  ;;  %1066 = vmatprep.mubr.bf16.mxu0 %v2304_v32  ;;  %v2388_v30 = vld [vmem:[%s2484_s9 + $0x198] ss:$20 sps:$4 sm:$0xff]  }
  0x30   : > { %2076 = vmatprep.subr.bf16.mxu1 %v2302_v31  ;;  %1162 = vmatprep.mubr.bf16.mxu1 %v2306_v33  ;;  %v2389_v31 = vld [vmem:[%s2484_s9 + $0xd8] ss:$20 sps:$4 sm:$0xff]   ;;  %v2392_v33 = vld [vmem:[%s2484_s9 + $0x100] ss:$20 sps:$4 sm:$0xff]  }
  0x31   : > { %2207 = vmatpush3.bf16.msra.mxu0 %v2343_v47  ;;  %v2390_v32 = vld [vmem:[%s2484_s9 + $0x1c4] ss:$20 sps:$4 sm:$0xff]  }
  0x32   : > { %2208 = vmatprep.subr.bf16.mxu0 %v2362_v56  ;;  %v2409_v47 = vld [vmem:[%s2484_s9 + $0x218] ss:$20 sps:$4 sm:$0xff]  }
  0x33   : > { %2077 = vmatpush3.bf16.msra.mxu1 %v2303_v34  ;;  %v2393_v34 = vld [vmem:[%s2484_s9 + $0x1c0] ss:$20 sps:$4 sm:$0xff]  }
  0x34   : > { %2078 = vmatprep.subr.bf16.mxu1 %v2310_v37  ;;  %v2397_v37 = vld [vmem:[%s2484_s9 + $0x150] ss:$20 sps:$4 sm:$0xff]  }
  0x35   : > { %2209 = vmatpush3.bf16.msra.mxu0 %v2362_v56 }
  0x36   : > { %1067 = vmatmul.mubr.bf16.gmra.mrb[8].mxu0 %v2308_v36  ;;  %1163 = vmatmul.mubr.bf16.gmra.mrb[8].mxu1 %v2309_v38  ;;  %v2395_v36 = vld [vmem:[%s2484_s9 + $0x1ec] ss:$20 sps:$4 sm:$0xff]   ;;  %v2398_v38 = vld [vmem:[%s2484_s9 + $0x1e8] ss:$20 sps:$4 sm:$0xff]  }
  0x37   : > { %2079 = vmatpush3.bf16.msra.mxu1 %v2311_v39  ;;  %1074 = vmatprep.mubr.bf16.mxu0 %v2314_v41  ;;  %v2399_v39 = vld [vmem:[%s2484_s9 + $0x178] ss:$20 sps:$4 sm:$0xff]   ;;  %v2402_v41 = vld [vmem:[%s2484_s9 + $0x1a0] ss:$20 sps:$4 sm:$0xff]  }
  0x38   : > { %2080 = vmatprep.subr.bf16.mxu1 %v2312_v40  ;;  %1170 = vmatprep.mubr.bf16.mxu1 %v2316_v42  ;;  %v2400_v40 = vld [vmem:[%s2484_s9 + $0x214] ss:$20 sps:$4 sm:$0xff]   ;;  %v2403_v42 = vld [vmem:[%s2484_s9 + $0x210] ss:$20 sps:$4 sm:$0xff]  }
  0x3b   : > { %2081 = vmatpush3.bf16.msra.mxu1 %v2313_v43  ;;  %v2404_v43 = vld [vmem:[%s2484_s9 + $0x1c8] ss:$20 sps:$4 sm:$0xff]  }
  0x3c   : > { %2082 = vmatprep.subr.bf16.mxu1 %v2320_v46  ;;  %v2408_v46 = vld [vmem:[%s2484_s9 + $0x238] ss:$20 sps:$4 sm:$0xff]  }
  0x3e   : > { %1075 = vmatmul.mubr.bf16.gmra.mrb[12].mxu0 %v2318_v44  ;;  %1171 = vmatmul.mubr.bf16.gmra.mrb[12].mxu1 %v2319_v45  ;;  %v2405_v44 = vld [vmem:[%s2484_s9 + $0x23c] ss:$20 sps:$4 sm:$0xff]  }
  0x3f   : > { %2083 = vmatpush3.bf16.msra.mxu1 %v2321_v48  ;;  %1082 = vmatprep.mubr.bf16.mxu0 %v2325_v50  ;;  %v2407_v45 = vld [vmem:[%s2484_s9 + $0x1f0] ss:$20 sps:$4 sm:$0xff]   ;;  %v2413_v50 = vld [vmem:[%s2484_s9 + $0x260] ss:$20 sps:$4 sm:$0xff]  }
  0x40   : > { %2084 = vmatprep.subr.bf16.mxu1 %v2322_v49  ;;  %1211 = vmatprep.mubr.bf16.mxu1 %v2329_v51  ;;  %v2410_v48 = vld [vmem:[%s2484_s9 + $0x264] ss:$20 sps:$4 sm:$0xff]   ;;  %v2412_v49 = vld [vmem:[%s2484_s9 + $0x240] ss:$20 sps:$4 sm:$0xff]   ;;  %v2414_v51 = vld [vmem:[%s2484_s9 + $0x268] ss:$20 sps:$4 sm:$0xff]  }
  0x43   : > { %2085 = vmatpush3.bf16.msra.mxu1 %v2324_v52 }
  0x46   : > { %1083 = vmatmul.mubr.bf16.gmra.mrb[16].mxu0 %v2330_v54  ;;  %1212 = vmatmul.mubr.bf16.vlgmr.msra.gmra.mrb[16].mxu1 %v2327_v53 }
  0x47   : > { %1090 = vmatprep.mubr.bf16.mxu0 %v2331_v55  ;;  %1219 = vmatprep.mubr.bf16.mxu1 %v2333_v57 }
  0x4e   : > { %1091 = vmatmul.mubr.bf16.gmra.mrb[20].mxu0 %v2335_v58  ;;  %1220 = vmatmul.mubr.bf16.gmra.mrb[20].mxu1 %v2336_v59 }
  0x4f   : > { %1098 = vmatprep.mubr.bf16.mxu0 %v2337_v60  ;;  %1227 = vmatprep.mubr.bf16.mxu1 %v2339_v61 }
  0x56   : > { %1099 = vmatmul.mubr.bf16.gmra.mrb[24].mxu0 %v2341_v62  ;;  %1228 = vmatmul.mubr.bf16.gmra.mrb[24].mxu1 %v2342_v63 }
  0x57   : > { %1106 = vmatprep.mubr.bf16.mxu0 %v2344_v0  ;;  %1235 = vmatprep.mubr.bf16.mxu1 %v2346_v1 }
  0x5e   : > { %1107 = vmatmul.mubr.bf16.gmra.mrb[28].mxu0 %v2348_v2  ;;  %1236 = vmatmul.mubr.bf16.gmra.mrb[28].mxu1 %v2349_v3 }
  0x5f   : > { %1114 = vmatprep.mubr.bf16.mxu0 %v2350_v4  ;;  %1243 = vmatprep.mubr.bf16.mxu1 %v2352_v5 }
  0x66   : > { %1115 = vmatmul.mubr.bf16.gmra.mrb[32].mxu0 %v2354_v6  ;;  %1244 = vmatmul.mubr.bf16.gmra.mrb[32].mxu1 %v2355_v7 }
  0x67   : > { %1122 = vmatprep.mubr.bf16.mxu0 %v2356_v8  ;;  %1251 = vmatprep.mubr.bf16.mxu1 %v2358_v9 }
  0x6e   : > { %1123 = vmatmul.mubr.bf16.gmra.mrb[36].mxu0 %v2360_v10  ;;  %1252 = vmatmul.mubr.bf16.gmra.mrb[36].mxu1 %v2361_v11 }
  0x6f   : > { %1130 = vmatprep.mubr.bf16.mxu0 %v2363_v12  ;;  %1259 = vmatprep.mubr.bf16.mxu1 %v2365_v13 }
  0x76   : > { %1131 = vmatmul.mubr.bf16.gmra.mrb[40].mxu0 %v2367_v14  ;;  %1260 = vmatmul.mubr.bf16.gmra.mrb[40].mxu1 %v2368_v15 }
  0x77   : > { %1138 = vmatprep.mubr.bf16.mxu0 %v2369_v16  ;;  %1267 = vmatprep.mubr.bf16.mxu1 %v2371_v17 }
  0x7e   : > { %1139 = vmatmul.mubr.bf16.gmra.mrb[44].mxu0 %v2373_v18  ;;  %1268 = vmatmul.mubr.bf16.gmra.mrb[44].mxu1 %v2374_v19 }
  0x7f   : > { %1275 = vmatprep.mubr.bf16.mxu1 %v2375_v20  ;;  %2210 = vmatprep.mubr.msk.bf16.mxu0 %vm969_vm0, %v2377_v21 }
  0x86   : > { %1276 = vmatmul.mubr.bf16.gmra.mrb[48].mxu1 %v2378_v22  ;;  %2211 = vmatmul.mubr.msk.bf16.vlgmr.msra.gmra.mrb[48].mxu0 %vm969_vm0, %v2379_v23 }
  0x87   : > { %1283 = vmatprep.mubr.bf16.mxu1 %v2380_v24  ;;  %2214 = vmatprep.mubr.msk.bf16.mxu0 %vm969_vm0, %v2382_v25 }
  0x8e   : > { %1284 = vmatmul.mubr.bf16.gmra.mrb[52].mxu1 %v2383_v26  ;;  %2215 = vmatmul.mubr.msk.bf16.gmra.mrb[52].mxu0 %vm969_vm0, %v2384_v27 }
  0x8f   : > { %1291 = vmatprep.mubr.bf16.mxu1 %v2385_v28  ;;  %2218 = vmatprep.mubr.msk.bf16.mxu0 %vm969_vm0, %v2387_v29 }
  0x96   : > { %1292 = vmatmul.mubr.bf16.gmra.mrb[56].mxu1 %v2388_v30  ;;  %2219 = vmatmul.mubr.msk.bf16.gmra.mrb[56].mxu0 %vm969_vm0, %v2389_v31 }
  0x97   : > { %1299 = vmatprep.mubr.bf16.mxu1 %v2390_v32  ;;  %2222 = vmatprep.mubr.msk.bf16.mxu0 %vm969_vm0, %v2392_v33 }
  0x9e   : > { %1300 = vmatmul.mubr.bf16.gmra.mrb[60].mxu1 %v2393_v34  ;;  %2223 = vmatmul.mubr.msk.bf16.gmra.mrb[60].mxu0 %vm969_vm0, %v2394_v35 }
  0x9f   : > { %1307 = vmatprep.mubr.bf16.mxu1 %v2395_v36  ;;  %2226 = vmatprep.mubr.msk.bf16.mxu0 %vm969_vm0, %v2397_v37 }
  0xa6   : > { %1308 = vmatmul.mubr.bf16.gmra.mrb[64].mxu1 %v2398_v38  ;;  %2227 = vmatmul.mubr.msk.bf16.gmra.mrb[64].mxu0 %vm969_vm0, %v2399_v39  ;;  %v2682_v38 = vld [vmem:[%s2886_s2] ss:$0 sm:$0xff] }
  0xa7   : > { %1315 = vmatprep.mubr.bf16.mxu1 %v2400_v40  ;;  %2230 = vmatprep.mubr.msk.bf16.mxu0 %vm969_vm0, %v2402_v41 }
  0xae   : > { %1316 = vmatmul.mubr.bf16.gmra.mrb[68].mxu1 %v2403_v42  ;;  %2231 = vmatmul.mubr.msk.bf16.gmra.mrb[68].mxu0 %vm969_vm0, %v2404_v43 }
  0xaf   : > { %1323 = vmatprep.mubr.bf16.mxu1 %v2405_v44  ;;  %2234 = vmatprep.mubr.msk.bf16.mxu0 %vm969_vm0, %v2407_v45 }
  0xb6   : > { %1324 = vmatmul.mubr.bf16.gmra.mrb[72].mxu1 %v2408_v46  ;;  %2235 = vmatmul.mubr.msk.bf16.gmra.mrb[72].mxu0 %vm969_vm0, %v2409_v47 }
  0xb7   : > { %1331 = vmatprep.mubr.bf16.mxu1 %v2410_v48  ;;  %2238 = vmatprep.mubr.msk.bf16.mxu0 %vm969_vm0, %v2412_v49 }
  0xbe   : > { %1332 = vmatmul.mubr.bf16.gmra.mrb[76].mxu1 %v2413_v50  ;;  %2239 = vmatmul.mubr.msk.bf16.gmra.mrb[76].mxu0 %vm969_vm0, %v2414_v51 }
  0xf9   : > { %v2046_v52 = vpop.f32.mrb[0].mxu1  ;;  %v1974_v53 = vpop.f32.mrb[0].mxu0 }
  0xfa   : > { %v2047_v54 = vpop.f32.mrb[1].mxu1  ;;  %v1975_v55 = vpop.f32.mrb[1].mxu0 }
  0xfb   : > { %v2663_v56 = vadd.f32 %v2047_v54, %v2046_v52  ;;  %v2049_v57 = vpop.f32.mrb[2].mxu1  ;;  %v1976_v58 = vadd.f32 %v1975_v55, %v1974_v53  ;;  %v1977_v59 = vpop.f32.mrb[2].mxu0 }
  0xfc   : > { %v2050_v60 = vpop.f32.mrb[3].mxu1  ;;  %v1978_v61 = vpop.f32.mrb[3].mxu0 }
  0xfd   : > { %v2665_v62 = vadd.f32 %v2050_v60, %v2049_v57  ;;  %v1979_v63 = vadd.f32 %v1978_v61, %v1977_v59  ;;  %v1053_v41 = vadd.f32 %v1976_v58, %v2682_v38 }
  0xff   : > { %v1056_v48 = vadd.f32 %v1979_v63, %v2682_v38 }
 0x101   : > { %v2052_v0 = vpop.f32.mrb[4].mxu1  ;;  %v1980_v1 = vpop.f32.mrb[4].mxu0 }
 0x102   : > { %v2053_v2 = vpop.f32.mrb[5].mxu1  ;;  %v1981_v3 = vpop.f32.mrb[5].mxu0 }
 0x103   : > { %v2667_v4 = vadd.f32 %v2053_v2, %v2052_v0  ;;  %v2055_v5 = vpop.f32.mrb[6].mxu1  ;;  %v1982_v6 = vadd.f32 %v1981_v3, %v1980_v1  ;;  %v1983_v7 = vpop.f32.mrb[6].mxu0 }
 0x104   : > { %v2056_v8 = vpop.f32.mrb[7].mxu1  ;;  %v1984_v9 = vpop.f32.mrb[7].mxu0 }
 0x105   : > { %v2669_v10 = vadd.f32 %v2056_v8, %v2055_v5  ;;  %v1985_v11 = vadd.f32 %v1984_v9, %v1983_v7  ;;  %v1061_v58 = vadd.f32 %v1982_v6, %v2682_v38 }
 0x107   : > { %v1064_v63 = vadd.f32 %v1985_v11, %v2682_v38 }
 0x109   : > { %v2058_v12 = vpop.f32.mrb[8].mxu1  ;;  %v1986_v13 = vpop.f32.mrb[8].mxu0 }
 0x10a   : > { %v2059_v14 = vpop.f32.mrb[9].mxu1  ;;  %v1987_v15 = vpop.f32.mrb[9].mxu0 }
 0x10b   : > { %v2671_v16 = vadd.f32 %v2059_v14, %v2058_v12  ;;  %v2061_v17 = vpop.f32.mrb[10].mxu1  ;;  %v1988_v18 = vadd.f32 %v1987_v15, %v1986_v13  ;;  %v1989_v19 = vpop.f32.mrb[10].mxu0 }
 0x10c   : > { %v2062_v20 = vpop.f32.mrb[11].mxu1  ;;  %v1990_v21 = vpop.f32.mrb[11].mxu0 }
 0x10d   : > { %v2673_v22 = vadd.f32 %v2062_v20, %v2061_v17  ;;  %v1991_v23 = vadd.f32 %v1990_v21, %v1989_v19  ;;  %v1069_v6 = vadd.f32 %v1988_v18, %v2682_v38 }
 0x10f   : > { %v1072_v11 = vadd.f32 %v1991_v23, %v2682_v38 }
 0x111   : > { %v2064_v24 = vpop.f32.mrb[12].mxu1  ;;  %v1992_v25 = vpop.f32.mrb[12].mxu0 }
 0x112   : > { %v2065_v26 = vpop.f32.mrb[13].mxu1  ;;  %v1993_v27 = vpop.f32.mrb[13].mxu0 }
 0x113   : > { %v2675_v28 = vadd.f32 %v2065_v26, %v2064_v24  ;;  %v2067_v29 = vpop.f32.mrb[14].mxu1  ;;  %v1994_v30 = vadd.f32 %v1993_v27, %v1992_v25  ;;  %v1995_v31 = vpop.f32.mrb[14].mxu0 }
 0x114   : > { %v2068_v32 = vpop.f32.mrb[15].mxu1  ;;  %v1996_v33 = vpop.f32.mrb[15].mxu0 }
 0x115   : > { %v2677_v34 = vadd.f32 %v2068_v32, %v2067_v29  ;;  %v1997_v35 = vadd.f32 %v1996_v33, %v1995_v31  ;;  %v1077_v18 = vadd.f32 %v1994_v30, %v2682_v38 }
 0x117   : > { %v1080_v23 = vadd.f32 %v1997_v35, %v2682_v38 }
 0x119   : > { %v2086_v36 = vpop.f32.mrb[16].mxu1  ;;  %v1998_v37 = vpop.f32.mrb[16].mxu0 }
 0x11a   : > { %v2087_v39 = vpop.f32.mrb[17].mxu1  ;;  %v1999_v40 = vpop.f32.mrb[17].mxu0 }
 0x11b   : > { %v2088_v42 = vadd.f32 %v2087_v39, %v2086_v36  ;;  %v2089_v43 = vpop.f32.mrb[18].mxu1  ;;  %v2000_v44 = vadd.f32 %v1999_v40, %v1998_v37  ;;  %v2001_v45 = vpop.f32.mrb[18].mxu0 }
 0x11c   : > { %v2090_v46 = vpop.f32.mrb[19].mxu1  ;;  %v2002_v47 = vpop.f32.mrb[19].mxu0 }
 0x11d   : > { %v2091_v49 = vadd.f32 %v2090_v46, %v2089_v43  ;;  %v2003_v50 = vadd.f32 %v2002_v47, %v2001_v45  ;;  %v2686_v51 = vadd.f32 %v2088_v42, %v1053_v41  ;;  %v1085_v30 = vadd.f32 %v2000_v44, %v2682_v38 }
 0x11f   : > { %v2688_v52 = vadd.f32 %v2091_v49, %v1056_v48  ;;  %v1088_v35 = vadd.f32 %v2003_v50, %v2682_v38 }
 0x121   : > { %v2092_v53 = vpop.f32.mrb[20].mxu1  ;;  %v2004_v54 = vpop.f32.mrb[20].mxu0 }
 0x122   : > { %v2093_v55 = vpop.f32.mrb[21].mxu1  ;;  %v2005_v57 = vpop.f32.mrb[21].mxu0 }
 0x123   : > { %v2094_v59 = vadd.f32 %v2093_v55, %v2092_v53  ;;  %v2095_v60 = vpop.f32.mrb[22].mxu1  ;;  %v2006_v61 = vadd.f32 %v2005_v57, %v2004_v54  ;;  %v2007_v0 = vpop.f32.mrb[22].mxu0 }
 0x124   : > { %v2096_v1 = vpop.f32.mrb[23].mxu1  ;;  %v2008_v2 = vpop.f32.mrb[23].mxu0 }
 0x125   : > { %v2097_v3 = vadd.f32 %v2096_v1, %v2095_v60  ;;  %v2009_v5 = vadd.f32 %v2008_v2, %v2007_v0  ;;  %v2692_v7 = vadd.f32 %v2094_v59, %v1061_v58  ;;  %v1093_v44 = vadd.f32 %v2006_v61, %v2682_v38 }
 0x127   : > { %v2694_v8 = vadd.f32 %v2097_v3, %v1064_v63  ;;  %v1096_v50 = vadd.f32 %v2009_v5, %v2682_v38 }
 0x129   : > { %v2098_v9 = vpop.f32.mrb[24].mxu1  ;;  %v2010_v12 = vpop.f32.mrb[24].mxu0 }
 0x12a   : > { %v2099_v13 = vpop.f32.mrb[25].mxu1  ;;  %v2011_v14 = vpop.f32.mrb[25].mxu0 }
 0x12b   : > { %v2100_v15 = vadd.f32 %v2099_v13, %v2098_v9  ;;  %v2101_v17 = vpop.f32.mrb[26].mxu1  ;;  %v2012_v19 = vadd.f32 %v2011_v14, %v2010_v12  ;;  %v2013_v20 = vpop.f32.mrb[26].mxu0 }
 0x12c   : > { %v2102_v21 = vpop.f32.mrb[27].mxu1  ;;  %v2014_v24 = vpop.f32.mrb[27].mxu0 }
 0x12d   : > { %v2103_v25 = vadd.f32 %v2102_v21, %v2101_v17  ;;  %v2015_v26 = vadd.f32 %v2014_v24, %v2013_v20  ;;  %v2698_v27 = vadd.f32 %v2100_v15, %v1069_v6 }
 0x12f   : > { %v2700_v29 = vadd.f32 %v2103_v25, %v1072_v11 }
 0x131   : > { %v2104_v31 = vpop.f32.mrb[28].mxu1  ;;  %v2016_v32 = vpop.f32.mrb[28].mxu0 }
 0x132   : > { %v2105_v33 = vpop.f32.mrb[29].mxu1  ;;  %v2017_v36 = vpop.f32.mrb[29].mxu0 }
 0x133   : > { %v2106_v37 = vadd.f32 %v2105_v33, %v2104_v31  ;;  %v2107_v39 = vpop.f32.mrb[30].mxu1  ;;  %v2018_v40 = vadd.f32 %v2017_v36, %v2016_v32  ;;  %v2019_v41 = vpop.f32.mrb[30].mxu0 }
 0x134   : > { %v2108_v42 = vpop.f32.mrb[31].mxu1  ;;  %v2020_v43 = vpop.f32.mrb[31].mxu0 }
 0x135   : > { %v2109_v45 = vadd.f32 %v2108_v42, %v2107_v39  ;;  %v2021_v46 = vadd.f32 %v2020_v43, %v2019_v41  ;;  %v2704_v47 = vadd.f32 %v2106_v37, %v1077_v18  ;;  %v1101_v39 = vadd.f32 %v2012_v19, %v2682_v38 }
 0x137   : > { %v2706_v48 = vadd.f32 %v2109_v45, %v1080_v23 }
 0x139   : > { %v2110_v49 = vpop.f32.mrb[32].mxu1  ;;  %v2022_v53 = vpop.f32.mrb[32].mxu0 }
 0x13a   : > { %v2111_v54 = vpop.f32.mrb[33].mxu1  ;;  %v2023_v55 = vpop.f32.mrb[33].mxu0 }
 0x13b   : > { %v2112_v57 = vadd.f32 %v2111_v54, %v2110_v49  ;;  %v2113_v58 = vpop.f32.mrb[34].mxu1  ;;  %v2709_v59 = vadd.f32 %v2023_v55, %v2022_v53  ;;  %v2025_v60 = vpop.f32.mrb[34].mxu0  ;;  %v1104_v49 = vadd.f32 %v2015_v26, %v2682_v38 }
 0x13c   : > { %v2114_v0 = vpop.f32.mrb[35].mxu1  ;;  %v2026_v1 = vpop.f32.mrb[35].mxu0 }
 0x13d   : > { %v2115_v2 = vadd.f32 %v2114_v0, %v2113_v58  ;;  %v2027_v63 = vadd.f32 %v2026_v1, %v2025_v60  ;;  %v2712_v3 = vadd.f32 %v2112_v57, %v1085_v30  ;;  %v1109_v0 = vadd.f32 %v2018_v40, %v2682_v38 }
 0x13f   : > { %v2714_v9 = vadd.f32 %v2115_v2, %v1088_v35 }
 0x141   : > { %v2116_v12 = vpop.f32.mrb[36].mxu1  ;;  %v2028_v13 = vpop.f32.mrb[36].mxu0 }
 0x142   : > { %v2117_v14 = vpop.f32.mrb[37].mxu1  ;;  %v2029_v6 = vpop.f32.mrb[37].mxu0 }
 0x143   : > { %v2118_v15 = vadd.f32 %v2117_v14, %v2116_v12  ;;  %v2119_v17 = vpop.f32.mrb[38].mxu1  ;;  %v2717_v20 = vadd.f32 %v2029_v6, %v2028_v13  ;;  %v2031_v21 = vpop.f32.mrb[38].mxu0  ;;  %v1112_v14 = vadd.f32 %v2021_v46, %v2682_v38 }
 0x144   : > { %v2120_v24 = vpop.f32.mrb[39].mxu1  ;;  %v2032_v11 = vpop.f32.mrb[39].mxu0 }
 0x145   : > { %v2121_v25 = vadd.f32 %v2120_v24, %v2119_v17  ;;  %v2720_v31 = vadd.f32 %v2032_v11, %v2031_v21  ;;  %v2722_v32 = vadd.f32 %v2118_v15, %v1093_v44 }
 0x147   : > { %v2724_v33 = vadd.f32 %v2121_v25, %v1096_v50  ;;  %v1117_v25 = vadd.f32 %v2709_v59, %v2682_v38 }
 0x149   : > { %v2122_v36 = vpop.f32.mrb[40].mxu1  ;;  %v2034_v18 = vpop.f32.mrb[40].mxu0 }
 0x14a   : > { %v2123_v37 = vpop.f32.mrb[41].mxu1  ;;  %v2035_v61 = vpop.f32.mrb[41].mxu0 }
 0x14b   : > { %v2124_v41 = vadd.f32 %v2123_v37, %v2122_v36  ;;  %v2125_v42 = vpop.f32.mrb[42].mxu1  ;;  %v2727_v43 = vadd.f32 %v2035_v61, %v2034_v18  ;;  %v2037_v23 = vpop.f32.mrb[42].mxu0  ;;  %v1120_v61 = vadd.f32 %v2027_v63, %v2682_v38 }
 0x14c   : > { %v2126_v45 = vpop.f32.mrb[43].mxu1  ;;  %v2038_v5 = vpop.f32.mrb[43].mxu0 }
 0x14d   : > { %v2127_v53 = vadd.f32 %v2126_v45, %v2125_v42  ;;  %v2730_v54 = vadd.f32 %v2038_v5, %v2037_v23  ;;  %v2732_v55 = vadd.f32 %v2124_v41, %v1101_v39 }
 0x14f   : > { %v2734_v30 = vadd.f32 %v2127_v53, %v1104_v49 }
 0x151   : > { %v2128_v57 = vpop.f32.mrb[44].mxu1  ;;  %v2040_v58 = vpop.f32.mrb[44].mxu0 }
 0x152   : > { %v2129_v60 = vpop.f32.mrb[45].mxu1  ;;  %v2041_v19 = vpop.f32.mrb[45].mxu0 }
 0x153   : > { %v2130_v1 = vadd.f32 %v2129_v60, %v2128_v57  ;;  %v2131_v35 = vpop.f32.mrb[46].mxu1  ;;  %v2737_v2 = vadd.f32 %v2041_v19, %v2040_v58  ;;  %v2043_v12 = vpop.f32.mrb[46].mxu0 }
 0x154   : > { %v2132_v26 = vpop.f32.mrb[47].mxu1  ;;  %v2044_v13 = vpop.f32.mrb[47].mxu0 }
 0x155   : > { %v2133_v6 = vadd.f32 %v2132_v26, %v2131_v35  ;;  %v2740_v44 = vadd.f32 %v2044_v13, %v2043_v12  ;;  %v2742_v15 = vadd.f32 %v2130_v1, %v1109_v0  ;;  %v1125_v35 = vadd.f32 %v2717_v20, %v2682_v38 }
 0x157   : > { %v2744_v17 = vadd.f32 %v2133_v6, %v1112_v14  ;;  %v1128_v6 = vadd.f32 %v2720_v31, %v2682_v38 }
 0x159   : > { %v2134_v21 = vpop.f32.mrb[48].mxu1  ;;  %v2212_v24 = vpop.f32.mrb[48].mxu0 }
 0x15a   : > { %v1383_v40 = vadd.f32 %v2212_v24, %v2692_v7  ;;  %v2135_v11 = vpop.f32.mrb[49].mxu1  ;;  %v1374_v50 = vpop.f32.mrb[49].mxu0 }
 0x15b   : > { %v2136_v36 = vadd.f32 %v2135_v11, %v2134_v21  ;;  %v1375_v46 = vadd.f32 %v1374_v50, %v2686_v51  ;;  %v2137_v18 = vpop.f32.mrb[50].mxu1  ;;  %v2213_v37 = vpop.f32.mrb[50].mxu0 }
 0x15c   : > { %v1503_v39 = vmax.f32 %v1383_v40, 0.0  ;;  %v1386_v41 = vadd.f32 %v2213_v37, %v2694_v8  ;;  %v2138_v42 = vpop.f32.mrb[51].mxu1  ;;  %v1377_v23 = vpop.f32.mrb[51].mxu0 }
 0x15d   : > { %v1501_v7 = vmax.f32 %v1375_v46, 0.0  ;;  %v2139_v51 = vadd.f32 %v2138_v42, %v2137_v18  ;;  %v1378_v59 = vadd.f32 %v1377_v23, %v2688_v52  ;;  %v2759_v45 = vadd.f32 %v2136_v36, %v1117_v25 }
 0x15e   : > { %v1928_v63 = vpack.c.bf16 %v1503_v39, %v1503_v39  ;;  %v1504_v5 = vmax.f32 %v1386_v41, 0.0  ;;  %v1133_v23 = vadd.f32 %v2727_v43, %v2682_v38 }
 0x15f   : > { %v1926_v8 = vpack.c.bf16 %v1501_v7, %v1501_v7  ;;  %v1502_v49 = vmax.f32 %v1378_v59, 0.0  ;;  %v2761_v53 = vadd.f32 %v2139_v51, %v1120_v61 }
 0x160   : > { %1664 = vst.msk [vmem:[%s2756_s21 + $0x8] sm:$0xf] %vm1661_vm1, %v1928_v63  ;;  %v1929_v57 = vpack.c.bf16 %v1504_v5, %v1504_v5  ;;  %v1136_v5 = vadd.f32 %v2730_v54, %v2682_v38 }
 0x161   : > { %1662 = vst.msk [vmem:[%s2756_s21] sm:$0xf] %vm1661_vm1, %v1926_v8  ;;  %v1927_v58 = vpack.c.bf16 %v1502_v49, %v1502_v49  ;;  %v2140_v60 = vpop.f32.mrb[52].mxu1  ;;  %v2216_v19 = vpop.f32.mrb[52].mxu0 }
 0x162   : > { %1665 = vst.msk [vmem:[%s2756_s21 + $0xc] sm:$0xf] %vm1661_vm1, %v1929_v57  ;;  %v1399_v52 = vadd.f32 %v2216_v19, %v2704_v47  ;;  %v2141_v0 = vpop.f32.mrb[53].mxu1  ;;  %v1390_v1 = vpop.f32.mrb[53].mxu0 }
 0x163   : > { %1663 = vst.msk [vmem:[%s2756_s21 + $0x4] sm:$0xf] %vm1661_vm1, %v1927_v58  ;;  %v2142_v12 = vadd.f32 %v2141_v0, %v2140_v60  ;;  %v1391_v26 = vadd.f32 %v1390_v1, %v2698_v27  ;;  %v2143_v13 = vpop.f32.mrb[54].mxu1  ;;  %v2217_v14 = vpop.f32.mrb[54].mxu0 }
 0x164   : > { %v1507_v21 = vmax.f32 %v1399_v52, 0.0  ;;  %v1402_v47 = vadd.f32 %v2217_v14, %v2706_v48  ;;  %v2144_v24 = vpop.f32.mrb[55].mxu1  ;;  %v1393_v40 = vpop.f32.mrb[55].mxu0 }
 0x165   : > { %v1505_v11 = vmax.f32 %v1391_v26, 0.0  ;;  %v2145_v20 = vadd.f32 %v2144_v24, %v2143_v13  ;;  %v1394_v50 = vadd.f32 %v1393_v40, %v2700_v29  ;;  %v2779_v25 = vadd.f32 %v2142_v12, %v1125_v35 }
 0x166   : > { %v1932_v27 = vpack.c.bf16 %v1507_v21, %v1507_v21  ;;  %v1508_v36 = vmax.f32 %v1402_v47, 0.0 }
 0x167   : > { %v1930_v46 = vpack.c.bf16 %v1505_v11, %v1505_v11  ;;  %v1506_v18 = vmax.f32 %v1394_v50, 0.0  ;;  %v2781_v37 = vadd.f32 %v2145_v20, %v1128_v6  ;;  %v1141_v6 = vadd.f32 %v2737_v2, %v2682_v38 }
 0x168   : > { %1668 = vst.msk [vmem:[%s2756_s21 + $0x18] sm:$0xf] %vm1661_vm1, %v1932_v27  ;;  %v1933_v31 = vpack.c.bf16 %v1508_v36, %v1508_v36  ;;  %v1144_v11 = vadd.f32 %v2740_v44, %v2682_v38 }
 0x169   : > { %1666 = vst.msk [vmem:[%s2756_s21 + $0x10] sm:$0xf] %vm1661_vm1, %v1930_v46  ;;  %v1931_v48 = vpack.c.bf16 %v1506_v18, %v1506_v18  ;;  %v2146_v61 = vpop.f32.mrb[56].mxu1  ;;  %v2220_v39 = vpop.f32.mrb[56].mxu0 }
 0x16a   : > { %1669 = vst.msk [vmem:[%s2756_s21 + $0x1c] sm:$0xf] %vm1661_vm1, %v1933_v31  ;;  %v1415_v29 = vadd.f32 %v2220_v39, %v2722_v32  ;;  %v2147_v41 = vpop.f32.mrb[57].mxu1  ;;  %v1406_v42 = vpop.f32.mrb[57].mxu0 }
 0x16b   : > { %1667 = vst.msk [vmem:[%s2756_s21 + $0x14] sm:$0xf] %vm1661_vm1, %v1931_v48  ;;  %v2148_v7 = vadd.f32 %v2147_v41, %v2146_v61  ;;  %v1407_v51 = vadd.f32 %v1406_v42, %v2712_v3  ;;  %v2149_v59 = vpop.f32.mrb[58].mxu1  ;;  %v2221_v63 = vpop.f32.mrb[58].mxu0 }
 0x16c   : > { %v1511_v8 = vmax.f32 %v1415_v29, 0.0  ;;  %v1418_v32 = vadd.f32 %v2221_v63, %v2724_v33  ;;  %v2150_v49 = vpop.f32.mrb[59].mxu1  ;;  %v1409_v57 = vpop.f32.mrb[59].mxu0 }
 0x16d   : > { %v1509_v58 = vmax.f32 %v1407_v51, 0.0  ;;  %v2151_v43 = vadd.f32 %v2150_v49, %v2149_v59  ;;  %v1410_v60 = vadd.f32 %v1409_v57, %v2714_v9  ;;  %v2799_v19 = vadd.f32 %v2148_v7, %v1133_v23 }
 0x16e   : > { %v1936_v3 = vpack.c.bf16 %v1511_v8, %v1511_v8  ;;  %v1512_v52 = vmax.f32 %v1418_v32, 0.0  ;;  %v1149_v7 = vadd.f32 %v2663_v56, %v2682_v38  ;;  %v1152_v8 = vadd.f32 %v2665_v62, %v2682_v38 }
 0x16f   : > { %v1934_v0 = vpack.c.bf16 %v1509_v58, %v1509_v58  ;;  %v1510_v1 = vmax.f32 %v1410_v60, 0.0  ;;  %v2801_v35 = vadd.f32 %v2151_v43, %v1136_v5 }
 0x170   : > { %1672 = vst.msk [vmem:[%s2756_s21 + $0x28] sm:$0xf] %vm1661_vm1, %v1936_v3  ;;  %v1937_v54 = vpack.c.bf16 %v1512_v52, %v1512_v52 }
 0x171   : > { %1670 = vst.msk [vmem:[%s2756_s21 + $0x20] sm:$0xf] %vm1661_vm1, %v1934_v0  ;;  %v1935_v33 = vpack.c.bf16 %v1510_v1, %v1510_v1  ;;  %v2152_v12 = vpop.f32.mrb[60].mxu1  ;;  %v2224_v26 = vpop.f32.mrb[60].mxu0 }
 0x172   : > { %1673 = vst.msk [vmem:[%s2756_s21 + $0x2c] sm:$0xf] %vm1661_vm1, %v1937_v54  ;;  %v1431_v9 = vadd.f32 %v2224_v26, %v2742_v15  ;;  %v2153_v13 = vpop.f32.mrb[61].mxu1  ;;  %v1422_v14 = vpop.f32.mrb[61].mxu0 }
 0x173   : > { %1671 = vst.msk [vmem:[%s2756_s21 + $0x24] sm:$0xf] %vm1661_vm1, %v1935_v33  ;;  %v2154_v21 = vadd.f32 %v2153_v13, %v2152_v12  ;;  %v1423_v47 = vadd.f32 %v1422_v14, %v2732_v55  ;;  %v2155_v24 = vpop.f32.mrb[62].mxu1  ;;  %v2225_v40 = vpop.f32.mrb[62].mxu0 }
 0x174   : > { %v1515_v20 = vmax.f32 %v1431_v9, 0.0  ;;  %v1434_v15 = vadd.f32 %v2225_v40, %v2744_v17  ;;  %v2156_v50 = vpop.f32.mrb[63].mxu1  ;;  %v1425_v27 = vpop.f32.mrb[63].mxu0  ;;  %v1157_v9 = vadd.f32 %v2667_v4, %v2682_v38 }
 0x175   : > { %v1513_v36 = vmax.f32 %v1423_v47, 0.0  ;;  %v2157_v2 = vadd.f32 %v2156_v50, %v2155_v24  ;;  %v1426_v46 = vadd.f32 %v1425_v27, %v2734_v30  ;;  %v1302_v18 = vadd.f32 %v2154_v21, %v1141_v6 }
 0x176   : > { %v1940_v31 = vpack.c.bf16 %v1515_v20, %v1515_v20  ;;  %v1516_v55 = vmax.f32 %v1434_v15, 0.0  ;;  %v1160_v47 = vadd.f32 %v2669_v10, %v2682_v38 }
 0x177   : > { %v1938_v48 = vpack.c.bf16 %v1513_v36, %v1513_v36  ;;  %v1514_v61 = vmax.f32 %v1426_v46, 0.0  ;;  %v1305_v39 = vadd.f32 %v2157_v2, %v1144_v11 }
 0x178   : > { %1676 = vst.msk [vmem:[%s2756_s21 + $0x38] sm:$0xf] %vm1661_vm1, %v1940_v31  ;;  %v1941_v44 = vpack.c.bf16 %v1516_v55, %v1516_v55 }
 0x179   : > { %1674 = vst.msk [vmem:[%s2756_s21 + $0x30] sm:$0xf] %vm1661_vm1, %v1938_v48  ;;  %v1939_v17 = vpack.c.bf16 %v1514_v61, %v1514_v61  ;;  %v2158_v29 = vpop.f32.mrb[64].mxu1  ;;  %v2228_v41 = vpop.f32.mrb[64].mxu0 }
 0x17a   : > { %1677 = vst.msk [vmem:[%s2756_s21 + $0x3c] sm:$0xf] %vm1661_vm1, %v1941_v44  ;;  %v1447_v42 = vadd.f32 %v2228_v41, %v2779_v25  ;;  %v2159_v30 = vpop.f32.mrb[65].mxu1  ;;  %v1438_v23 = vpop.f32.mrb[65].mxu0  ;;  %v1165_v44 = vadd.f32 %v2671_v16, %v2682_v38 }
 0x17b   : > { %1675 = vst.msk [vmem:[%s2756_s21 + $0x34] sm:$0xf] %vm1661_vm1, %v1939_v17  ;;  %v2160_v51 = vadd.f32 %v2159_v30, %v2158_v29  ;;  %v1439_v59 = vadd.f32 %v1438_v23, %v2759_v45  ;;  %v2161_v63 = vpop.f32.mrb[66].mxu1  ;;  %v2229_v5 = vpop.f32.mrb[66].mxu0  ;;  %v1168_v30 = vadd.f32 %v2673_v22, %v2682_v38 }
 0x17c   : > { %v1519_v32 = vmax.f32 %v1447_v42, 0.0  ;;  %v1450_v25 = vadd.f32 %v2229_v5, %v2781_v37  ;;  %v2162_v49 = vpop.f32.mrb[67].mxu1  ;;  %v1441_v57 = vpop.f32.mrb[67].mxu0 }
 0x17d   : > { %v1517_v58 = vmax.f32 %v1439_v59, 0.0  ;;  %v2163_v56 = vadd.f32 %v2162_v49, %v2161_v63  ;;  %v1442_v43 = vadd.f32 %v1441_v57, %v2761_v53  ;;  %v1310_v60 = vadd.f32 %v2160_v51, %v1149_v7 }
 0x17e   : > { %v1944_v3 = vpack.c.bf16 %v1519_v32, %v1519_v32  ;;  %v1520_v45 = vmax.f32 %v1450_v25, 0.0 }
 0x17f   : > { %v1942_v52 = vpack.c.bf16 %v1517_v58, %v1517_v58  ;;  %v1518_v0 = vmax.f32 %v1442_v43, 0.0  ;;  %v1313_v1 = vadd.f32 %v2163_v56, %v1152_v8 }
 0x180   : > { %1680 = vst.msk [vmem:[%s2756_s21 + $0x48] sm:$0xf] %vm1661_vm1, %v1944_v3  ;;  %v1945_v62 = vpack.c.bf16 %v1520_v45, %v1520_v45 }
 0x181   : > { %1678 = vst.msk [vmem:[%s2756_s21 + $0x40] sm:$0xf] %vm1661_vm1, %v1942_v52  ;;  %v1943_v37 = vpack.c.bf16 %v1518_v0, %v1518_v0  ;;  %v2164_v54 = vpop.f32.mrb[68].mxu1  ;;  %v2232_v33 = vpop.f32.mrb[68].mxu0  ;;  %v1173_v52 = vadd.f32 %v2675_v28, %v2682_v38 }
 0x182   : > { %1681 = vst.msk [vmem:[%s2756_s21 + $0x4c] sm:$0xf] %vm1661_vm1, %v1945_v62  ;;  %v1463_v12 = vadd.f32 %v2232_v33, %v1302_v18  ;;  %v2165_v26 = vpop.f32.mrb[69].mxu1  ;;  %v1454_v53 = vpop.f32.mrb[69].mxu0 }
 0x183   : > { %1679 = vst.msk [vmem:[%s2756_s21 + $0x44] sm:$0xf] %vm1661_vm1, %v1943_v37  ;;  %v2166_v13 = vadd.f32 %v2165_v26, %v2164_v54  ;;  %v1455_v14 = vadd.f32 %v1454_v53, %v2799_v19  ;;  %v2167_v6 = vpop.f32.mrb[70].mxu1  ;;  %v2233_v21 = vpop.f32.mrb[70].mxu0  ;;  %v1176_v54 = vadd.f32 %v2677_v34, %v2682_v38 }
 0x184   : > { %v1523_v24 = vmax.f32 %v1463_v12, 0.0  ;;  %v1466_v40 = vadd.f32 %v2233_v21, %v1305_v39  ;;  %v2168_v11 = vpop.f32.mrb[71].mxu1  ;;  %v1457_v20 = vpop.f32.mrb[71].mxu0 }
 0x185   : > { %v1521_v15 = vmax.f32 %v1455_v14, 0.0  ;;  %v2169_v50 = vadd.f32 %v2168_v11, %v2167_v6  ;;  %v1458_v4 = vadd.f32 %v1457_v20, %v2801_v35  ;;  %v1318_v27 = vadd.f32 %v2166_v13, %v1157_v9 }
 0x186   : > { %v1948_v36 = vpack.c.bf16 %v1523_v24, %v1523_v24  ;;  %v1524_v19 = vmax.f32 %v1466_v40, 0.0 }
 0x187   : > { %v1946_v2 = vpack.c.bf16 %v1521_v15, %v1521_v15  ;;  %v1522_v46 = vmax.f32 %v1458_v4, 0.0  ;;  %v1321_v18 = vadd.f32 %v2169_v50, %v1160_v47 }
 0x188   : > { %1684 = vst.msk [vmem:[%s2756_s21 + $0x58] sm:$0xf] %vm1661_vm1, %v1948_v36  ;;  %v1949_v10 = vpack.c.bf16 %v1524_v19, %v1524_v19 }
 0x189   : > { %1682 = vst.msk [vmem:[%s2756_s21 + $0x50] sm:$0xf] %vm1661_vm1, %v1946_v2  ;;  %v1947_v31 = vpack.c.bf16 %v1522_v46, %v1522_v46  ;;  %v2170_v55 = vpop.f32.mrb[72].mxu1  ;;  %v2236_v48 = vpop.f32.mrb[72].mxu0 }
 0x18a   : > { %1685 = vst.msk [vmem:[%s2756_s21 + $0x5c] sm:$0xf] %vm1661_vm1, %v1949_v10  ;;  %v1479_v61 = vadd.f32 %v2236_v48, %v1318_v27  ;;  %v2171_v39 = vpop.f32.mrb[73].mxu1  ;;  %v1470_v35 = vpop.f32.mrb[73].mxu0 }
 0x18b   : > { %1683 = vst.msk [vmem:[%s2756_s21 + $0x54] sm:$0xf] %vm1661_vm1, %v1947_v31  ;;  %v2172_v17 = vadd.f32 %v2171_v39, %v2170_v55  ;;  %v1471_v29 = vadd.f32 %v1470_v35, %v1310_v60  ;;  %v2173_v41 = vpop.f32.mrb[74].mxu1  ;;  %v2237_v42 = vpop.f32.mrb[74].mxu0 }
 0x18c   : > { %v1527_v23 = vmax.f32 %v1479_v61, 0.0  ;;  %v1482_v7 = vadd.f32 %v2237_v42, %v1321_v18  ;;  %v2174_v51 = vpop.f32.mrb[75].mxu1  ;;  %v1473_v59 = vpop.f32.mrb[75].mxu0 }
 0x18d   : > { %v1525_v63 = vmax.f32 %v1471_v29, 0.0  ;;  %v2175_v5 = vadd.f32 %v2174_v51, %v2173_v41  ;;  %v1474_v8 = vadd.f32 %v1473_v59, %v1313_v1  ;;  %v1326_v16 = vadd.f32 %v2172_v17, %v1165_v44 }
 0x18e   : > { %v1952_v32 = vpack.c.bf16 %v1527_v23, %v1527_v23  ;;  %v1528_v25 = vmax.f32 %v1482_v7, 0.0 }
 0x18f   : > { %v1950_v49 = vpack.c.bf16 %v1525_v63, %v1525_v63  ;;  %v1526_v57 = vmax.f32 %v1474_v8, 0.0  ;;  %v1329_v58 = vadd.f32 %v2175_v5, %v1168_v30 }
 0x190   : > { %1688 = vst.msk [vmem:[%s2756_s21 + $0x68] sm:$0xf] %vm1661_vm1, %v1952_v32  ;;  %v1953_v56 = vpack.c.bf16 %v1528_v25, %v1528_v25 }
 0x191   : > { %1686 = vst.msk [vmem:[%s2756_s21 + $0x60] sm:$0xf] %vm1661_vm1, %v1950_v49  ;;  %v1951_v22 = vpack.c.bf16 %v1526_v57, %v1526_v57  ;;  %v2176_v43 = vpop.f32.mrb[76].mxu1  ;;  %v2240_v60 = vpop.f32.mrb[76].mxu0 }
 0x192   : > { %1689 = vst.msk [vmem:[%s2756_s21 + $0x6c] sm:$0xf] %vm1661_vm1, %v1953_v56  ;;  %v2177_v3 = vpop.f32.mrb[77].mxu1  ;;  %v1486_v45 = vpop.f32.mrb[77].mxu0 }
 0x193   : > { %1687 = vst.msk [vmem:[%s2756_s21 + $0x64] sm:$0xf] %vm1661_vm1, %v1951_v22  ;;  %v2178_v0 = vadd.f32 %v2177_v3, %v2176_v43  ;;  %v1487_v1 = vadd.f32 %v1486_v45, %v1326_v16  ;;  %v2179_v62 = vpop.f32.mrb[78].mxu1  ;;  %v2241_v37 = vpop.f32.mrb[78].mxu0 }
 0x194   : > { %v2180_v33 = vpop.f32.mrb[79].mxu1  ;;  %v1489_v12 = vpop.f32.mrb[79].mxu0 }
 0x195   : > { %v1334_v26 = vadd.f32 %v2178_v0, %v1173_v52  ;;  %v1529_v53 = vmax.f32 %v1487_v1, 0.0  ;;  %v2181_v9 = vadd.f32 %v2180_v33, %v2179_v62  ;;  %v1490_v13 = vadd.f32 %v1489_v12, %v1329_v58 }
 0x197   : > { %v1495_v28 = vadd.f32 %v2240_v60, %v1334_v26  ;;  %v1954_v14 = vpack.c.bf16 %v1529_v53, %v1529_v53  ;;  %v1337_v6 = vadd.f32 %v2181_v9, %v1176_v54  ;;  %v1530_v21 = vmax.f32 %v1490_v13, 0.0 }
 0x199   : > { %v1531_v47 = vmax.f32 %v1495_v28, 0.0  ;;  %1690 = vst.msk [vmem:[%s2756_s21 + $0x70] sm:$0xf] %vm1661_vm1, %v1954_v14  ;;  %v1498_v24 = vadd.f32 %v2241_v37, %v1337_v6  ;;  %v1955_v40 = vpack.c.bf16 %v1530_v21, %v1530_v21 }
 0x19b   : > { %v1956_v11 = vpack.c.bf16 %v1531_v47, %v1531_v47  ;;  %v1532_v34 = vmax.f32 %v1498_v24, 0.0  ;;  %1691 = vst.msk [vmem:[%s2756_s21 + $0x74] sm:$0xf] %vm1661_vm1, %v1955_v40 }
 0x19d   : > { %1692 = vst.msk [vmem:[%s2756_s21 + $0x78] sm:$0xf] %vm1661_vm1, %v1956_v11  ;;  %v1957_v38 = vpack.c.bf16 %v1532_v34, %v1532_v34 }
 0x19f   : > { %1693 = vst.msk [vmem:[%s2756_s21 + $0x7c] sm:$0xf] %vm1661_vm1, %v1957_v38 }
 0x1a0 PF: > { %s13_s12 = sadd.s32 1, %s2421_s12  }
 0x1a1   : > { %p10_p4 = scmp.ge.s32.totalorder %s13_s12, 4  }
 0x1a3   :  { %12 = sbr.rel (!%p10_p4) target bundleno = 1 (0x1), region = 62 }

// kernel: _lambda_.24
= control target key start
LH: loop header
LB: loop body
LE: loop exit
PB: predicated region body
PF: predicated region fallthrough
CT: control target
= control target key end

     0   :  { %s4585_s18 = smov 0   ;;  %s5482_s0 = inlined_call_operand.vmem [shape: bf16[512,576], index: 0, kind: input, shape index: {}]   ;;  %s5483_s1 = inlined_call_operand.vmem [shape: bf16[512,576], index: 1, kind: input, shape index: {}]   ;;  %s5484_s2 = inlined_call_operand.vmem [shape: bf16[576,64], index: 2, kind: input, shape index: {}]   ;;  %s5485_s3 = inlined_call_operand.vmem [shape: bf16[576,64], index: 3, kind: input, shape index: {}]   ;;  %s5486_s4 = inlined_call_operand.vmem [shape: f32[1,64], index: 4, kind: input, shape index: {}]   ;;  %s5487_s5 = inlined_call_operand.vmem [shape: bf16[512,64], index: 5, kind: output, shape index: {}]  }
   0x1 LB: > { %s3188_s19 = sadd.s32 4294967295, %s4553_s18   ;;  %p3192_p0 = scmp.ge.s32.totalorder %s4553_s18, 1  ;;  %s4553_s18 = sphi %s4585_s18, %s15_s18  }
   0x2   : > { %p201_p1 = scmp.lt.s32.totalorder %s4553_s18, 3 }
   0x4   : > { %p202_p2 = pnand %p3192_p0, %p201_p1 }
   0x6   : > { %205 = sbr.rel (%p202_p2) target bundleno = 588 (0x24c), region = 40 }
   0xd   : > { %v4251_v0 = vld [vmem:[%s5485_s3 + $0x40] sm:$0xff]   ;;  %s3193_s22 = sshll.u32 %s3188_s19, 5  ;;  %v4253_v2 = vld [vmem:[%s5485_s3 + $0x48] sm:$0xff]   ;;  %v4255_v4 = vld [vmem:[%s5485_s3 + $0x50] sm:$0xff]   ;;  %vm1209_vm0 = vcmask 523264   ;;  %vm3087_vm1 = vcmask 519168  }
   0xe   : > { %v4252_v1 = vld [vmem:[%s5485_s3] sm:$0xff]   ;;  %3530 = vmatprep.subr.bf16.mxu0 %v4251_v0  ;;  %4098 = vmatprep.subr.bf16.mxu1 %v4251_v0  ;;  %p237_p3 = scmp.lt.s32.totalorder %s3193_s22, 63  ;;  %v4254_v3 = vld [vmem:[%s5485_s3 + $0x8] sm:$0xff]   ;;  %v4256_v5 = vld [vmem:[%s5485_s3 + $0x10] sm:$0xff]  }
   0xf   : > { %3531 = vmatpush3.bf16.msra.mxu0 %v4252_v1  ;;  %4106 = vmatpush3.bf16.msra.mxu1 %v4252_v1  ;;  %v4257_v6 = vld [vmem:[%s5485_s3 + $0x58] sm:$0xff]   ;;  %v4259_v8 = vld [vmem:[%s5485_s3 + $0x60] sm:$0xff]   ;;  %v4261_v10 = vld [vmem:[%s5485_s3 + $0x68] sm:$0xff]  }
  0x10   : > { %3532 = vmatprep.subr.bf16.mxu0 %v4253_v2  ;;  %4099 = vmatprep.subr.bf16.mxu1 %v4253_v2  ;;  %s5495_s22 = smov (!%p237_p3, %s3193_s22), 63  ;;  %v4258_v7 = vld [vmem:[%s5485_s3 + $0x18] sm:$0xff]   ;;  %v4260_v9 = vld [vmem:[%s5485_s3 + $0x20] sm:$0xff]   ;;  %v4262_v13 = vld [vmem:[%s5485_s3 + $0x28] sm:$0xff]  }
  0x11   : > { %s4242_s10 = smul.u32 20, %s5495_s22  ;;  %v4263_v14 = vld [vmem:[%s5485_s3 + $0x70] sm:$0xff]   ;;  %v4265_v16 = vld [vmem:[%s5485_s3 + $0x78] sm:$0xff]   ;;  %v4273_v20 = vld [vmem:[%s5485_s3 + $0xc0] sm:$0xff]   ;;  %s3198_s21 = sshll.u32 %s5495_s22, 2 }
  0x12   : > { %v4264_v15 = vld [vmem:[%s5485_s3 + $0x30] sm:$0xff]   ;;  %v4266_v17 = vld [vmem:[%s5485_s3 + $0x38] sm:$0xff]   ;;  %v4275_v21 = vld [vmem:[%s5485_s3 + $0x100] sm:$0xff]   ;;  %s5323_s22 = scalar_lea.vmem %s5487_s5, %s3198_s21 }
  0x13   : > { %3533 = vmatpush3.bf16.msra.mxu0 %v4254_v3  ;;  %4107 = vmatpush3.bf16.msra.mxu1 %v4254_v3  ;;  %s4628_s17 = scalar_lea.vmem %s5483_s1, %s4242_s10  ;;  %v4274_v22 = vld [vmem:[%s5485_s3 + $0x80] sm:$0xff]   ;;  %v4282_v25 = vld [vmem:[%s5485_s3 + $0xc8] sm:$0xff]   ;;  %v4290_v28 = vld [vmem:[%s5485_s3 + $0xd0] sm:$0xff]   ;;  %s4813_s24 = scalar_lea.vmem %s5482_s0, %s4242_s10 }
  0x14   : > { %3534 = vmatprep.subr.bf16.mxu0 %v4255_v4  ;;  %4100 = vmatprep.subr.bf16.mxu1 %v4255_v4  ;;  %v4269_v11 = vld [vmem:[%s4628_s17 + $0x4] ss:$20 sps:$4 sm:$0xff]   ;;  %v4267_v18 = vld [vmem:[%s4628_s17] ss:$20 sps:$4 sm:$0xff]   ;;  %v4292_v26 = vld [vmem:[%s5485_s3 + $0x108] sm:$0xff]  }
  0x15   : > { %v4272_v12 = vld [vmem:[%s4628_s17 + $0x144] ss:$20 sps:$4 sm:$0xff]   ;;  %1290 = vmatprep.mubr.bf16.mxu0 %v4269_v11  ;;  %v4270_v19 = vld [vmem:[%s4628_s17 + $0x140] ss:$20 sps:$4 sm:$0xff]   ;;  %v4283_v27 = vld [vmem:[%s5485_s3 + $0x88] sm:$0xff]  }
  0x16   : > { %1354 = vmatprep.mubr.bf16.mxu1 %v4272_v12  ;;  %v4276_v23 = vld [vmem:[%s4628_s17 + $0x2c] ss:$20 sps:$4 sm:$0xff]   ;;  %v4280_v29 = vld [vmem:[%s4628_s17 + $0x28] ss:$20 sps:$4 sm:$0xff]   ;;  %v4291_v33 = vld [vmem:[%s5485_s3 + $0x90] sm:$0xff]  }
  0x17   : > { %3535 = vmatpush3.bf16.msra.mxu0 %v4256_v5  ;;  %4108 = vmatpush3.bf16.msra.mxu1 %v4256_v5  ;;  %v4278_v24 = vld [vmem:[%s4628_s17 + $0x16c] ss:$20 sps:$4 sm:$0xff]   ;;  %v4281_v30 = vld [vmem:[%s4628_s17 + $0x168] ss:$20 sps:$4 sm:$0xff]   ;;  %v4309_v35 = vld [vmem:[%s5485_s3 + $0x110] sm:$0xff]  }
  0x18   : > { %3536 = vmatprep.subr.bf16.mxu0 %v4257_v6  ;;  %4101 = vmatprep.subr.bf16.mxu1 %v4257_v6  ;;  %v4284_v31 = vld [vmem:[%s4628_s17 + $0x54] ss:$20 sps:$4 sm:$0xff]   ;;  %v4299_v34 = vld [vmem:[%s5485_s3 + $0xd8] sm:$0xff]   ;;  %v4288_v36 = vld [vmem:[%s4628_s17 + $0x50] ss:$20 sps:$4 sm:$0xff]  }
  0x19   : > { %v4286_v32 = vld [vmem:[%s4628_s17 + $0x194] ss:$20 sps:$4 sm:$0xff]   ;;  %v4289_v37 = vld [vmem:[%s4628_s17 + $0x190] ss:$20 sps:$4 sm:$0xff]   ;;  %v4300_v38 = vld [vmem:[%s5485_s3 + $0x98] sm:$0xff]  }
  0x1a   : > { %v4307_v39 = vld [vmem:[%s5485_s3 + $0xe0] sm:$0xff]   ;;  %v4293_v40 = vld [vmem:[%s4628_s17 + $0x7c] ss:$20 sps:$4 sm:$0xff]   ;;  %v4316_v43 = vld [vmem:[%s5485_s3 + $0xe8] sm:$0xff]  }
  0x1b   : > { %3537 = vmatpush3.bf16.msra.mxu0 %v4258_v7  ;;  %4109 = vmatpush3.bf16.msra.mxu1 %v4258_v7  ;;  %v4295_v41 = vld [vmem:[%s4628_s17 + $0x1bc] ss:$20 sps:$4 sm:$0xff]   ;;  %v4308_v42 = vld [vmem:[%s5485_s3 + $0xa0] sm:$0xff]   ;;  %v4317_v44 = vld [vmem:[%s5485_s3 + $0xa8] sm:$0xff]  }
  0x1c   : > { %3538 = vmatprep.subr.bf16.mxu0 %v4259_v8  ;;  %4102 = vmatprep.subr.bf16.mxu1 %v4259_v8  ;;  %v4297_v45 = vld [vmem:[%s4628_s17 + $0x78] ss:$20 sps:$4 sm:$0xff]   ;;  %v4324_v47 = vld [vmem:[%s5485_s3 + $0xf0] sm:$0xff]   ;;  %v4340_v57 = vld [vmem:[%s5484_s2 + $0x40] sm:$0xff]  }
  0x1d   : > { %v4326_v46 = vld [vmem:[%s5485_s3 + $0x118] sm:$0xff]   ;;  %v4325_v51 = vld [vmem:[%s5485_s3 + $0xb0] sm:$0xff]   ;;  %v4310_v56 = vld [vmem:[%s4628_s17 + $0xcc] ss:$20 sps:$4 sm:$0xff]  }
  0x1e   : > { %v4298_v48 = vld [vmem:[%s4628_s17 + $0x1b8] ss:$20 sps:$4 sm:$0xff]   ;;  %v4305_v53 = vld [vmem:[%s4628_s17 + $0xa0] ss:$20 sps:$4 sm:$0xff]   ;;  %v4314_v60 = vld [vmem:[%s4628_s17 + $0xc8] ss:$20 sps:$4 sm:$0xff]  }
  0x1f   : > { %3539 = vmatpush3.bf16.msra.mxu0 %v4260_v9  ;;  %4110 = vmatpush3.bf16.msra.mxu1 %v4260_v9  ;;  %v4301_v49 = vld [vmem:[%s4628_s17 + $0xa4] ss:$20 sps:$4 sm:$0xff]   ;;  %v4306_v54 = vld [vmem:[%s4628_s17 + $0x1e0] ss:$20 sps:$4 sm:$0xff]   ;;  %v4315_v61 = vld [vmem:[%s4628_s17 + $0x208] ss:$20 sps:$4 sm:$0xff]  }
  0x20   : > { %3540 = vmatprep.subr.bf16.mxu0 %v4261_v10  ;;  %4103 = vmatprep.subr.bf16.mxu1 %v4261_v10  ;;  %v4303_v50 = vld [vmem:[%s4628_s17 + $0x1e4] ss:$20 sps:$4 sm:$0xff]   ;;  %v4312_v58 = vld [vmem:[%s4628_s17 + $0x20c] ss:$20 sps:$4 sm:$0xff]   ;;  %v4318_v62 = vld [vmem:[%s4628_s17 + $0xf4] ss:$20 sps:$4 sm:$0xff]  }
  0x21   : > { %v4333_v52 = vld [vmem:[%s5485_s3 + $0xf8] sm:$0xff]   ;;  %v4342_v59 = vld [vmem:[%s5484_s2 + $0xc0] sm:$0xff]   ;;  %v4320_v63 = vld [vmem:[%s4628_s17 + $0x234] ss:$20 sps:$4 sm:$0xff]  }
  0x22   : > { %v4334_v55 = vld [vmem:[%s5485_s3 + $0xb8] sm:$0xff]   ;;  %v4322_v0 = vld [vmem:[%s4628_s17 + $0xf0] ss:$20 sps:$4 sm:$0xff]   ;;  %v4337_v6 = vld [vmem:[%s4628_s17 + $0xc] ss:$20 sps:$4 sm:$0xff]  }
  0x23   : > { %3541 = vmatpush3.bf16.msra.mxu0 %v4262_v13  ;;  %4111 = vmatpush3.bf16.msra.mxu1 %v4262_v13  ;;  %v4323_v1 = vld [vmem:[%s4628_s17 + $0x230] ss:$20 sps:$4 sm:$0xff]   ;;  %v4331_v4 = vld [vmem:[%s4628_s17 + $0x118] ss:$20 sps:$4 sm:$0xff]   ;;  %v4335_v8 = vld [vmem:[%s4628_s17 + $0x8] ss:$20 sps:$4 sm:$0xff]  }
  0x24   : > { %3542 = vmatprep.subr.bf16.mxu0 %v4263_v14  ;;  %4104 = vmatprep.subr.bf16.mxu1 %v4263_v14  ;;  %v4327_v2 = vld [vmem:[%s4628_s17 + $0x11c] ss:$20 sps:$4 sm:$0xff]   ;;  %v4332_v5 = vld [vmem:[%s4628_s17 + $0x258] ss:$20 sps:$4 sm:$0xff]   ;;  %v4341_v10 = vld [vmem:[%s5484_s2] sm:$0xff]  }
  0x25   : > { %v4329_v3 = vld [vmem:[%s4628_s17 + $0x25c] ss:$20 sps:$4 sm:$0xff]   ;;  %v4339_v9 = vld [vmem:[%s4628_s17 + $0x38] ss:$20 sps:$4 sm:$0xff]   ;;  %v4343_v11 = vld [vmem:[%s4628_s17 + $0x34] ss:$20 sps:$4 sm:$0xff]  }
  0x26   : > { %v4338_v7 = vld [vmem:[%s4628_s17 + $0x10] ss:$20 sps:$4 sm:$0xff]   ;;  %v4345_v12 = vld [vmem:[%s4628_s17 + $0x60] ss:$20 sps:$4 sm:$0xff]   ;;  %v4349_v14 = vld [vmem:[%s5484_s2 + $0xc8] sm:$0xff]  }
  0x27   : > { %3543 = vmatpush3.bf16.msra.mxu0 %v4264_v15  ;;  %4112 = vmatpush3.bf16.msra.mxu1 %v4264_v15  ;;  %v4346_v13 = vld [vmem:[%s5484_s2 + $0x80] sm:$0xff]   ;;  %v4356_v15 = vld [vmem:[%s5484_s2 + $0x48] sm:$0xff]  }
  0x28   : > { %3544 = vmatprep.subr.bf16.mxu0 %v4265_v16  ;;  %4105 = vmatprep.subr.bf16.mxu1 %v4265_v16  ;;  %v4353_v16 = vld [vmem:[%s5484_s2 + $0x88] sm:$0xff]  }
  0x2b   : > { %3545 = vmatpush3.bf16.msra.mxu0 %v4266_v17  ;;  %4113 = vmatpush3.bf16.msra.mxu1 %v4266_v17  ;;  %v4357_v17 = vld [vmem:[%s5484_s2 + $0x8] sm:$0xff]  }
  0x2c   : > { %3642 = vmatprep.subr.bf16.mxu1 %v4273_v20  ;;  %4018 = vmatprep.subr.bf16.mxu0 %v4275_v21  ;;  %v4372_v20 = vld [vmem:[%s5484_s2 + $0x50] sm:$0xff]  }
  0x2e   : > { %1291 = vmatmul.mubr.bf16.vlgmr.msra.gmra.mrb[0].mxu0 %v4267_v18  ;;  %1355 = vmatmul.mubr.bf16.vlgmr.msra.gmra.mrb[0].mxu1 %v4270_v19  ;;  %v4347_v18 = vld [vmem:[%s4628_s17 + $0x30] ss:$20 sps:$4 sm:$0xff]   ;;  %v4348_v19 = vld [vmem:[%s4628_s17 + $0x88] ss:$20 sps:$4 sm:$0xff]  }
  0x2f   : > { %3643 = vmatpush3.bf16.msra.mxu1 %v4274_v22  ;;  %1298 = vmatprep.mubr.bf16.mxu0 %v4276_v23  ;;  %v4358_v22 = vld [vmem:[%s5484_s2 + $0xd0] sm:$0xff]  }
  0x30   : > { %1362 = vmatprep.mubr.bf16.mxu1 %v4278_v24  ;;  %4019 = vmatpush3.bf16.msra.mxu0 %v4275_v21  ;;  %v4350_v21 = vld [vmem:[%s4628_s17 + $0x5c] ss:$20 sps:$4 sm:$0xff]  }
  0x31   : > { %3644 = vmatprep.subr.bf16.mxu1 %v4282_v25  ;;  %4020 = vmatprep.subr.bf16.mxu0 %v4292_v26  ;;  %v4352_v23 = vld [vmem:[%s4628_s17 + $0xb0] ss:$20 sps:$4 sm:$0xff]   ;;  %v4365_v25 = vld [vmem:[%s5484_s2 + $0xd8] sm:$0xff]  }
  0x32   : > { %v4362_v24 = vld [vmem:[%s5484_s2 + $0x90] sm:$0xff]  }
  0x33   : > { %3645 = vmatpush3.bf16.msra.mxu1 %v4283_v27  ;;  %v4388_v27 = vld [vmem:[%s5484_s2 + $0x58] sm:$0xff]  }
  0x34   : > { %3646 = vmatprep.subr.bf16.mxu1 %v4290_v28  ;;  %4021 = vmatpush3.bf16.msra.mxu0 %v4292_v26  ;;  %v4373_v26 = vld [vmem:[%s5484_s2 + $0x10] sm:$0xff]   ;;  %v4369_v28 = vld [vmem:[%s5484_s2 + $0x98] sm:$0xff]  }
  0x35   : > { %4022 = vmatprep.subr.bf16.mxu0 %v4309_v35 }
  0x36   : > { %1299 = vmatmul.mubr.bf16.gmra.mrb[4].mxu0 %v4280_v29  ;;  %1363 = vmatmul.mubr.bf16.gmra.mrb[4].mxu1 %v4281_v30  ;;  %v4354_v29 = vld [vmem:[%s4628_s17 + $0x58] ss:$20 sps:$4 sm:$0xff]  }
  0x37   : > { %1306 = vmatprep.mubr.bf16.mxu0 %v4284_v31  ;;  %1370 = vmatprep.mubr.bf16.mxu1 %v4286_v32  ;;  %v4355_v30 = vld [vmem:[%s4628_s17 + $0xd8] ss:$20 sps:$4 sm:$0xff]  }
  0x38   : > { %3647 = vmatpush3.bf16.msra.mxu1 %v4291_v33  ;;  %4023 = vmatpush3.bf16.msra.mxu0 %v4309_v35  ;;  %v4389_v31 = vld [vmem:[%s5484_s2 + $0x18] sm:$0xff]   ;;  %v4374_v33 = vld [vmem:[%s5484_s2 + $0xe0] sm:$0xff]  }
  0x39   : > { %3648 = vmatprep.subr.bf16.mxu1 %v4299_v34  ;;  %4024 = vmatprep.subr.bf16.mxu0 %v4326_v46  ;;  %v4359_v32 = vld [vmem:[%s4628_s17 + $0x84] ss:$20 sps:$4 sm:$0xff]   ;;  %v4361_v34 = vld [vmem:[%s4628_s17 + $0x100] ss:$20 sps:$4 sm:$0xff]  }
  0x3a   : > { %v4378_v35 = vld [vmem:[%s5484_s2 + $0xa0] sm:$0xff]  }
  0x3c   : > { %3649 = vmatpush3.bf16.msra.mxu1 %v4300_v38  ;;  %4025 = vmatpush3.bf16.msra.mxu0 %v4326_v46  ;;  %v4381_v38 = vld [vmem:[%s5484_s2 + $0xe8] sm:$0xff]  }
  0x3d   : > { %3650 = vmatprep.subr.bf16.mxu1 %v4307_v39  ;;  %3886 = vmatprep.subr.bf16.mxu0 %v4342_v59  ;;  %v4363_v39 = vld [vmem:[%s4628_s17 + $0x80] ss:$20 sps:$4 sm:$0xff]   ;;  %v4419_v46 = vld [vmem:[%s5484_s2 + $0x68] sm:$0xff]   ;;  %v4382_v59 = vld [vmem:[%s4628_s17 + $0xfc] ss:$20 sps:$4 sm:$0xff]  }
  0x3e   : > { %1307 = vmatmul.mubr.bf16.gmra.mrb[8].mxu0 %v4288_v36  ;;  %1371 = vmatmul.mubr.bf16.gmra.mrb[8].mxu1 %v4289_v37  ;;  %v4405_v36 = vld [vmem:[%s5484_s2 + $0x60] sm:$0xff]  }
  0x3f   : > { %1314 = vmatprep.mubr.bf16.mxu0 %v4293_v40  ;;  %1378 = vmatprep.mubr.bf16.mxu1 %v4295_v41  ;;  %v4406_v37 = vld [vmem:[%s5484_s2 + $0x20] sm:$0xff]   ;;  %v4364_v40 = vld [vmem:[%s4628_s17 + $0x128] ss:$20 sps:$4 sm:$0xff]  }
  0x40   : > { %3651 = vmatpush3.bf16.msra.mxu1 %v4308_v42  ;;  %v4385_v41 = vld [vmem:[%s5484_s2 + $0xa8] sm:$0xff]   ;;  %v4390_v42 = vld [vmem:[%s5484_s2 + $0xf0] sm:$0xff]  }
  0x41   : > { %3652 = vmatprep.subr.bf16.mxu1 %v4316_v43  ;;  %v4366_v43 = vld [vmem:[%s4628_s17 + $0xac] ss:$20 sps:$4 sm:$0xff]  }
  0x44   : > { %3653 = vmatpush3.bf16.msra.mxu1 %v4317_v44  ;;  %v4368_v44 = vld [vmem:[%s4628_s17 + $0x150] ss:$20 sps:$4 sm:$0xff]  }
  0x45   : > { %3654 = vmatprep.subr.bf16.mxu1 %v4324_v47  ;;  %v4421_v47 = vld [vmem:[%s5484_s2 + $0x28] sm:$0xff]  }
  0x46   : > { %1315 = vmatmul.mubr.bf16.gmra.mrb[12].mxu0 %v4297_v45  ;;  %1379 = vmatmul.mubr.bf16.gmra.mrb[12].mxu1 %v4298_v48  ;;  %v4394_v45 = vld [vmem:[%s5484_s2 + $0xb0] sm:$0xff]   ;;  %v4397_v48 = vld [vmem:[%s5484_s2 + $0xf8] sm:$0xff]  }
  0x47   : > { %1322 = vmatprep.mubr.bf16.mxu0 %v4301_v49  ;;  %1386 = vmatprep.mubr.bf16.mxu1 %v4303_v50  ;;  %v4370_v49 = vld [vmem:[%s4628_s17 + $0xa8] ss:$20 sps:$4 sm:$0xff]   ;;  %v4371_v50 = vld [vmem:[%s4628_s17 + $0x178] ss:$20 sps:$4 sm:$0xff]  }
  0x48   : > { %3655 = vmatpush3.bf16.msra.mxu1 %v4325_v51  ;;  %v4398_v51 = vld [vmem:[%s5484_s2 + $0xb8] sm:$0xff]  }
  0x49   : > { %3656 = vmatprep.subr.bf16.mxu1 %v4333_v52  ;;  %v4375_v52 = vld [vmem:[%s4628_s17 + $0xd4] ss:$20 sps:$4 sm:$0xff]  }
  0x4c   : > { %3657 = vmatpush3.bf16.msra.mxu1 %v4334_v55  ;;  %v4377_v55 = vld [vmem:[%s4628_s17 + $0x1a0] ss:$20 sps:$4 sm:$0xff]  }
  0x4d   : > { %3774 = vmatprep.subr.bf16.mxu1 %v4340_v57  ;;  %v4379_v57 = vld [vmem:[%s4628_s17 + $0xd0] ss:$20 sps:$4 sm:$0xff]  }
  0x4e   : > { %1323 = vmatmul.mubr.bf16.gmra.mrb[16].mxu0 %v4305_v53  ;;  %1387 = vmatmul.mubr.bf16.gmra.mrb[16].mxu1 %v4306_v54  ;;  %v4407_v53 = vld [vmem:[%s5484_s2 + $0x100] sm:$0xff]   ;;  %v4433_v54 = vld [vmem:[%s5484_s2 + $0x70] sm:$0xff]  }
  0x4f   : > { %1330 = vmatprep.mubr.bf16.mxu0 %v4310_v56  ;;  %1394 = vmatprep.mubr.bf16.mxu1 %v4312_v58  ;;  %v4435_v56 = vld [vmem:[%s5484_s2 + $0x30] sm:$0xff]   ;;  %v4380_v58 = vld [vmem:[%s4628_s17 + $0x1c8] ss:$20 sps:$4 sm:$0xff]  }
  0x56   : > { %1331 = vmatmul.mubr.bf16.gmra.mrb[20].mxu0 %v4314_v60  ;;  %1395 = vmatmul.mubr.bf16.gmra.mrb[20].mxu1 %v4315_v61  ;;  %v4384_v60 = vld [vmem:[%s4628_s17 + $0x1f0] ss:$20 sps:$4 sm:$0xff]   ;;  %v4448_v61 = vld [vmem:[%s5484_s2 + $0x78] sm:$0xff]  }
  0x57   : > { %1338 = vmatprep.mubr.bf16.mxu0 %v4318_v62  ;;  %1402 = vmatprep.mubr.bf16.mxu1 %v4320_v63  ;;  %v4450_v62 = vld [vmem:[%s5484_s2 + $0x38] sm:$0xff]  }
  0x58   : > { %v4386_v63 = vld [vmem:[%s4628_s17 + $0xf8] ss:$20 sps:$4 sm:$0xff]  }
  0x5e   : > { %1339 = vmatmul.mubr.bf16.gmra.mrb[24].mxu0 %v4322_v0  ;;  %1403 = vmatmul.mubr.bf16.gmra.mrb[24].mxu1 %v4323_v1  ;;  %v4387_v0 = vld [vmem:[%s4628_s17 + $0x218] ss:$20 sps:$4 sm:$0xff]  }
  0x5f   : > { %1346 = vmatprep.mubr.bf16.mxu0 %v4327_v2  ;;  %1410 = vmatprep.mubr.bf16.mxu1 %v4329_v3  ;;  %v4391_v1 = vld [vmem:[%s4628_s17 + $0x124] ss:$20 sps:$4 sm:$0xff]   ;;  %v4393_v2 = vld [vmem:[%s4628_s17 + $0x240] ss:$20 sps:$4 sm:$0xff]  }
  0x60   : > { %v4395_v3 = vld [vmem:[%s4628_s17 + $0x120] ss:$20 sps:$4 sm:$0xff]  }
  0x66   : > { %1347 = vmatmul.mubr.bf16.gmra.mrb[28].mxu0 %v4331_v4  ;;  %1411 = vmatmul.mubr.bf16.gmra.mrb[28].mxu1 %v4332_v5  ;;  %v4396_v4 = vld [vmem:[%s4628_s17 + $0x268] ss:$20 sps:$4 sm:$0xff]   ;;  %v4399_v5 = vld [vmem:[%s4628_s17 + $0x14c] ss:$20 sps:$4 sm:$0xff]  }
  0x67   : > { %1451 = vmatprep.mubr.bf16.mxu1 %v4337_v6  ;;  %4026 = vmatprep.mubr.msk.bf16.mxu0 %vm1209_vm0, %v4338_v7  ;;  %v4403_v6 = vld [vmem:[%s4813_s24 + $0xc] ss:$20 sps:$4 sm:$0xff]   ;;  %v4401_v7 = vld [vmem:[%s4813_s24 + $0x8] ss:$20 sps:$4 sm:$0xff]  }
  0x6e   : > { %1452 = vmatmul.mubr.bf16.vlgmr.msra.gmra.mrb[32].mxu1 %v4335_v8  ;;  %4027 = vmatmul.mubr.msk.bf16.vlgmr.msra.gmra.mrb[32].mxu0 %vm1209_vm0, %v4339_v9  ;;  %v4404_v8 = vld [vmem:[%s4628_s17 + $0x148] ss:$20 sps:$4 sm:$0xff]  }
  0x6f   : > { %3775 = vmatpush3.bf16.msra.mxu1 %v4341_v10  ;;  %1459 = vmatprep.mubr.bf16.mxu1 %v4343_v11  ;;  %v4408_v9 = vld [vmem:[%s4628_s17 + $0x174] ss:$20 sps:$4 sm:$0xff]  }
  0x70   : > { %4030 = vmatprep.mubr.msk.bf16.mxu0 %vm1209_vm0, %v4345_v12  ;;  %3887 = vmatpush3.bf16.msra.mxu0 %v4346_v13  ;;  %v4410_v10 = vld [vmem:[%s4813_s24 + $0x34] ss:$20 sps:$4 sm:$0xff]   ;;  %v4412_v12 = vld [vmem:[%s4628_s17 + $0x170] ss:$20 sps:$4 sm:$0xff]  }
  0x71   : > { %3888 = vmatprep.subr.bf16.mxu0 %v4349_v14  ;;  %3776 = vmatprep.subr.bf16.mxu1 %v4356_v15  ;;  %v4436_v11 = vld [vmem:[%s5484_s2 + $0x108] sm:$0xff]   ;;  %v4413_v13 = vld [vmem:[%s4813_s24 + $0x30] ss:$20 sps:$4 sm:$0xff]  }
  0x72   : > { %v4463_v14 = vld [vmem:[%s5484_s2 + $0x110] sm:$0xff]  }
  0x73   : > { %3777 = vmatpush3.bf16.msra.mxu1 %v4357_v17  ;;  %v4414_v15 = vld [vmem:[%s4628_s17 + $0x19c] ss:$20 sps:$4 sm:$0xff]  }
  0x74   : > { %3889 = vmatpush3.bf16.msra.mxu0 %v4353_v16  ;;  %3778 = vmatprep.subr.bf16.mxu1 %v4372_v20  ;;  %v4416_v16 = vld [vmem:[%s4813_s24 + $0x5c] ss:$20 sps:$4 sm:$0xff]   ;;  %v4422_v20 = vld [vmem:[%s4628_s17 + $0x1c4] ss:$20 sps:$4 sm:$0xff]  }
  0x75   : > { %3890 = vmatprep.subr.bf16.mxu0 %v4358_v22  ;;  %v4488_v17 = vld [vmem:[%s5484_s2 + $0x118] sm:$0xff]   ;;  %v4426_v22 = vld [vmem:[%s4628_s17 + $0x1c0] ss:$20 sps:$4 sm:$0xff]  }
  0x76   : > { %1460 = vmatmul.mubr.bf16.gmra.mrb[36].mxu1 %v4347_v18  ;;  %4031 = vmatmul.mubr.msk.bf16.gmra.mrb[36].mxu0 %vm1209_vm0, %v4348_v19  ;;  %v4418_v18 = vld [vmem:[%s4628_s17 + $0x198] ss:$20 sps:$4 sm:$0xff]  }
  0x77   : > { %1467 = vmatprep.mubr.bf16.mxu1 %v4350_v21  ;;  %4034 = vmatprep.mubr.msk.bf16.mxu0 %vm1209_vm0, %v4352_v23  ;;  %v4420_v19 = vld [vmem:[%s4813_s24 + $0x58] ss:$20 sps:$4 sm:$0xff]   ;;  %v4427_v23 = vld [vmem:[%s4813_s24 + $0x80] ss:$20 sps:$4 sm:$0xff]  }
  0x78   : > { %3891 = vmatpush3.bf16.msra.mxu0 %v4362_v24  ;;  %3779 = vmatpush3.bf16.msra.mxu1 %v4373_v26  ;;  %v4424_v21 = vld [vmem:[%s4813_s24 + $0x84] ss:$20 sps:$4 sm:$0xff]   ;;  %v4428_v24 = vld [vmem:[%s4628_s17 + $0x1ec] ss:$20 sps:$4 sm:$0xff]   ;;  %v4432_v26 = vld [vmem:[%s4628_s17 + $0x1e8] ss:$20 sps:$4 sm:$0xff]  }
  0x79   : > { %3892 = vmatprep.subr.bf16.mxu0 %v4365_v25  ;;  %3780 = vmatprep.subr.bf16.mxu1 %v4388_v27  ;;  %v4430_v25 = vld [vmem:[%s4813_s24 + $0xac] ss:$20 sps:$4 sm:$0xff]   ;;  %v4434_v27 = vld [vmem:[%s4813_s24 + $0xa8] ss:$20 sps:$4 sm:$0xff]  }
  0x7c   : > { %3893 = vmatpush3.bf16.msra.mxu0 %v4369_v28  ;;  %3781 = vmatpush3.bf16.msra.mxu1 %v4389_v31  ;;  %v4437_v28 = vld [vmem:[%s4628_s17 + $0x214] ss:$20 sps:$4 sm:$0xff]   ;;  %v4442_v31 = vld [vmem:[%s4813_s24 + $0xd0] ss:$20 sps:$4 sm:$0xff]  }
  0x7d   : > { %3894 = vmatprep.subr.bf16.mxu0 %v4374_v33  ;;  %3782 = vmatprep.subr.bf16.mxu1 %v4405_v36  ;;  %v4445_v33 = vld [vmem:[%s4813_s24 + $0xfc] ss:$20 sps:$4 sm:$0xff]   ;;  %v4451_v36 = vld [vmem:[%s4628_s17 + $0x264] ss:$20 sps:$4 sm:$0xff]  }
  0x7e   : > { %1468 = vmatmul.mubr.bf16.gmra.mrb[40].mxu1 %v4354_v29  ;;  %4035 = vmatmul.mubr.msk.bf16.gmra.mrb[40].mxu0 %vm1209_vm0, %v4355_v30  ;;  %v4439_v29 = vld [vmem:[%s4813_s24 + $0xd4] ss:$20 sps:$4 sm:$0xff]   ;;  %v4441_v30 = vld [vmem:[%s4628_s17 + $0x210] ss:$20 sps:$4 sm:$0xff]  }
  0x7f   : > { %1475 = vmatprep.mubr.bf16.mxu1 %v4359_v32  ;;  %4038 = vmatprep.mubr.msk.bf16.mxu0 %vm1209_vm0, %v4361_v34  ;;  %v4443_v32 = vld [vmem:[%s4628_s17 + $0x23c] ss:$20 sps:$4 sm:$0xff]   ;;  %v4447_v34 = vld [vmem:[%s4628_s17 + $0x238] ss:$20 sps:$4 sm:$0xff]  }
  0x80   : > { %3895 = vmatpush3.bf16.msra.mxu0 %v4378_v35  ;;  %3783 = vmatpush3.bf16.msra.mxu1 %v4406_v37  ;;  %v4449_v35 = vld [vmem:[%s4813_s24 + $0xf8] ss:$20 sps:$4 sm:$0xff]  }
  0x81   : > { %3896 = vmatprep.subr.bf16.mxu0 %v4381_v38  ;;  %3784 = vmatprep.subr.bf16.mxu1 %v4419_v46  ;;  %v4453_v37 = vld [vmem:[%s4813_s24 + $0x124] ss:$20 sps:$4 sm:$0xff]   ;;  %v4455_v38 = vld [vmem:[%s4628_s17 + $0x260] ss:$20 sps:$4 sm:$0xff]   ;;  %v4468_v46 = vld [vmem:[%s4813_s24 + $0x28] ss:$20 sps:$4 sm:$0xff]  }
  0x84   : > { %3897 = vmatpush3.bf16.msra.mxu0 %v4385_v41  ;;  %3785 = vmatpush3.bf16.msra.mxu1 %v4421_v47  ;;  %v4460_v41 = vld [vmem:[%s4813_s24 + $0x14c] ss:$20 sps:$4 sm:$0xff]   ;;  %v4469_v47 = vld [vmem:[%s4813_s24 + $0x170] ss:$20 sps:$4 sm:$0xff]  }
  0x85   : > { %3898 = vmatprep.subr.bf16.mxu0 %v4390_v42  ;;  %3786 = vmatprep.subr.bf16.mxu1 %v4433_v54  ;;  %v4457_v42 = vld [vmem:[%s4813_s24] ss:$20 sps:$4 sm:$0xff]  }
  0x86   : > { %1476 = vmatmul.mubr.bf16.gmra.mrb[44].mxu1 %v4363_v39  ;;  %4039 = vmatmul.mubr.msk.bf16.gmra.mrb[44].mxu0 %vm1209_vm0, %v4364_v40  ;;  %v4456_v39 = vld [vmem:[%s4813_s24 + $0x120] ss:$20 sps:$4 sm:$0xff]   ;;  %v4459_v40 = vld [vmem:[%s4813_s24 + $0x4] ss:$20 sps:$4 sm:$0xff]  }
  0x87   : > { %1483 = vmatprep.mubr.bf16.mxu1 %v4366_v43  ;;  %4042 = vmatprep.mubr.msk.bf16.mxu0 %vm1209_vm0, %v4368_v44  ;;  %v4462_v43 = vld [vmem:[%s4813_s24 + $0x148] ss:$20 sps:$4 sm:$0xff]   ;;  %v4464_v44 = vld [vmem:[%s4813_s24 + $0x2c] ss:$20 sps:$4 sm:$0xff]  }
  0x88   : > { %3899 = vmatpush3.bf16.msra.mxu0 %v4394_v45  ;;  %3787 = vmatpush3.bf16.msra.mxu1 %v4435_v56  ;;  %v4466_v45 = vld [vmem:[%s4813_s24 + $0x174] ss:$20 sps:$4 sm:$0xff]  }
  0x89   : > { %3900 = vmatprep.subr.bf16.mxu0 %v4397_v48  ;;  %3788 = vmatprep.subr.bf16.mxu1 %v4448_v61  ;;  %v4470_v48 = vld [vmem:[%s4813_s24 + $0x54] ss:$20 sps:$4 sm:$0xff]  }
  0x8c   : > { %3901 = vmatpush3.bf16.msra.mxu0 %v4398_v51  ;;  %3789 = vmatpush3.bf16.msra.mxu1 %v4450_v62  ;;  %v4475_v51 = vld [vmem:[%s4813_s24 + $0x198] ss:$20 sps:$4 sm:$0xff]  }
  0x8d   : > { %4058 = vmatprep.subr.bf16.mxu0 %v4407_v53 }
  0x8e   : > { %1484 = vmatmul.mubr.bf16.gmra.mrb[48].mxu1 %v4370_v49  ;;  %4043 = vmatmul.mubr.msk.bf16.gmra.mrb[48].mxu0 %vm1209_vm0, %v4371_v50  ;;  %v4472_v49 = vld [vmem:[%s4813_s24 + $0x19c] ss:$20 sps:$4 sm:$0xff]  }
  0x8f   : > { %1491 = vmatprep.mubr.bf16.mxu1 %v4375_v52  ;;  %4046 = vmatprep.mubr.msk.bf16.mxu0 %vm1209_vm0, %v4377_v55  ;;  %v4474_v50 = vld [vmem:[%s4813_s24 + $0x50] ss:$20 sps:$4 sm:$0xff]  }
  0x90   : > { %v4476_v52 = vld [vmem:[%s4813_s24 + $0x7c] ss:$20 sps:$4 sm:$0xff]  }
  0x96   : > { %1492 = vmatmul.mubr.bf16.gmra.mrb[52].mxu1 %v4379_v57  ;;  %4047 = vmatmul.mubr.msk.bf16.gmra.mrb[52].mxu0 %vm1209_vm0, %v4380_v58  ;;  %v4480_v58 = vld [vmem:[%s4813_s24 + $0x78] ss:$20 sps:$4 sm:$0xff]  }
  0x97   : > { %1499 = vmatprep.mubr.bf16.mxu1 %v4382_v59  ;;  %4050 = vmatprep.mubr.msk.bf16.mxu0 %vm1209_vm0, %v4384_v60  ;;  %v4481_v59 = vld [vmem:[%s4813_s24 + $0x1c0] ss:$20 sps:$4 sm:$0xff]  }
  0x9e   : > { %1500 = vmatmul.mubr.bf16.gmra.mrb[56].mxu1 %v4386_v63  ;;  %4051 = vmatmul.mubr.msk.bf16.gmra.mrb[56].mxu0 %vm1209_vm0, %v4387_v0  ;;  %v4482_v0 = vld [vmem:[%s4813_s24 + $0xa4] ss:$20 sps:$4 sm:$0xff]  }
  0x9f   : > { %1507 = vmatprep.mubr.bf16.mxu1 %v4391_v1  ;;  %4054 = vmatprep.mubr.msk.bf16.mxu0 %vm1209_vm0, %v4393_v2  ;;  %v4484_v1 = vld [vmem:[%s4813_s24 + $0x1ec] ss:$20 sps:$4 sm:$0xff]  }
  0xa6   : > { %1508 = vmatmul.mubr.bf16.gmra.mrb[60].mxu1 %v4395_v3  ;;  %4055 = vmatmul.mubr.msk.bf16.gmra.mrb[60].mxu0 %vm1209_vm0, %v4396_v4 }
  0xa7   : > { %1515 = vmatprep.mubr.bf16.mxu1 %v4399_v5  ;;  %2598 = vmatprep.mubr.bf16.mxu0 %v4403_v6 }
  0xae   : > { %1516 = vmatmul.mubr.bf16.gmra.mrb[64].mxu1 %v4404_v8  ;;  %2599 = vmatmul.mubr.bf16.vlgmr.msra.gmra.mrb[64].mxu0 %v4401_v7 }
  0xaf   : > { %1523 = vmatprep.mubr.bf16.mxu1 %v4408_v9  ;;  %2606 = vmatprep.mubr.bf16.mxu0 %v4410_v10  ;;  %v4486_v10 = vld [vmem:[%s4813_s24 + $0xa0] ss:$20 sps:$4 sm:$0xff]  }
  0xb0   : > { %4059 = vmatpush3.bf16.msra.mxu0 %v4407_v53  ;;  %v4478_v53 = vld [vmem:[%s4813_s24 + $0x1c4] ss:$20 sps:$4 sm:$0xff]  }
  0xb1   : > { %4060 = vmatprep.subr.bf16.mxu0 %v4436_v11 }
  0xb4   : > { %4061 = vmatpush3.bf16.msra.mxu0 %v4436_v11  ;;  %v4487_v11 = vld [vmem:[%s4813_s24 + $0x1e8] ss:$20 sps:$4 sm:$0xff]  }
  0xb5   : > { %4062 = vmatprep.subr.bf16.mxu0 %v4463_v14 }
  0xb6   : > { %1524 = vmatmul.mubr.bf16.gmra.mrb[68].mxu1 %v4412_v12  ;;  %2607 = vmatmul.mubr.bf16.gmra.mrb[68].mxu0 %v4413_v13 }
  0xb7   : > { %1531 = vmatprep.mubr.bf16.mxu1 %v4414_v15  ;;  %2614 = vmatprep.mubr.bf16.mxu0 %v4416_v16  ;;  %v4489_v16 = vld [vmem:[%s4813_s24 + $0xcc] ss:$20 sps:$4 sm:$0xff]  }
  0xb8   : > { %4063 = vmatpush3.bf16.msra.mxu0 %v4463_v14 }
  0xb9   : > { %4064 = vmatprep.subr.bf16.mxu0 %v4488_v17 }
  0xbc   : > { %4065 = vmatpush3.bf16.msra.mxu0 %v4488_v17  ;;  %v4491_v17 = vld [vmem:[%s4813_s24 + $0x214] ss:$20 sps:$4 sm:$0xff]  }
  0xbe   : > { %1532 = vmatmul.mubr.bf16.gmra.mrb[72].mxu1 %v4418_v18  ;;  %2615 = vmatmul.mubr.bf16.gmra.mrb[72].mxu0 %v4420_v19 }
  0xbf   : > { %1539 = vmatprep.mubr.bf16.mxu1 %v4422_v20  ;;  %2622 = vmatprep.mubr.bf16.mxu0 %v4424_v21 }
  0xc6   : > { %1540 = vmatmul.mubr.bf16.gmra.mrb[76].mxu1 %v4426_v22  ;;  %2623 = vmatmul.mubr.bf16.gmra.mrb[76].mxu0 %v4427_v23 }
  0xc7   : > { %1547 = vmatprep.mubr.bf16.mxu1 %v4428_v24  ;;  %2630 = vmatprep.mubr.bf16.mxu0 %v4430_v25 }
  0xce   : > { %1548 = vmatmul.mubr.bf16.gmra.mrb[80].mxu1 %v4432_v26  ;;  %2631 = vmatmul.mubr.bf16.gmra.mrb[80].mxu0 %v4434_v27  ;;  %v4493_v26 = vld [vmem:[%s4813_s24 + $0xc8] ss:$20 sps:$4 sm:$0xff]   ;;  %v4494_v27 = vld [vmem:[%s4813_s24 + $0x210] ss:$20 sps:$4 sm:$0xff]  }
  0xcf   : > { %1555 = vmatprep.mubr.bf16.mxu1 %v4437_v28  ;;  %2638 = vmatprep.mubr.bf16.mxu0 %v4439_v29 }
  0xd6   : > { %1556 = vmatmul.mubr.bf16.gmra.mrb[84].mxu1 %v4441_v30  ;;  %2639 = vmatmul.mubr.bf16.gmra.mrb[84].mxu0 %v4442_v31 }
  0xd7   : > { %1563 = vmatprep.mubr.bf16.mxu1 %v4443_v32  ;;  %2646 = vmatprep.mubr.bf16.mxu0 %v4445_v33  ;;  %v4495_v32 = vld [vmem:[%s4813_s24 + $0xf4] ss:$20 sps:$4 sm:$0xff]   ;;  %v4497_v33 = vld [vmem:[%s4813_s24 + $0x23c] ss:$20 sps:$4 sm:$0xff]  }
  0xde   : > { %1564 = vmatmul.mubr.bf16.gmra.mrb[88].mxu1 %v4447_v34  ;;  %2647 = vmatmul.mubr.bf16.gmra.mrb[88].mxu0 %v4449_v35 }
  0xdf   : > { %1571 = vmatprep.mubr.bf16.mxu1 %v4451_v36  ;;  %2654 = vmatprep.mubr.bf16.mxu0 %v4453_v37 }
  0xe6   : > { %1572 = vmatmul.mubr.bf16.gmra.mrb[92].mxu1 %v4455_v38  ;;  %2655 = vmatmul.mubr.bf16.gmra.mrb[92].mxu0 %v4456_v39 }
  0xe7   : > { %2437 = vmatprep.mubr.bf16.mxu1 %v4459_v40  ;;  %2662 = vmatprep.mubr.bf16.mxu0 %v4460_v41 }
  0xee   : > { %2438 = vmatmul.mubr.bf16.vlgmr.msra.gmra.mrb[96].mxu1 %v4457_v42  ;;  %2663 = vmatmul.mubr.bf16.gmra.mrb[96].mxu0 %v4462_v43  ;;  %v4499_v42 = vld [vmem:[%s4813_s24 + $0xf0] ss:$20 sps:$4 sm:$0xff]   ;;  %v4500_v43 = vld [vmem:[%s4813_s24 + $0x238] ss:$20 sps:$4 sm:$0xff]  }
  0xef   : > { %2445 = vmatprep.mubr.bf16.mxu1 %v4464_v44  ;;  %2670 = vmatprep.mubr.bf16.mxu0 %v4466_v45 }
  0xf6   : > { %2446 = vmatmul.mubr.bf16.gmra.mrb[100].mxu1 %v4468_v46  ;;  %2671 = vmatmul.mubr.bf16.gmra.mrb[100].mxu0 %v4469_v47 }
  0xf7   : > { %2453 = vmatprep.mubr.bf16.mxu1 %v4470_v48  ;;  %2678 = vmatprep.mubr.bf16.mxu0 %v4472_v49  ;;  %v4501_v48 = vld [vmem:[%s4813_s24 + $0x11c] ss:$20 sps:$4 sm:$0xff]   ;;  %v4503_v49 = vld [vmem:[%s4813_s24 + $0x264] ss:$20 sps:$4 sm:$0xff]  }
  0xfe   : > { %2454 = vmatmul.mubr.bf16.gmra.mrb[104].mxu1 %v4474_v50  ;;  %2679 = vmatmul.mubr.bf16.gmra.mrb[104].mxu0 %v4475_v51 }
  0xff   : > { %2461 = vmatprep.mubr.bf16.mxu1 %v4476_v52  ;;  %2686 = vmatprep.mubr.bf16.mxu0 %v4478_v53 }
 0x101   : > { %v3594_v54 = vpop.f32.mrb[0].mxu1  ;;  %v3546_v55 = vpop.f32.mrb[0].mxu0 }
 0x102   : > { %v3595_v56 = vpop.f32.mrb[1].mxu1  ;;  %v3547_v57 = vpop.f32.mrb[1].mxu0 }
 0x103   : > { %v4954_v60 = vadd.f32 %v3595_v56, %v3594_v54  ;;  %v3597_v61 = vpop.f32.mrb[2].mxu1  ;;  %v4956_v62 = vadd.f32 %v3547_v57, %v3546_v55  ;;  %v3549_v63 = vpop.f32.mrb[2].mxu0 }
 0x104   : > { %v3598_v2 = vpop.f32.mrb[3].mxu1  ;;  %v3550_v3 = vpop.f32.mrb[3].mxu0 }
 0x105   : > { %v4960_v4 = vadd.f32 %v3598_v2, %v3597_v61  ;;  %v4962_v5 = vadd.f32 %v3550_v3, %v3549_v63  ;;  %v4507_v2 = vld [vmem:[%s4813_s24 + $0x144] ss:$20 sps:$4 sm:$0xff]  }
 0x106   : > { %2462 = vmatmul.mubr.bf16.gmra.mrb[108].mxu1 %v4480_v58  ;;  %2687 = vmatmul.mubr.bf16.gmra.mrb[108].mxu0 %v4481_v59  ;;  %v4505_v58 = vld [vmem:[%s4813_s24 + $0x118] ss:$20 sps:$4 sm:$0xff]   ;;  %v4506_v59 = vld [vmem:[%s4813_s24 + $0x260] ss:$20 sps:$4 sm:$0xff]   ;;  %v4509_v3 = vld [vmem:[%s4813_s24 + $0x10] ss:$20 sps:$4 sm:$0xff]  }
 0x107   : > { %2469 = vmatprep.mubr.bf16.mxu1 %v4482_v0  ;;  %2694 = vmatprep.mubr.bf16.mxu0 %v4484_v1 }
 0x109   : > { %v3600_v6 = vpop.f32.mrb[4].mxu1  ;;  %v3552_v7 = vpop.f32.mrb[4].mxu0 }
 0x10a   : > { %v3601_v8 = vpop.f32.mrb[5].mxu1  ;;  %v3553_v9 = vpop.f32.mrb[5].mxu0 }
 0x10b   : > { %v4966_v12 = vadd.f32 %v3601_v8, %v3600_v6  ;;  %v3603_v13 = vpop.f32.mrb[6].mxu1  ;;  %v4968_v14 = vadd.f32 %v3553_v9, %v3552_v7  ;;  %v3555_v15 = vpop.f32.mrb[6].mxu0 }
 0x10c   : > { %v3604_v18 = vpop.f32.mrb[7].mxu1  ;;  %v3556_v19 = vpop.f32.mrb[7].mxu0 }
 0x10d   : > { %v4972_v20 = vadd.f32 %v3604_v18, %v3603_v13  ;;  %v4974_v21 = vadd.f32 %v3556_v19, %v3555_v15 }
 0x10e   : > { %2470 = vmatmul.mubr.bf16.gmra.mrb[112].mxu1 %v4486_v10  ;;  %2695 = vmatmul.mubr.bf16.gmra.mrb[112].mxu0 %v4487_v11 }
 0x10f   : > { %2477 = vmatprep.mubr.bf16.mxu1 %v4489_v16  ;;  %2702 = vmatprep.mubr.bf16.mxu0 %v4491_v17  ;;  %v4510_v16 = vld [vmem:[%s4813_s24 + $0x140] ss:$20 sps:$4 sm:$0xff]   ;;  %v4511_v17 = vld [vmem:[%s4813_s24 + $0x38] ss:$20 sps:$4 sm:$0xff]  }
 0x111   : > { %v3606_v22 = vpop.f32.mrb[8].mxu1  ;;  %v3558_v23 = vpop.f32.mrb[8].mxu0 }
 0x112   : > { %v3607_v24 = vpop.f32.mrb[9].mxu1  ;;  %v3559_v25 = vpop.f32.mrb[9].mxu0 }
 0x113   : > { %v4978_v28 = vadd.f32 %v3607_v24, %v3606_v22  ;;  %v3609_v29 = vpop.f32.mrb[10].mxu1  ;;  %v4980_v30 = vadd.f32 %v3559_v25, %v3558_v23  ;;  %v3561_v31 = vpop.f32.mrb[10].mxu0  ;;  %v4512_v24 = vld [vmem:[%s4813_s24 + $0x16c] ss:$20 sps:$4 sm:$0xff]  }
 0x114   : > { %v3610_v34 = vpop.f32.mrb[11].mxu1  ;;  %v3562_v35 = vpop.f32.mrb[11].mxu0  ;;  %v4514_v25 = vld [vmem:[%s4813_s24 + $0x60] ss:$20 sps:$4 sm:$0xff]  }
 0x115   : > { %v4984_v36 = vadd.f32 %v3610_v34, %v3609_v29  ;;  %v4986_v37 = vadd.f32 %v3562_v35, %v3561_v31 }
 0x116   : > { %2478 = vmatmul.mubr.bf16.gmra.mrb[116].mxu1 %v4493_v26  ;;  %2703 = vmatmul.mubr.bf16.gmra.mrb[116].mxu0 %v4494_v27 }
 0x117   : > { %2485 = vmatprep.mubr.bf16.mxu1 %v4495_v32  ;;  %2710 = vmatprep.mubr.bf16.mxu0 %v4497_v33 }
 0x119   : > { %v3612_v38 = vpop.f32.mrb[12].mxu1  ;;  %v3564_v39 = vpop.f32.mrb[12].mxu0 }
 0x11a   : > { %v3613_v40 = vpop.f32.mrb[13].mxu1  ;;  %v3565_v41 = vpop.f32.mrb[13].mxu0 }
 0x11b   : > { %v4990_v44 = vadd.f32 %v3613_v40, %v3612_v38  ;;  %v3615_v45 = vpop.f32.mrb[14].mxu1  ;;  %v4992_v46 = vadd.f32 %v3565_v41, %v3564_v39  ;;  %v3567_v47 = vpop.f32.mrb[14].mxu0  ;;  %v4515_v38 = vld [vmem:[%s4813_s24 + $0x168] ss:$20 sps:$4 sm:$0xff]  }
 0x11c   : > { %v3616_v50 = vpop.f32.mrb[15].mxu1  ;;  %v3568_v51 = vpop.f32.mrb[15].mxu0  ;;  %v4516_v39 = vld [vmem:[%s4813_s24 + $0x88] ss:$20 sps:$4 sm:$0xff]  }
 0x11d   : > { %v4996_v52 = vadd.f32 %v3616_v50, %v3615_v45  ;;  %v4998_v53 = vadd.f32 %v3568_v51, %v3567_v47  ;;  %v4517_v45 = vld [vmem:[%s4813_s24 + $0x194] ss:$20 sps:$4 sm:$0xff]   ;;  %v4519_v47 = vld [vmem:[%s4813_s24 + $0xb0] ss:$20 sps:$4 sm:$0xff]  }
 0x11e   : > { %2486 = vmatmul.mubr.bf16.gmra.mrb[120].mxu1 %v4499_v42  ;;  %2711 = vmatmul.mubr.bf16.gmra.mrb[120].mxu0 %v4500_v43 }
 0x11f   : > { %2493 = vmatprep.mubr.bf16.mxu1 %v4501_v48  ;;  %2718 = vmatprep.mubr.bf16.mxu0 %v4503_v49 }
 0x121   : > { %v3618_v54 = vpop.f32.mrb[16].mxu1  ;;  %v3570_v55 = vpop.f32.mrb[16].mxu0 }
 0x122   : > { %v3619_v56 = vpop.f32.mrb[17].mxu1  ;;  %v3571_v57 = vpop.f32.mrb[17].mxu0 }
 0x123   : > { %v5002_v61 = vadd.f32 %v3619_v56, %v3618_v54  ;;  %v3621_v63 = vpop.f32.mrb[18].mxu1  ;;  %v5004_v0 = vadd.f32 %v3571_v57, %v3570_v55  ;;  %v3573_v1 = vpop.f32.mrb[18].mxu0 }
 0x124   : > { %v3622_v6 = vpop.f32.mrb[19].mxu1  ;;  %v3574_v7 = vpop.f32.mrb[19].mxu0 }
 0x125   : > { %v5008_v8 = vadd.f32 %v3622_v6, %v3621_v63  ;;  %v5010_v9 = vadd.f32 %v3574_v7, %v3573_v1  ;;  %v4522_v6 = vld [vmem:[%s4813_s24 + $0x1bc] ss:$20 sps:$4 sm:$0xff]   ;;  %v4524_v7 = vld [vmem:[%s4813_s24 + $0x100] ss:$20 sps:$4 sm:$0xff]  }
 0x126   : > { %2494 = vmatmul.mubr.bf16.gmra.mrb[124].mxu1 %v4505_v58  ;;  %2719 = vmatmul.mubr.bf16.gmra.mrb[124].mxu0 %v4506_v59  ;;  %v4520_v58 = vld [vmem:[%s4813_s24 + $0x190] ss:$20 sps:$4 sm:$0xff]   ;;  %v4521_v59 = vld [vmem:[%s4813_s24 + $0xd8] ss:$20 sps:$4 sm:$0xff]  }
 0x127   : > { %2501 = vmatprep.mubr.bf16.mxu1 %v4507_v2  ;;  %4066 = vmatprep.mubr.msk.bf16.mxu0 %vm1209_vm0, %v4509_v3 }
 0x129   : > { %v3624_v10 = vpop.f32.mrb[20].mxu1  ;;  %v3576_v11 = vpop.f32.mrb[20].mxu0 }
 0x12a   : > { %v3625_v13 = vpop.f32.mrb[21].mxu1  ;;  %v3577_v15 = vpop.f32.mrb[21].mxu0 }
 0x12b   : > { %v5015_v18 = vadd.f32 %v3625_v13, %v3624_v10  ;;  %v3627_v19 = vpop.f32.mrb[22].mxu1  ;;  %v5017_v22 = vadd.f32 %v3577_v15, %v3576_v11  ;;  %v3579_v23 = vpop.f32.mrb[22].mxu0 }
 0x12c   : > { %v3628_v26 = vpop.f32.mrb[23].mxu1  ;;  %v3580_v27 = vpop.f32.mrb[23].mxu0 }
 0x12d   : > { %v5021_v29 = vadd.f32 %v3628_v26, %v3627_v19  ;;  %v5023_v31 = vadd.f32 %v3580_v27, %v3579_v23  ;;  %v4525_v19 = vld [vmem:[%s4813_s24 + $0x1b8] ss:$20 sps:$4 sm:$0xff]   ;;  %v4526_v23 = vld [vmem:[%s4813_s24 + $0x128] ss:$20 sps:$4 sm:$0xff]   ;;  %v4529_v27 = vld [vmem:[%s4813_s24 + $0x150] ss:$20 sps:$4 sm:$0xff]  }
 0x12e   : > { %2502 = vmatmul.mubr.bf16.gmra.mrb[128].mxu1 %v4510_v16  ;;  %4067 = vmatmul.mubr.msk.bf16.vlgmr.msra.gmra.mrb[32].mxu0 %vm1209_vm0, %v4511_v17  ;;  %v4527_v26 = vld [vmem:[%s4813_s24 + $0x1e4] ss:$20 sps:$4 sm:$0xff]  }
 0x12f   : > { %2509 = vmatprep.mubr.bf16.mxu1 %v4512_v24  ;;  %4070 = vmatprep.mubr.msk.bf16.mxu0 %vm1209_vm0, %v4514_v25 }
 0x131   : > { %v3630_v32 = vpop.f32.mrb[24].mxu1  ;;  %v3582_v33 = vpop.f32.mrb[24].mxu0 }
 0x132   : > { %v3631_v34 = vpop.f32.mrb[25].mxu1  ;;  %v3583_v35 = vpop.f32.mrb[25].mxu0 }
 0x133   : > { %v5029_v40 = vadd.f32 %v3631_v34, %v3630_v32  ;;  %v3633_v41 = vpop.f32.mrb[26].mxu1  ;;  %v5031_v42 = vadd.f32 %v3583_v35, %v3582_v33  ;;  %v3585_v43 = vpop.f32.mrb[26].mxu0 }
 0x134   : > { %v3634_v48 = vpop.f32.mrb[27].mxu1  ;;  %v3586_v49 = vpop.f32.mrb[27].mxu0 }
 0x135   : > { %v5035_v50 = vadd.f32 %v3634_v48, %v3633_v41  ;;  %v5037_v51 = vadd.f32 %v3586_v49, %v3585_v43  ;;  %v4530_v41 = vld [vmem:[%s4813_s24 + $0x1e0] ss:$20 sps:$4 sm:$0xff]   ;;  %v4531_v43 = vld [vmem:[%s4813_s24 + $0x178] ss:$20 sps:$4 sm:$0xff]  }
 0x136   : > { %2510 = vmatmul.mubr.bf16.gmra.mrb[132].mxu1 %v4515_v38  ;;  %4071 = vmatmul.mubr.msk.bf16.gmra.mrb[36].mxu0 %vm1209_vm0, %v4516_v39  ;;  %v4534_v48 = vld [vmem:[%s4813_s24 + $0x1a0] ss:$20 sps:$4 sm:$0xff]  }
 0x137   : > { %2517 = vmatprep.mubr.bf16.mxu1 %v4517_v45  ;;  %4074 = vmatprep.mubr.msk.bf16.mxu0 %vm1209_vm0, %v4519_v47 }
 0x139   : > { %v3636_v54 = vpop.f32.mrb[28].mxu1  ;;  %v3588_v55 = vpop.f32.mrb[28].mxu0 }
 0x13a   : > { %v3637_v56 = vpop.f32.mrb[29].mxu1  ;;  %v3589_v57 = vpop.f32.mrb[29].mxu0 }
 0x13b   : > { %v5043_v63 = vadd.f32 %v3637_v56, %v3636_v54  ;;  %v3639_v1 = vpop.f32.mrb[30].mxu1  ;;  %v5045_v2 = vadd.f32 %v3589_v57, %v3588_v55  ;;  %v3591_v3 = vpop.f32.mrb[30].mxu0 }
 0x13c   : > { %v3640_v10 = vpop.f32.mrb[31].mxu1  ;;  %v3592_v11 = vpop.f32.mrb[31].mxu0 }
 0x13d   : > { %v5049_v13 = vadd.f32 %v3640_v10, %v3639_v1  ;;  %v5051_v15 = vadd.f32 %v3592_v11, %v3591_v3 }
 0x13e   : > { %2518 = vmatmul.mubr.bf16.gmra.mrb[136].mxu1 %v4520_v58  ;;  %4075 = vmatmul.mubr.msk.bf16.gmra.mrb[40].mxu0 %vm1209_vm0, %v4521_v59  ;;  %v4535_v58 = vld [vmem:[%s4813_s24 + $0x208] ss:$20 sps:$4 sm:$0xff]  }
 0x13f   : > { %2525 = vmatprep.mubr.bf16.mxu1 %v4522_v6  ;;  %4078 = vmatprep.mubr.msk.bf16.mxu0 %vm1209_vm0, %v4524_v7  ;;  %v4536_v59 = vld [vmem:[%s4813_s24 + $0x1c8] ss:$20 sps:$4 sm:$0xff]   ;;  %v4539_v6 = vld [vmem:[%s4813_s24 + $0x1f0] ss:$20 sps:$4 sm:$0xff]  }
 0x141   : > { %v3658_v16 = vpop.f32.mrb[32].mxu1 }
 0x142   : > { %v3659_v17 = vpop.f32.mrb[33].mxu1 }
 0x143   : > { %v3660_v24 = vadd.f32 %v3659_v17, %v3658_v16  ;;  %v3661_v25 = vpop.f32.mrb[34].mxu1 }
 0x144   : > { %v3662_v32 = vpop.f32.mrb[35].mxu1 }
 0x145   : > { %v5060_v33 = vadd.f32 %v3660_v24, %v4956_v62  ;;  %v3663_v34 = vadd.f32 %v3662_v32, %v3661_v25  ;;  %v4532_v62 = vld [vmem:[%s4813_s24 + $0x20c] ss:$20 sps:$4 sm:$0xff]  }
 0x146   : > { %2526 = vmatmul.mubr.bf16.gmra.mrb[140].mxu1 %v4525_v19  ;;  %4079 = vmatmul.mubr.msk.bf16.gmra.mrb[44].mxu0 %vm1209_vm0, %v4526_v23  ;;  %v4540_v19 = vld [vmem:[%s4813_s24 + $0x230] ss:$20 sps:$4 sm:$0xff]   ;;  %v4541_v23 = vld [vmem:[%s4813_s24 + $0x218] ss:$20 sps:$4 sm:$0xff]  }
 0x147   : > { %v5064_v35 = vadd.f32 %v3663_v34, %v4962_v5  ;;  %2533 = vmatprep.mubr.bf16.mxu1 %v4527_v26  ;;  %4082 = vmatprep.mubr.msk.bf16.mxu0 %vm1209_vm0, %v4529_v27  ;;  %v4544_v26 = vld [vmem:[%s4813_s24 + $0x240] ss:$20 sps:$4 sm:$0xff]  }
 0x149   : > { %v3664_v38 = vpop.f32.mrb[36].mxu1 }
 0x14a   : > { %v3665_v39 = vpop.f32.mrb[37].mxu1 }
 0x14b   : > { %v3666_v45 = vadd.f32 %v3665_v39, %v3664_v38  ;;  %v3667_v47 = vpop.f32.mrb[38].mxu1 }
 0x14c   : > { %v3668_v49 = vpop.f32.mrb[39].mxu1 }
 0x14d   : > { %v5072_v54 = vadd.f32 %v3666_v45, %v4968_v14  ;;  %v3669_v5 = vadd.f32 %v3668_v49, %v3667_v47  ;;  %v4537_v14 = vld [vmem:[%s4813_s24 + $0x234] ss:$20 sps:$4 sm:$0xff]  }
 0x14e   : > { %2534 = vmatmul.mubr.bf16.gmra.mrb[144].mxu1 %v4530_v41  ;;  %4083 = vmatmul.mubr.msk.bf16.gmra.mrb[48].mxu0 %vm1209_vm0, %v4531_v43  ;;  %v4545_v41 = vld [vmem:[%s4813_s24 + $0x258] ss:$20 sps:$4 sm:$0xff]   ;;  %v4546_v43 = vld [vmem:[%s4813_s24 + $0x268] ss:$20 sps:$4 sm:$0xff]  }
 0x14f   : > { %v5076_v55 = vadd.f32 %v3669_v5, %v4974_v21  ;;  %2541 = vmatprep.mubr.bf16.mxu1 %v4532_v62  ;;  %4086 = vmatprep.mubr.msk.bf16.mxu0 %vm1209_vm0, %v4534_v48 }
 0x151   : > { %v3670_v56 = vpop.f32.mrb[40].mxu1 }
 0x152   : > { %v3671_v57 = vpop.f32.mrb[41].mxu1 }
 0x153   : > { %v3672_v1 = vadd.f32 %v3671_v57, %v3670_v56  ;;  %v3673_v3 = vpop.f32.mrb[42].mxu1 }
 0x154   : > { %v3674_v7 = vpop.f32.mrb[43].mxu1 }
 0x155   : > { %v5084_v10 = vadd.f32 %v3672_v1, %v4980_v30  ;;  %v3675_v21 = vadd.f32 %v3674_v7, %v3673_v3  ;;  %v4542_v30 = vld [vmem:[%s4813_s24 + $0x25c] ss:$20 sps:$4 sm:$0xff]  }
 0x156   : > { %2542 = vmatmul.mubr.bf16.gmra.mrb[148].mxu1 %v4535_v58  ;;  %4087 = vmatmul.mubr.msk.bf16.gmra.mrb[52].mxu0 %vm1209_vm0, %v4536_v59 }
 0x157   : > { %v5088_v11 = vadd.f32 %v3675_v21, %v4986_v37  ;;  %2549 = vmatprep.mubr.bf16.mxu1 %v4537_v14  ;;  %4090 = vmatprep.mubr.msk.bf16.mxu0 %vm1209_vm0, %v4539_v6 }
 0x159   : > { %v3676_v16 = vpop.f32.mrb[44].mxu1 }
 0x15a   : > { %v3677_v17 = vpop.f32.mrb[45].mxu1 }
 0x15b   : > { %v3678_v24 = vadd.f32 %v3677_v17, %v3676_v16  ;;  %v3679_v25 = vpop.f32.mrb[46].mxu1 }
 0x15c   : > { %v3680_v27 = vpop.f32.mrb[47].mxu1 }
 0x15d   : > { %v5096_v32 = vadd.f32 %v3678_v24, %v4992_v46  ;;  %v3681_v34 = vadd.f32 %v3680_v27, %v3679_v25 }
 0x15e   : > { %2550 = vmatmul.mubr.bf16.gmra.mrb[152].mxu1 %v4540_v19  ;;  %4091 = vmatmul.mubr.msk.bf16.gmra.mrb[56].mxu0 %vm1209_vm0, %v4541_v23 }
 0x15f   : > { %v5100_v37 = vadd.f32 %v3681_v34, %v4998_v53  ;;  %2557 = vmatprep.mubr.bf16.mxu1 %v4542_v30  ;;  %4094 = vmatprep.mubr.msk.bf16.mxu0 %vm1209_vm0, %v4544_v26 }
 0x161   : > { %v3682_v38 = vpop.f32.mrb[48].mxu1 }
 0x162   : > { %v3683_v39 = vpop.f32.mrb[49].mxu1 }
 0x163   : > { %v3684_v45 = vadd.f32 %v3683_v39, %v3682_v38  ;;  %v3685_v47 = vpop.f32.mrb[50].mxu1 }
 0x164   : > { %v3686_v62 = vpop.f32.mrb[51].mxu1 }
 0x165   : > { %v5106_v46 = vadd.f32 %v3684_v45, %v5004_v0  ;;  %v3687_v48 = vadd.f32 %v3686_v62, %v3685_v47 }
 0x166   : > { %2558 = vmatmul.mubr.bf16.gmra.mrb[156].mxu1 %v4545_v41  ;;  %4095 = vmatmul.mubr.msk.bf16.gmra.mrb[60].mxu0 %vm1209_vm0, %v4546_v43 }
 0x167   : > { %v5110_v53 = vadd.f32 %v3687_v48, %v5010_v9 }
 0x169   : > { %v3688_v49 = vpop.f32.mrb[52].mxu1 }
 0x16a   : > { %v3689_v5 = vpop.f32.mrb[53].mxu1 }
 0x16b   : > { %v3690_v56 = vadd.f32 %v3689_v5, %v3688_v49  ;;  %v3691_v57 = vpop.f32.mrb[54].mxu1 }
 0x16c   : > { %v3692_v58 = vpop.f32.mrb[55].mxu1 }
 0x16d   : > { %v5113_v59 = vadd.f32 %v3690_v56, %v5017_v22  ;;  %v3693_v1 = vadd.f32 %v3692_v58, %v3691_v57 }
 0x16f   : > { %v5116_v3 = vadd.f32 %v3693_v1, %v5023_v31 }
 0x171   : > { %v3694_v0 = vpop.f32.mrb[56].mxu1 }
 0x172   : > { %v3695_v14 = vpop.f32.mrb[57].mxu1 }
 0x173   : > { %v3696_v6 = vadd.f32 %v3695_v14, %v3694_v0  ;;  %v3697_v7 = vpop.f32.mrb[58].mxu1 }
 0x174   : > { %v3698_v21 = vpop.f32.mrb[59].mxu1 }
 0x175   : > { %v5119_v9 = vadd.f32 %v3696_v6, %v5031_v42  ;;  %v3699_v16 = vadd.f32 %v3698_v21, %v3697_v7 }
 0x177   : > { %v5122_v17 = vadd.f32 %v3699_v16, %v5037_v51 }
 0x179   : > { %v3700_v19 = vpop.f32.mrb[60].mxu1 }
 0x17a   : > { %v3701_v23 = vpop.f32.mrb[61].mxu1 }
 0x17b   : > { %v3702_v22 = vadd.f32 %v3701_v23, %v3700_v19  ;;  %v3703_v24 = vpop.f32.mrb[62].mxu1 }
 0x17c   : > { %v3704_v25 = vpop.f32.mrb[63].mxu1 }
 0x17d   : > { %v5125_v31 = vadd.f32 %v3702_v22, %v5045_v2  ;;  %v3705_v30 = vadd.f32 %v3704_v25, %v3703_v24 }
 0x17f   : > { %v5128_v26 = vadd.f32 %v3705_v30, %v5051_v15 }
 0x181   : > { %v3706_v27 = vpop.f32.mrb[64].mxu1  ;;  %v3902_v34 = vpop.f32.mrb[64].mxu0 }
 0x182   : > { %v3707_v42 = vpop.f32.mrb[65].mxu1  ;;  %v3903_v38 = vpop.f32.mrb[65].mxu0 }
 0x183   : > { %v3708_v39 = vadd.f32 %v3707_v42, %v3706_v27  ;;  %v3709_v41 = vpop.f32.mrb[66].mxu1  ;;  %v5130_v51 = vadd.f32 %v3903_v38, %v3902_v34  ;;  %v3905_v43 = vpop.f32.mrb[66].mxu0 }
 0x184   : > { %v3710_v45 = vpop.f32.mrb[67].mxu1  ;;  %v3906_v47 = vpop.f32.mrb[67].mxu0 }
 0x185   : > { %v5133_v62 = vadd.f32 %v3708_v39, %v4954_v60  ;;  %v3711_v2 = vadd.f32 %v3710_v45, %v3709_v41  ;;  %v5135_v48 = vadd.f32 %v3906_v47, %v3905_v43 }
 0x187   : > { %v5138_v15 = vadd.f32 %v3711_v2, %v4960_v4 }
 0x189   : > { %v3712_v49 = vpop.f32.mrb[68].mxu1  ;;  %v3908_v5 = vpop.f32.mrb[68].mxu0 }
 0x18a   : > { %v3713_v56 = vpop.f32.mrb[69].mxu1  ;;  %v3909_v57 = vpop.f32.mrb[69].mxu0 }
 0x18b   : > { %v3714_v58 = vadd.f32 %v3713_v56, %v3712_v49  ;;  %v3715_v1 = vpop.f32.mrb[70].mxu1  ;;  %v5140_v0 = vadd.f32 %v3909_v57, %v3908_v5  ;;  %v3911_v14 = vpop.f32.mrb[70].mxu0 }
 0x18c   : > { %v3716_v6 = vpop.f32.mrb[71].mxu1  ;;  %v3912_v7 = vpop.f32.mrb[71].mxu0 }
 0x18d   : > { %v5143_v60 = vadd.f32 %v3714_v58, %v4966_v12  ;;  %v3717_v21 = vadd.f32 %v3716_v6, %v3715_v1  ;;  %v5145_v16 = vadd.f32 %v3912_v7, %v3911_v14 }
 0x18f   : > { %v5148_v4 = vadd.f32 %v3717_v21, %v4972_v20 }
 0x191   : > { %v3718_v19 = vpop.f32.mrb[72].mxu1  ;;  %v3914_v23 = vpop.f32.mrb[72].mxu0 }
 0x192   : > { %v3719_v22 = vpop.f32.mrb[73].mxu1  ;;  %v3915_v24 = vpop.f32.mrb[73].mxu0 }
 0x193   : > { %v3720_v25 = vadd.f32 %v3719_v22, %v3718_v19  ;;  %v3721_v30 = vpop.f32.mrb[74].mxu1  ;;  %v5150_v27 = vadd.f32 %v3915_v24, %v3914_v23  ;;  %v3917_v34 = vpop.f32.mrb[74].mxu0 }
 0x194   : > { %v3722_v42 = vpop.f32.mrb[75].mxu1  ;;  %v3918_v38 = vpop.f32.mrb[75].mxu0 }
 0x195   : > { %v5153_v12 = vadd.f32 %v3720_v25, %v4978_v28  ;;  %v3723_v39 = vadd.f32 %v3722_v42, %v3721_v30  ;;  %v5155_v41 = vadd.f32 %v3918_v38, %v3917_v34 }
 0x197   : > { %v5158_v20 = vadd.f32 %v3723_v39, %v4984_v36 }
 0x199   : > { %v3724_v43 = vpop.f32.mrb[76].mxu1  ;;  %v3920_v45 = vpop.f32.mrb[76].mxu0 }
 0x19a   : > { %v3725_v47 = vpop.f32.mrb[77].mxu1  ;;  %v3921_v2 = vpop.f32.mrb[77].mxu0 }
 0x19b   : > { %v3726_v49 = vadd.f32 %v3725_v47, %v3724_v43  ;;  %v3727_v5 = vpop.f32.mrb[78].mxu1  ;;  %v5160_v56 = vadd.f32 %v3921_v2, %v3920_v45  ;;  %v3923_v57 = vpop.f32.mrb[78].mxu0 }
 0x19c   : > { %v3728_v58 = vpop.f32.mrb[79].mxu1  ;;  %v3924_v1 = vpop.f32.mrb[79].mxu0 }
 0x19d   : > { %v5163_v28 = vadd.f32 %v3726_v49, %v4990_v44  ;;  %v3729_v14 = vadd.f32 %v3728_v58, %v3727_v5  ;;  %v5165_v6 = vadd.f32 %v3924_v1, %v3923_v57 }
 0x19f   : > { %v5168_v36 = vadd.f32 %v3729_v14, %v4996_v52 }
 0x1a1   : > { %v3730_v7 = vpop.f32.mrb[80].mxu1  ;;  %v3926_v21 = vpop.f32.mrb[80].mxu0 }
 0x1a2   : > { %v3731_v19 = vpop.f32.mrb[81].mxu1  ;;  %v3927_v23 = vpop.f32.mrb[81].mxu0 }
 0x1a3   : > { %v3732_v22 = vadd.f32 %v3731_v19, %v3730_v7  ;;  %v3733_v24 = vpop.f32.mrb[82].mxu1  ;;  %v5170_v25 = vadd.f32 %v3927_v23, %v3926_v21  ;;  %v3929_v30 = vpop.f32.mrb[82].mxu0 }
 0x1a4   : > { %v3734_v34 = vpop.f32.mrb[83].mxu1  ;;  %v3930_v42 = vpop.f32.mrb[83].mxu0 }
 0x1a5   : > { %v5173_v44 = vadd.f32 %v3732_v22, %v5002_v61  ;;  %v3735_v38 = vadd.f32 %v3734_v34, %v3733_v24  ;;  %v5175_v39 = vadd.f32 %v3930_v42, %v3929_v30 }
 0x1a7   : > { %v5178_v52 = vadd.f32 %v3735_v38, %v5008_v8 }
 0x1a9   : > { %v3736_v43 = vpop.f32.mrb[84].mxu1  ;;  %v3932_v45 = vpop.f32.mrb[84].mxu0 }
 0x1aa   : > { %v3737_v47 = vpop.f32.mrb[85].mxu1  ;;  %v3933_v2 = vpop.f32.mrb[85].mxu0 }
 0x1ab   : > { %v3738_v49 = vadd.f32 %v3737_v47, %v3736_v43  ;;  %v3739_v5 = vpop.f32.mrb[86].mxu1  ;;  %v5180_v57 = vadd.f32 %v3933_v2, %v3932_v45  ;;  %v3935_v58 = vpop.f32.mrb[86].mxu0 }
 0x1ac   : > { %v3740_v1 = vpop.f32.mrb[87].mxu1  ;;  %v3936_v14 = vpop.f32.mrb[87].mxu0 }
 0x1ad   : > { %v5183_v61 = vadd.f32 %v3738_v49, %v5015_v18  ;;  %v3741_v7 = vadd.f32 %v3740_v1, %v3739_v5  ;;  %v5185_v21 = vadd.f32 %v3936_v14, %v3935_v58 }
 0x1af   : > { %v5188_v8 = vadd.f32 %v3741_v7, %v5021_v29 }
 0x1b1   : > { %v3742_v19 = vpop.f32.mrb[88].mxu1  ;;  %v3938_v23 = vpop.f32.mrb[88].mxu0 }
 0x1b2   : > { %v3743_v22 = vpop.f32.mrb[89].mxu1  ;;  %v3939_v24 = vpop.f32.mrb[89].mxu0 }
 0x1b3   : > { %v3744_v30 = vadd.f32 %v3743_v22, %v3742_v19  ;;  %v3745_v34 = vpop.f32.mrb[90].mxu1  ;;  %v5190_v42 = vadd.f32 %v3939_v24, %v3938_v23  ;;  %v3941_v38 = vpop.f32.mrb[90].mxu0 }
 0x1b4   : > { %v3746_v43 = vpop.f32.mrb[91].mxu1  ;;  %v3942_v45 = vpop.f32.mrb[91].mxu0 }
 0x1b5   : > { %v5193_v18 = vadd.f32 %v3744_v30, %v5029_v40  ;;  %v3747_v47 = vadd.f32 %v3746_v43, %v3745_v34  ;;  %v5195_v2 = vadd.f32 %v3942_v45, %v3941_v38 }
 0x1b7   : > { %5488 = vst [vmem:[#allocation2_spill] sm:$0xff] %v5193_v18  ;;  %v5198_v29 = vadd.f32 %v3747_v47, %v5035_v50 }
 0x1b9   : > { %5489 = vst [vmem:[#allocation3_spill] sm:$0xff] %v5198_v29  ;;  %v3748_v49 = vpop.f32.mrb[92].mxu1  ;;  %v3944_v5 = vpop.f32.mrb[92].mxu0 }
 0x1ba   : > { %v3749_v58 = vpop.f32.mrb[93].mxu1  ;;  %v3945_v1 = vpop.f32.mrb[93].mxu0 }
 0x1bb   : > { %v3750_v14 = vadd.f32 %v3749_v58, %v3748_v49  ;;  %v3751_v7 = vpop.f32.mrb[94].mxu1  ;;  %v5200_v19 = vadd.f32 %v3945_v1, %v3944_v5  ;;  %v3947_v23 = vpop.f32.mrb[94].mxu0 }
 0x1bc   : > { %v3752_v22 = vpop.f32.mrb[95].mxu1  ;;  %v3948_v24 = vpop.f32.mrb[95].mxu0 }
 0x1bd   : > { %v5203_v40 = vadd.f32 %v3750_v14, %v5043_v63  ;;  %v3753_v30 = vadd.f32 %v3752_v22, %v3751_v7  ;;  %v5205_v34 = vadd.f32 %v3948_v24, %v3947_v23 }
 0x1bf   : > { %v5208_v50 = vadd.f32 %v3753_v30, %v5049_v13 }
 0x1c1   : > { %5490 = vst [vmem:[#allocation4_spill] sm:$0xff] %v5208_v50  ;;  %v3790_v38 = vpop.f32.mrb[96].mxu1  ;;  %v3950_v43 = vpop.f32.mrb[96].mxu0 }
 0x1c2   : > { %v3791_v45 = vpop.f32.mrb[97].mxu1  ;;  %v3951_v47 = vpop.f32.mrb[97].mxu0 }
 0x1c3   : > { %v3792_v49 = vadd.f32 %v3791_v45, %v3790_v38  ;;  %v3793_v58 = vpop.f32.mrb[98].mxu1  ;;  %v5210_v5 = vadd.f32 %v3951_v47, %v3950_v43  ;;  %v3953_v1 = vpop.f32.mrb[98].mxu0 }
 0x1c4   : > { %v3794_v29 = vpop.f32.mrb[99].mxu1  ;;  %v3954_v18 = vpop.f32.mrb[99].mxu0 }
 0x1c5   : > { %v4117_v63 = vadd.f32 %v3792_v49, %v5060_v33  ;;  %v3795_v14 = vadd.f32 %v3794_v29, %v3793_v58  ;;  %v5213_v7 = vadd.f32 %v3954_v18, %v3953_v1 }
 0x1c7   : > { %v4123_v23 = vadd.f32 %v3795_v14, %v5064_v35  ;;  %v5217_v13 = vadd.f32 %v4117_v63, %v5130_v51 }
 0x1c9   : > { %v3796_v22 = vpop.f32.mrb[100].mxu1  ;;  %v3956_v24 = vpop.f32.mrb[100].mxu0  ;;  %v5220_v30 = vadd.f32 %v4123_v23, %v5135_v48 }
 0x1ca   : > { %v3797_v38 = vpop.f32.mrb[101].mxu1  ;;  %v3957_v43 = vpop.f32.mrb[101].mxu0 }
 0x1cb   : > { %v3798_v45 = vadd.f32 %v3797_v38, %v3796_v22  ;;  %v3799_v47 = vpop.f32.mrb[102].mxu1  ;;  %v5222_v50 = vadd.f32 %v3957_v43, %v3956_v24  ;;  %v3959_v33 = vpop.f32.mrb[102].mxu0 }
 0x1cc   : > { %v3800_v29 = vpop.f32.mrb[103].mxu1  ;;  %v3960_v18 = vpop.f32.mrb[103].mxu0 }
 0x1cd   : > { %v4114_v49 = vadd.f32 %v3798_v45, %v5072_v54  ;;  %v3801_v35 = vadd.f32 %v3800_v29, %v3799_v47  ;;  %v5225_v58 = vadd.f32 %v3960_v18, %v3959_v33 }
 0x1cf   : > { %v4120_v51 = vadd.f32 %v3801_v35, %v5076_v55  ;;  %v5229_v1 = vadd.f32 %v4114_v49, %v5140_v0 }
 0x1d1   : > { %v3802_v48 = vpop.f32.mrb[104].mxu1  ;;  %v3962_v63 = vpop.f32.mrb[104].mxu0  ;;  %v5232_v14 = vadd.f32 %v4120_v51, %v5145_v16 }
 0x1d2   : > { %v3803_v23 = vpop.f32.mrb[105].mxu1  ;;  %v3963_v22 = vpop.f32.mrb[105].mxu0 }
 0x1d3   : > { %v3804_v24 = vadd.f32 %v3803_v23, %v3802_v48  ;;  %v3805_v38 = vpop.f32.mrb[106].mxu1  ;;  %v5234_v43 = vadd.f32 %v3963_v22, %v3962_v63  ;;  %v3965_v54 = vpop.f32.mrb[106].mxu0 }
 0x1d4   : > { %v3806_v45 = vpop.f32.mrb[107].mxu1  ;;  %v3966_v47 = vpop.f32.mrb[107].mxu0 }
 0x1d5   : > { %v4129_v33 = vadd.f32 %v3804_v24, %v5084_v10  ;;  %v3807_v55 = vadd.f32 %v3806_v45, %v3805_v38  ;;  %v5237_v29 = vadd.f32 %v3966_v47, %v3965_v54 }
 0x1d7   : > { %v4135_v0 = vadd.f32 %v3807_v55, %v5088_v11  ;;  %v5241_v18 = vadd.f32 %v4129_v33, %v5150_v27 }
 0x1d9   : > { %v3808_v16 = vpop.f32.mrb[108].mxu1  ;;  %v3968_v49 = vpop.f32.mrb[108].mxu0  ;;  %v5244_v35 = vadd.f32 %v4135_v0, %v5155_v41 }
 0x1da   : > { %v3809_v51 = vpop.f32.mrb[109].mxu1  ;;  %v3969_v48 = vpop.f32.mrb[109].mxu0 }
 0x1db   : > { %v3810_v63 = vadd.f32 %v3809_v51, %v3808_v16  ;;  %v3811_v23 = vpop.f32.mrb[110].mxu1  ;;  %v5246_v22 = vadd.f32 %v3969_v48, %v3968_v49  ;;  %v3971_v10 = vpop.f32.mrb[110].mxu0 }
 0x1dc   : > { %v3812_v24 = vpop.f32.mrb[111].mxu1  ;;  %v3972_v38 = vpop.f32.mrb[111].mxu0 }
 0x1dd   : > { %v4126_v54 = vadd.f32 %v3810_v63, %v5096_v32  ;;  %v3813_v11 = vadd.f32 %v3812_v24, %v3811_v23  ;;  %v5249_v45 = vadd.f32 %v3972_v38, %v3971_v10 }
 0x1df   : > { %v4132_v27 = vadd.f32 %v3813_v11, %v5100_v37  ;;  %v5253_v47 = vadd.f32 %v4126_v54, %v5160_v56 }
 0x1e1   : > { %v3814_v41 = vpop.f32.mrb[112].mxu1  ;;  %v3974_v33 = vpop.f32.mrb[112].mxu0  ;;  %v5256_v55 = vadd.f32 %v4132_v27, %v5165_v6 }
 0x1e2   : > { %v3815_v0 = vpop.f32.mrb[113].mxu1  ;;  %v3975_v16 = vpop.f32.mrb[113].mxu0 }
 0x1e3   : > { %v3816_v49 = vadd.f32 %v3815_v0, %v3814_v41  ;;  %v3817_v51 = vpop.f32.mrb[114].mxu1  ;;  %v5258_v48 = vadd.f32 %v3975_v16, %v3974_v33  ;;  %v3977_v32 = vpop.f32.mrb[114].mxu0 }
 0x1e4   : > { %v3818_v63 = vpop.f32.mrb[115].mxu1  ;;  %v3978_v23 = vpop.f32.mrb[115].mxu0 }
 0x1e5   : > { %v4141_v10 = vadd.f32 %v3816_v49, %v5106_v46  ;;  %v3819_v37 = vadd.f32 %v3818_v63, %v3817_v51  ;;  %v5261_v24 = vadd.f32 %v3978_v23, %v3977_v32 }
 0x1e7   : > { %v4147_v56 = vadd.f32 %v3819_v37, %v5110_v53  ;;  %v5265_v38 = vadd.f32 %v4141_v10, %v5170_v25 }
 0x1e9   : > { %v3820_v6 = vpop.f32.mrb[116].mxu1  ;;  %v3980_v54 = vpop.f32.mrb[116].mxu0  ;;  %v5268_v11 = vadd.f32 %v4147_v56, %v5175_v39 }
 0x1ea   : > { %v3821_v27 = vpop.f32.mrb[117].mxu1  ;;  %v3981_v41 = vpop.f32.mrb[117].mxu0 }
 0x1eb   : > { %v3822_v33 = vadd.f32 %v3821_v27, %v3820_v6  ;;  %v3823_v0 = vpop.f32.mrb[118].mxu1  ;;  %v5270_v16 = vadd.f32 %v3981_v41, %v3980_v54  ;;  %v3983_v46 = vpop.f32.mrb[118].mxu0 }
 0x1ec   : > { %v3824_v49 = vpop.f32.mrb[119].mxu1  ;;  %v3984_v51 = vpop.f32.mrb[119].mxu0 }
 0x1ed   : > { %v4138_v32 = vadd.f32 %v3822_v33, %v5113_v59  ;;  %v3825_v53 = vadd.f32 %v3824_v49, %v3823_v0  ;;  %v5273_v63 = vadd.f32 %v3984_v51, %v3983_v46 }
 0x1ef   : > { %v4144_v25 = vadd.f32 %v3825_v53, %v5116_v3  ;;  %v5277_v23 = vadd.f32 %v4138_v32, %v5180_v57 }
 0x1f1   : > { %v3826_v39 = vpop.f32.mrb[120].mxu1  ;;  %v3986_v10 = vpop.f32.mrb[120].mxu0  ;;  %v5280_v37 = vadd.f32 %v4144_v25, %v5185_v21 }
 0x1f2   : > { %v3827_v56 = vpop.f32.mrb[121].mxu1  ;;  %v3987_v6 = vpop.f32.mrb[121].mxu0 }
 0x1f3   : > { %v3828_v54 = vadd.f32 %v3827_v56, %v3826_v39  ;;  %v3829_v27 = vpop.f32.mrb[122].mxu1  ;;  %v5282_v41 = vadd.f32 %v3987_v6, %v3986_v10  ;;  %v3989_v59 = vpop.f32.mrb[122].mxu0 }
 0x1f4   : > { %v3830_v33 = vpop.f32.mrb[123].mxu1  ;;  %v3990_v0 = vpop.f32.mrb[123].mxu0 }
 0x1f5   : > { %v4153_v46 = vadd.f32 %v3828_v54, %v5119_v9  ;;  %v3831_v3 = vadd.f32 %v3830_v33, %v3829_v27  ;;  %v5285_v49 = vadd.f32 %v3990_v0, %v3989_v59 }
 0x1f7   : > { %v4159_v57 = vadd.f32 %v3831_v3, %v5122_v17  ;;  %v5289_v51 = vadd.f32 %v4153_v46, %v5190_v42  ;;  %v5306_v3 = vld [vmem:[%s5486_s4] ss:$0 sm:$0xff] }
 0x1f9   : > { %v3832_v21 = vpop.f32.mrb[124].mxu1  ;;  %v3992_v32 = vpop.f32.mrb[124].mxu0  ;;  %v5292_v53 = vadd.f32 %v4159_v57, %v5195_v2 }
 0x1fa   : > { %v3833_v25 = vpop.f32.mrb[125].mxu1  ;;  %v3993_v39 = vpop.f32.mrb[125].mxu0 }
 0x1fb   : > { %v3834_v10 = vadd.f32 %v3833_v25, %v3832_v21  ;;  %v3835_v56 = vpop.f32.mrb[126].mxu1  ;;  %v5294_v6 = vadd.f32 %v3993_v39, %v3992_v32  ;;  %v3995_v9 = vpop.f32.mrb[126].mxu0 }
 0x1fc   : > { %v3836_v54 = vpop.f32.mrb[127].mxu1  ;;  %v3996_v27 = vpop.f32.mrb[127].mxu0 }
 0x1fd   : > { %v4150_v59 = vadd.f32 %v3834_v10, %v5125_v31  ;;  %v3837_v17 = vadd.f32 %v3836_v54, %v3835_v56  ;;  %v5297_v42 = vadd.f32 %v3996_v27, %v3995_v9 }
 0x1ff   : > { %v4156_v33 = vadd.f32 %v3837_v17, %v5128_v26  ;;  %v5301_v2 = vadd.f32 %v4150_v59, %v5200_v19 }
 0x201   : > { %v3838_v0 = vpop.f32.mrb[128].mxu1  ;;  %v4068_v46 = vpop.f32.mrb[32].mxu0  ;;  %v5309_v57 = vadd.f32 %v4156_v33, %v5205_v34 }
 0x202   : > { %v4116_v31 = vadd.f32 %v5229_v1, %v4068_v46  ;;  %v3839_v21 = vpop.f32.mrb[129].mxu1  ;;  %v2761_v32 = vpop.f32.mrb[33].mxu0 }
 0x203   : > { %v3840_v25 = vadd.f32 %v3839_v21, %v3838_v0  ;;  %v4119_v26 = vadd.f32 %v5217_v13, %v2761_v32  ;;  %v3841_v39 = vpop.f32.mrb[130].mxu1  ;;  %v4069_v19 = vpop.f32.mrb[34].mxu0 }
 0x204   : > { %v2897_v10 = vadd.f32 %v4116_v31, %v5306_v3  ;;  %v4122_v56 = vadd.f32 %v5232_v14, %v4069_v19  ;;  %v3842_v9 = vpop.f32.mrb[131].mxu1  ;;  %v2764_v54 = vpop.f32.mrb[35].mxu0 }
 0x205   : > { %v4165_v27 = vadd.f32 %v3840_v25, %v5133_v62  ;;  %v2895_v34 = vadd.f32 %v4119_v26, %v5306_v3  ;;  %v3843_v59 = vadd.f32 %v3842_v9, %v3841_v39  ;;  %v4125_v1 = vadd.f32 %v5220_v30, %v2764_v54 }
 0x206   : > { %v2929_v17 = vmax.f32 %v2897_v10, 0.0  ;;  %v2898_v13 = vadd.f32 %v4122_v56, %v5306_v3 }
 0x207   : > { %v2927_v14 = vmax.f32 %v2895_v34, 0.0  ;;  %v4171_v33 = vadd.f32 %v3843_v59, %v5138_v15  ;;  %v2896_v62 = vadd.f32 %v4125_v1, %v5306_v3  ;;  %v5328_v0 = vadd.f32 %v4165_v27, %v5210_v5 }
 0x208   : > { %v3500_v30 = vpack.c.bf16 %v2929_v17, %v2929_v17  ;;  %v2930_v46 = vmax.f32 %v2898_v13, 0.0 }
 0x209   : > { %v3498_v31 = vpack.c.bf16 %v2927_v14, %v2927_v14  ;;  %v2928_v21 = vmax.f32 %v2896_v62, 0.0  ;;  %v3844_v32 = vpop.f32.mrb[132].mxu1  ;;  %v4072_v25 = vpop.f32.mrb[36].mxu0  ;;  %v5331_v26 = vadd.f32 %v4171_v33, %v5213_v7 }
 0x20a   : > { %3090 = vst.msk [vmem:[%s5323_s22 + $0x8] sm:$0xf] %vm3087_vm1, %v3500_v30  ;;  %v3501_v39 = vpack.c.bf16 %v2930_v46, %v2930_v46  ;;  %v4128_v15 = vadd.f32 %v5253_v47, %v4072_v25  ;;  %v3845_v19 = vpop.f32.mrb[133].mxu1  ;;  %v2777_v10 = vpop.f32.mrb[37].mxu0 }
 0x20b   : > { %3088 = vst.msk [vmem:[%s5323_s22] sm:$0xf] %vm3087_vm1, %v3498_v31  ;;  %v3499_v5 = vpack.c.bf16 %v2928_v21, %v2928_v21  ;;  %v3846_v56 = vadd.f32 %v3845_v19, %v3844_v32  ;;  %v4131_v9 = vadd.f32 %v5241_v18, %v2777_v10  ;;  %v3847_v54 = vpop.f32.mrb[134].mxu1  ;;  %v4073_v27 = vpop.f32.mrb[38].mxu0 }
 0x20c   : > { %3091 = vst.msk [vmem:[%s5323_s22 + $0xc] sm:$0xf] %vm3087_vm1, %v3501_v39  ;;  %v2901_v7 = vadd.f32 %v4128_v15, %v5306_v3  ;;  %v4134_v34 = vadd.f32 %v5256_v55, %v4073_v27  ;;  %v3848_v59 = vpop.f32.mrb[135].mxu1  ;;  %v2780_v1 = vpop.f32.mrb[39].mxu0 }
 0x20d   : > { %3089 = vst.msk [vmem:[%s5323_s22 + $0x4] sm:$0xf] %vm3087_vm1, %v3499_v5  ;;  %v4162_v47 = vadd.f32 %v3846_v56, %v5143_v60  ;;  %v2899_v17 = vadd.f32 %v4131_v9, %v5306_v3  ;;  %v3849_v13 = vadd.f32 %v3848_v59, %v3847_v54  ;;  %v4137_v18 = vadd.f32 %v5244_v35, %v2780_v1 }
 0x20e   : > { %v2933_v14 = vmax.f32 %v2901_v7, 0.0  ;;  %v2902_v33 = vadd.f32 %v4134_v34, %v5306_v3 }
 0x20f   : > { %v2931_v62 = vmax.f32 %v2899_v17, 0.0  ;;  %v4168_v30 = vadd.f32 %v3849_v13, %v5148_v4  ;;  %v2900_v55 = vadd.f32 %v4137_v18, %v5306_v3  ;;  %v5352_v46 = vadd.f32 %v4162_v47, %v5222_v50 }
 0x210   : > { %v3504_v31 = vpack.c.bf16 %v2933_v14, %v2933_v14  ;;  %v2934_v60 = vmax.f32 %v2902_v33, 0.0 }
 0x211   : > { %v3502_v21 = vpack.c.bf16 %v2931_v62, %v2931_v62  ;;  %v2932_v32 = vmax.f32 %v2900_v55, 0.0  ;;  %v3850_v25 = vpop.f32.mrb[136].mxu1  ;;  %v4076_v39 = vpop.f32.mrb[40].mxu0  ;;  %v5355_v35 = vadd.f32 %v4168_v30, %v5225_v58 }
 0x212   : > { %3094 = vst.msk [vmem:[%s5323_s22 + $0x18] sm:$0xf] %vm3087_vm1, %v3504_v31  ;;  %v3505_v15 = vpack.c.bf16 %v2934_v60, %v2934_v60  ;;  %v4140_v4 = vadd.f32 %v5277_v23, %v4076_v39  ;;  %v3851_v19 = vpop.f32.mrb[137].mxu1  ;;  %v2793_v10 = vpop.f32.mrb[41].mxu0 }
 0x213   : > { %3092 = vst.msk [vmem:[%s5323_s22 + $0x10] sm:$0xf] %vm3087_vm1, %v3502_v21  ;;  %v3503_v50 = vpack.c.bf16 %v2932_v32, %v2932_v32  ;;  %v3852_v5 = vadd.f32 %v3851_v19, %v3850_v25  ;;  %v4143_v56 = vadd.f32 %v5265_v38, %v2793_v10  ;;  %v3853_v9 = vpop.f32.mrb[138].mxu1  ;;  %v4077_v54 = vpop.f32.mrb[42].mxu0 }
 0x214   : > { %3095 = vst.msk [vmem:[%s5323_s22 + $0x1c] sm:$0xf] %vm3087_vm1, %v3505_v15  ;;  %v2905_v58 = vadd.f32 %v4140_v4, %v5306_v3  ;;  %v4146_v27 = vadd.f32 %v5280_v37, %v4077_v54  ;;  %v3854_v7 = vpop.f32.mrb[139].mxu1  ;;  %v2796_v34 = vpop.f32.mrb[43].mxu0 }
 0x215   : > { %3093 = vst.msk [vmem:[%s5323_s22 + $0x14] sm:$0xf] %vm3087_vm1, %v3503_v50  ;;  %v4177_v23 = vadd.f32 %v3852_v5, %v5153_v12  ;;  %v2903_v59 = vadd.f32 %v4143_v56, %v5306_v3  ;;  %v3855_v1 = vadd.f32 %v3854_v7, %v3853_v9  ;;  %v4149_v38 = vadd.f32 %v5268_v11, %v2796_v34 }
 0x216   : > { %v2937_v47 = vmax.f32 %v2905_v58, 0.0  ;;  %v2906_v17 = vadd.f32 %v4146_v27, %v5306_v3 }
 0x217   : > { %v2935_v13 = vmax.f32 %v2903_v59, 0.0  ;;  %v4183_v18 = vadd.f32 %v3855_v1, %v5158_v20  ;;  %v2904_v37 = vadd.f32 %v4149_v38, %v5306_v3  ;;  %v5376_v14 = vadd.f32 %v4177_v23, %v5234_v43 }
 0x218   : > { %v3508_v33 = vpack.c.bf16 %v2937_v47, %v2937_v47  ;;  %v2938_v12 = vmax.f32 %v2906_v17, 0.0 }
 0x219   : > { %v3506_v62 = vpack.c.bf16 %v2935_v13, %v2935_v13  ;;  %v2936_v30 = vmax.f32 %v2904_v37, 0.0  ;;  %v3856_v55 = vpop.f32.mrb[140].mxu1  ;;  %v4080_v31 = vpop.f32.mrb[44].mxu0  ;;  %v5379_v11 = vadd.f32 %v4183_v18, %v5237_v29 }
 0x21a   : > { %3098 = vst.msk [vmem:[%s5323_s22 + $0x28] sm:$0xf] %vm3087_vm1, %v3508_v33  ;;  %v3509_v60 = vpack.c.bf16 %v2938_v12, %v2938_v12  ;;  %v4152_v20 = vadd.f32 %v5301_v2, %v4080_v31  ;;  %v3857_v21 = vpop.f32.mrb[141].mxu1  ;;  %v2809_v32 = vpop.f32.mrb[45].mxu0 }
 0x21b   : > { %3096 = vst.msk [vmem:[%s5323_s22 + $0x20] sm:$0xf] %vm3087_vm1, %v3506_v62  ;;  %v3507_v43 = vpack.c.bf16 %v2936_v30, %v2936_v30  ;;  %v3858_v25 = vadd.f32 %v3857_v21, %v3856_v55  ;;  %v4155_v39 = vadd.f32 %v5289_v51, %v2809_v32  ;;  %v3859_v15 = vpop.f32.mrb[142].mxu1  ;;  %v4081_v4 = vpop.f32.mrb[46].mxu0 }
 0x21c   : > { %3099 = vst.msk [vmem:[%s5323_s22 + $0x2c] sm:$0xf] %vm3087_vm1, %v3509_v60  ;;  %v2909_v29 = vadd.f32 %v4152_v20, %v5306_v3  ;;  %v4158_v19 = vadd.f32 %v5309_v57, %v4081_v4  ;;  %v3860_v10 = vpop.f32.mrb[143].mxu1  ;;  %v2812_v50 = vpop.f32.mrb[47].mxu0 }
 0x21d   : > { %3097 = vst.msk [vmem:[%s5323_s22 + $0x24] sm:$0xf] %vm3087_vm1, %v3507_v43  ;;  %v4174_v2 = vadd.f32 %v3858_v25, %v5163_v28  ;;  %v2907_v5 = vadd.f32 %v4155_v39, %v5306_v3  ;;  %v3861_v56 = vadd.f32 %v3860_v10, %v3859_v15  ;;  %v4161_v51 = vadd.f32 %v5292_v53, %v2812_v50 }
 0x21e   : > { %v2941_v9 = vmax.f32 %v2909_v29, 0.0  ;;  %v2910_v54 = vadd.f32 %v4158_v19, %v5306_v3 }
 0x21f   : > { %v2939_v58 = vmax.f32 %v2907_v5, 0.0  ;;  %v4180_v27 = vadd.f32 %v3861_v56, %v5168_v36  ;;  %v2908_v57 = vadd.f32 %v4161_v51, %v5306_v3  ;;  %v4175_v7 = vadd.f32 %v4174_v2, %v5246_v22 }
 0x220   : > { %v3512_v34 = vpack.c.bf16 %v2941_v9, %v2941_v9  ;;  %v2942_v23 = vmax.f32 %v2910_v54, 0.0 }
 0x221   : > { %v3510_v28 = vpack.c.bf16 %v2939_v58, %v2939_v58  ;;  %v2940_v59 = vmax.f32 %v2908_v57, 0.0  ;;  %v3862_v1 = vpop.f32.mrb[144].mxu1  ;;  %v4084_v38 = vpop.f32.mrb[48].mxu0  ;;  %v4181_v53 = vadd.f32 %v4180_v27, %v5249_v45 }
 0x222   : > { %3102 = vst.msk [vmem:[%s5323_s22 + $0x38] sm:$0xf] %vm3087_vm1, %v3512_v34  ;;  %v3513_v47 = vpack.c.bf16 %v2942_v23, %v2942_v23  ;;  %v4164_v17 = vadd.f32 %v5352_v46, %v4084_v38  ;;  %v3863_v36 = vpop.f32.mrb[145].mxu1  ;;  %v2825_v13 = vpop.f32.mrb[49].mxu0 }
 0x223   : > { %3100 = vst.msk [vmem:[%s5323_s22 + $0x30] sm:$0xf] %vm3087_vm1, %v3510_v28  ;;  %v3511_v22 = vpack.c.bf16 %v2940_v59, %v2940_v59  ;;  %v3864_v18 = vadd.f32 %v3863_v36, %v3862_v1  ;;  %v4167_v37 = vadd.f32 %v5328_v0, %v2825_v13  ;;  %v3865_v33 = vpop.f32.mrb[146].mxu1  ;;  %v4085_v12 = vpop.f32.mrb[50].mxu0 }
 0x224   : > { %3103 = vst.msk [vmem:[%s5323_s22 + $0x3c] sm:$0xf] %vm3087_vm1, %v3513_v47  ;;  %v2913_v45 = vadd.f32 %v4164_v17, %v5306_v3  ;;  %v4170_v62 = vadd.f32 %v5355_v35, %v4085_v12  ;;  %v3866_v30 = vpop.f32.mrb[147].mxu1  ;;  %v2828_v55 = vpop.f32.mrb[51].mxu0 }
 0x225   : > { %3101 = vst.msk [vmem:[%s5323_s22 + $0x34] sm:$0xf] %vm3087_vm1, %v3511_v22  ;;  %v4189_v46 = vadd.f32 %v3864_v18, %v5173_v44  ;;  %v2911_v31 = vadd.f32 %v4167_v37, %v5306_v3  ;;  %v3867_v60 = vadd.f32 %v3866_v30, %v3865_v33  ;;  %v4173_v0 = vadd.f32 %v5331_v26, %v2828_v55 }
 0x226   : > { %v2945_v20 = vmax.f32 %v2913_v45, 0.0  ;;  %v2914_v21 = vadd.f32 %v4170_v62, %v5306_v3 }
 0x227   : > { %v2943_v32 = vmax.f32 %v2911_v31, 0.0  ;;  %v4195_v43 = vadd.f32 %v3867_v60, %v5178_v52  ;;  %v2912_v35 = vadd.f32 %v4173_v0, %v5306_v3  ;;  %v4190_v25 = vadd.f32 %v4189_v46, %v5258_v48  ;;  %v5491_v60 = vld [vmem:[#allocation2_spill] sm:$0xff] }
 0x228   : > { %v3516_v39 = vpack.c.bf16 %v2945_v20, %v2945_v20  ;;  %v2946_v15 = vmax.f32 %v2914_v21, 0.0 }
 0x229   : > { %v3514_v44 = vpack.c.bf16 %v2943_v32, %v2943_v32  ;;  %v2944_v4 = vmax.f32 %v2912_v35, 0.0  ;;  %v3868_v29 = vpop.f32.mrb[148].mxu1  ;;  %v4088_v19 = vpop.f32.mrb[52].mxu0  ;;  %v4196_v26 = vadd.f32 %v4195_v43, %v5261_v24 }
 0x22a   : > { %3106 = vst.msk [vmem:[%s5323_s22 + $0x48] sm:$0xf] %vm3087_vm1, %v3516_v39  ;;  %v3517_v10 = vpack.c.bf16 %v2946_v15, %v2946_v15  ;;  %v4176_v50 = vadd.f32 %v4175_v7, %v4088_v19  ;;  %v3869_v2 = vpop.f32.mrb[149].mxu1  ;;  %v2841_v52 = vpop.f32.mrb[53].mxu0  ;;  %v5492_v39 = vld [vmem:[#allocation3_spill] sm:$0xff] }
 0x22b   : > { %3104 = vst.msk [vmem:[%s5323_s22 + $0x40] sm:$0xf] %vm3087_vm1, %v3514_v44  ;;  %v3515_v5 = vpack.c.bf16 %v2944_v4, %v2944_v4  ;;  %v3870_v48 = vadd.f32 %v3869_v2, %v3868_v29  ;;  %v4179_v56 = vadd.f32 %v5376_v14, %v2841_v52  ;;  %v3871_v51 = vpop.f32.mrb[150].mxu1  ;;  %v4089_v9 = vpop.f32.mrb[54].mxu0 }
 0x22c   : > { %3107 = vst.msk [vmem:[%s5323_s22 + $0x4c] sm:$0xf] %vm3087_vm1, %v3517_v10  ;;  %v2917_v54 = vadd.f32 %v4176_v50, %v5306_v3  ;;  %v4182_v24 = vadd.f32 %v4181_v53, %v4089_v9  ;;  %v3872_v58 = vpop.f32.mrb[151].mxu1  ;;  %v2844_v27 = vpop.f32.mrb[55].mxu0 }
 0x22d   : > { %3105 = vst.msk [vmem:[%s5323_s22 + $0x44] sm:$0xf] %vm3087_vm1, %v3515_v5  ;;  %v4186_v57 = vadd.f32 %v3870_v48, %v5183_v61  ;;  %v2915_v7 = vadd.f32 %v4179_v56, %v5306_v3  ;;  %v3873_v34 = vadd.f32 %v3872_v58, %v3871_v51  ;;  %v4185_v23 = vadd.f32 %v5379_v11, %v2844_v27 }
 0x22e   : > { %v2949_v14 = vmax.f32 %v2917_v54, 0.0  ;;  %v2918_v28 = vadd.f32 %v4182_v24, %v5306_v3 }
 0x22f   : > { %v2947_v59 = vmax.f32 %v2915_v7, 0.0  ;;  %v4192_v1 = vadd.f32 %v3873_v34, %v5188_v8  ;;  %v2916_v38 = vadd.f32 %v4185_v23, %v5306_v3  ;;  %v4187_v53 = vadd.f32 %v4186_v57, %v5270_v16 }
 0x230   : > { %v3520_v47 = vpack.c.bf16 %v2949_v14, %v2949_v14  ;;  %v2950_v17 = vmax.f32 %v2918_v28, 0.0  ;;  %v5493_v28 = vld [vmem:[#allocation4_spill] sm:$0xff] }
 0x231   : > { %v3518_v61 = vpack.c.bf16 %v2947_v59, %v2947_v59  ;;  %v2948_v36 = vmax.f32 %v2916_v38, 0.0  ;;  %v3874_v13 = vpop.f32.mrb[152].mxu1  ;;  %v4092_v22 = vpop.f32.mrb[56].mxu0  ;;  %v4193_v11 = vadd.f32 %v4192_v1, %v5273_v63 }
 0x232   : > { %3110 = vst.msk [vmem:[%s5323_s22 + $0x58] sm:$0xf] %vm3087_vm1, %v3520_v47  ;;  %v3521_v18 = vpack.c.bf16 %v2950_v17, %v2950_v17  ;;  %v4188_v37 = vadd.f32 %v4187_v53, %v4092_v22  ;;  %v3875_v33 = vpop.f32.mrb[153].mxu1  ;;  %v2857_v8 = vpop.f32.mrb[57].mxu0 }
 0x233   : > { %3108 = vst.msk [vmem:[%s5323_s22 + $0x50] sm:$0xf] %vm3087_vm1, %v3518_v61  ;;  %v3519_v12 = vpack.c.bf16 %v2948_v36, %v2948_v36  ;;  %v3876_v16 = vadd.f32 %v3875_v33, %v3874_v13  ;;  %v4191_v45 = vadd.f32 %v4190_v25, %v2857_v8  ;;  %v3877_v62 = vpop.f32.mrb[154].mxu1  ;;  %v4093_v30 = vpop.f32.mrb[58].mxu0 }
 0x234   : > { %3111 = vst.msk [vmem:[%s5323_s22 + $0x5c] sm:$0xf] %vm3087_vm1, %v3521_v18  ;;  %v2921_v55 = vadd.f32 %v4188_v37, %v5306_v3  ;;  %v4194_v46 = vadd.f32 %v4193_v11, %v4093_v30  ;;  %v3878_v63 = vpop.f32.mrb[155].mxu1  ;;  %v2860_v31 = vpop.f32.mrb[59].mxu0 }
 0x235   : > { %3109 = vst.msk [vmem:[%s5323_s22 + $0x54] sm:$0xf] %vm3087_vm1, %v3519_v12  ;;  %v4201_v0 = vadd.f32 %v3876_v16, %v5491_v60  ;;  %v2919_v20 = vadd.f32 %v4191_v45, %v5306_v3  ;;  %v3879_v21 = vadd.f32 %v3878_v63, %v3877_v62  ;;  %v4197_v32 = vadd.f32 %v4196_v26, %v2860_v31 }
 0x236   : > { %v2953_v43 = vmax.f32 %v2921_v55, 0.0  ;;  %v2922_v35 = vadd.f32 %v4194_v46, %v5306_v3 }
 0x237   : > { %v2951_v25 = vmax.f32 %v2919_v20, 0.0  ;;  %v4207_v15 = vadd.f32 %v3879_v21, %v5492_v39  ;;  %v2920_v44 = vadd.f32 %v4197_v32, %v5306_v3  ;;  %v4202_v4 = vadd.f32 %v4201_v0, %v5282_v41 }
 0x238   : > { %v3524_v29 = vpack.c.bf16 %v2953_v43, %v2953_v43  ;;  %v2954_v19 = vmax.f32 %v2922_v35, 0.0 }
 0x239   : > { %v3522_v10 = vpack.c.bf16 %v2951_v25, %v2951_v25  ;;  %v2952_v50 = vmax.f32 %v2920_v44, 0.0  ;;  %v3880_v2 = vpop.f32.mrb[156].mxu1  ;;  %v4096_v52 = vpop.f32.mrb[60].mxu0  ;;  %v4208_v26 = vadd.f32 %v4207_v15, %v5285_v49 }
 0x23a   : > { %3114 = vst.msk [vmem:[%s5323_s22 + $0x68] sm:$0xf] %vm3087_vm1, %v3524_v29  ;;  %v3525_v5 = vpack.c.bf16 %v2954_v19, %v2954_v19  ;;  %v3881_v48 = vpop.f32.mrb[157].mxu1  ;;  %v2873_v56 = vpop.f32.mrb[61].mxu0 }
 0x23b   : > { %3112 = vst.msk [vmem:[%s5323_s22 + $0x60] sm:$0xf] %vm3087_vm1, %v3522_v10  ;;  %v3523_v51 = vpack.c.bf16 %v2952_v50, %v2952_v50  ;;  %v3882_v9 = vadd.f32 %v3881_v48, %v3880_v2  ;;  %v4203_v41 = vadd.f32 %v4202_v4, %v2873_v56  ;;  %v3883_v54 = vpop.f32.mrb[158].mxu1  ;;  %v4097_v24 = vpop.f32.mrb[62].mxu0 }
 0x23c   : > { %3115 = vst.msk [vmem:[%s5323_s22 + $0x6c] sm:$0xf] %vm3087_vm1, %v3525_v5  ;;  %v3884_v58 = vpop.f32.mrb[159].mxu1  ;;  %v2876_v27 = vpop.f32.mrb[63].mxu0 }
 0x23d   : > { %3113 = vst.msk [vmem:[%s5323_s22 + $0x64] sm:$0xf] %vm3087_vm1, %v3523_v51  ;;  %v4198_v49 = vadd.f32 %v3882_v9, %v5203_v40  ;;  %v2923_v57 = vadd.f32 %v4203_v41, %v5306_v3  ;;  %v3885_v7 = vadd.f32 %v3884_v58, %v3883_v54  ;;  %v4209_v34 = vadd.f32 %v4208_v26, %v2876_v27 }
 0x23f   : > { %v4199_v23 = vadd.f32 %v4198_v49, %v5294_v6  ;;  %v2955_v14 = vmax.f32 %v2923_v57, 0.0  ;;  %v4204_v59 = vadd.f32 %v3885_v7, %v5493_v28  ;;  %v2924_v1 = vadd.f32 %v4209_v34, %v5306_v3 }
 0x241   : > { %v4200_v38 = vadd.f32 %v4199_v23, %v4096_v52  ;;  %v3526_v53 = vpack.c.bf16 %v2955_v14, %v2955_v14  ;;  %v4205_v47 = vadd.f32 %v4204_v59, %v5297_v42  ;;  %v2956_v17 = vmax.f32 %v2924_v1, 0.0 }
 0x243   : > { %v2925_v40 = vadd.f32 %v4200_v38, %v5306_v3  ;;  %3116 = vst.msk [vmem:[%s5323_s22 + $0x70] sm:$0xf] %vm3087_vm1, %v3526_v53  ;;  %v4206_v61 = vadd.f32 %v4205_v47, %v4097_v24  ;;  %v3527_v36 = vpack.c.bf16 %v2956_v17, %v2956_v17 }
 0x245   : > { %v2957_v13 = vmax.f32 %v2925_v40, 0.0  ;;  %v2926_v6 = vadd.f32 %v4206_v61, %v5306_v3  ;;  %3117 = vst.msk [vmem:[%s5323_s22 + $0x74] sm:$0xf] %vm3087_vm1, %v3527_v36 }
 0x247   : > { %v3528_v22 = vpack.c.bf16 %v2957_v13, %v2957_v13  ;;  %v2958_v11 = vmax.f32 %v2926_v6, 0.0 }
 0x249   : > { %3118 = vst.msk [vmem:[%s5323_s22 + $0x78] sm:$0xf] %vm3087_vm1, %v3528_v22  ;;  %v3529_v18 = vpack.c.bf16 %v2958_v11, %v2958_v11 }
 0x24b   : > { %3119 = vst.msk [vmem:[%s5323_s22 + $0x7c] sm:$0xf] %vm3087_vm1, %v3529_v18 }
 0x24c PF: > { %s15_s18 = sadd.s32 1, %s4553_s18  }
 0x24d   : > { %p12_p4 = scmp.ge.s32.totalorder %s15_s18, 4  }
 0x24f   :  { %14 = sbr.rel (!%p12_p4) target bundleno = 1 (0x1), region = 73 }

// kernel: _lambda_.26
= control target key start
LH: loop header
LB: loop body
LE: loop exit
PB: predicated region body
PF: predicated region fallthrough
CT: control target
= control target key end

     0   :  { %s482_s15 = smov 0   ;;  %s566_s0 = inlined_call_operand.vmem [shape: bf16[128,64], index: 0, kind: input, shape index: {}]   ;;  %s567_s1 = inlined_call_operand.vmem [shape: bf16[128,64], index: 1, kind: input, shape index: {}]   ;;  %s568_s2 = inlined_call_operand.vmem [shape: bf16[128,64], index: 2, kind: input, shape index: {}]   ;;  %s569_s3 = inlined_call_operand.vmem [shape: bf16[128,64], index: 3, kind: input, shape index: {}]   ;;  %s570_s4 = inlined_call_operand.vmem [shape: bf16[128,64], index: 4, kind: output, shape index: {}]  }
   0x1 LB: > { %s424_s16 = sadd.s32 4294967295, %s455_s15   ;;  %p428_p0 = scmp.ge.s32.totalorder %s455_s15, 1  ;;  %s455_s15 = sphi %s482_s15, %s14_s15  }
   0x2   : > { %p196_p1 = scmp.lt.s32.totalorder %s455_s15, 3 }
   0x4   : > { %p197_p2 = pnand %p428_p0, %p196_p1 }
   0x5   : > { %s429_s17 = sshll.u32 (!%p197_p2), %s424_s16, 3  ;;  %vm323_vm0 = vcmask (!%p197_p2), 519168  }
   0x6   : > { %200 = sbr.rel (%p197_p2) target bundleno = 34 (0x22), region = 36  ;;  %p238_p3 = scmp.lt.s32.totalorder (!%p197_p2), %s429_s17, 15 }
   0xd   : > { %s572_s17 = smov (!%p238_p3, %s429_s17), 15 }
   0xe   : > { %s430_s18 = sshll.u32 %s572_s17, 2 }
   0xf   : > { %s493_s21 = scalar_lea.vmem %s566_s0, %s430_s18  ;;  %s498_s24 = scalar_lea.vmem %s567_s1, %s430_s18 }
  0x10   : > { %s503_s27 = scalar_lea.vmem %s568_s2, %s430_s18  ;;  %s508_s30 = scalar_lea.vmem %s569_s3, %s430_s18  ;;  %v267_v0 = vld [vmem:[%s493_s21] sm:$0xf]  ;;  %v268_v2 = vld [vmem:[%s493_s21 + $0x4] sm:$0xf]  ;;  %v269_v11 = vld [vmem:[%s493_s21 + $0x8] sm:$0xf] }
  0x11   : > { %v275_v1 = vld [vmem:[%s498_s24] sm:$0xf]  ;;  %v276_v6 = vld [vmem:[%s498_s24 + $0x4] sm:$0xf]  ;;  %s522_s7 = scalar_lea.vmem %s570_s4, %s430_s18  ;;  %v277_v13 = vld [vmem:[%s498_s24 + $0x8] sm:$0xf] }
  0x12   : > { %v283_v3 = vmax.bf16 %v275_v1, %v267_v0  ;;  %v291_v4 = vld [vmem:[%s503_s27] sm:$0xf]  ;;  %v284_v8 = vmax.bf16 %v276_v6, %v268_v2  ;;  %v292_v9 = vld [vmem:[%s503_s27 + $0x4] sm:$0xf]  ;;  %v293_v14 = vld [vmem:[%s503_s27 + $0x8] sm:$0xf]  ;;  %v285_v17 = vmax.bf16 %v277_v13, %v269_v11 }
  0x13   : > { %v299_v5 = vld [vmem:[%s508_s30] sm:$0xf]  ;;  %v300_v10 = vld [vmem:[%s508_s30 + $0x4] sm:$0xf]  ;;  %v301_v15 = vld [vmem:[%s508_s30 + $0x8] sm:$0xf] }
  0x14   : > { %v307_v7 = vmax.bf16 %v299_v5, %v291_v4  ;;  %v308_v12 = vmax.bf16 %v300_v10, %v292_v9  ;;  %v309_v18 = vmax.bf16 %v301_v15, %v293_v14  ;;  %v270_v19 = vld [vmem:[%s493_s21 + $0xc] sm:$0xf]  ;;  %v271_v25 = vld [vmem:[%s493_s21 + $0x10] sm:$0xf]  ;;  %v272_v32 = vld [vmem:[%s493_s21 + $0x14] sm:$0xf] }
  0x15   : > { %v278_v20 = vld [vmem:[%s498_s24 + $0xc] sm:$0xf]  ;;  %v279_v26 = vld [vmem:[%s498_s24 + $0x10] sm:$0xf]  ;;  %v280_v34 = vld [vmem:[%s498_s24 + $0x14] sm:$0xf] }
  0x16   : > { %v315_v16 = vmax.bf16 %v307_v7, %v283_v3  ;;  %v294_v21 = vld [vmem:[%s503_s27 + $0xc] sm:$0xf]  ;;  %v316_v22 = vmax.bf16 %v308_v12, %v284_v8  ;;  %v286_v23 = vmax.bf16 %v278_v20, %v270_v19  ;;  %v317_v27 = vmax.bf16 %v309_v18, %v285_v17  ;;  %v295_v30 = vld [vmem:[%s503_s27 + $0x10] sm:$0xf]  ;;  %v296_v35 = vld [vmem:[%s503_s27 + $0x14] sm:$0xf] }
  0x17   : > { %v302_v24 = vld [vmem:[%s508_s30 + $0xc] sm:$0xf]  ;;  %v287_v29 = vmax.bf16 %v279_v26, %v271_v25  ;;  %v303_v31 = vld [vmem:[%s508_s30 + $0x10] sm:$0xf]  ;;  %v304_v36 = vld [vmem:[%s508_s30 + $0x14] sm:$0xf]  ;;  %v288_v38 = vmax.bf16 %v280_v34, %v272_v32 }
  0x18   : > { %324 = vst.msk [vmem:[%s522_s7] sm:$0xf] %vm323_vm0, %v315_v16  ;;  %v310_v28 = vmax.bf16 %v302_v24, %v294_v21  ;;  %325 = vst.msk [vmem:[%s522_s7 + $0x4] sm:$0xf] %vm323_vm0, %v316_v22  ;;  %v311_v33 = vmax.bf16 %v303_v31, %v295_v30  ;;  %v312_v39 = vmax.bf16 %v304_v36, %v296_v35  ;;  %v273_v40 = vld [vmem:[%s493_s21 + $0x18] sm:$0xf] }
  0x19   : > { %326 = vst.msk [vmem:[%s522_s7 + $0x8] sm:$0xf] %vm323_vm0, %v317_v27  ;;  %v281_v41 = vld [vmem:[%s498_s24 + $0x18] sm:$0xf]  ;;  %v274_v46 = vld [vmem:[%s493_s21 + $0x1c] sm:$0xf] }
  0x1a   : > { %v318_v37 = vmax.bf16 %v310_v28, %v286_v23  ;;  %v297_v42 = vld [vmem:[%s503_s27 + $0x18] sm:$0xf]  ;;  %v319_v43 = vmax.bf16 %v311_v33, %v287_v29  ;;  %v289_v44 = vmax.bf16 %v281_v41, %v273_v40  ;;  %v282_v47 = vld [vmem:[%s498_s24 + $0x1c] sm:$0xf]  ;;  %v320_v48 = vmax.bf16 %v312_v39, %v288_v38 }
  0x1b   : > { %v305_v45 = vld [vmem:[%s508_s30 + $0x18] sm:$0xf]  ;;  %v290_v50 = vmax.bf16 %v282_v47, %v274_v46  ;;  %v298_v51 = vld [vmem:[%s503_s27 + $0x1c] sm:$0xf] }
  0x1c   : > { %327 = vst.msk [vmem:[%s522_s7 + $0xc] sm:$0xf] %vm323_vm0, %v318_v37  ;;  %v313_v49 = vmax.bf16 %v305_v45, %v297_v42  ;;  %v306_v52 = vld [vmem:[%s508_s30 + $0x1c] sm:$0xf]  ;;  %328 = vst.msk [vmem:[%s522_s7 + $0x10] sm:$0xf] %vm323_vm0, %v319_v43 }
  0x1d   : > { %v314_v53 = vmax.bf16 %v306_v52, %v298_v51  ;;  %329 = vst.msk [vmem:[%s522_s7 + $0x14] sm:$0xf] %vm323_vm0, %v320_v48 }
  0x1e   : > { %v321_v54 = vmax.bf16 %v313_v49, %v289_v44 }
  0x1f   : > { %v322_v55 = vmax.bf16 %v314_v53, %v290_v50 }
  0x20   : > { %330 = vst.msk [vmem:[%s522_s7 + $0x18] sm:$0xf] %vm323_vm0, %v321_v54 }
  0x21   : > { %331 = vst.msk [vmem:[%s522_s7 + $0x1c] sm:$0xf] %vm323_vm0, %v322_v55 }
  0x22 PF: > { %s14_s15 = sadd.s32 1, %s455_s15  }
  0x23   : > { %p11_p4 = scmp.ge.s32.totalorder %s14_s15, 4  }
  0x25   :  { %13 = sbr.rel (!%p11_p4) target bundleno = 1 (0x1), region = 75 }

// kernel: _lambda_.27
= control target key start
LH: loop header
LB: loop body
LE: loop exit
PB: predicated region body
PF: predicated region fallthrough
CT: control target
= control target key end

     0   :  { %s1233_s12 = smov 0   ;;  %s1389_s0 = inlined_call_operand.vmem [shape: bf16[128,576], index: 0, kind: input, shape index: {}]   ;;  %s1390_s1 = inlined_call_operand.vmem [shape: bf16[576,128], index: 1, kind: input, shape index: {}]   ;;  %s1391_s2 = inlined_call_operand.vmem [shape: f32[1,128], index: 2, kind: input, shape index: {}]   ;;  %s1392_s3 = inlined_call_operand.vmem [shape: bf16[128,128], index: 3, kind: output, shape index: {}]  }
   0x1 LB: > { %s909_s13 = sadd.s32 4294967295, %s1211_s12   ;;  %p913_p0 = scmp.ge.s32.totalorder %s1211_s12, 1  ;;  %s1211_s12 = sphi %s1233_s12, %s13_s12  }
   0x2   : > { %p139_p1 = scmp.lt.s32.totalorder %s1211_s12, 3 }
   0x4   : > { %p140_p2 = pnand %p913_p0, %p139_p1 }
   0x5   : > { %v1141_v0 = vld [vmem:[%s1390_s1 + $0x40] sm:$0xff] (!%p140_p2)   ;;  %v1145_v4 = vld [vmem:[%s1390_s1 + $0x48] sm:$0xff] (!%p140_p2)   ;;  %v1149_v8 = vld [vmem:[%s1390_s1 + $0x50] sm:$0xff] (!%p140_p2)   ;;  %s914_s19 = sshll.u32 (!%p140_p2), %s909_s13, 3  ;;  %vm597_vm0 = vcmask (!%p140_p2), 523264  }
   0x6   : > { %143 = sbr.rel (%p140_p2) target bundleno = 294 (0x126), region = 32  ;;  %v1142_v1 = vld [vmem:[%s1390_s1 + $0xc0] sm:$0xff] (!%p140_p2)   ;;  %1020 = vmatprep.subr.bf16.mxu0 (!%p140_p2), %v1141_v0  ;;  %v1146_v5 = vld [vmem:[%s1390_s1 + $0xc8] sm:$0xff] (!%p140_p2)   ;;  %v1150_v9 = vld [vmem:[%s1390_s1 + $0xd0] sm:$0xff] (!%p140_p2)   ;;  %p165_p3 = scmp.lt.s32.totalorder (!%p140_p2), %s914_s19, 15 }
   0x7   : > { %v1143_v2 = vld [vmem:[%s1390_s1] sm:$0xff] (!%p140_p2)   ;;  %1060 = vmatprep.subr.bf16.mxu1 (!%p140_p2), %v1142_v1  ;;  %v1147_v6 = vld [vmem:[%s1390_s1 + $0x8] sm:$0xff] (!%p140_p2)   ;;  %v1151_v10 = vld [vmem:[%s1390_s1 + $0x10] sm:$0xff] (!%p140_p2)  }
   0x8   : > { %v1144_v3 = vld [vmem:[%s1390_s1 + $0x80] sm:$0xff] (!%p140_p2)   ;;  %1021 = vmatpush3.bf16.msra.mxu0 (!%p140_p2), %v1143_v2  ;;  %v1148_v7 = vld [vmem:[%s1390_s1 + $0x88] sm:$0xff] (!%p140_p2)   ;;  %v1152_v11 = vld [vmem:[%s1390_s1 + $0x90] sm:$0xff] (!%p140_p2)  }
   0x9   : > { %1061 = vmatpush3.bf16.msra.mxu1 (!%p140_p2), %v1144_v3  ;;  %1022 = vmatprep.subr.bf16.mxu0 (!%p140_p2), %v1145_v4  ;;  %v1153_v12 = vld [vmem:[%s1390_s1 + $0x58] sm:$0xff] (!%p140_p2)   ;;  %v1157_v16 = vld [vmem:[%s1390_s1 + $0x60] sm:$0xff] (!%p140_p2)   ;;  %v1161_v20 = vld [vmem:[%s1390_s1 + $0x68] sm:$0xff] (!%p140_p2)  }
   0xa   : > { %1062 = vmatprep.subr.bf16.mxu1 (!%p140_p2), %v1146_v5  ;;  %v1154_v13 = vld [vmem:[%s1390_s1 + $0xd8] sm:$0xff] (!%p140_p2)   ;;  %v1158_v17 = vld [vmem:[%s1390_s1 + $0xe0] sm:$0xff] (!%p140_p2)   ;;  %v1162_v21 = vld [vmem:[%s1390_s1 + $0xe8] sm:$0xff] (!%p140_p2)  }
   0xb   : > { %v1155_v14 = vld [vmem:[%s1390_s1 + $0x18] sm:$0xff] (!%p140_p2)   ;;  %v1159_v18 = vld [vmem:[%s1390_s1 + $0x20] sm:$0xff] (!%p140_p2)   ;;  %v1163_v22 = vld [vmem:[%s1390_s1 + $0x28] sm:$0xff] (!%p140_p2)  }
   0xc   : > { %1023 = vmatpush3.bf16.msra.mxu0 (!%p140_p2), %v1147_v6  ;;  %v1156_v15 = vld [vmem:[%s1390_s1 + $0x98] sm:$0xff] (!%p140_p2)   ;;  %v1160_v19 = vld [vmem:[%s1390_s1 + $0xa0] sm:$0xff] (!%p140_p2)   ;;  %v1164_v23 = vld [vmem:[%s1390_s1 + $0xa8] sm:$0xff] (!%p140_p2)  }
   0xd   : > { %1063 = vmatpush3.bf16.msra.mxu1 %v1148_v7  ;;  %1024 = vmatprep.subr.bf16.mxu0 %v1149_v8  ;;  %s1394_s19 = smov (!%p165_p3, %s914_s19), 15  ;;  %v1165_v24 = vld [vmem:[%s1390_s1 + $0x70] sm:$0xff]   ;;  %v1169_v28 = vld [vmem:[%s1390_s1 + $0x78] sm:$0xff]   ;;  %v1179_v36 = vld [vmem:[%s1390_s1 + $0x100] sm:$0xff]  }
   0xe   : > { %1064 = vmatprep.subr.bf16.mxu1 %v1150_v9  ;;  %v1166_v25 = vld [vmem:[%s1390_s1 + $0xf0] sm:$0xff]   ;;  %s1132_s16 = smul.u32 20, %s1394_s19  ;;  %v1170_v29 = vld [vmem:[%s1390_s1 + $0xf8] sm:$0xff]   ;;  %v1186_v39 = vld [vmem:[%s1390_s1 + $0x108] sm:$0xff]   ;;  %s917_s17 = sshll.u32 %s1394_s19, 2 }
   0xf   : > { %v1167_v26 = vld [vmem:[%s1390_s1 + $0x30] sm:$0xff]   ;;  %v1171_v30 = vld [vmem:[%s1390_s1 + $0x38] sm:$0xff]   ;;  %v918_v58 = vld [vmem:[%s1391_s2] ss:$0 sm:$0xff]  ;;  %s175_s21 = scalar_lea.vmem %s1392_s3, %s917_s17 }
  0x10   : > { %1025 = vmatpush3.bf16.msra.mxu0 %v1151_v10  ;;  %v1168_v27 = vld [vmem:[%s1390_s1 + $0xb0] sm:$0xff]   ;;  %s1339_s13 = scalar_lea.vmem %s1389_s0, %s1132_s16  ;;  %v1172_v31 = vld [vmem:[%s1390_s1 + $0xb8] sm:$0xff]  }
  0x11   : > { %1065 = vmatpush3.bf16.msra.mxu1 %v1152_v11  ;;  %1026 = vmatprep.subr.bf16.mxu0 %v1153_v12  ;;  %v1173_v32 = vld [vmem:[%s1339_s13] ss:$20 sps:$4 sm:$0xff]   ;;  %v1175_v33 = vld [vmem:[%s1339_s13 + $0x4] ss:$20 sps:$4 sm:$0xff]   ;;  %v1176_v34 = vld [vmem:[%s1339_s13 + $0x8] ss:$20 sps:$4 sm:$0xff]  }
  0x12   : > { %1066 = vmatprep.subr.bf16.mxu1 %v1154_v13  ;;  %v1178_v35 = vld [vmem:[%s1339_s13 + $0xc] ss:$20 sps:$4 sm:$0xff]   ;;  %642 = vmatprep.mubr.bf16.mxu0 %v1175_v33  ;;  %v1182_v38 = vld [vmem:[%s1339_s13 + $0x34] ss:$20 sps:$4 sm:$0xff]   ;;  %v1185_v41 = vld [vmem:[%s1339_s13 + $0x30] ss:$20 sps:$4 sm:$0xff]  }
  0x13   : > { %707 = vmatprep.mubr.bf16.mxu1 %v1178_v35  ;;  %v1180_v37 = vld [vmem:[%s1339_s13 + $0x2c] ss:$20 sps:$4 sm:$0xff]   ;;  %v1184_v40 = vld [vmem:[%s1339_s13 + $0x28] ss:$20 sps:$4 sm:$0xff]   ;;  %v1193_v44 = vld [vmem:[%s1390_s1 + $0x110] sm:$0xff]  }
  0x14   : > { %1027 = vmatpush3.bf16.msra.mxu0 %v1155_v14  ;;  %v1187_v42 = vld [vmem:[%s1339_s13 + $0x54] ss:$20 sps:$4 sm:$0xff]   ;;  %v1189_v43 = vld [vmem:[%s1339_s13 + $0x5c] ss:$20 sps:$4 sm:$0xff]   ;;  %v1192_v47 = vld [vmem:[%s1339_s13 + $0x58] ss:$20 sps:$4 sm:$0xff]  }
  0x15   : > { %1067 = vmatpush3.bf16.msra.mxu1 %v1156_v15  ;;  %1028 = vmatprep.subr.bf16.mxu0 %v1157_v16  ;;  %v1200_v45 = vld [vmem:[%s1390_s1 + $0x118] sm:$0xff]   ;;  %v1191_v46 = vld [vmem:[%s1339_s13 + $0x50] ss:$20 sps:$4 sm:$0xff]   ;;  %v1199_v51 = vld [vmem:[%s1339_s13 + $0x80] ss:$20 sps:$4 sm:$0xff]  }
  0x16   : > { %1068 = vmatprep.subr.bf16.mxu1 %v1158_v17  ;;  %v1194_v48 = vld [vmem:[%s1339_s13 + $0x7c] ss:$20 sps:$4 sm:$0xff]   ;;  %v1196_v49 = vld [vmem:[%s1339_s13 + $0x84] ss:$20 sps:$4 sm:$0xff]   ;;  %v1202_v53 = vld [vmem:[%s1339_s13 + $0x60] ss:$20 sps:$4 sm:$0xff]  }
  0x17   : > { %v1198_v50 = vld [vmem:[%s1339_s13 + $0x78] ss:$20 sps:$4 sm:$0xff]   ;;  %v1201_v52 = vld [vmem:[%s1339_s13 + $0x10] ss:$20 sps:$4 sm:$0xff]   ;;  %v1204_v55 = vld [vmem:[%s1339_s13 + $0x88] ss:$20 sps:$4 sm:$0xff]  }
  0x18   : > { %1029 = vmatpush3.bf16.msra.mxu0 %v1159_v18  ;;  %v1203_v54 = vld [vmem:[%s1339_s13 + $0x38] ss:$20 sps:$4 sm:$0xff]  }
  0x19   : > { %1069 = vmatpush3.bf16.msra.mxu1 %v1160_v19  ;;  %1030 = vmatprep.subr.bf16.mxu0 %v1161_v20 }
  0x1a   : > { %1070 = vmatprep.subr.bf16.mxu1 %v1162_v21 }
  0x1c   : > { %1031 = vmatpush3.bf16.msra.mxu0 %v1163_v22 }
  0x1d   : > { %1071 = vmatpush3.bf16.msra.mxu1 %v1164_v23  ;;  %1032 = vmatprep.subr.bf16.mxu0 %v1165_v24 }
  0x1e   : > { %1072 = vmatprep.subr.bf16.mxu1 %v1166_v25 }
  0x20   : > { %1033 = vmatpush3.bf16.msra.mxu0 %v1167_v26 }
  0x21   : > { %1073 = vmatpush3.bf16.msra.mxu1 %v1168_v27  ;;  %1034 = vmatprep.subr.bf16.mxu0 %v1169_v28 }
  0x22   : > { %1074 = vmatprep.subr.bf16.mxu1 %v1170_v29 }
  0x24   : > { %1035 = vmatpush3.bf16.msra.mxu0 %v1171_v30 }
  0x25   : > { %1075 = vmatpush3.bf16.msra.mxu1 %v1172_v31  ;;  %1108 = vmatprep.subr.bf16.mxu0 %v1179_v36 }
  0x26   : > { %1124 = vmatprep.subr.bf16.mxu1 %v1179_v36 }
  0x27   : > { %643 = vmatmul.mubr.bf16.vlgmr.msra.gmra.mrb[0].mxu0 %v1173_v32 }
  0x28   : > { %708 = vmatmul.mubr.bf16.vlgmr.msra.gmra.mrb[0].mxu1 %v1176_v34  ;;  %1109 = vmatpush3.bf16.msra.mxu0 %v1179_v36 }
  0x29   : > { %1128 = vmatpush3.bf16.msra.mxu1 %v1179_v36  ;;  %650 = vmatprep.mubr.bf16.mxu0 %v1180_v37 }
  0x2a   : > { %715 = vmatprep.mubr.bf16.mxu1 %v1182_v38  ;;  %1110 = vmatprep.subr.bf16.mxu0 %v1186_v39 }
  0x2b   : > { %1125 = vmatprep.subr.bf16.mxu1 %v1186_v39 }
  0x2c   : > { %1111 = vmatpush3.bf16.msra.mxu0 %v1186_v39 }
  0x2d   : > { %1129 = vmatpush3.bf16.msra.mxu1 %v1186_v39  ;;  %1112 = vmatprep.subr.bf16.mxu0 %v1193_v44 }
  0x2e   : > { %1126 = vmatprep.subr.bf16.mxu1 %v1193_v44 }
  0x2f   : > { %651 = vmatmul.mubr.bf16.gmra.mrb[4].mxu0 %v1184_v40 }
  0x30   : > { %716 = vmatmul.mubr.bf16.gmra.mrb[4].mxu1 %v1185_v41  ;;  %658 = vmatprep.mubr.bf16.mxu0 %v1187_v42 }
  0x31   : > { %723 = vmatprep.mubr.bf16.mxu1 %v1189_v43  ;;  %1113 = vmatpush3.bf16.msra.mxu0 %v1193_v44 }
  0x32   : > { %1130 = vmatpush3.bf16.msra.mxu1 %v1193_v44  ;;  %1114 = vmatprep.subr.bf16.mxu0 %v1200_v45 }
  0x33   : > { %1127 = vmatprep.subr.bf16.mxu1 %v1200_v45 }
  0x35   : > { %1115 = vmatpush3.bf16.msra.mxu0 %v1200_v45 }
  0x36   : > { %1131 = vmatpush3.bf16.msra.mxu1 %v1200_v45 }
  0x37   : > { %659 = vmatmul.mubr.bf16.gmra.mrb[8].mxu0 %v1191_v46 }
  0x38   : > { %724 = vmatmul.mubr.bf16.gmra.mrb[8].mxu1 %v1192_v47  ;;  %666 = vmatprep.mubr.bf16.mxu0 %v1194_v48 }
  0x39   : > { %731 = vmatprep.mubr.bf16.mxu1 %v1196_v49 }
  0x3f   : > { %667 = vmatmul.mubr.bf16.gmra.mrb[12].mxu0 %v1198_v50 }
  0x40   : > { %732 = vmatmul.mubr.bf16.gmra.mrb[12].mxu1 %v1199_v51  ;;  %1116 = vmatprep.mubr.msk.bf16.mxu0 %vm597_vm0, %v1201_v52 }
  0x41   : > { %1120 = vmatprep.mubr.msk.bf16.mxu1 %vm597_vm0, %v1202_v53 }
  0x47   : > { %1117 = vmatmul.mubr.msk.bf16.vlgmr.msra.gmra.mrb[16].mxu0 %vm597_vm0, %v1203_v54 }
  0x48   : > { %1121 = vmatmul.mubr.msk.bf16.vlgmr.msra.gmra.mrb[16].mxu1 %vm597_vm0, %v1204_v55 }
  0xfa   : > { %v1036_v56 = vpop.f32.mrb[0].mxu0 }
  0xfb   : > { %v1076_v57 = vpop.f32.mrb[0].mxu1  ;;  %v1037_v59 = vpop.f32.mrb[1].mxu0 }
  0xfc   : > { %v1038_v60 = vadd.f32 %v1037_v59, %v1036_v56  ;;  %v1077_v61 = vpop.f32.mrb[1].mxu1  ;;  %v1039_v62 = vpop.f32.mrb[2].mxu0 }
  0xfd   : > { %v1078_v63 = vadd.f32 %v1077_v61, %v1076_v57  ;;  %v1079_v0 = vpop.f32.mrb[2].mxu1  ;;  %v1040_v1 = vpop.f32.mrb[3].mxu0 }
  0xfe   : > { %v645_v2 = vadd.f32 %v1038_v60, %v918_v58  ;;  %v1041_v3 = vadd.f32 %v1040_v1, %v1039_v62  ;;  %v1080_v4 = vpop.f32.mrb[3].mxu1 }
  0xff   : > { %v1081_v5 = vadd.f32 %v1080_v4, %v1079_v0 }
 0x100   : > { %v648_v6 = vadd.f32 %v1041_v3, %v918_v58  ;;  %v710_v7 = vadd.f32 %v1078_v63, %v645_v2 }
 0x102   : > { %v1042_v8 = vpop.f32.mrb[4].mxu0  ;;  %v713_v9 = vadd.f32 %v1081_v5, %v648_v6 }
 0x103   : > { %v1082_v10 = vpop.f32.mrb[4].mxu1  ;;  %v1043_v11 = vpop.f32.mrb[5].mxu0 }
 0x104   : > { %v1044_v12 = vadd.f32 %v1043_v11, %v1042_v8  ;;  %v1083_v13 = vpop.f32.mrb[5].mxu1  ;;  %v1045_v14 = vpop.f32.mrb[6].mxu0 }
 0x105   : > { %v1084_v15 = vadd.f32 %v1083_v13, %v1082_v10  ;;  %v1085_v16 = vpop.f32.mrb[6].mxu1  ;;  %v1046_v17 = vpop.f32.mrb[7].mxu0 }
 0x106   : > { %v653_v18 = vadd.f32 %v1044_v12, %v918_v58  ;;  %v1047_v19 = vadd.f32 %v1046_v17, %v1045_v14  ;;  %v1086_v20 = vpop.f32.mrb[7].mxu1 }
 0x107   : > { %v1087_v21 = vadd.f32 %v1086_v20, %v1085_v16 }
 0x108   : > { %v656_v22 = vadd.f32 %v1047_v19, %v918_v58  ;;  %v718_v23 = vadd.f32 %v1084_v15, %v653_v18 }
 0x10a   : > { %v1048_v24 = vpop.f32.mrb[8].mxu0  ;;  %v721_v25 = vadd.f32 %v1087_v21, %v656_v22 }
 0x10b   : > { %v1088_v26 = vpop.f32.mrb[8].mxu1  ;;  %v1049_v27 = vpop.f32.mrb[9].mxu0 }
 0x10c   : > { %v1050_v28 = vadd.f32 %v1049_v27, %v1048_v24  ;;  %v1089_v29 = vpop.f32.mrb[9].mxu1  ;;  %v1051_v30 = vpop.f32.mrb[10].mxu0 }
 0x10d   : > { %v1090_v31 = vadd.f32 %v1089_v29, %v1088_v26  ;;  %v1091_v32 = vpop.f32.mrb[10].mxu1  ;;  %v1052_v33 = vpop.f32.mrb[11].mxu0 }
 0x10e   : > { %v661_v34 = vadd.f32 %v1050_v28, %v918_v58  ;;  %v1053_v35 = vadd.f32 %v1052_v33, %v1051_v30  ;;  %v1092_v36 = vpop.f32.mrb[11].mxu1 }
 0x10f   : > { %v1093_v37 = vadd.f32 %v1092_v36, %v1091_v32 }
 0x110   : > { %v664_v38 = vadd.f32 %v1053_v35, %v918_v58  ;;  %v726_v39 = vadd.f32 %v1090_v31, %v661_v34 }
 0x112   : > { %v1054_v40 = vpop.f32.mrb[12].mxu0  ;;  %v729_v41 = vadd.f32 %v1093_v37, %v664_v38 }
 0x113   : > { %v1094_v42 = vpop.f32.mrb[12].mxu1  ;;  %v1055_v43 = vpop.f32.mrb[13].mxu0 }
 0x114   : > { %v1056_v44 = vadd.f32 %v1055_v43, %v1054_v40  ;;  %v1095_v45 = vpop.f32.mrb[13].mxu1  ;;  %v1057_v46 = vpop.f32.mrb[14].mxu0 }
 0x115   : > { %v1096_v47 = vadd.f32 %v1095_v45, %v1094_v42  ;;  %v1097_v48 = vpop.f32.mrb[14].mxu1  ;;  %v1058_v49 = vpop.f32.mrb[15].mxu0 }
 0x116   : > { %v669_v50 = vadd.f32 %v1056_v44, %v918_v58  ;;  %v1059_v51 = vadd.f32 %v1058_v49, %v1057_v46  ;;  %v1098_v52 = vpop.f32.mrb[15].mxu1 }
 0x117   : > { %v1099_v53 = vadd.f32 %v1098_v52, %v1097_v48 }
 0x118   : > { %v672_v54 = vadd.f32 %v1059_v51, %v918_v58  ;;  %v734_v55 = vadd.f32 %v1096_v47, %v669_v50 }
 0x11a   : > { %v1118_v56 = vpop.f32.mrb[16].mxu0  ;;  %v737_v57 = vadd.f32 %v1099_v53, %v672_v54 }
 0x11b   : > { %v783_v59 = vadd.f32 %v1118_v56, %v718_v23  ;;  %v1122_v60 = vpop.f32.mrb[16].mxu1  ;;  %v774_v61 = vpop.f32.mrb[17].mxu0 }
 0x11c   : > { %v799_v62 = vadd.f32 %v1122_v60, %v734_v55  ;;  %v775_v63 = vadd.f32 %v774_v61, %v710_v7  ;;  %v790_v0 = vpop.f32.mrb[17].mxu1  ;;  %v1119_v1 = vpop.f32.mrb[18].mxu0 }
 0x11d   : > { %v791_v2 = vadd.f32 %v790_v0, %v726_v39  ;;  %v786_v3 = vadd.f32 %v1119_v1, %v721_v25  ;;  %v1123_v4 = vpop.f32.mrb[18].mxu1  ;;  %v777_v5 = vpop.f32.mrb[19].mxu0  ;;  %v807_v11 = vmax.f32 %v783_v59, 0.0 }
 0x11e   : > { %v802_v6 = vadd.f32 %v1123_v4, %v737_v57  ;;  %v778_v8 = vadd.f32 %v777_v5, %v713_v9  ;;  %v793_v10 = vpop.f32.mrb[19].mxu1  ;;  %v811_v13 = vmax.f32 %v799_v62, 0.0  ;;  %v805_v14 = vmax.f32 %v775_v63, 0.0 }
 0x11f   : > { %v808_v58 = vmax.f32 %v786_v3, 0.0  ;;  %v794_v12 = vadd.f32 %v793_v10, %v729_v41  ;;  %v809_v16 = vmax.f32 %v791_v2, 0.0 }
 0x120   : > { %v812_v7 = vmax.f32 %v802_v6, 0.0  ;;  %v806_v15 = vmax.f32 %v778_v8, 0.0 }
 0x121   : > { %v1005_v17 = vpack.c.bf16 %v808_v58, %v807_v11  ;;  %v810_v18 = vmax.f32 %v794_v12, 0.0 }
 0x122   : > { %v1015_v19 = vpack.c.bf16 %v812_v7, %v811_v13  ;;  %v1000_v20 = vpack.c.bf16 %v806_v15, %v805_v14 }
 0x123   : > { %1017 = vst [vmem:[%s175_s21 + $0x8] sm:$0xff] %v1005_v17   ;;  %v1010_v21 = vpack.c.bf16 %v810_v18, %v809_v16 }
 0x124   : > { %1019 = vst [vmem:[%s175_s21 + $0x18] sm:$0xff] %v1015_v19   ;;  %1001 = vst [vmem:[%s175_s21] sm:$0xff] %v1000_v20  }
 0x125   : > { %1018 = vst [vmem:[%s175_s21 + $0x10] sm:$0xff] %v1010_v21  }
 0x126 PF: > { %s13_s12 = sadd.s32 1, %s1211_s12  }
 0x127   : > { %p10_p4 = scmp.ge.s32.totalorder %s13_s12, 4  }
 0x129   :  { %12 = sbr.rel (!%p10_p4) target bundleno = 1 (0x1), region = 62 }

// kernel: _lambda_.28
= control target key start
LH: loop header
LB: loop body
LE: loop exit
PB: predicated region body
PF: predicated region fallthrough
CT: control target
= control target key end

     0   :  { %s1946_s12 = smov 0   ;;  %s2226_s0 = inlined_call_operand.vmem [shape: bf16[128,1152], index: 0, kind: input, shape index: {}]   ;;  %s2227_s1 = inlined_call_operand.vmem [shape: bf16[1152,128], index: 1, kind: input, shape index: {}]   ;;  %s2228_s2 = inlined_call_operand.vmem [shape: f32[1,128], index: 2, kind: input, shape index: {}]   ;;  %s2229_s3 = inlined_call_operand.vmem [shape: bf16[128,128], index: 3, kind: output, shape index: {}]  }
   0x1 LB: > { %s1414_s13 = sadd.s32 4294967295, %s1924_s12   ;;  %p1418_p0 = scmp.ge.s32.totalorder %s1924_s12, 1  ;;  %s1924_s12 = sphi %s1946_s12, %s13_s12  }
   0x2   : > { %p139_p1 = scmp.lt.s32.totalorder %s1924_s12, 3 }
   0x4   : > { %p140_p2 = pnand %p1418_p0, %p139_p1 }
   0x5   : > { %v1794_v0 = vld [vmem:[%s2227_s1 + $0x40] sm:$0xff] (!%p140_p2)   ;;  %v1798_v4 = vld [vmem:[%s2227_s1 + $0x48] sm:$0xff] (!%p140_p2)   ;;  %v1802_v8 = vld [vmem:[%s2227_s1 + $0x50] sm:$0xff] (!%p140_p2)   ;;  %s1419_s19 = sshll.u32 (!%p140_p2), %s1414_s13, 3 }
   0x6   : > { %143 = sbr.rel (%p140_p2) target bundleno = 327 (0x147), region = 32  ;;  %v1795_v1 = vld [vmem:[%s2227_s1 + $0xc0] sm:$0xff] (!%p140_p2)   ;;  %1573 = vmatprep.subr.bf16.mxu0 (!%p140_p2), %v1794_v0  ;;  %v1799_v5 = vld [vmem:[%s2227_s1 + $0xc8] sm:$0xff] (!%p140_p2)   ;;  %v1803_v9 = vld [vmem:[%s2227_s1 + $0xd0] sm:$0xff] (!%p140_p2)   ;;  %p165_p3 = scmp.lt.s32.totalorder (!%p140_p2), %s1419_s19, 15 }
   0x7   : > { %v1796_v2 = vld [vmem:[%s2227_s1] sm:$0xff] (!%p140_p2)   ;;  %1613 = vmatprep.subr.bf16.mxu1 (!%p140_p2), %v1795_v1  ;;  %v1800_v6 = vld [vmem:[%s2227_s1 + $0x8] sm:$0xff] (!%p140_p2)   ;;  %v1804_v10 = vld [vmem:[%s2227_s1 + $0x10] sm:$0xff] (!%p140_p2)  }
   0x8   : > { %v1797_v3 = vld [vmem:[%s2227_s1 + $0x80] sm:$0xff] (!%p140_p2)   ;;  %1574 = vmatpush3.bf16.msra.mxu0 (!%p140_p2), %v1796_v2  ;;  %v1801_v7 = vld [vmem:[%s2227_s1 + $0x88] sm:$0xff] (!%p140_p2)   ;;  %v1805_v11 = vld [vmem:[%s2227_s1 + $0x90] sm:$0xff] (!%p140_p2)  }
   0x9   : > { %1614 = vmatpush3.bf16.msra.mxu1 (!%p140_p2), %v1797_v3  ;;  %1575 = vmatprep.subr.bf16.mxu0 (!%p140_p2), %v1798_v4  ;;  %v1806_v12 = vld [vmem:[%s2227_s1 + $0x58] sm:$0xff] (!%p140_p2)   ;;  %v1810_v16 = vld [vmem:[%s2227_s1 + $0x60] sm:$0xff] (!%p140_p2)   ;;  %v1814_v20 = vld [vmem:[%s2227_s1 + $0x68] sm:$0xff] (!%p140_p2)  }
   0xa   : > { %1615 = vmatprep.subr.bf16.mxu1 (!%p140_p2), %v1799_v5  ;;  %v1807_v13 = vld [vmem:[%s2227_s1 + $0xd8] sm:$0xff] (!%p140_p2)   ;;  %v1811_v17 = vld [vmem:[%s2227_s1 + $0xe0] sm:$0xff] (!%p140_p2)   ;;  %v1815_v21 = vld [vmem:[%s2227_s1 + $0xe8] sm:$0xff] (!%p140_p2)  }
   0xb   : > { %v1808_v14 = vld [vmem:[%s2227_s1 + $0x18] sm:$0xff] (!%p140_p2)   ;;  %v1812_v18 = vld [vmem:[%s2227_s1 + $0x20] sm:$0xff] (!%p140_p2)   ;;  %v1816_v22 = vld [vmem:[%s2227_s1 + $0x28] sm:$0xff] (!%p140_p2)  }
   0xc   : > { %1576 = vmatpush3.bf16.msra.mxu0 (!%p140_p2), %v1800_v6  ;;  %v1809_v15 = vld [vmem:[%s2227_s1 + $0x98] sm:$0xff] (!%p140_p2)   ;;  %v1813_v19 = vld [vmem:[%s2227_s1 + $0xa0] sm:$0xff] (!%p140_p2)   ;;  %v1817_v23 = vld [vmem:[%s2227_s1 + $0xa8] sm:$0xff] (!%p140_p2)  }
   0xd   : > { %1616 = vmatpush3.bf16.msra.mxu1 %v1801_v7  ;;  %1577 = vmatprep.subr.bf16.mxu0 %v1802_v8  ;;  %s2231_s19 = smov (!%p165_p3, %s1419_s19), 15  ;;  %v1818_v24 = vld [vmem:[%s2227_s1 + $0x70] sm:$0xff]   ;;  %v1822_v28 = vld [vmem:[%s2227_s1 + $0x78] sm:$0xff]   ;;  %v1832_v36 = vld [vmem:[%s2227_s1 + $0x140] sm:$0xff]  }
   0xe   : > { %1617 = vmatprep.subr.bf16.mxu1 %v1803_v9  ;;  %v1819_v25 = vld [vmem:[%s2227_s1 + $0xf0] sm:$0xff]   ;;  %s1785_s16 = smul.u32 36, %s2231_s19  ;;  %v1823_v29 = vld [vmem:[%s2227_s1 + $0xf8] sm:$0xff]   ;;  %v1833_v37 = vld [vmem:[%s2227_s1 + $0x1c0] sm:$0xff]  }
   0xf   : > { %v1820_v26 = vld [vmem:[%s2227_s1 + $0x30] sm:$0xff]   ;;  %v1824_v30 = vld [vmem:[%s2227_s1 + $0x38] sm:$0xff]   ;;  %v1834_v38 = vld [vmem:[%s2227_s1 + $0x100] sm:$0xff]  }
  0x10   : > { %1578 = vmatpush3.bf16.msra.mxu0 %v1804_v10  ;;  %v1821_v27 = vld [vmem:[%s2227_s1 + $0xb0] sm:$0xff]   ;;  %s2052_s13 = scalar_lea.vmem %s2226_s0, %s1785_s16  ;;  %v1825_v31 = vld [vmem:[%s2227_s1 + $0xb8] sm:$0xff]   ;;  %v1835_v39 = vld [vmem:[%s2227_s1 + $0x180] sm:$0xff]  }
  0x11   : > { %1618 = vmatpush3.bf16.msra.mxu1 %v1805_v11  ;;  %1579 = vmatprep.subr.bf16.mxu0 %v1806_v12  ;;  %v1826_v32 = vld [vmem:[%s2052_s13] ss:$36 sps:$4 sm:$0xff]   ;;  %v1829_v34 = vld [vmem:[%s2052_s13 + $0x8] ss:$36 sps:$4 sm:$0xff]   ;;  %v1842_v45 = vld [vmem:[%s2052_s13 + $0x54] ss:$36 sps:$4 sm:$0xff]  }
  0x12   : > { %1619 = vmatprep.subr.bf16.mxu1 %v1807_v13  ;;  %v1828_v33 = vld [vmem:[%s2052_s13 + $0x4] ss:$36 sps:$4 sm:$0xff]   ;;  %v1831_v35 = vld [vmem:[%s2052_s13 + $0xc] ss:$36 sps:$4 sm:$0xff]   ;;  %v1850_v52 = vld [vmem:[%s2227_s1 + $0x158] sm:$0xff]  }
  0x13   : > { %1017 = vmatprep.mubr.bf16.mxu0 %v1828_v33  ;;  %1082 = vmatprep.mubr.bf16.mxu1 %v1831_v35  ;;  %v1836_v40 = vld [vmem:[%s2227_s1 + $0x148] sm:$0xff]   ;;  %v1845_v47 = vld [vmem:[%s2052_s13 + $0x50] ss:$36 sps:$4 sm:$0xff]   ;;  %v1851_v53 = vld [vmem:[%s2227_s1 + $0x1d8] sm:$0xff]  }
  0x14   : > { %1580 = vmatpush3.bf16.msra.mxu0 %v1808_v14  ;;  %v1837_v41 = vld [vmem:[%s2227_s1 + $0x1c8] sm:$0xff]   ;;  %v1846_v48 = vld [vmem:[%s2227_s1 + $0x150] sm:$0xff]   ;;  %v1852_v54 = vld [vmem:[%s2227_s1 + $0x118] sm:$0xff]  }
  0x15   : > { %1620 = vmatpush3.bf16.msra.mxu1 %v1809_v15  ;;  %1581 = vmatprep.subr.bf16.mxu0 %v1810_v16  ;;  %v1838_v42 = vld [vmem:[%s2227_s1 + $0x108] sm:$0xff]   ;;  %v1847_v49 = vld [vmem:[%s2227_s1 + $0x1d0] sm:$0xff]   ;;  %v1853_v55 = vld [vmem:[%s2227_s1 + $0x198] sm:$0xff]  }
  0x16   : > { %1621 = vmatprep.subr.bf16.mxu1 %v1811_v17  ;;  %v1839_v43 = vld [vmem:[%s2227_s1 + $0x188] sm:$0xff]   ;;  %v1848_v50 = vld [vmem:[%s2227_s1 + $0x110] sm:$0xff]   ;;  %v1856_v57 = vld [vmem:[%s2052_s13 + $0x9c] ss:$36 sps:$4 sm:$0xff]  }
  0x17   : > { %v1840_v44 = vld [vmem:[%s2052_s13 + $0x4c] ss:$36 sps:$4 sm:$0xff]   ;;  %v1854_v56 = vld [vmem:[%s2052_s13 + $0x94] ss:$36 sps:$4 sm:$0xff]   ;;  %v1860_v60 = vld [vmem:[%s2227_s1 + $0x160] sm:$0xff]  }
  0x18   : > { %1582 = vmatpush3.bf16.msra.mxu0 %v1812_v18  ;;  %v1844_v46 = vld [vmem:[%s2052_s13 + $0x48] ss:$36 sps:$4 sm:$0xff]   ;;  %v1849_v51 = vld [vmem:[%s2227_s1 + $0x190] sm:$0xff]   ;;  %v1859_v59 = vld [vmem:[%s2052_s13 + $0x98] ss:$36 sps:$4 sm:$0xff]  }
  0x19   : > { %1622 = vmatpush3.bf16.msra.mxu1 %v1813_v19  ;;  %1583 = vmatprep.subr.bf16.mxu0 %v1814_v20  ;;  %v1858_v58 = vld [vmem:[%s2052_s13 + $0x90] ss:$36 sps:$4 sm:$0xff]   ;;  %v1861_v61 = vld [vmem:[%s2227_s1 + $0x1e0] sm:$0xff]   ;;  %v1864_v0 = vld [vmem:[%s2227_s1 + $0x168] sm:$0xff]  }
  0x1a   : > { %1623 = vmatprep.subr.bf16.mxu1 %v1815_v21  ;;  %v1862_v62 = vld [vmem:[%s2227_s1 + $0x120] sm:$0xff]   ;;  %v1865_v1 = vld [vmem:[%s2227_s1 + $0x1e8] sm:$0xff]   ;;  %v1872_v6 = vld [vmem:[%s2052_s13 + $0xd8] ss:$36 sps:$4 sm:$0xff]  }
  0x1b   : > { %v1863_v63 = vld [vmem:[%s2227_s1 + $0x1a0] sm:$0xff]   ;;  %v1866_v2 = vld [vmem:[%s2227_s1 + $0x128] sm:$0xff]   ;;  %v1874_v8 = vld [vmem:[%s2227_s1 + $0x170] sm:$0xff]  }
  0x1c   : > { %1584 = vmatpush3.bf16.msra.mxu0 %v1816_v22  ;;  %v1867_v3 = vld [vmem:[%s2227_s1 + $0x1a8] sm:$0xff]   ;;  %v1868_v4 = vld [vmem:[%s2052_s13 + $0xdc] ss:$36 sps:$4 sm:$0xff]   ;;  %v1875_v9 = vld [vmem:[%s2227_s1 + $0x1f0] sm:$0xff]  }
  0x1d   : > { %1624 = vmatpush3.bf16.msra.mxu1 %v1817_v23  ;;  %1585 = vmatprep.subr.bf16.mxu0 %v1818_v24  ;;  %v1870_v5 = vld [vmem:[%s2052_s13 + $0xe4] ss:$36 sps:$4 sm:$0xff]   ;;  %v1876_v10 = vld [vmem:[%s2227_s1 + $0x130] sm:$0xff]   ;;  %v1878_v12 = vld [vmem:[%s2227_s1 + $0x178] sm:$0xff]  }
  0x1e   : > { %1625 = vmatprep.subr.bf16.mxu1 %v1819_v25  ;;  %v1873_v7 = vld [vmem:[%s2052_s13 + $0xe0] ss:$36 sps:$4 sm:$0xff]   ;;  %v1877_v11 = vld [vmem:[%s2227_s1 + $0x1b0] sm:$0xff]   ;;  %v1879_v13 = vld [vmem:[%s2227_s1 + $0x1f8] sm:$0xff]  }
  0x1f   : > { %v1880_v14 = vld [vmem:[%s2227_s1 + $0x138] sm:$0xff]   ;;  %v1882_v16 = vld [vmem:[%s2052_s13 + $0x10] ss:$36 sps:$4 sm:$0xff]   ;;  %v1888_v20 = vld [vmem:[%s2227_s1 + $0x200] sm:$0xff]  }
  0x20   : > { %1586 = vmatpush3.bf16.msra.mxu0 %v1820_v26  ;;  %v1881_v15 = vld [vmem:[%s2227_s1 + $0x1b8] sm:$0xff]   ;;  %v1889_v21 = vld [vmem:[%s2227_s1 + $0x208] sm:$0xff]   ;;  %v1895_v25 = vld [vmem:[%s2052_s13 + $0x60] ss:$36 sps:$4 sm:$0xff]  }
  0x21   : > { %1626 = vmatpush3.bf16.msra.mxu1 %v1821_v27  ;;  %1587 = vmatprep.subr.bf16.mxu0 %v1822_v28  ;;  %v1884_v17 = vld [vmem:[%s2052_s13 + $0x14] ss:$36 sps:$4 sm:$0xff]   ;;  %v1887_v19 = vld [vmem:[%s2052_s13 + $0x1c] ss:$36 sps:$4 sm:$0xff]   ;;  %v1892_v23 = vld [vmem:[%s2052_s13 + $0x64] ss:$36 sps:$4 sm:$0xff]  }
  0x22   : > { %1627 = vmatprep.subr.bf16.mxu1 %v1823_v29  ;;  %v1885_v18 = vld [vmem:[%s2052_s13 + $0x18] ss:$36 sps:$4 sm:$0xff]   ;;  %v1896_v26 = vld [vmem:[%s2227_s1 + $0x210] sm:$0xff]   ;;  %v1898_v27 = vld [vmem:[%s2052_s13 + $0xa4] ss:$36 sps:$4 sm:$0xff]  }
  0x23   : > { %v1890_v22 = vld [vmem:[%s2052_s13 + $0x5c] ss:$36 sps:$4 sm:$0xff]   ;;  %v1900_v28 = vld [vmem:[%s2052_s13 + $0xac] ss:$36 sps:$4 sm:$0xff]  }
  0x24   : > { %1588 = vmatpush3.bf16.msra.mxu0 %v1824_v30  ;;  %v1894_v24 = vld [vmem:[%s2052_s13 + $0x58] ss:$36 sps:$4 sm:$0xff]   ;;  %v1902_v30 = vld [vmem:[%s2052_s13 + $0xa0] ss:$36 sps:$4 sm:$0xff]   ;;  %v1906_v33 = vld [vmem:[%s2052_s13 + $0xec] ss:$36 sps:$4 sm:$0xff]  }
  0x25   : > { %1628 = vmatpush3.bf16.msra.mxu1 %v1825_v31  ;;  %1653 = vmatprep.subr.bf16.mxu0 %v1832_v36  ;;  %v1897_v29 = vld [vmem:[%s2227_s1 + $0x218] sm:$0xff]   ;;  %v1903_v31 = vld [vmem:[%s2052_s13 + $0xa8] ss:$36 sps:$4 sm:$0xff]  }
  0x26   : > { %1693 = vmatprep.subr.bf16.mxu1 %v1833_v37  ;;  %v1905_v35 = vld [vmem:[%s2227_s1 + $0x228] sm:$0xff]   ;;  %v1912_v37 = vld [vmem:[%s2227_s1 + $0x230] sm:$0xff]  }
  0x27   : > { %1018 = vmatmul.mubr.bf16.vlgmr.msra.gmra.mrb[0].mxu0 %v1826_v32  ;;  %v1904_v32 = vld [vmem:[%s2227_s1 + $0x220] sm:$0xff]   ;;  %v1910_v36 = vld [vmem:[%s2052_s13 + $0xe8] ss:$36 sps:$4 sm:$0xff]  }
  0x28   : > { %1083 = vmatmul.mubr.bf16.vlgmr.msra.gmra.mrb[0].mxu1 %v1829_v34  ;;  %1654 = vmatpush3.bf16.msra.mxu0 %v1834_v38  ;;  %v1908_v34 = vld [vmem:[%s2052_s13 + $0xf4] ss:$36 sps:$4 sm:$0xff]  }
  0x29   : > { %1694 = vmatpush3.bf16.msra.mxu1 %v1835_v39  ;;  %1655 = vmatprep.subr.bf16.mxu0 %v1836_v40  ;;  %v1911_v38 = vld [vmem:[%s2052_s13 + $0xf0] ss:$36 sps:$4 sm:$0xff]   ;;  %v1914_v39 = vld [vmem:[%s2052_s13 + $0x20] ss:$36 sps:$4 sm:$0xff]  }
  0x2a   : > { %1695 = vmatprep.subr.bf16.mxu1 %v1837_v41  ;;  %1025 = vmatprep.mubr.bf16.mxu0 %v1840_v44  ;;  %v1915_v40 = vld [vmem:[%s2052_s13 + $0xb0] ss:$36 sps:$4 sm:$0xff]   ;;  %v1913_v41 = vld [vmem:[%s2227_s1 + $0x238] sm:$0xff]  }
  0x2b   : > { %1090 = vmatprep.mubr.bf16.mxu1 %v1842_v45 }
  0x2c   : > { %1656 = vmatpush3.bf16.msra.mxu0 %v1838_v42  ;;  %v1916_v42 = vld [vmem:[%s2052_s13 + $0x68] ss:$36 sps:$4 sm:$0xff]  }
  0x2d   : > { %1696 = vmatpush3.bf16.msra.mxu1 %v1839_v43  ;;  %1657 = vmatprep.subr.bf16.mxu0 %v1846_v48  ;;  %v1917_v43 = vld [vmem:[%s2052_s13 + $0xf8] ss:$36 sps:$4 sm:$0xff]   ;;  %s1422_s13 = sshll.u32 %s2231_s19, 2 }
  0x2e   : > { %1697 = vmatprep.subr.bf16.mxu1 %v1847_v49  ;;  %s175_s20 = scalar_lea.vmem %s2229_s3, %s1422_s13 }
  0x2f   : > { %1026 = vmatmul.mubr.bf16.gmra.mrb[4].mxu0 %v1844_v46  ;;  %v1423_v46 = vld [vmem:[%s2228_s2] ss:$0 sm:$0xff] }
  0x30   : > { %1091 = vmatmul.mubr.bf16.gmra.mrb[4].mxu1 %v1845_v47  ;;  %1658 = vmatpush3.bf16.msra.mxu0 %v1848_v50 }
  0x31   : > { %1698 = vmatpush3.bf16.msra.mxu1 %v1849_v51  ;;  %1659 = vmatprep.subr.bf16.mxu0 %v1850_v52 }
  0x32   : > { %1699 = vmatprep.subr.bf16.mxu1 %v1851_v53  ;;  %1033 = vmatprep.mubr.bf16.mxu0 %v1854_v56 }
  0x33   : > { %1098 = vmatprep.mubr.bf16.mxu1 %v1856_v57 }
  0x34   : > { %1660 = vmatpush3.bf16.msra.mxu0 %v1852_v54 }
  0x35   : > { %1700 = vmatpush3.bf16.msra.mxu1 %v1853_v55  ;;  %1661 = vmatprep.subr.bf16.mxu0 %v1860_v60 }
  0x36   : > { %1701 = vmatprep.subr.bf16.mxu1 %v1861_v61 }
  0x37   : > { %1034 = vmatmul.mubr.bf16.gmra.mrb[8].mxu0 %v1858_v58 }
  0x38   : > { %1099 = vmatmul.mubr.bf16.gmra.mrb[8].mxu1 %v1859_v59  ;;  %1662 = vmatpush3.bf16.msra.mxu0 %v1862_v62 }
  0x39   : > { %1702 = vmatpush3.bf16.msra.mxu1 %v1863_v63  ;;  %1663 = vmatprep.subr.bf16.mxu0 %v1864_v0 }
  0x3a   : > { %1703 = vmatprep.subr.bf16.mxu1 %v1865_v1  ;;  %1041 = vmatprep.mubr.bf16.mxu0 %v1868_v4 }
  0x3b   : > { %1106 = vmatprep.mubr.bf16.mxu1 %v1870_v5 }
  0x3c   : > { %1664 = vmatpush3.bf16.msra.mxu0 %v1866_v2 }
  0x3d   : > { %1704 = vmatpush3.bf16.msra.mxu1 %v1867_v3  ;;  %1665 = vmatprep.subr.bf16.mxu0 %v1874_v8 }
  0x3e   : > { %1705 = vmatprep.subr.bf16.mxu1 %v1875_v9 }
  0x3f   : > { %1042 = vmatmul.mubr.bf16.gmra.mrb[12].mxu0 %v1872_v6 }
  0x40   : > { %1107 = vmatmul.mubr.bf16.gmra.mrb[12].mxu1 %v1873_v7  ;;  %1666 = vmatpush3.bf16.msra.mxu0 %v1876_v10 }
  0x41   : > { %1706 = vmatpush3.bf16.msra.mxu1 %v1877_v11  ;;  %1667 = vmatprep.subr.bf16.mxu0 %v1878_v12 }
  0x42   : > { %1707 = vmatprep.subr.bf16.mxu1 %v1879_v13  ;;  %1147 = vmatprep.mubr.bf16.mxu0 %v1884_v17 }
  0x43   : > { %1212 = vmatprep.mubr.bf16.mxu1 %v1887_v19 }
  0x44   : > { %1668 = vmatpush3.bf16.msra.mxu0 %v1880_v14 }
  0x45   : > { %1708 = vmatpush3.bf16.msra.mxu1 %v1881_v15  ;;  %1745 = vmatprep.subr.bf16.mxu0 %v1888_v20 }
  0x46   : > { %1769 = vmatprep.subr.bf16.mxu1 %v1888_v20 }
  0x47   : > { %1148 = vmatmul.mubr.bf16.vlgmr.msra.gmra.mrb[16].mxu0 %v1882_v16 }
  0x48   : > { %1213 = vmatmul.mubr.bf16.vlgmr.msra.gmra.mrb[16].mxu1 %v1885_v18  ;;  %1746 = vmatpush3.bf16.msra.mxu0 %v1888_v20 }
  0x49   : > { %1777 = vmatpush3.bf16.msra.mxu1 %v1888_v20  ;;  %1747 = vmatprep.subr.bf16.mxu0 %v1889_v21 }
  0x4a   : > { %1770 = vmatprep.subr.bf16.mxu1 %v1889_v21  ;;  %1155 = vmatprep.mubr.bf16.mxu0 %v1890_v22 }
  0x4b   : > { %1220 = vmatprep.mubr.bf16.mxu1 %v1892_v23 }
  0x4c   : > { %1748 = vmatpush3.bf16.msra.mxu0 %v1889_v21 }
  0x4d   : > { %1778 = vmatpush3.bf16.msra.mxu1 %v1889_v21  ;;  %1749 = vmatprep.subr.bf16.mxu0 %v1896_v26 }
  0x4e   : > { %1771 = vmatprep.subr.bf16.mxu1 %v1896_v26 }
  0x4f   : > { %1156 = vmatmul.mubr.bf16.gmra.mrb[20].mxu0 %v1894_v24 }
  0x50   : > { %1221 = vmatmul.mubr.bf16.gmra.mrb[20].mxu1 %v1895_v25  ;;  %1163 = vmatprep.mubr.bf16.mxu0 %v1898_v27 }
  0x51   : > { %1750 = vmatpush3.bf16.msra.mxu0 %v1896_v26  ;;  %1228 = vmatprep.mubr.bf16.mxu1 %v1900_v28 }
  0x52   : > { %1779 = vmatpush3.bf16.msra.mxu1 %v1896_v26  ;;  %1751 = vmatprep.subr.bf16.mxu0 %v1897_v29 }
  0x53   : > { %1772 = vmatprep.subr.bf16.mxu1 %v1897_v29 }
  0x55   : > { %1752 = vmatpush3.bf16.msra.mxu0 %v1897_v29 }
  0x56   : > { %1780 = vmatpush3.bf16.msra.mxu1 %v1897_v29  ;;  %1753 = vmatprep.subr.bf16.mxu0 %v1904_v32 }
  0x57   : > { %1164 = vmatmul.mubr.bf16.gmra.mrb[24].mxu0 %v1902_v30  ;;  %1773 = vmatprep.subr.bf16.mxu1 %v1904_v32 }
  0x58   : > { %1229 = vmatmul.mubr.bf16.gmra.mrb[24].mxu1 %v1903_v31  ;;  %1171 = vmatprep.mubr.bf16.mxu0 %v1906_v33 }
  0x59   : > { %1754 = vmatpush3.bf16.msra.mxu0 %v1904_v32  ;;  %1236 = vmatprep.mubr.bf16.mxu1 %v1908_v34 }
  0x5a   : > { %1781 = vmatpush3.bf16.msra.mxu1 %v1904_v32  ;;  %1755 = vmatprep.subr.bf16.mxu0 %v1905_v35 }
  0x5b   : > { %1774 = vmatprep.subr.bf16.mxu1 %v1905_v35 }
  0x5d   : > { %1756 = vmatpush3.bf16.msra.mxu0 %v1905_v35 }
  0x5e   : > { %1782 = vmatpush3.bf16.msra.mxu1 %v1905_v35  ;;  %1757 = vmatprep.subr.bf16.mxu0 %v1912_v37 }
  0x5f   : > { %1172 = vmatmul.mubr.bf16.gmra.mrb[28].mxu0 %v1910_v36  ;;  %1775 = vmatprep.subr.bf16.mxu1 %v1912_v37 }
  0x60   : > { %1237 = vmatmul.mubr.bf16.gmra.mrb[28].mxu1 %v1911_v38  ;;  %1761 = vmatprep.mubr.bf16.mxu0 %v1914_v39 }
  0x61   : > { %1758 = vmatpush3.bf16.msra.mxu0 %v1912_v37  ;;  %1765 = vmatprep.mubr.bf16.mxu1 %v1915_v40 }
  0x62   : > { %1783 = vmatpush3.bf16.msra.mxu1 %v1912_v37  ;;  %1759 = vmatprep.subr.bf16.mxu0 %v1913_v41 }
  0x63   : > { %1776 = vmatprep.subr.bf16.mxu1 %v1913_v41 }
  0x65   : > { %1760 = vmatpush3.bf16.msra.mxu0 %v1913_v41 }
  0x66   : > { %1784 = vmatpush3.bf16.msra.mxu1 %v1913_v41 }
  0x68   : > { %1762 = vmatmul.mubr.bf16.vlgmr.msra.gmra.mrb[32].mxu0 %v1916_v42 }
  0x69   : > { %1766 = vmatmul.mubr.bf16.vlgmr.msra.gmra.mrb[32].mxu1 %v1917_v43 }
  0xfa   : > { %v1589_v44 = vpop.f32.mrb[0].mxu0 }
  0xfb   : > { %v1629_v45 = vpop.f32.mrb[0].mxu1  ;;  %v1590_v47 = vpop.f32.mrb[1].mxu0 }
  0xfc   : > { %v1591_v48 = vadd.f32 %v1590_v47, %v1589_v44  ;;  %v1630_v49 = vpop.f32.mrb[1].mxu1  ;;  %v1592_v50 = vpop.f32.mrb[2].mxu0 }
  0xfd   : > { %v1631_v51 = vadd.f32 %v1630_v49, %v1629_v45  ;;  %v1632_v52 = vpop.f32.mrb[2].mxu1  ;;  %v1593_v53 = vpop.f32.mrb[3].mxu0 }
  0xfe   : > { %v1020_v54 = vadd.f32 %v1591_v48, %v1423_v46  ;;  %v1594_v55 = vadd.f32 %v1593_v53, %v1592_v50  ;;  %v1633_v56 = vpop.f32.mrb[3].mxu1 }
  0xff   : > { %v1634_v57 = vadd.f32 %v1633_v56, %v1632_v52 }
 0x100   : > { %v1085_v58 = vadd.f32 %v1631_v51, %v1020_v54  ;;  %v1023_v59 = vadd.f32 %v1594_v55, %v1423_v46 }
 0x102   : > { %v1088_v60 = vadd.f32 %v1634_v57, %v1023_v59  ;;  %v1595_v61 = vpop.f32.mrb[4].mxu0 }
 0x103   : > { %v1635_v62 = vpop.f32.mrb[4].mxu1  ;;  %v1596_v63 = vpop.f32.mrb[5].mxu0 }
 0x104   : > { %v1597_v0 = vadd.f32 %v1596_v63, %v1595_v61  ;;  %v1636_v1 = vpop.f32.mrb[5].mxu1  ;;  %v1598_v2 = vpop.f32.mrb[6].mxu0 }
 0x105   : > { %v1637_v3 = vadd.f32 %v1636_v1, %v1635_v62  ;;  %v1638_v4 = vpop.f32.mrb[6].mxu1  ;;  %v1599_v5 = vpop.f32.mrb[7].mxu0 }
 0x106   : > { %v1028_v6 = vadd.f32 %v1597_v0, %v1423_v46  ;;  %v1600_v7 = vadd.f32 %v1599_v5, %v1598_v2  ;;  %v1639_v8 = vpop.f32.mrb[7].mxu1 }
 0x107   : > { %v1640_v9 = vadd.f32 %v1639_v8, %v1638_v4 }
 0x108   : > { %v1093_v10 = vadd.f32 %v1637_v3, %v1028_v6  ;;  %v1031_v11 = vadd.f32 %v1600_v7, %v1423_v46 }
 0x10a   : > { %v1096_v12 = vadd.f32 %v1640_v9, %v1031_v11  ;;  %v1601_v13 = vpop.f32.mrb[8].mxu0 }
 0x10b   : > { %v1641_v14 = vpop.f32.mrb[8].mxu1  ;;  %v1602_v15 = vpop.f32.mrb[9].mxu0 }
 0x10c   : > { %v1603_v16 = vadd.f32 %v1602_v15, %v1601_v13  ;;  %v1642_v17 = vpop.f32.mrb[9].mxu1  ;;  %v1604_v18 = vpop.f32.mrb[10].mxu0 }
 0x10d   : > { %v1643_v19 = vadd.f32 %v1642_v17, %v1641_v14  ;;  %v1644_v20 = vpop.f32.mrb[10].mxu1  ;;  %v1605_v21 = vpop.f32.mrb[11].mxu0 }
 0x10e   : > { %v1036_v22 = vadd.f32 %v1603_v16, %v1423_v46  ;;  %v1606_v23 = vadd.f32 %v1605_v21, %v1604_v18  ;;  %v1645_v24 = vpop.f32.mrb[11].mxu1 }
 0x10f   : > { %v1646_v25 = vadd.f32 %v1645_v24, %v1644_v20 }
 0x110   : > { %v1101_v26 = vadd.f32 %v1643_v19, %v1036_v22  ;;  %v1039_v27 = vadd.f32 %v1606_v23, %v1423_v46 }
 0x112   : > { %v1104_v28 = vadd.f32 %v1646_v25, %v1039_v27  ;;  %v1607_v29 = vpop.f32.mrb[12].mxu0 }
 0x113   : > { %v1647_v30 = vpop.f32.mrb[12].mxu1  ;;  %v1608_v31 = vpop.f32.mrb[13].mxu0 }
 0x114   : > { %v1648_v32 = vpop.f32.mrb[13].mxu1  ;;  %v1609_v33 = vadd.f32 %v1608_v31, %v1607_v29  ;;  %v1610_v35 = vpop.f32.mrb[14].mxu0 }
 0x115   : > { %v1649_v34 = vadd.f32 %v1648_v32, %v1647_v30  ;;  %v1650_v36 = vpop.f32.mrb[14].mxu1  ;;  %v1611_v37 = vpop.f32.mrb[15].mxu0 }
 0x116   : > { %v1651_v38 = vpop.f32.mrb[15].mxu1  ;;  %v1044_v39 = vadd.f32 %v1609_v33, %v1423_v46  ;;  %v1612_v40 = vadd.f32 %v1611_v37, %v1610_v35 }
 0x117   : > { %v1652_v41 = vadd.f32 %v1651_v38, %v1650_v36 }
 0x118   : > { %v1109_v42 = vadd.f32 %v1649_v34, %v1044_v39  ;;  %v1047_v43 = vadd.f32 %v1612_v40, %v1423_v46 }
 0x11a   : > { %v1112_v44 = vadd.f32 %v1652_v41, %v1047_v43  ;;  %v1669_v45 = vpop.f32.mrb[16].mxu0 }
 0x11b   : > { %v1670_v47 = vpop.f32.mrb[17].mxu0  ;;  %v1709_v48 = vpop.f32.mrb[16].mxu1 }
 0x11c   : > { %v1671_v49 = vadd.f32 %v1670_v47, %v1669_v45  ;;  %v1672_v50 = vpop.f32.mrb[18].mxu0  ;;  %v1710_v51 = vpop.f32.mrb[17].mxu1 }
 0x11d   : > { %v1673_v52 = vpop.f32.mrb[19].mxu0  ;;  %v1711_v54 = vadd.f32 %v1710_v51, %v1709_v48  ;;  %v1712_v55 = vpop.f32.mrb[18].mxu1 }
 0x11e   : > { %v1150_v53 = vadd.f32 %v1671_v49, %v1085_v58  ;;  %v1674_v56 = vadd.f32 %v1673_v52, %v1672_v50  ;;  %v1713_v57 = vpop.f32.mrb[19].mxu1 }
 0x11f   : > { %v1714_v61 = vadd.f32 %v1713_v57, %v1712_v55 }
 0x120   : > { %v1153_v59 = vadd.f32 %v1674_v56, %v1088_v60  ;;  %v1215_v62 = vadd.f32 %v1711_v54, %v1150_v53 }
 0x122   : > { %v1675_v63 = vpop.f32.mrb[20].mxu0  ;;  %v1218_v0 = vadd.f32 %v1714_v61, %v1153_v59 }
 0x123   : > { %v1676_v1 = vpop.f32.mrb[21].mxu0  ;;  %v1715_v46 = vpop.f32.mrb[20].mxu1 }
 0x124   : > { %v1677_v2 = vadd.f32 %v1676_v1, %v1675_v63  ;;  %v1678_v3 = vpop.f32.mrb[22].mxu0  ;;  %v1716_v4 = vpop.f32.mrb[21].mxu1 }
 0x125   : > { %v1679_v5 = vpop.f32.mrb[23].mxu0  ;;  %v1717_v7 = vadd.f32 %v1716_v4, %v1715_v46  ;;  %v1718_v8 = vpop.f32.mrb[22].mxu1 }
 0x126   : > { %v1158_v6 = vadd.f32 %v1677_v2, %v1093_v10  ;;  %v1680_v9 = vadd.f32 %v1679_v5, %v1678_v3  ;;  %v1719_v58 = vpop.f32.mrb[23].mxu1 }
 0x127   : > { %v1720_v13 = vadd.f32 %v1719_v58, %v1718_v8 }
 0x128   : > { %v1161_v11 = vadd.f32 %v1680_v9, %v1096_v12  ;;  %v1223_v14 = vadd.f32 %v1717_v7, %v1158_v6 }
 0x12a   : > { %v1681_v15 = vpop.f32.mrb[24].mxu0  ;;  %v1226_v60 = vadd.f32 %v1720_v13, %v1161_v11 }
 0x12b   : > { %v1682_v16 = vpop.f32.mrb[25].mxu0  ;;  %v1721_v17 = vpop.f32.mrb[24].mxu1 }
 0x12c   : > { %v1683_v18 = vadd.f32 %v1682_v16, %v1681_v15  ;;  %v1684_v19 = vpop.f32.mrb[26].mxu0  ;;  %v1722_v20 = vpop.f32.mrb[25].mxu1 }
 0x12d   : > { %v1685_v21 = vpop.f32.mrb[27].mxu0  ;;  %v1723_v23 = vadd.f32 %v1722_v20, %v1721_v17  ;;  %v1724_v24 = vpop.f32.mrb[26].mxu1 }
 0x12e   : > { %v1166_v22 = vadd.f32 %v1683_v18, %v1101_v26  ;;  %v1686_v25 = vadd.f32 %v1685_v21, %v1684_v19  ;;  %v1725_v10 = vpop.f32.mrb[27].mxu1 }
 0x12f   : > { %v1726_v29 = vadd.f32 %v1725_v10, %v1724_v24 }
 0x130   : > { %v1169_v27 = vadd.f32 %v1686_v25, %v1104_v28  ;;  %v1231_v30 = vadd.f32 %v1723_v23, %v1166_v22 }
 0x132   : > { %v1687_v31 = vpop.f32.mrb[28].mxu0  ;;  %v1234_v12 = vadd.f32 %v1726_v29, %v1169_v27 }
 0x133   : > { %v1688_v32 = vpop.f32.mrb[29].mxu0  ;;  %v1727_v33 = vpop.f32.mrb[28].mxu1 }
 0x134   : > { %v1689_v34 = vadd.f32 %v1688_v32, %v1687_v31  ;;  %v1690_v35 = vpop.f32.mrb[30].mxu0  ;;  %v1728_v36 = vpop.f32.mrb[29].mxu1 }
 0x135   : > { %v1691_v37 = vpop.f32.mrb[31].mxu0  ;;  %v1729_v39 = vadd.f32 %v1728_v36, %v1727_v33  ;;  %v1730_v40 = vpop.f32.mrb[30].mxu1 }
 0x136   : > { %v1174_v38 = vadd.f32 %v1689_v34, %v1109_v42  ;;  %v1692_v26 = vadd.f32 %v1691_v37, %v1690_v35  ;;  %v1731_v41 = vpop.f32.mrb[31].mxu1 }
 0x137   : > { %v1732_v45 = vadd.f32 %v1731_v41, %v1730_v40 }
 0x138   : > { %v1177_v43 = vadd.f32 %v1692_v26, %v1112_v44  ;;  %v1239_v47 = vadd.f32 %v1729_v39, %v1174_v38 }
 0x13a   : > { %v1242_v28 = vadd.f32 %v1732_v45, %v1177_v43 }
 0x13b   : > { %v1763_v48 = vpop.f32.mrb[32].mxu0 }
 0x13c   : > { %v1288_v49 = vadd.f32 %v1763_v48, %v1223_v14  ;;  %v1767_v50 = vpop.f32.mrb[32].mxu1  ;;  %v1279_v51 = vpop.f32.mrb[33].mxu0 }
 0x13d   : > { %v1304_v52 = vadd.f32 %v1767_v50, %v1239_v47  ;;  %v1280_v53 = vadd.f32 %v1279_v51, %v1215_v62  ;;  %v1295_v54 = vpop.f32.mrb[33].mxu1  ;;  %v1764_v55 = vpop.f32.mrb[34].mxu0 }
 0x13e   : > { %v1296_v56 = vadd.f32 %v1295_v54, %v1231_v30  ;;  %v1291_v42 = vadd.f32 %v1764_v55, %v1226_v60  ;;  %v1768_v57 = vpop.f32.mrb[34].mxu1  ;;  %v1282_v59 = vpop.f32.mrb[35].mxu0  ;;  %v1312_v44 = vmax.f32 %v1288_v49, 0.0 }
 0x13f   : > { %v1307_v61 = vadd.f32 %v1768_v57, %v1242_v28  ;;  %v1283_v63 = vadd.f32 %v1282_v59, %v1218_v0  ;;  %v1298_v1 = vpop.f32.mrb[35].mxu1  ;;  %v1316_v3 = vmax.f32 %v1304_v52, 0.0  ;;  %v1310_v4 = vmax.f32 %v1280_v53, 0.0 }
 0x140   : > { %v1313_v46 = vmax.f32 %v1291_v42, 0.0  ;;  %v1299_v2 = vadd.f32 %v1298_v1, %v1234_v12  ;;  %v1314_v6 = vmax.f32 %v1296_v56, 0.0 }
 0x141   : > { %v1317_v62 = vmax.f32 %v1307_v61, 0.0  ;;  %v1311_v5 = vmax.f32 %v1283_v63, 0.0 }
 0x142   : > { %v1558_v7 = vpack.c.bf16 %v1313_v46, %v1312_v44  ;;  %v1315_v8 = vmax.f32 %v1299_v2, 0.0 }
 0x143   : > { %v1568_v9 = vpack.c.bf16 %v1317_v62, %v1316_v3  ;;  %v1553_v58 = vpack.c.bf16 %v1311_v5, %v1310_v4 }
 0x144   : > { %1570 = vst [vmem:[%s175_s20 + $0x8] sm:$0xff] %v1558_v7   ;;  %v1563_v11 = vpack.c.bf16 %v1315_v8, %v1314_v6 }
 0x145   : > { %1572 = vst [vmem:[%s175_s20 + $0x18] sm:$0xff] %v1568_v9   ;;  %1554 = vst [vmem:[%s175_s20] sm:$0xff] %v1553_v58  }
 0x146   : > { %1571 = vst [vmem:[%s175_s20 + $0x10] sm:$0xff] %v1563_v11  }
 0x147 PF: > { %s13_s12 = sadd.s32 1, %s1924_s12  }
 0x148   : > { %p10_p4 = scmp.ge.s32.totalorder %s13_s12, 4  }
 0x14a   :  { %12 = sbr.rel (!%p10_p4) target bundleno = 1 (0x1), region = 62 }

// kernel: _lambda_.30
= control target key start
LH: loop header
LB: loop body
LE: loop exit
PB: predicated region body
PF: predicated region fallthrough
CT: control target
= control target key end

     0   :  { %s815_s30 = smov 0   ;;  %s868_s0 = inlined_call_operand.vmem [shape: bf16[32,128], index: 0, kind: input, shape index: {}]   ;;  %s869_s1 = inlined_call_operand.vmem [shape: bf16[32,128], index: 1, kind: input, shape index: {}]   ;;  %s870_s2 = inlined_call_operand.vmem [shape: bf16[32,128], index: 2, kind: input, shape index: {}]   ;;  %s871_s3 = inlined_call_operand.vmem [shape: bf16[32,128], index: 3, kind: input, shape index: {}]   ;;  %s872_s4 = inlined_call_operand.vmem [shape: bf16[32,128], index: 4, kind: input, shape index: {}]   ;;  %s873_s5 = inlined_call_operand.vmem [shape: bf16[32,128], index: 5, kind: input, shape index: {}]   ;;  %s874_s6 = inlined_call_operand.vmem [shape: bf16[32,128], index: 6, kind: input, shape index: {}]   ;;  %s875_s7 = inlined_call_operand.vmem [shape: bf16[32,128], index: 7, kind: input, shape index: {}]   ;;  %s876_s8 = inlined_call_operand.vmem [shape: bf16[32,128], index: 8, kind: output, shape index: {0}]   ;;  %s877_s9 = inlined_call_operand.vmem [shape: bf16[32,128], index: 9, kind: output, shape index: {1}]  }
   0x1 LB: > { %s710_s10 = sadd.s32 4294967295, %s763_s30   ;;  %p714_p0 = scmp.ge.s32.totalorder %s763_s30, 1  ;;  %s763_s30 = sphi %s815_s30, %s20_s30  }
   0x2   : > { %p368_p1 = scmp.lt.s32.totalorder %s763_s30, 3 }
   0x4   : > { %p369_p2 = pnand %p714_p0, %p368_p1 }
   0x5   : > { %s715_s11 = sshll.u32 (!%p369_p2), %s710_s10, 1 }
   0x6   : > { %372 = sbr.rel (%p369_p2) target bundleno = 31 (0x1f), region = 52  ;;  %p445_p3 = scmp.lt.s32.totalorder (!%p369_p2), %s715_s11, 3 }
   0xd   : > { %s879_s11 = smov (!%p445_p3, %s715_s11), 3 }
   0xe   : > { %s823_s12 = sshll.u32 %s879_s11, 2 }
   0xf   : > { %s448_s15 = scalar_lea.vmem %s868_s0, %s823_s12  ;;  %s454_s18 = scalar_lea.vmem %s869_s1, %s823_s12 }
  0x10   : > { %s460_s21 = scalar_lea.vmem %s870_s2, %s823_s12  ;;  %s466_s24 = scalar_lea.vmem %s871_s3, %s823_s12  ;;  %v504_v0 = vld [vmem:[%s448_s15] sm:$0xf]  ;;  %v505_v1 = vld [vmem:[%s448_s15 + $0x4] sm:$0xf] }
  0x11   : > { %v506_v2 = vld [vmem:[%s454_s18] sm:$0xf]  ;;  %v507_v3 = vld [vmem:[%s454_s18 + $0x4] sm:$0xf]  ;;  %s472_s27 = scalar_lea.vmem %s872_s4, %s823_s12  ;;  %s478_s10 = scalar_lea.vmem %s873_s5, %s823_s12 }
  0x12   : > { %v508_v4 = vmax.bf16 %v506_v2, %v504_v0  ;;  %v510_v5 = vld [vmem:[%s460_s21] sm:$0xf]  ;;  %v511_v6 = vld [vmem:[%s460_s21 + $0x4] sm:$0xf]  ;;  %v509_v7 = vmax.bf16 %v507_v3, %v505_v1  ;;  %s484_s14 = scalar_lea.vmem %s874_s6, %s823_s12  ;;  %s490_s17 = scalar_lea.vmem %s875_s7, %s823_s12 }
  0x13   : > { %v512_v8 = vld [vmem:[%s466_s24] sm:$0xf]  ;;  %v513_v9 = vld [vmem:[%s466_s24 + $0x4] sm:$0xf]  ;;  %s496_s20 = scalar_lea.vmem %s876_s8, %s823_s12  ;;  %s502_s23 = scalar_lea.vmem %s877_s9, %s823_s12 }
  0x14   : > { %v520_v10 = vld [vmem:[%s472_s27] sm:$0xf]  ;;  %v514_v11 = vmax.bf16 %v512_v8, %v510_v5  ;;  %v515_v12 = vmax.bf16 %v513_v9, %v511_v6  ;;  %v521_v13 = vld [vmem:[%s472_s27 + $0x4] sm:$0xf] }
  0x15   : > { %v522_v14 = vld [vmem:[%s478_s10] sm:$0xf]  ;;  %v523_v15 = vld [vmem:[%s478_s10 + $0x4] sm:$0xf] }
  0x16   : > { %v524_v16 = vmax.bf16 %v522_v14, %v520_v10  ;;  %v525_v17 = vmax.bf16 %v523_v15, %v521_v13  ;;  %v526_v18 = vld [vmem:[%s484_s14] sm:$0xf]  ;;  %v527_v19 = vld [vmem:[%s484_s14 + $0x4] sm:$0xf]  ;;  %v516_v21 = vmax.bf16 %v514_v11, %v508_v4  ;;  %v517_v22 = vmax.bf16 %v515_v12, %v509_v7 }
  0x17   : > { %v528_v20 = vld [vmem:[%s490_s17] sm:$0xf]  ;;  %v529_v23 = vld [vmem:[%s490_s17 + $0x4] sm:$0xf] }
  0x18   : > { %v530_v24 = vmax.bf16 %v528_v20, %v526_v18  ;;  %v531_v25 = vmax.bf16 %v529_v23, %v527_v19  ;;  %v747_v26 = vcombine.low %v516_v21, %v517_v22 }
  0x1a   : > { %v532_v27 = vmax.bf16 %v530_v24, %v524_v16  ;;  %v533_v28 = vmax.bf16 %v531_v25, %v525_v17  ;;  %741 = vst [vmem:[%s496_s20] sm:$0xff] %v747_v26  }
  0x1c   : > { %v748_v29 = vcombine.low %v532_v27, %v533_v28 }
  0x1e   : > { %746 = vst [vmem:[%s502_s23] sm:$0xff] %v748_v29  }
  0x1f PF: > { %s20_s30 = sadd.s32 1, %s763_s30  }
  0x20   : > { %p17_p4 = scmp.ge.s32.totalorder %s20_s30, 4  }
  0x22   :  { %19 = sbr.rel (!%p17_p4) target bundleno = 1 (0x1), region = 115 }

// kernel: _lambda_.32
= control target key start
LH: loop header
LB: loop body
LE: loop exit
PB: predicated region body
PF: predicated region fallthrough
CT: control target
= control target key end

     0   :  { %s1435_s12 = smov 0   ;;  %s1688_s0 = inlined_call_operand.vmem [shape: bf16[32,1152], index: 0, kind: input, shape index: {}]   ;;  %s1689_s1 = inlined_call_operand.vmem [shape: bf16[1152,128], index: 1, kind: input, shape index: {}]   ;;  %s1690_s2 = inlined_call_operand.vmem [shape: f32[1,128], index: 2, kind: input, shape index: {}]   ;;  %s1691_s3 = inlined_call_operand.vmem [shape: bf16[32,128], index: 3, kind: output, shape index: {}]  }
   0x1 LB: > { %s1090_s13 = sadd.s32 4294967295, %s1411_s12   ;;  %p1094_p0 = scmp.ge.s32.totalorder %s1411_s12, 1  ;;  %s1411_s12 = sphi %s1435_s12, %s13_s12  }
   0x2   : > { %p139_p1 = scmp.lt.s32.totalorder %s1411_s12, 3 }
   0x4   : > { %p140_p2 = pnand %p1094_p0, %p139_p1 }
   0x5   : > { %v1320_v0 = vld [vmem:[%s1689_s1 + $0x40] sm:$0xff] (!%p140_p2)   ;;  %v1324_v4 = vld [vmem:[%s1689_s1 + $0x48] sm:$0xff] (!%p140_p2)   ;;  %v1328_v8 = vld [vmem:[%s1689_s1 + $0x50] sm:$0xff] (!%p140_p2)   ;;  %s1095_s17 = sshll.u32 (!%p140_p2), %s1090_s13, 1  ;;  %vm1414_vm0 = vmmov (!%p140_p2), 0  }
   0x6   : > { %143 = sbr.rel (%p140_p2) target bundleno = 323 (0x143), region = 32  ;;  %v1321_v1 = vld [vmem:[%s1689_s1] sm:$0xff] (!%p140_p2)   ;;  %1192 = vmatprep.subr.bf16.mxu0 (!%p140_p2), %v1320_v0  ;;  %v1325_v5 = vld [vmem:[%s1689_s1 + $0x8] sm:$0xff] (!%p140_p2)   ;;  %v1329_v9 = vld [vmem:[%s1689_s1 + $0x10] sm:$0xff] (!%p140_p2)   ;;  %p165_p3 = scmp.lt.s32.totalorder (!%p140_p2), %s1095_s17, 3 }
   0x7   : > { %v1322_v2 = vld [vmem:[%s1689_s1 + $0xc0] sm:$0xff] (!%p140_p2)   ;;  %1193 = vmatpush3.bf16.msra.mxu0 (!%p140_p2), %v1321_v1  ;;  %v1326_v6 = vld [vmem:[%s1689_s1 + $0xc8] sm:$0xff] (!%p140_p2)   ;;  %v1330_v10 = vld [vmem:[%s1689_s1 + $0xd0] sm:$0xff] (!%p140_p2)  }
   0x8   : > { %v1323_v3 = vld [vmem:[%s1689_s1 + $0x80] sm:$0xff] (!%p140_p2)   ;;  %1214 = vmatprep.subr.bf16.mxu1 (!%p140_p2), %v1322_v2  ;;  %1194 = vmatprep.subr.bf16.mxu0 (!%p140_p2), %v1324_v4  ;;  %v1327_v7 = vld [vmem:[%s1689_s1 + $0x88] sm:$0xff] (!%p140_p2)   ;;  %v1331_v11 = vld [vmem:[%s1689_s1 + $0x90] sm:$0xff] (!%p140_p2)  }
   0x9   : > { %1215 = vmatpush3.bf16.msra.mxu1 (!%p140_p2), %v1323_v3  ;;  %v1332_v12 = vld [vmem:[%s1689_s1 + $0x58] sm:$0xff] (!%p140_p2)   ;;  %v1336_v16 = vld [vmem:[%s1689_s1 + $0x60] sm:$0xff] (!%p140_p2)   ;;  %v1340_v20 = vld [vmem:[%s1689_s1 + $0x68] sm:$0xff] (!%p140_p2)  }
   0xa   : > { %1216 = vmatprep.subr.bf16.mxu1 (!%p140_p2), %v1326_v6  ;;  %v1333_v13 = vld [vmem:[%s1689_s1 + $0x18] sm:$0xff] (!%p140_p2)   ;;  %v1337_v17 = vld [vmem:[%s1689_s1 + $0x20] sm:$0xff] (!%p140_p2)   ;;  %v1341_v21 = vld [vmem:[%s1689_s1 + $0x28] sm:$0xff] (!%p140_p2)   ;;  %v1413_v6 = vmov (!%p140_p2), 0.0  }
   0xb   : > { %1195 = vmatpush3.bf16.msra.mxu0 (!%p140_p2), %v1325_v5  ;;  %v1334_v14 = vld [vmem:[%s1689_s1 + $0xd8] sm:$0xff] (!%p140_p2)   ;;  %v1338_v18 = vld [vmem:[%s1689_s1 + $0xe0] sm:$0xff] (!%p140_p2)   ;;  %v1342_v22 = vld [vmem:[%s1689_s1 + $0xe8] sm:$0xff] (!%p140_p2)  }
   0xc   : > { %1196 = vmatprep.subr.bf16.mxu0 (!%p140_p2), %v1328_v8  ;;  %v1335_v15 = vld [vmem:[%s1689_s1 + $0x98] sm:$0xff] (!%p140_p2)   ;;  %v1339_v19 = vld [vmem:[%s1689_s1 + $0xa0] sm:$0xff] (!%p140_p2)   ;;  %v1343_v23 = vld [vmem:[%s1689_s1 + $0xa8] sm:$0xff] (!%p140_p2)  }
   0xd   : > { %1217 = vmatpush3.bf16.msra.mxu1 %v1327_v7  ;;  %s1693_s17 = smov (!%p165_p3, %s1095_s17), 3  ;;  %v1344_v24 = vld [vmem:[%s1689_s1 + $0x70] sm:$0xff]   ;;  %v1348_v28 = vld [vmem:[%s1689_s1 + $0x78] sm:$0xff]   ;;  %v1355_v34 = vld [vmem:[%s1689_s1 + $0x140] sm:$0xff]  }
   0xe   : > { %1218 = vmatprep.subr.bf16.mxu1 %v1330_v10  ;;  %s1309_s14 = smul.u32 36, %s1693_s17  ;;  %v1345_v25 = vld [vmem:[%s1689_s1 + $0x30] sm:$0xff]   ;;  %v1349_v29 = vld [vmem:[%s1689_s1 + $0x38] sm:$0xff]   ;;  %v1359_v37 = vld [vmem:[%s1689_s1 + $0x100] sm:$0xff]  }
   0xf   : > { %1197 = vmatpush3.bf16.msra.mxu0 %v1329_v9  ;;  %v1346_v26 = vld [vmem:[%s1689_s1 + $0xf0] sm:$0xff]   ;;  %v1350_v30 = vld [vmem:[%s1689_s1 + $0xf8] sm:$0xff]   ;;  %v1360_v38 = vld [vmem:[%s1689_s1 + $0x1c0] sm:$0xff]  }
  0x10   : > { %1198 = vmatprep.subr.bf16.mxu0 %v1332_v12  ;;  %v1347_v27 = vld [vmem:[%s1689_s1 + $0xb0] sm:$0xff]   ;;  %s1538_s13 = scalar_lea.vmem %s1688_s0, %s1309_s14  ;;  %v1354_v33 = vld [vmem:[%s1689_s1 + $0xb8] sm:$0xff]   ;;  %v1361_v39 = vld [vmem:[%s1689_s1 + $0x180] sm:$0xff]  }
  0x11   : > { %1219 = vmatpush3.bf16.msra.mxu1 %v1331_v11  ;;  %v1351_v31 = vld [vmem:[%s1538_s13] ss:$36 sps:$4 sm:$0xff]   ;;  %v1356_v35 = vld [vmem:[%s1538_s13 + $0x8] ss:$36 sps:$4 sm:$0xff]   ;;  %v1366_v44 = vld [vmem:[%s1689_s1 + $0x150] sm:$0xff]  }
  0x12   : > { %1220 = vmatprep.subr.bf16.mxu1 %v1334_v14  ;;  %v1353_v32 = vld [vmem:[%s1538_s13 + $0x4] ss:$36 sps:$4 sm:$0xff]   ;;  %v1358_v36 = vld [vmem:[%s1538_s13 + $0xc] ss:$36 sps:$4 sm:$0xff]   ;;  %v1370_v48 = vld [vmem:[%s1689_s1 + $0x158] sm:$0xff]  }
  0x13   : > { %1199 = vmatpush3.bf16.msra.mxu0 %v1333_v13  ;;  %849 = vmatprep.mubr.bf16.mxu0 %v1353_v32  ;;  %v1362_v40 = vld [vmem:[%s1689_s1 + $0x148] sm:$0xff]   ;;  %v1367_v45 = vld [vmem:[%s1689_s1 + $0x110] sm:$0xff]   ;;  %v1371_v49 = vld [vmem:[%s1689_s1 + $0x118] sm:$0xff]  }
  0x14   : > { %1200 = vmatprep.subr.bf16.mxu0 %v1336_v16  ;;  %890 = vmatprep.mubr.bf16.mxu1 %v1358_v36  ;;  %v1363_v41 = vld [vmem:[%s1689_s1 + $0x108] sm:$0xff]   ;;  %v1368_v46 = vld [vmem:[%s1689_s1 + $0x1d0] sm:$0xff]   ;;  %v1372_v50 = vld [vmem:[%s1689_s1 + $0x1d8] sm:$0xff]  }
  0x15   : > { %1221 = vmatpush3.bf16.msra.mxu1 %v1335_v15  ;;  %v1364_v42 = vld [vmem:[%s1689_s1 + $0x1c8] sm:$0xff]   ;;  %v1369_v47 = vld [vmem:[%s1689_s1 + $0x190] sm:$0xff]   ;;  %v1373_v51 = vld [vmem:[%s1689_s1 + $0x198] sm:$0xff]  }
  0x16   : > { %1222 = vmatprep.subr.bf16.mxu1 %v1338_v18  ;;  %v1365_v43 = vld [vmem:[%s1689_s1 + $0x188] sm:$0xff]   ;;  %v1374_v52 = vld [vmem:[%s1689_s1 + $0x160] sm:$0xff]   ;;  %v1382_v60 = vld [vmem:[%s1689_s1 + $0x170] sm:$0xff]  }
  0x17   : > { %1201 = vmatpush3.bf16.msra.mxu0 %v1337_v17  ;;  %v1375_v53 = vld [vmem:[%s1689_s1 + $0x120] sm:$0xff]   ;;  %v1378_v56 = vld [vmem:[%s1689_s1 + $0x168] sm:$0xff]   ;;  %v1383_v61 = vld [vmem:[%s1689_s1 + $0x130] sm:$0xff]  }
  0x18   : > { %1202 = vmatprep.subr.bf16.mxu0 %v1340_v20  ;;  %v1376_v54 = vld [vmem:[%s1689_s1 + $0x1e0] sm:$0xff]   ;;  %v1379_v57 = vld [vmem:[%s1689_s1 + $0x128] sm:$0xff]   ;;  %v1384_v62 = vld [vmem:[%s1689_s1 + $0x1f0] sm:$0xff]  }
  0x19   : > { %1223 = vmatpush3.bf16.msra.mxu1 %v1339_v19  ;;  %v1377_v55 = vld [vmem:[%s1689_s1 + $0x1a0] sm:$0xff]   ;;  %v1380_v58 = vld [vmem:[%s1689_s1 + $0x1e8] sm:$0xff]   ;;  %v1385_v63 = vld [vmem:[%s1689_s1 + $0x1b0] sm:$0xff]  }
  0x1a   : > { %1224 = vmatprep.subr.bf16.mxu1 %v1342_v22  ;;  %v1381_v59 = vld [vmem:[%s1689_s1 + $0x1a8] sm:$0xff]   ;;  %v1386_v0 = vld [vmem:[%s1689_s1 + $0x178] sm:$0xff]   ;;  %v1389_v3 = vld [vmem:[%s1538_s13 + $0x10] ss:$36 sps:$4 sm:$0xff]  }
  0x1b   : > { %1203 = vmatpush3.bf16.msra.mxu0 %v1341_v21  ;;  %v1387_v1 = vld [vmem:[%s1689_s1 + $0x138] sm:$0xff]   ;;  %v1396_v9 = vld [vmem:[%s1689_s1 + $0x200] sm:$0xff]   ;;  %v1397_v10 = vld [vmem:[%s1689_s1 + $0x208] sm:$0xff]  }
  0x1c   : > { %1204 = vmatprep.subr.bf16.mxu0 %v1344_v24  ;;  %v1388_v2 = vld [vmem:[%s1689_s1 + $0x1f8] sm:$0xff]   ;;  %v1398_v11 = vld [vmem:[%s1689_s1 + $0x210] sm:$0xff]   ;;  %v1400_v13 = vld [vmem:[%s1689_s1 + $0x220] sm:$0xff]  }
  0x1d   : > { %1225 = vmatpush3.bf16.msra.mxu1 %v1343_v23  ;;  %v1391_v4 = vld [vmem:[%s1538_s13 + $0x14] ss:$36 sps:$4 sm:$0xff]   ;;  %v1395_v8 = vld [vmem:[%s1538_s13 + $0x1c] ss:$36 sps:$4 sm:$0xff]   ;;  %v1401_v14 = vld [vmem:[%s1689_s1 + $0x228] sm:$0xff]  }
  0x1e   : > { %1226 = vmatprep.subr.bf16.mxu1 %v1346_v26  ;;  %v1392_v5 = vld [vmem:[%s1689_s1 + $0x1b8] sm:$0xff]   ;;  %v1402_v15 = vld [vmem:[%s1689_s1 + $0x230] sm:$0xff]   ;;  %v1404_v17 = vld [vmem:[%s1538_s13 + $0x20] ss:$36 sps:$4 sm:$0xff]  }
  0x1f   : > { %1205 = vmatpush3.bf16.msra.mxu0 %v1345_v25  ;;  %v1393_v7 = vld [vmem:[%s1538_s13 + $0x18] ss:$36 sps:$4 sm:$0xff]   ;;  %v1099_v19 = vld [vmem:[%s1690_s2] ss:$0 sm:$0xff]  ;;  %s1098_s13 = sshll.u32 %s1693_s17, 2 }
  0x20   : > { %1206 = vmatprep.subr.bf16.mxu0 %v1348_v28  ;;  %v1399_v12 = vld [vmem:[%s1689_s1 + $0x218] sm:$0xff]   ;;  %s175_s20 = scalar_lea.vmem %s1691_s3, %s1098_s13 }
  0x21   : > { %1227 = vmatpush3.bf16.msra.mxu1 %v1347_v27  ;;  %v1403_v16 = vld [vmem:[%s1689_s1 + $0x238] sm:$0xff]  }
  0x22   : > { %1228 = vmatprep.subr.bf16.mxu1 %v1350_v30 }
  0x23   : > { %1207 = vmatpush3.bf16.msra.mxu0 %v1349_v29 }
  0x24   : > { %1236 = vmatprep.subr.bf16.mxu0 %v1355_v34 }
  0x25   : > { %1229 = vmatpush3.bf16.msra.mxu1 %v1354_v33 }
  0x26   : > { %850 = vmatmul.mubr.bf16.vlgmr.msra.gmra.mrb[0].mxu0 %v1351_v31  ;;  %1258 = vmatprep.subr.bf16.mxu1 %v1360_v38 }
  0x27   : > { %1237 = vmatpush3.bf16.msra.mxu0 %v1359_v37  ;;  %931 = vmatprep.mubr.bf16.mxu0 %v1391_v4 }
  0x28   : > { %891 = vmatmul.mubr.bf16.vlgmr.msra.gmra.mrb[0].mxu1 %v1356_v35  ;;  %1238 = vmatprep.subr.bf16.mxu0 %v1362_v40 }
  0x29   : > { %1259 = vmatpush3.bf16.msra.mxu1 %v1361_v39  ;;  %972 = vmatprep.mubr.bf16.mxu1 %v1395_v8 }
  0x2a   : > { %1260 = vmatprep.subr.bf16.mxu1 %v1364_v42 }
  0x2b   : > { %1239 = vmatpush3.bf16.msra.mxu0 %v1363_v41 }
  0x2c   : > { %1240 = vmatprep.subr.bf16.mxu0 %v1366_v44 }
  0x2d   : > { %1261 = vmatpush3.bf16.msra.mxu1 %v1365_v43 }
  0x2e   : > { %1262 = vmatprep.subr.bf16.mxu1 %v1368_v46 }
  0x2f   : > { %1241 = vmatpush3.bf16.msra.mxu0 %v1367_v45 }
  0x30   : > { %1242 = vmatprep.subr.bf16.mxu0 %v1370_v48 }
  0x31   : > { %1263 = vmatpush3.bf16.msra.mxu1 %v1369_v47 }
  0x32   : > { %1264 = vmatprep.subr.bf16.mxu1 %v1372_v50 }
  0x33   : > { %1243 = vmatpush3.bf16.msra.mxu0 %v1371_v49 }
  0x34   : > { %1244 = vmatprep.subr.bf16.mxu0 %v1374_v52 }
  0x35   : > { %1265 = vmatpush3.bf16.msra.mxu1 %v1373_v51 }
  0x36   : > { %1266 = vmatprep.subr.bf16.mxu1 %v1376_v54 }
  0x37   : > { %1245 = vmatpush3.bf16.msra.mxu0 %v1375_v53 }
  0x38   : > { %1246 = vmatprep.subr.bf16.mxu0 %v1378_v56 }
  0x39   : > { %1267 = vmatpush3.bf16.msra.mxu1 %v1377_v55 }
  0x3a   : > { %1268 = vmatprep.subr.bf16.mxu1 %v1380_v58 }
  0x3b   : > { %1247 = vmatpush3.bf16.msra.mxu0 %v1379_v57 }
  0x3c   : > { %1248 = vmatprep.subr.bf16.mxu0 %v1382_v60 }
  0x3d   : > { %1269 = vmatpush3.bf16.msra.mxu1 %v1381_v59 }
  0x3e   : > { %1270 = vmatprep.subr.bf16.mxu1 %v1384_v62 }
  0x3f   : > { %1249 = vmatpush3.bf16.msra.mxu0 %v1383_v61 }
  0x40   : > { %1250 = vmatprep.subr.bf16.mxu0 %v1386_v0 }
  0x41   : > { %1271 = vmatpush3.bf16.msra.mxu1 %v1385_v63 }
  0x42   : > { %1272 = vmatprep.subr.bf16.mxu1 %v1388_v2 }
  0x43   : > { %1251 = vmatpush3.bf16.msra.mxu0 %v1387_v1 }
  0x44   : > { %1289 = vmatprep.subr.bf16.mxu0 %v1413_v6 }
  0x45   : > { %1273 = vmatpush3.bf16.msra.mxu1 %v1392_v5 }
  0x46   : > { %932 = vmatmul.mubr.bf16.vlgmr.msra.gmra.mrb[4].mxu0 %v1389_v3 }
  0x47   : > { %1305 = vmatprep.mubr.msk.bf16.mxu0 %vm1414_vm0, %v1413_v6  ;;  %1290 = vmatpush3.bf16.msra.mxu0 %v1396_v9 }
  0x48   : > { %973 = vmatmul.mubr.bf16.vlgmr.msra.gmra.mrb[4].mxu1 %v1393_v7  ;;  %1291 = vmatprep.subr.bf16.mxu0 %v1413_v6 }
  0x4b   : > { %1292 = vmatpush3.bf16.msra.mxu0 %v1397_v10 }
  0x4c   : > { %1293 = vmatprep.subr.bf16.mxu0 %v1413_v6 }
  0x4f   : > { %1294 = vmatpush3.bf16.msra.mxu0 %v1398_v11 }
  0x50   : > { %1295 = vmatprep.subr.bf16.mxu0 %v1413_v6 }
  0x53   : > { %1296 = vmatpush3.bf16.msra.mxu0 %v1399_v12 }
  0x54   : > { %1297 = vmatprep.subr.bf16.mxu0 %v1413_v6 }
  0x57   : > { %1298 = vmatpush3.bf16.msra.mxu0 %v1400_v13 }
  0x58   : > { %1299 = vmatprep.subr.bf16.mxu0 %v1413_v6 }
  0x5b   : > { %1300 = vmatpush3.bf16.msra.mxu0 %v1401_v14 }
  0x5c   : > { %1301 = vmatprep.subr.bf16.mxu0 %v1413_v6 }
  0x5f   : > { %1302 = vmatpush3.bf16.msra.mxu0 %v1402_v15 }
  0x60   : > { %1303 = vmatprep.subr.bf16.mxu0 %v1413_v6 }
  0x63   : > { %1304 = vmatpush3.bf16.msra.mxu0 %v1403_v16 }
  0x66   : > { %1306 = vmatmul.mubr.bf16.vlgmr.msra.gmra.mrb[8].mxu0 %v1404_v17 }
  0xf9   : > { %v1208_v18 = vpop.f32.mrb[0].mxu0 }
  0xfa   : > { %v1209_v20 = vpop.f32.mrb[1].mxu0 }
  0xfb   : > { %v1210_v21 = vadd.f32 %v1209_v20, %v1208_v18  ;;  %v1211_v22 = vpop.f32.mrb[2].mxu0  ;;  %v1230_v23 = vpop.f32.mrb[0].mxu1 }
  0xfc   : > { %v1212_v24 = vpop.f32.mrb[3].mxu0  ;;  %v1231_v27 = vpop.f32.mrb[1].mxu1 }
  0xfd   : > { %v852_v25 = vadd.f32 %v1210_v21, %v1099_v19  ;;  %v1213_v26 = vadd.f32 %v1212_v24, %v1211_v22  ;;  %v1232_v28 = vadd.f32 %v1231_v27, %v1230_v23  ;;  %v1233_v29 = vpop.f32.mrb[2].mxu1 }
  0xfe   : > { %v1234_v31 = vpop.f32.mrb[3].mxu1 }
  0xff   : > { %v855_v30 = vadd.f32 %v1213_v26, %v1099_v19  ;;  %v893_v32 = vadd.f32 %v1232_v28, %v852_v25  ;;  %v1235_v33 = vadd.f32 %v1234_v31, %v1233_v29 }
 0x101   : > { %v896_v34 = vadd.f32 %v1235_v33, %v855_v30 }
 0x119   : > { %v1252_v35 = vpop.f32.mrb[4].mxu0 }
 0x11a   : > { %v1253_v36 = vpop.f32.mrb[5].mxu0 }
 0x11b   : > { %v1254_v37 = vadd.f32 %v1253_v36, %v1252_v35  ;;  %v1255_v38 = vpop.f32.mrb[6].mxu0  ;;  %v1274_v39 = vpop.f32.mrb[4].mxu1 }
 0x11c   : > { %v1256_v40 = vpop.f32.mrb[7].mxu0  ;;  %v1275_v43 = vpop.f32.mrb[5].mxu1 }
 0x11d   : > { %v934_v41 = vadd.f32 %v1254_v37, %v893_v32  ;;  %v1257_v42 = vadd.f32 %v1256_v40, %v1255_v38  ;;  %v1276_v44 = vadd.f32 %v1275_v43, %v1274_v39  ;;  %v1277_v45 = vpop.f32.mrb[6].mxu1 }
 0x11e   : > { %v1278_v47 = vpop.f32.mrb[7].mxu1 }
 0x11f   : > { %v937_v46 = vadd.f32 %v1257_v42, %v896_v34  ;;  %v1279_v48 = vadd.f32 %v1278_v47, %v1277_v45  ;;  %v975_v49 = vadd.f32 %v1276_v44, %v934_v41 }
 0x121   : > { %v978_v50 = vadd.f32 %v1279_v48, %v937_v46 }
 0x139   : > { %v1015_v51 = vpop.f32.mrb[8].mxu0 }
 0x13a   : > { %v1016_v52 = vadd.f32 %v1015_v51, %v975_v49  ;;  %v1307_v53 = vpop.f32.mrb[9].mxu0 }
 0x13b   : > { %v1018_v54 = vpop.f32.mrb[10].mxu0 }
 0x13c   : > { %v1019_v55 = vadd.f32 %v1018_v54, %v978_v50  ;;  %v1308_v56 = vpop.f32.mrb[11].mxu0  ;;  %v1022_v57 = vmax.f32 %v1016_v52, 0.0 }
 0x13e   : > { %v1023_v58 = vmax.f32 %v1019_v55, 0.0 }
 0x140   : > { %v1190_v59 = vpack.c.bf16 %v1023_v58, %v1022_v57 }
 0x142   : > { %1191 = vst [vmem:[%s175_s20] sm:$0xff] %v1190_v59  }
 0x143 PF: > { %s13_s12 = sadd.s32 1, %s1411_s12  }
 0x144   : > { %p10_p4 = scmp.ge.s32.totalorder %s13_s12, 4  }
 0x146   :  { %12 = sbr.rel (!%p10_p4) target bundleno = 1 (0x1), region = 62 }

// kernel: _lambda_.31
= control target key start
LH: loop header
LB: loop body
LE: loop exit
PB: predicated region body
PF: predicated region fallthrough
CT: control target
= control target key end

     0   :  { %s2660_s18 = smov 0   ;;  %s3167_s0 = inlined_call_operand.vmem [shape: bf16[32,1152], index: 0, kind: input, shape index: {}]   ;;  %s3168_s1 = inlined_call_operand.vmem [shape: bf16[32,1152], index: 1, kind: input, shape index: {}]   ;;  %s3169_s2 = inlined_call_operand.vmem [shape: bf16[1152,128], index: 2, kind: input, shape index: {}]   ;;  %s3170_s3 = inlined_call_operand.vmem [shape: bf16[1152,128], index: 3, kind: input, shape index: {}]   ;;  %s3171_s4 = inlined_call_operand.vmem [shape: f32[1,128], index: 4, kind: input, shape index: {}]   ;;  %s3172_s5 = inlined_call_operand.vmem [shape: bf16[32,128], index: 5, kind: output, shape index: {}]  }
   0x1 LB: > { %s2020_s19 = sadd.s32 4294967295, %s2626_s18   ;;  %p2024_p0 = scmp.ge.s32.totalorder %s2626_s18, 1  ;;  %s2626_s18 = sphi %s2660_s18, %s15_s18  }
   0x2   : > { %p201_p1 = scmp.lt.s32.totalorder %s2626_s18, 3 }
   0x4   : > { %p202_p2 = pnand %p2024_p0, %p201_p1 }
   0x5   : > { %v2450_v0 = vld [vmem:[%s3170_s3 + $0x40] sm:$0xff] (!%p202_p2)   ;;  %v2454_v4 = vld [vmem:[%s3170_s3 + $0x48] sm:$0xff] (!%p202_p2)   ;;  %v2458_v8 = vld [vmem:[%s3170_s3 + $0x50] sm:$0xff] (!%p202_p2)   ;;  %s2025_s27 = sshll.u32 (!%p202_p2), %s2020_s19, 1  ;;  %vm2629_vm0 = vmmov (!%p202_p2), 0  }
   0x6   : > { %205 = sbr.rel (%p202_p2) target bundleno = 396 (0x18c), region = 40  ;;  %v2451_v1 = vld [vmem:[%s3170_s3 + $0xc0] sm:$0xff] (!%p202_p2)   ;;  %2205 = vmatprep.subr.bf16.mxu0 (!%p202_p2), %v2450_v0  ;;  %v2455_v5 = vld [vmem:[%s3170_s3 + $0xc8] sm:$0xff] (!%p202_p2)   ;;  %v2459_v9 = vld [vmem:[%s3170_s3 + $0xd0] sm:$0xff] (!%p202_p2)   ;;  %p237_p3 = scmp.lt.s32.totalorder (!%p202_p2), %s2025_s27, 3 }
   0x7   : > { %v2452_v2 = vld [vmem:[%s3170_s3] sm:$0xff] (!%p202_p2)   ;;  %2227 = vmatprep.subr.bf16.mxu1 (!%p202_p2), %v2451_v1  ;;  %v2456_v6 = vld [vmem:[%s3170_s3 + $0x8] sm:$0xff] (!%p202_p2)   ;;  %v2460_v10 = vld [vmem:[%s3170_s3 + $0x10] sm:$0xff] (!%p202_p2)  }
   0x8   : > { %v2453_v3 = vld [vmem:[%s3170_s3 + $0x80] sm:$0xff] (!%p202_p2)   ;;  %2206 = vmatpush3.bf16.msra.mxu0 (!%p202_p2), %v2452_v2  ;;  %v2457_v7 = vld [vmem:[%s3170_s3 + $0x88] sm:$0xff] (!%p202_p2)   ;;  %v2461_v11 = vld [vmem:[%s3170_s3 + $0x90] sm:$0xff] (!%p202_p2)  }
   0x9   : > { %2228 = vmatpush3.bf16.msra.mxu1 (!%p202_p2), %v2453_v3  ;;  %2207 = vmatprep.subr.bf16.mxu0 (!%p202_p2), %v2454_v4  ;;  %v2462_v12 = vld [vmem:[%s3170_s3 + $0x58] sm:$0xff] (!%p202_p2)   ;;  %v2466_v16 = vld [vmem:[%s3170_s3 + $0x60] sm:$0xff] (!%p202_p2)   ;;  %v2470_v20 = vld [vmem:[%s3170_s3 + $0x68] sm:$0xff] (!%p202_p2)  }
   0xa   : > { %2229 = vmatprep.subr.bf16.mxu1 (!%p202_p2), %v2455_v5  ;;  %v2463_v13 = vld [vmem:[%s3170_s3 + $0xd8] sm:$0xff] (!%p202_p2)   ;;  %v2467_v17 = vld [vmem:[%s3170_s3 + $0xe0] sm:$0xff] (!%p202_p2)   ;;  %v2471_v21 = vld [vmem:[%s3170_s3 + $0xe8] sm:$0xff] (!%p202_p2)  }
   0xb   : > { %v2464_v14 = vld [vmem:[%s3170_s3 + $0x18] sm:$0xff] (!%p202_p2)   ;;  %v2468_v18 = vld [vmem:[%s3170_s3 + $0x20] sm:$0xff] (!%p202_p2)   ;;  %v2472_v22 = vld [vmem:[%s3170_s3 + $0x28] sm:$0xff] (!%p202_p2)  }
   0xc   : > { %2208 = vmatpush3.bf16.msra.mxu0 (!%p202_p2), %v2456_v6  ;;  %v2465_v15 = vld [vmem:[%s3170_s3 + $0x98] sm:$0xff] (!%p202_p2)   ;;  %v2469_v19 = vld [vmem:[%s3170_s3 + $0xa0] sm:$0xff] (!%p202_p2)   ;;  %v2473_v23 = vld [vmem:[%s3170_s3 + $0xa8] sm:$0xff] (!%p202_p2)  }
   0xd   : > { %2230 = vmatpush3.bf16.msra.mxu1 %v2457_v7  ;;  %2209 = vmatprep.subr.bf16.mxu0 %v2458_v8  ;;  %s3174_s27 = smov (!%p237_p3, %s2025_s27), 3  ;;  %v2474_v24 = vld [vmem:[%s3170_s3 + $0x70] sm:$0xff]   ;;  %v2478_v28 = vld [vmem:[%s3170_s3 + $0x78] sm:$0xff]   ;;  %v2488_v36 = vld [vmem:[%s3170_s3 + $0x140] sm:$0xff]   ;;  %v2628_v7 = vmov 0.0  }
   0xe   : > { %2231 = vmatprep.subr.bf16.mxu1 %v2459_v9  ;;  %v2475_v25 = vld [vmem:[%s3170_s3 + $0xf0] sm:$0xff]   ;;  %s2439_s26 = smul.u32 36, %s3174_s27  ;;  %v2479_v29 = vld [vmem:[%s3170_s3 + $0xf8] sm:$0xff]   ;;  %v2489_v37 = vld [vmem:[%s3170_s3 + $0x1c0] sm:$0xff]   ;;  %s2030_s8 = sshll.u32 %s3174_s27, 2 }
   0xf   : > { %v2476_v26 = vld [vmem:[%s3170_s3 + $0x30] sm:$0xff]   ;;  %v2480_v30 = vld [vmem:[%s3170_s3 + $0x38] sm:$0xff]   ;;  %v2490_v38 = vld [vmem:[%s3170_s3 + $0x100] sm:$0xff]   ;;  %s254_s19 = scalar_lea.vmem %s3172_s5, %s2030_s8 }
  0x10   : > { %2210 = vmatpush3.bf16.msra.mxu0 %v2460_v10  ;;  %v2477_v27 = vld [vmem:[%s3170_s3 + $0xb0] sm:$0xff]   ;;  %s2768_s12 = scalar_lea.vmem %s3168_s1, %s2439_s26  ;;  %v2481_v31 = vld [vmem:[%s3170_s3 + $0xb8] sm:$0xff]   ;;  %v2491_v39 = vld [vmem:[%s3170_s3 + $0x180] sm:$0xff]   ;;  %s2950_s16 = scalar_lea.vmem %s3167_s0, %s2439_s26 }
  0x11   : > { %2232 = vmatpush3.bf16.msra.mxu1 %v2461_v11  ;;  %2211 = vmatprep.subr.bf16.mxu0 %v2462_v12  ;;  %v2482_v32 = vld [vmem:[%s2768_s12] ss:$36 sps:$4 sm:$0xff]   ;;  %v2485_v34 = vld [vmem:[%s2768_s12 + $0x8] ss:$36 sps:$4 sm:$0xff]   ;;  %v2496_v44 = vld [vmem:[%s3170_s3 + $0x150] sm:$0xff]  }
  0x12   : > { %2233 = vmatprep.subr.bf16.mxu1 %v2463_v13  ;;  %v2484_v33 = vld [vmem:[%s2768_s12 + $0x4] ss:$36 sps:$4 sm:$0xff]   ;;  %v2487_v35 = vld [vmem:[%s2768_s12 + $0xc] ss:$36 sps:$4 sm:$0xff]   ;;  %v2500_v48 = vld [vmem:[%s3170_s3 + $0x158] sm:$0xff]  }
  0x13   : > { %1075 = vmatprep.mubr.bf16.mxu0 %v2484_v33  ;;  %1116 = vmatprep.mubr.bf16.mxu1 %v2487_v35  ;;  %v2492_v40 = vld [vmem:[%s3170_s3 + $0x148] sm:$0xff]   ;;  %v2497_v45 = vld [vmem:[%s3170_s3 + $0x1d0] sm:$0xff]   ;;  %v2501_v49 = vld [vmem:[%s3170_s3 + $0x1d8] sm:$0xff]  }
  0x14   : > { %2212 = vmatpush3.bf16.msra.mxu0 %v2464_v14  ;;  %v2493_v41 = vld [vmem:[%s3170_s3 + $0x1c8] sm:$0xff]   ;;  %v2498_v46 = vld [vmem:[%s3170_s3 + $0x110] sm:$0xff]   ;;  %v2502_v50 = vld [vmem:[%s3170_s3 + $0x118] sm:$0xff]  }
  0x15   : > { %2234 = vmatpush3.bf16.msra.mxu1 %v2465_v15  ;;  %2213 = vmatprep.subr.bf16.mxu0 %v2466_v16  ;;  %v2494_v42 = vld [vmem:[%s3170_s3 + $0x108] sm:$0xff]   ;;  %v2499_v47 = vld [vmem:[%s3170_s3 + $0x190] sm:$0xff]   ;;  %v2503_v51 = vld [vmem:[%s3170_s3 + $0x198] sm:$0xff]  }
  0x16   : > { %2235 = vmatprep.subr.bf16.mxu1 %v2467_v17  ;;  %v2495_v43 = vld [vmem:[%s3170_s3 + $0x188] sm:$0xff]   ;;  %v2504_v52 = vld [vmem:[%s3170_s3 + $0x160] sm:$0xff]   ;;  %v2512_v60 = vld [vmem:[%s3170_s3 + $0x170] sm:$0xff]  }
  0x17   : > { %v2505_v53 = vld [vmem:[%s3170_s3 + $0x1e0] sm:$0xff]   ;;  %v2508_v56 = vld [vmem:[%s3170_s3 + $0x168] sm:$0xff]   ;;  %v2513_v61 = vld [vmem:[%s3170_s3 + $0x1f0] sm:$0xff]  }
  0x18   : > { %2214 = vmatpush3.bf16.msra.mxu0 %v2468_v18  ;;  %v2506_v54 = vld [vmem:[%s3170_s3 + $0x120] sm:$0xff]   ;;  %v2509_v57 = vld [vmem:[%s3170_s3 + $0x1e8] sm:$0xff]   ;;  %v2514_v62 = vld [vmem:[%s3170_s3 + $0x130] sm:$0xff]  }
  0x19   : > { %2236 = vmatpush3.bf16.msra.mxu1 %v2469_v19  ;;  %2215 = vmatprep.subr.bf16.mxu0 %v2470_v20  ;;  %v2507_v55 = vld [vmem:[%s3170_s3 + $0x1a0] sm:$0xff]   ;;  %v2510_v58 = vld [vmem:[%s3170_s3 + $0x128] sm:$0xff]   ;;  %v2515_v63 = vld [vmem:[%s3170_s3 + $0x1b0] sm:$0xff]  }
  0x1a   : > { %2237 = vmatprep.subr.bf16.mxu1 %v2471_v21  ;;  %v2511_v59 = vld [vmem:[%s3170_s3 + $0x1a8] sm:$0xff]   ;;  %v2516_v0 = vld [vmem:[%s3170_s3 + $0x178] sm:$0xff]   ;;  %v2520_v4 = vld [vmem:[%s2768_s12 + $0x10] ss:$36 sps:$4 sm:$0xff]  }
  0x1b   : > { %v2517_v1 = vld [vmem:[%s3170_s3 + $0x1f8] sm:$0xff]   ;;  %v2526_v9 = vld [vmem:[%s3169_s2 + $0x40] sm:$0xff]   ;;  %v2529_v12 = vld [vmem:[%s3169_s2 + $0x48] sm:$0xff]  }
  0x1c   : > { %2216 = vmatpush3.bf16.msra.mxu0 %v2472_v22  ;;  %v2518_v2 = vld [vmem:[%s3170_s3 + $0x138] sm:$0xff]   ;;  %v2527_v10 = vld [vmem:[%s3170_s3 + $0x200] sm:$0xff]   ;;  %v2530_v13 = vld [vmem:[%s3170_s3 + $0x208] sm:$0xff]  }
  0x1d   : > { %2238 = vmatpush3.bf16.msra.mxu1 %v2473_v23  ;;  %2217 = vmatprep.subr.bf16.mxu0 %v2474_v24  ;;  %v2519_v3 = vld [vmem:[%s3170_s3 + $0x1b8] sm:$0xff]   ;;  %v2528_v11 = vld [vmem:[%s3169_s2] sm:$0xff]   ;;  %v2531_v14 = vld [vmem:[%s3169_s2 + $0x8] sm:$0xff]  }
  0x1e   : > { %2239 = vmatprep.subr.bf16.mxu1 %v2475_v25  ;;  %v2522_v5 = vld [vmem:[%s2768_s12 + $0x14] ss:$36 sps:$4 sm:$0xff]   ;;  %v2525_v8 = vld [vmem:[%s2768_s12 + $0x1c] ss:$36 sps:$4 sm:$0xff]   ;;  %v2541_v24 = vld [vmem:[%s3169_s2 + $0x68] sm:$0xff]  }
  0x1f   : > { %v2523_v6 = vld [vmem:[%s2768_s12 + $0x18] ss:$36 sps:$4 sm:$0xff]   ;;  %v2532_v15 = vld [vmem:[%s3169_s2 + $0x50] sm:$0xff]   ;;  %v2538_v21 = vld [vmem:[%s3169_s2 + $0x60] sm:$0xff]  }
  0x20   : > { %2218 = vmatpush3.bf16.msra.mxu0 %v2476_v26  ;;  %v2533_v16 = vld [vmem:[%s3170_s3 + $0x210] sm:$0xff]   ;;  %v2535_v18 = vld [vmem:[%s3169_s2 + $0x58] sm:$0xff]   ;;  %v2539_v22 = vld [vmem:[%s3170_s3 + $0x220] sm:$0xff]  }
  0x21   : > { %2240 = vmatpush3.bf16.msra.mxu1 %v2477_v27  ;;  %2219 = vmatprep.subr.bf16.mxu0 %v2478_v28  ;;  %v2534_v17 = vld [vmem:[%s3169_s2 + $0x10] sm:$0xff]   ;;  %v2536_v19 = vld [vmem:[%s3170_s3 + $0x218] sm:$0xff]   ;;  %v2540_v23 = vld [vmem:[%s3169_s2 + $0x20] sm:$0xff]  }
  0x22   : > { %2241 = vmatprep.subr.bf16.mxu1 %v2479_v29  ;;  %v2537_v20 = vld [vmem:[%s3169_s2 + $0x18] sm:$0xff]   ;;  %v2542_v25 = vld [vmem:[%s3170_s3 + $0x228] sm:$0xff]   ;;  %v2544_v27 = vld [vmem:[%s3169_s2 + $0x70] sm:$0xff]  }
  0x23   : > { %v2543_v26 = vld [vmem:[%s3169_s2 + $0x28] sm:$0xff]   ;;  %v2545_v28 = vld [vmem:[%s3170_s3 + $0x230] sm:$0xff]   ;;  %v2549_v33 = vld [vmem:[%s3169_s2 + $0x38] sm:$0xff]  }
  0x24   : > { %2220 = vmatpush3.bf16.msra.mxu0 %v2480_v30  ;;  %v2546_v29 = vld [vmem:[%s3169_s2 + $0x30] sm:$0xff]   ;;  %v2552_v30 = vld [vmem:[%s2950_s16 + $0x4] ss:$36 sps:$4 sm:$0xff]  }
  0x25   : > { %2242 = vmatpush3.bf16.msra.mxu1 %v2481_v31  ;;  %2249 = vmatprep.subr.bf16.mxu0 %v2488_v36  ;;  %v2547_v31 = vld [vmem:[%s3169_s2 + $0x78] sm:$0xff]   ;;  %v2554_v35 = vld [vmem:[%s3169_s2 + $0xc0] sm:$0xff]  }
  0x26   : > { %2271 = vmatprep.subr.bf16.mxu1 %v2489_v37  ;;  %v2550_v36 = vld [vmem:[%s2950_s16] ss:$36 sps:$4 sm:$0xff]  }
  0x27   : > { %1076 = vmatmul.mubr.bf16.vlgmr.msra.gmra.mrb[0].mxu0 %v2482_v32  ;;  %v2548_v32 = vld [vmem:[%s3170_s3 + $0x238] sm:$0xff]   ;;  %v2556_v37 = vld [vmem:[%s3169_s2 + $0x140] sm:$0xff]  }
  0x28   : > { %1117 = vmatmul.mubr.bf16.vlgmr.msra.gmra.mrb[0].mxu1 %v2485_v34  ;;  %2250 = vmatpush3.bf16.msra.mxu0 %v2490_v38  ;;  %v2553_v34 = vld [vmem:[%s2768_s12 + $0x20] ss:$36 sps:$4 sm:$0xff]  }
  0x29   : > { %2272 = vmatpush3.bf16.msra.mxu1 %v2491_v39  ;;  %2251 = vmatprep.subr.bf16.mxu0 %v2492_v40  ;;  %v2555_v38 = vld [vmem:[%s3169_s2 + $0x80] sm:$0xff]   ;;  %v2558_v40 = vld [vmem:[%s3169_s2 + $0xc8] sm:$0xff]  }
  0x2a   : > { %2273 = vmatprep.subr.bf16.mxu1 %v2493_v41  ;;  %1157 = vmatprep.mubr.bf16.mxu0 %v2522_v5  ;;  %v2557_v39 = vld [vmem:[%s3169_s2 + $0x100] sm:$0xff]   ;;  %v2560_v41 = vld [vmem:[%s3169_s2 + $0x148] sm:$0xff]  }
  0x2b   : > { %1198 = vmatprep.mubr.bf16.mxu1 %v2525_v8  ;;  %v2585_v5 = vld [vmem:[%s2950_s16 + $0x8] ss:$36 sps:$4 sm:$0xff]   ;;  %v2590_v8 = vld [vmem:[%s2950_s16 + $0x10] ss:$36 sps:$4 sm:$0xff]  }
  0x2c   : > { %2252 = vmatpush3.bf16.msra.mxu0 %v2494_v42  ;;  %v2559_v42 = vld [vmem:[%s3169_s2 + $0x88] sm:$0xff]  }
  0x2d   : > { %2274 = vmatpush3.bf16.msra.mxu1 %v2495_v43  ;;  %2253 = vmatprep.subr.bf16.mxu0 %v2496_v44  ;;  %v2561_v43 = vld [vmem:[%s3169_s2 + $0x108] sm:$0xff]   ;;  %v2562_v44 = vld [vmem:[%s3169_s2 + $0xd0] sm:$0xff]  }
  0x2e   : > { %2275 = vmatprep.subr.bf16.mxu1 %v2497_v45  ;;  %v2564_v45 = vld [vmem:[%s3169_s2 + $0x150] sm:$0xff]  }
  0x30   : > { %2254 = vmatpush3.bf16.msra.mxu0 %v2498_v46  ;;  %v2563_v46 = vld [vmem:[%s3169_s2 + $0x90] sm:$0xff]  }
  0x31   : > { %2276 = vmatpush3.bf16.msra.mxu1 %v2499_v47  ;;  %2255 = vmatprep.subr.bf16.mxu0 %v2500_v48  ;;  %v2565_v47 = vld [vmem:[%s3169_s2 + $0x110] sm:$0xff]   ;;  %v2566_v48 = vld [vmem:[%s3169_s2 + $0xd8] sm:$0xff]  }
  0x32   : > { %2277 = vmatprep.subr.bf16.mxu1 %v2501_v49  ;;  %v2568_v49 = vld [vmem:[%s3169_s2 + $0x158] sm:$0xff]  }
  0x34   : > { %2256 = vmatpush3.bf16.msra.mxu0 %v2502_v50  ;;  %v2567_v50 = vld [vmem:[%s3169_s2 + $0x98] sm:$0xff]  }
  0x35   : > { %2278 = vmatpush3.bf16.msra.mxu1 %v2503_v51  ;;  %2257 = vmatprep.subr.bf16.mxu0 %v2504_v52  ;;  %v2569_v51 = vld [vmem:[%s3169_s2 + $0x118] sm:$0xff]   ;;  %v2570_v52 = vld [vmem:[%s3169_s2 + $0xe0] sm:$0xff]  }
  0x36   : > { %2279 = vmatprep.subr.bf16.mxu1 %v2505_v53  ;;  %v2572_v53 = vld [vmem:[%s3169_s2 + $0x160] sm:$0xff]  }
  0x38   : > { %2258 = vmatpush3.bf16.msra.mxu0 %v2506_v54  ;;  %v2571_v54 = vld [vmem:[%s3169_s2 + $0xa0] sm:$0xff]  }
  0x39   : > { %2280 = vmatpush3.bf16.msra.mxu1 %v2507_v55  ;;  %2259 = vmatprep.subr.bf16.mxu0 %v2508_v56  ;;  %v2573_v55 = vld [vmem:[%s3169_s2 + $0x120] sm:$0xff]   ;;  %v2574_v56 = vld [vmem:[%s3169_s2 + $0xe8] sm:$0xff]  }
  0x3a   : > { %2281 = vmatprep.subr.bf16.mxu1 %v2509_v57  ;;  %v2576_v57 = vld [vmem:[%s3169_s2 + $0x168] sm:$0xff]  }
  0x3c   : > { %2260 = vmatpush3.bf16.msra.mxu0 %v2510_v58  ;;  %v2575_v58 = vld [vmem:[%s3169_s2 + $0xa8] sm:$0xff]  }
  0x3d   : > { %2282 = vmatpush3.bf16.msra.mxu1 %v2511_v59  ;;  %2261 = vmatprep.subr.bf16.mxu0 %v2512_v60  ;;  %v2577_v59 = vld [vmem:[%s3169_s2 + $0x128] sm:$0xff]   ;;  %v2578_v60 = vld [vmem:[%s3169_s2 + $0xf0] sm:$0xff]  }
  0x3e   : > { %2283 = vmatprep.subr.bf16.mxu1 %v2513_v61  ;;  %v2580_v61 = vld [vmem:[%s3169_s2 + $0x170] sm:$0xff]  }
  0x40   : > { %2262 = vmatpush3.bf16.msra.mxu0 %v2514_v62  ;;  %v2579_v62 = vld [vmem:[%s3169_s2 + $0xb0] sm:$0xff]  }
  0x41   : > { %2284 = vmatpush3.bf16.msra.mxu1 %v2515_v63  ;;  %2263 = vmatprep.subr.bf16.mxu0 %v2516_v0  ;;  %v2581_v63 = vld [vmem:[%s3169_s2 + $0x130] sm:$0xff]   ;;  %v2582_v0 = vld [vmem:[%s3169_s2 + $0xf8] sm:$0xff]  }
  0x42   : > { %2285 = vmatprep.subr.bf16.mxu1 %v2517_v1  ;;  %v2584_v1 = vld [vmem:[%s3169_s2 + $0x178] sm:$0xff]  }
  0x44   : > { %2264 = vmatpush3.bf16.msra.mxu0 %v2518_v2  ;;  %v2587_v2 = vld [vmem:[%s2950_s16 + $0xc] ss:$36 sps:$4 sm:$0xff]  }
  0x45   : > { %2286 = vmatpush3.bf16.msra.mxu1 %v2519_v3  ;;  %2399 = vmatprep.subr.bf16.mxu0 %v2628_v7  ;;  %v2583_v3 = vld [vmem:[%s3169_s2 + $0xb8] sm:$0xff]  }
  0x46   : > { %2302 = vmatprep.subr.bf16.mxu1 %v2526_v9  ;;  %v2592_v9 = vld [vmem:[%s2950_s16 + $0x14] ss:$36 sps:$4 sm:$0xff]  }
  0x47   : > { %1158 = vmatmul.mubr.bf16.vlgmr.msra.gmra.mrb[4].mxu0 %v2520_v4  ;;  %v2588_v4 = vld [vmem:[%s3169_s2 + $0x138] sm:$0xff]  }
  0x48   : > { %2415 = vmatprep.mubr.msk.bf16.mxu0 %vm2629_vm0, %v2628_v7  ;;  %1199 = vmatmul.mubr.bf16.vlgmr.msra.gmra.mrb[4].mxu1 %v2523_v6  ;;  %v2589_v6 = vld [vmem:[%s3169_s2 + $0x1c0] sm:$0xff]  }
  0x49   : > { %2400 = vmatpush3.bf16.msra.mxu0 %v2527_v10  ;;  %2303 = vmatpush3.bf16.msra.mxu1 %v2528_v11  ;;  %v2593_v10 = vld [vmem:[%s3169_s2 + $0x180] sm:$0xff]  }
  0x4a   : > { %2401 = vmatprep.subr.bf16.mxu0 %v2628_v7  ;;  %2304 = vmatprep.subr.bf16.mxu1 %v2529_v12  ;;  %v2594_v11 = vld [vmem:[%s3169_s2 + $0x200] sm:$0xff]   ;;  %v2595_v12 = vld [vmem:[%s3169_s2 + $0x1c8] sm:$0xff]  }
  0x4b   : > { %1758 = vmatprep.mubr.bf16.mxu1 %v2552_v30  ;;  %v2612_v30 = vld [vmem:[%s3169_s2 + $0x230] sm:$0xff]  }
  0x4d   : > { %2402 = vmatpush3.bf16.msra.mxu0 %v2530_v13  ;;  %2305 = vmatpush3.bf16.msra.mxu1 %v2531_v14  ;;  %v2596_v13 = vld [vmem:[%s3169_s2 + $0x188] sm:$0xff]  }
  0x4e   : > { %2403 = vmatprep.subr.bf16.mxu0 %v2628_v7  ;;  %2306 = vmatprep.subr.bf16.mxu1 %v2532_v15  ;;  %v2597_v14 = vld [vmem:[%s3169_s2 + $0x208] sm:$0xff]   ;;  %v2598_v15 = vld [vmem:[%s3169_s2 + $0x1d0] sm:$0xff]  }
  0x51   : > { %2404 = vmatpush3.bf16.msra.mxu0 %v2533_v16  ;;  %2307 = vmatpush3.bf16.msra.mxu1 %v2534_v17  ;;  %v2599_v16 = vld [vmem:[%s3169_s2 + $0x190] sm:$0xff]  }
  0x52   : > { %2405 = vmatprep.subr.bf16.mxu0 %v2628_v7  ;;  %2308 = vmatprep.subr.bf16.mxu1 %v2535_v18  ;;  %v2600_v17 = vld [vmem:[%s3169_s2 + $0x210] sm:$0xff]   ;;  %v2601_v18 = vld [vmem:[%s3169_s2 + $0x1d8] sm:$0xff]  }
  0x55   : > { %2406 = vmatpush3.bf16.msra.mxu0 %v2536_v19  ;;  %2309 = vmatpush3.bf16.msra.mxu1 %v2537_v20  ;;  %v2602_v19 = vld [vmem:[%s3169_s2 + $0x198] sm:$0xff]  }
  0x56   : > { %2407 = vmatprep.subr.bf16.mxu0 %v2628_v7  ;;  %2310 = vmatprep.subr.bf16.mxu1 %v2538_v21  ;;  %v2603_v20 = vld [vmem:[%s3169_s2 + $0x218] sm:$0xff]   ;;  %v2604_v21 = vld [vmem:[%s3169_s2 + $0x1e0] sm:$0xff]  }
  0x59   : > { %2408 = vmatpush3.bf16.msra.mxu0 %v2539_v22  ;;  %2311 = vmatpush3.bf16.msra.mxu1 %v2540_v23  ;;  %v2605_v22 = vld [vmem:[%s3169_s2 + $0x1a0] sm:$0xff]  }
  0x5a   : > { %2409 = vmatprep.subr.bf16.mxu0 %v2628_v7  ;;  %2312 = vmatprep.subr.bf16.mxu1 %v2541_v24  ;;  %v2606_v23 = vld [vmem:[%s3169_s2 + $0x220] sm:$0xff]   ;;  %v2607_v24 = vld [vmem:[%s3169_s2 + $0x1e8] sm:$0xff]  }
  0x5d   : > { %2410 = vmatpush3.bf16.msra.mxu0 %v2542_v25  ;;  %2313 = vmatpush3.bf16.msra.mxu1 %v2543_v26  ;;  %v2608_v25 = vld [vmem:[%s3169_s2 + $0x1a8] sm:$0xff]  }
  0x5e   : > { %2411 = vmatprep.subr.bf16.mxu0 %v2628_v7  ;;  %2314 = vmatprep.subr.bf16.mxu1 %v2544_v27  ;;  %v2609_v26 = vld [vmem:[%s3169_s2 + $0x228] sm:$0xff]   ;;  %v2610_v27 = vld [vmem:[%s3169_s2 + $0x1f0] sm:$0xff]  }
  0x61   : > { %2412 = vmatpush3.bf16.msra.mxu0 %v2545_v28  ;;  %2315 = vmatpush3.bf16.msra.mxu1 %v2546_v29  ;;  %v2617_v28 = vld [vmem:[%s2950_s16 + $0x1c] ss:$36 sps:$4 sm:$0xff]   ;;  %v2611_v29 = vld [vmem:[%s3169_s2 + $0x1b0] sm:$0xff]  }
  0x62   : > { %2413 = vmatprep.subr.bf16.mxu0 %v2628_v7  ;;  %2316 = vmatprep.subr.bf16.mxu1 %v2547_v31  ;;  %v2613_v31 = vld [vmem:[%s3169_s2 + $0x1f8] sm:$0xff]  }
  0x65   : > { %2414 = vmatpush3.bf16.msra.mxu0 %v2548_v32  ;;  %2317 = vmatpush3.bf16.msra.mxu1 %v2549_v33  ;;  %v2614_v32 = vld [vmem:[%s3169_s2 + $0x1b8] sm:$0xff]  }
  0x66   : > { %2324 = vmatprep.subr.bf16.mxu0 %v2554_v35  ;;  %2346 = vmatprep.subr.bf16.mxu1 %v2556_v37  ;;  %v2618_v33 = vld [vmem:[%s3169_s2 + $0x238] sm:$0xff]   ;;  %v2619_v35 = vld [vmem:[%s2950_s16 + $0x20] ss:$36 sps:$4 sm:$0xff]  }
  0x68   : > { %2416 = vmatmul.mubr.bf16.vlgmr.msra.gmra.mrb[8].mxu0 %v2553_v34  ;;  %1759 = vmatmul.mubr.bf16.vlgmr.msra.gmra.mrb[8].mxu1 %v2550_v36  ;;  %v2615_v34 = vld [vmem:[%s2950_s16 + $0x18] ss:$36 sps:$4 sm:$0xff]  }
  0x69   : > { %2325 = vmatpush3.bf16.msra.mxu0 %v2555_v38  ;;  %2347 = vmatpush3.bf16.msra.mxu1 %v2557_v39 }
  0x6a   : > { %2326 = vmatprep.subr.bf16.mxu0 %v2558_v40  ;;  %2348 = vmatprep.subr.bf16.mxu1 %v2560_v41 }
  0x6b   : > { %1799 = vmatprep.mubr.bf16.mxu0 %v2587_v2  ;;  %1840 = vmatprep.mubr.bf16.mxu1 %v2592_v9 }
  0x6d   : > { %2327 = vmatpush3.bf16.msra.mxu0 %v2559_v42  ;;  %2349 = vmatpush3.bf16.msra.mxu1 %v2561_v43 }
  0x6e   : > { %2328 = vmatprep.subr.bf16.mxu0 %v2562_v44  ;;  %2350 = vmatprep.subr.bf16.mxu1 %v2564_v45 }
  0x71   : > { %2329 = vmatpush3.bf16.msra.mxu0 %v2563_v46  ;;  %2351 = vmatpush3.bf16.msra.mxu1 %v2565_v47 }
  0x72   : > { %2330 = vmatprep.subr.bf16.mxu0 %v2566_v48  ;;  %2352 = vmatprep.subr.bf16.mxu1 %v2568_v49 }
  0x75   : > { %2331 = vmatpush3.bf16.msra.mxu0 %v2567_v50  ;;  %2353 = vmatpush3.bf16.msra.mxu1 %v2569_v51 }
  0x76   : > { %2332 = vmatprep.subr.bf16.mxu0 %v2570_v52  ;;  %2354 = vmatprep.subr.bf16.mxu1 %v2572_v53 }
  0x79   : > { %2333 = vmatpush3.bf16.msra.mxu0 %v2571_v54  ;;  %2355 = vmatpush3.bf16.msra.mxu1 %v2573_v55 }
  0x7a   : > { %2334 = vmatprep.subr.bf16.mxu0 %v2574_v56  ;;  %2356 = vmatprep.subr.bf16.mxu1 %v2576_v57 }
  0x7d   : > { %2335 = vmatpush3.bf16.msra.mxu0 %v2575_v58  ;;  %2357 = vmatpush3.bf16.msra.mxu1 %v2577_v59 }
  0x7e   : > { %2336 = vmatprep.subr.bf16.mxu0 %v2578_v60  ;;  %2358 = vmatprep.subr.bf16.mxu1 %v2580_v61 }
  0x81   : > { %2337 = vmatpush3.bf16.msra.mxu0 %v2579_v62  ;;  %2359 = vmatpush3.bf16.msra.mxu1 %v2581_v63 }
  0x82   : > { %2338 = vmatprep.subr.bf16.mxu0 %v2582_v0  ;;  %2360 = vmatprep.subr.bf16.mxu1 %v2584_v1 }
  0x85   : > { %2339 = vmatpush3.bf16.msra.mxu0 %v2583_v3  ;;  %2361 = vmatpush3.bf16.msra.mxu1 %v2588_v4 }
  0x86   : > { %2368 = vmatprep.subr.bf16.mxu0 %v2589_v6  ;;  %2419 = vmatprep.subr.bf16.mxu1 %v2628_v7 }
  0x88   : > { %1800 = vmatmul.mubr.bf16.vlgmr.msra.gmra.mrb[12].mxu0 %v2585_v5  ;;  %1841 = vmatmul.mubr.bf16.vlgmr.msra.gmra.mrb[12].mxu1 %v2590_v8 }
  0x89   : > { %2369 = vmatpush3.bf16.msra.mxu0 %v2593_v10  ;;  %2420 = vmatpush3.bf16.msra.mxu1 %v2594_v11 }
  0x8a   : > { %2370 = vmatprep.subr.bf16.mxu0 %v2595_v12  ;;  %2421 = vmatprep.subr.bf16.mxu1 %v2628_v7 }
  0x8b   : > { %2435 = vmatprep.mubr.msk.bf16.mxu1 %vm2629_vm0, %v2628_v7  ;;  %1881 = vmatprep.mubr.bf16.mxu0 %v2617_v28 }
  0x8d   : > { %2371 = vmatpush3.bf16.msra.mxu0 %v2596_v13  ;;  %2422 = vmatpush3.bf16.msra.mxu1 %v2597_v14 }
  0x8e   : > { %2372 = vmatprep.subr.bf16.mxu0 %v2598_v15  ;;  %2423 = vmatprep.subr.bf16.mxu1 %v2628_v7 }
  0x91   : > { %2373 = vmatpush3.bf16.msra.mxu0 %v2599_v16  ;;  %2424 = vmatpush3.bf16.msra.mxu1 %v2600_v17 }
  0x92   : > { %2374 = vmatprep.subr.bf16.mxu0 %v2601_v18  ;;  %2425 = vmatprep.subr.bf16.mxu1 %v2628_v7 }
  0x95   : > { %2375 = vmatpush3.bf16.msra.mxu0 %v2602_v19  ;;  %2426 = vmatpush3.bf16.msra.mxu1 %v2603_v20 }
  0x96   : > { %2376 = vmatprep.subr.bf16.mxu0 %v2604_v21  ;;  %2427 = vmatprep.subr.bf16.mxu1 %v2628_v7 }
  0x99   : > { %2377 = vmatpush3.bf16.msra.mxu0 %v2605_v22  ;;  %2428 = vmatpush3.bf16.msra.mxu1 %v2606_v23 }
  0x9a   : > { %2378 = vmatprep.subr.bf16.mxu0 %v2607_v24  ;;  %2429 = vmatprep.subr.bf16.mxu1 %v2628_v7 }
  0x9d   : > { %2379 = vmatpush3.bf16.msra.mxu0 %v2608_v25  ;;  %2430 = vmatpush3.bf16.msra.mxu1 %v2609_v26 }
  0x9e   : > { %2380 = vmatprep.subr.bf16.mxu0 %v2610_v27  ;;  %2431 = vmatprep.subr.bf16.mxu1 %v2628_v7 }
  0xa1   : > { %2381 = vmatpush3.bf16.msra.mxu0 %v2611_v29  ;;  %2432 = vmatpush3.bf16.msra.mxu1 %v2612_v30 }
  0xa2   : > { %2382 = vmatprep.subr.bf16.mxu0 %v2613_v31  ;;  %2433 = vmatprep.subr.bf16.mxu1 %v2628_v7 }
  0xa5   : > { %2383 = vmatpush3.bf16.msra.mxu0 %v2614_v32  ;;  %2434 = vmatpush3.bf16.msra.mxu1 %v2618_v33 }
  0xa8   : > { %1882 = vmatmul.mubr.bf16.vlgmr.msra.gmra.mrb[16].mxu0 %v2615_v34  ;;  %2436 = vmatmul.mubr.bf16.vlgmr.msra.gmra.mrb[16].mxu1 %v2619_v35 }
  0xfa   : > { %v2221_v36 = vpop.f32.mrb[0].mxu0 }
  0xfb   : > { %v2243_v37 = vpop.f32.mrb[0].mxu1  ;;  %v2222_v38 = vpop.f32.mrb[1].mxu0 }
  0xfc   : > { %v2223_v39 = vadd.f32 %v2222_v38, %v2221_v36  ;;  %v2244_v40 = vpop.f32.mrb[1].mxu1  ;;  %v2224_v41 = vpop.f32.mrb[2].mxu0 }
  0xfd   : > { %v2245_v42 = vadd.f32 %v2244_v40, %v2243_v37  ;;  %v2246_v43 = vpop.f32.mrb[2].mxu1  ;;  %v2225_v44 = vpop.f32.mrb[3].mxu0 }
  0xfe   : > { %v2226_v45 = vadd.f32 %v2225_v44, %v2224_v41  ;;  %v2247_v46 = vpop.f32.mrb[3].mxu1 }
  0xff   : > { %v1119_v47 = vadd.f32 %v2245_v42, %v2223_v39  ;;  %v2248_v48 = vadd.f32 %v2247_v46, %v2246_v43  ;;  %v2193_v43 = vld [vmem:[%s3171_s4] ss:$0 sm:$0xff] }
 0x101   : > { %v1122_v7 = vadd.f32 %v2248_v48, %v2226_v45 }
 0x11a   : > { %v2265_v49 = vpop.f32.mrb[4].mxu0 }
 0x11b   : > { %v2266_v50 = vpop.f32.mrb[5].mxu0  ;;  %v2287_v53 = vpop.f32.mrb[4].mxu1 }
 0x11c   : > { %v2267_v51 = vadd.f32 %v2266_v50, %v2265_v49  ;;  %v2268_v52 = vpop.f32.mrb[6].mxu0  ;;  %v2288_v55 = vpop.f32.mrb[5].mxu1 }
 0x11d   : > { %v2269_v54 = vpop.f32.mrb[7].mxu0  ;;  %v2289_v58 = vadd.f32 %v2288_v55, %v2287_v53  ;;  %v2290_v59 = vpop.f32.mrb[6].mxu1 }
 0x11e   : > { %v1160_v56 = vadd.f32 %v2267_v51, %v1119_v47  ;;  %v2270_v57 = vadd.f32 %v2269_v54, %v2268_v52  ;;  %v2291_v60 = vpop.f32.mrb[7].mxu1 }
 0x11f   : > { %v2292_v62 = vadd.f32 %v2291_v60, %v2290_v59 }
 0x120   : > { %v1163_v61 = vadd.f32 %v2270_v57, %v1122_v7  ;;  %v1201_v63 = vadd.f32 %v2289_v58, %v1160_v56 }
 0x122   : > { %v1204_v0 = vadd.f32 %v2292_v62, %v1163_v61 }
 0x13b   : > { %v1241_v1 = vpop.f32.mrb[8].mxu0  ;;  %v2318_v3 = vpop.f32.mrb[8].mxu1 }
 0x13c   : > { %v1242_v2 = vadd.f32 %v1241_v1, %v1201_v63  ;;  %v2417_v4 = vpop.f32.mrb[9].mxu0  ;;  %v2319_v5 = vpop.f32.mrb[9].mxu1 }
 0x13d   : > { %v1244_v6 = vpop.f32.mrb[10].mxu0  ;;  %v2320_v8 = vadd.f32 %v2319_v5, %v2318_v3  ;;  %v2321_v10 = vpop.f32.mrb[10].mxu1 }
 0x13e   : > { %v1245_v9 = vadd.f32 %v1244_v6, %v1204_v0  ;;  %v2418_v11 = vpop.f32.mrb[11].mxu0  ;;  %v2322_v12 = vpop.f32.mrb[11].mxu1 }
 0x13f   : > { %v1761_v13 = vadd.f32 %v2320_v8, %v1242_v2  ;;  %v2323_v14 = vadd.f32 %v2322_v12, %v2321_v10 }
 0x141   : > { %v1764_v15 = vadd.f32 %v2323_v14, %v1245_v9 }
 0x15b   : > { %v2340_v16 = vpop.f32.mrb[12].mxu0  ;;  %v2362_v18 = vpop.f32.mrb[12].mxu1 }
 0x15c   : > { %v2341_v17 = vpop.f32.mrb[13].mxu0  ;;  %v2363_v21 = vpop.f32.mrb[13].mxu1 }
 0x15d   : > { %v2342_v19 = vadd.f32 %v2341_v17, %v2340_v16  ;;  %v2343_v20 = vpop.f32.mrb[14].mxu0  ;;  %v2364_v23 = vadd.f32 %v2363_v21, %v2362_v18  ;;  %v2365_v24 = vpop.f32.mrb[14].mxu1 }
 0x15e   : > { %v2344_v22 = vpop.f32.mrb[15].mxu0  ;;  %v2366_v27 = vpop.f32.mrb[15].mxu1 }
 0x15f   : > { %v1802_v25 = vadd.f32 %v2342_v19, %v1761_v13  ;;  %v2345_v26 = vadd.f32 %v2344_v22, %v2343_v20  ;;  %v2367_v28 = vadd.f32 %v2366_v27, %v2365_v24 }
 0x161   : > { %v1805_v29 = vadd.f32 %v2345_v26, %v1764_v15  ;;  %v1843_v30 = vadd.f32 %v2364_v23, %v1802_v25 }
 0x163   : > { %v1846_v31 = vadd.f32 %v2367_v28, %v1805_v29 }
 0x17b   : > { %v2384_v32 = vpop.f32.mrb[16].mxu0  ;;  %v1924_v34 = vpop.f32.mrb[16].mxu1 }
 0x17c   : > { %v2385_v33 = vpop.f32.mrb[17].mxu0  ;;  %v2437_v37 = vpop.f32.mrb[17].mxu1 }
 0x17d   : > { %v2386_v35 = vadd.f32 %v2385_v33, %v2384_v32  ;;  %v2387_v36 = vpop.f32.mrb[18].mxu0  ;;  %v1927_v39 = vpop.f32.mrb[18].mxu1 }
 0x17e   : > { %v2388_v38 = vpop.f32.mrb[19].mxu0  ;;  %v2438_v42 = vpop.f32.mrb[19].mxu1 }
 0x17f   : > { %v1884_v40 = vadd.f32 %v2386_v35, %v1843_v30  ;;  %v2389_v41 = vadd.f32 %v2388_v38, %v2387_v36 }
 0x181   : > { %v1925_v44 = vadd.f32 %v1924_v34, %v1884_v40  ;;  %v1887_v45 = vadd.f32 %v2389_v41, %v1846_v31 }
 0x183   : > { %v1938_v46 = vadd.f32 %v2193_v43, %v1925_v44  ;;  %v1928_v47 = vadd.f32 %v1927_v39, %v1887_v45 }
 0x185   : > { %v1939_v48 = vadd.f32 %v2193_v43, %v1928_v47  ;;  %v1940_v7 = vmax.f32 %v1938_v46, 0.0 }
 0x187   : > { %v1941_v49 = vmax.f32 %v1939_v48, 0.0 }
 0x189   : > { %v2203_v50 = vpack.c.bf16 %v1941_v49, %v1940_v7 }
 0x18b   : > { %2204 = vst [vmem:[%s254_s19] sm:$0xff] %v2203_v50  }
 0x18c PF: > { %s15_s18 = sadd.s32 1, %s2626_s18  }
 0x18d   : > { %p12_p4 = scmp.ge.s32.totalorder %s15_s18, 4  }
 0x18f   :  { %14 = sbr.rel (!%p12_p4) target bundleno = 1 (0x1), region = 73 }

// kernel: _lambda_.34
= control target key start
LH: loop header
LB: loop body
LE: loop exit
PB: predicated region body
PF: predicated region fallthrough
CT: control target
= control target key end

     0   :  { %s135_s0 = inlined_call_operand.vmem [shape: bf16[8,128], index: 0, kind: input, shape index: {}]   ;;  %s136_s1 = inlined_call_operand.vmem [shape: bf16[8,128], index: 1, kind: input, shape index: {}]   ;;  %s137_s2 = inlined_call_operand.vmem [shape: bf16[8,128], index: 2, kind: input, shape index: {}]   ;;  %s138_s3 = inlined_call_operand.vmem [shape: bf16[8,128], index: 3, kind: input, shape index: {}]   ;;  %s139_s4 = inlined_call_operand.vmem [shape: bf16[8,128], index: 4, kind: input, shape index: {}]   ;;  %s140_s5 = inlined_call_operand.vmem [shape: bf16[8,128], index: 5, kind: input, shape index: {}]   ;;  %s141_s6 = inlined_call_operand.vmem [shape: bf16[8,128], index: 6, kind: input, shape index: {}]   ;;  %s142_s7 = inlined_call_operand.vmem [shape: bf16[8,128], index: 7, kind: input, shape index: {}]   ;;  %s143_s8 = inlined_call_operand.vmem [shape: bf16[8,128], index: 8, kind: output, shape index: {0}]   ;;  %s144_s9 = inlined_call_operand.vmem [shape: bf16[8,128], index: 9, kind: output, shape index: {1}]  }
   0x1   :  { %v31_v0 = vld [vmem:[%s135_s0] sm:$0xf] }
   0x2   :  { %v32_v1 = vld [vmem:[%s136_s1] sm:$0xf] }
   0x3   :  { %v34_v2 = vld [vmem:[%s137_s2] sm:$0xf]  ;;  %v33_v3 = vmax.bf16 %v32_v1, %v31_v0 }
   0x4   :  { %v35_v4 = vld [vmem:[%s138_s3] sm:$0xf] }
   0x5   :  { %v39_v5 = vld [vmem:[%s139_s4] sm:$0xf]  ;;  %v36_v7 = vmax.bf16 %v35_v4, %v34_v2 }
   0x6   :  { %v40_v6 = vld [vmem:[%s140_s5] sm:$0xf] }
   0x7   :  { %v41_v8 = vmax.bf16 %v40_v6, %v39_v5  ;;  %v42_v9 = vld [vmem:[%s141_s6] sm:$0xf]  ;;  %v37_v12 = vmax.bf16 %v36_v7, %v33_v3 }
   0x8   :  { %v43_v10 = vld [vmem:[%s142_s7] sm:$0xf] }
   0x9   :  { %v44_v11 = vmax.bf16 %v43_v10, %v42_v9  ;;  %38 = vst [vmem:[%s143_s8] sm:$0xf] %v37_v12 }
   0xb   :  { %v45_v13 = vmax.bf16 %v44_v11, %v41_v8 }
   0xd   :  { %46 = vst [vmem:[%s144_s9] sm:$0xf] %v45_v13 }

// kernel: _lambda_.36
= control target key start
LH: loop header
LB: loop body
LE: loop exit
PB: predicated region body
PF: predicated region fallthrough
CT: control target
= control target key end

     0   :  { %vm1125_vm0 = vmmov 0   ;;  %s1383_s1 = inlined_call_operand.vmem [shape: bf16[1152,128], index: 1, kind: input, shape index: {}]   ;;  %s1384_s0 = inlined_call_operand.vmem [shape: bf16[8,1152], index: 0, kind: input, shape index: {}]   ;;  %s1385_s2 = inlined_call_operand.vmem [shape: f32[1,128], index: 2, kind: input, shape index: {}]   ;;  %s1386_s3 = inlined_call_operand.vmem [shape: bf16[8,128], index: 3, kind: output, shape index: {}]  }
   0x1   :  { %v1043_v0 = vld [vmem:[%s1383_s1 + $0x40] sm:$0xff]   ;;  %v1047_v4 = vld [vmem:[%s1383_s1 + $0x48] sm:$0xff]   ;;  %v1051_v8 = vld [vmem:[%s1383_s1 + $0x50] sm:$0xff]  }
   0x2   :  { %v1044_v1 = vld [vmem:[%s1383_s1] sm:$0xff]   ;;  %924 = vmatprep.subr.bf16.mxu0 %v1043_v0  ;;  %v1048_v5 = vld [vmem:[%s1383_s1 + $0x8] sm:$0xff]   ;;  %v1052_v9 = vld [vmem:[%s1383_s1 + $0x10] sm:$0xff]  }
   0x3   :  { %v1045_v2 = vld [vmem:[%s1383_s1 + $0xc0] sm:$0xff]   ;;  %925 = vmatpush3.bf16.msra.mxu0 %v1044_v1  ;;  %v1049_v6 = vld [vmem:[%s1383_s1 + $0xc8] sm:$0xff]   ;;  %v1053_v10 = vld [vmem:[%s1383_s1 + $0xd0] sm:$0xff]  }
   0x4   :  { %v1046_v3 = vld [vmem:[%s1383_s1 + $0x80] sm:$0xff]   ;;  %946 = vmatprep.subr.bf16.mxu1 %v1045_v2  ;;  %926 = vmatprep.subr.bf16.mxu0 %v1047_v4  ;;  %v1050_v7 = vld [vmem:[%s1383_s1 + $0x88] sm:$0xff]   ;;  %v1054_v11 = vld [vmem:[%s1383_s1 + $0x90] sm:$0xff]  }
   0x5   :  { %947 = vmatpush3.bf16.msra.mxu1 %v1046_v3  ;;  %v1055_v12 = vld [vmem:[%s1383_s1 + $0x58] sm:$0xff]   ;;  %v1059_v16 = vld [vmem:[%s1383_s1 + $0x60] sm:$0xff]   ;;  %v1063_v20 = vld [vmem:[%s1383_s1 + $0x68] sm:$0xff]  }
   0x6   :  { %948 = vmatprep.subr.bf16.mxu1 %v1049_v6  ;;  %v1056_v13 = vld [vmem:[%s1383_s1 + $0x18] sm:$0xff]   ;;  %v1060_v17 = vld [vmem:[%s1383_s1 + $0x20] sm:$0xff]   ;;  %v1064_v21 = vld [vmem:[%s1383_s1 + $0x28] sm:$0xff]  }
   0x7   :  { %927 = vmatpush3.bf16.msra.mxu0 %v1048_v5  ;;  %v1057_v14 = vld [vmem:[%s1383_s1 + $0xd8] sm:$0xff]   ;;  %v1061_v18 = vld [vmem:[%s1383_s1 + $0xe0] sm:$0xff]   ;;  %v1065_v22 = vld [vmem:[%s1383_s1 + $0xe8] sm:$0xff]  }
   0x8   :  { %928 = vmatprep.subr.bf16.mxu0 %v1051_v8  ;;  %v1058_v15 = vld [vmem:[%s1383_s1 + $0x98] sm:$0xff]   ;;  %v1062_v19 = vld [vmem:[%s1383_s1 + $0xa0] sm:$0xff]   ;;  %v1066_v23 = vld [vmem:[%s1383_s1 + $0xa8] sm:$0xff]  }
   0x9   :  { %949 = vmatpush3.bf16.msra.mxu1 %v1050_v7  ;;  %v1067_v24 = vld [vmem:[%s1383_s1 + $0x70] sm:$0xff]   ;;  %v1071_v28 = vld [vmem:[%s1383_s1 + $0x78] sm:$0xff]   ;;  %v15_v31 = vld [vmem:[%s1384_s0] sm:$0xff] }
   0xa   :  { %950 = vmatprep.subr.bf16.mxu1 %v1053_v10  ;;  %v1068_v25 = vld [vmem:[%s1383_s1 + $0x30] sm:$0xff]   ;;  %v1072_v29 = vld [vmem:[%s1383_s1 + $0x38] sm:$0xff]   ;;  %v843_v32 = vcombine.low %v15_v31, %v15_v31  ;;  %v844_v33 = vcombine.high %v15_v31, %v15_v31  ;;  %v1077_v35 = vld [vmem:[%s1383_s1 + $0x140] sm:$0xff]  }
   0xb   :  { %929 = vmatpush3.bf16.msra.mxu0 %v1052_v9  ;;  %v1069_v26 = vld [vmem:[%s1383_s1 + $0xf0] sm:$0xff]   ;;  %v1073_v30 = vld [vmem:[%s1383_s1 + $0xf8] sm:$0xff]   ;;  %v16_v36 = vld [vmem:[%s1384_s0 + $0x8] sm:$0xff]  ;;  %v1124_v9 = vmov 0.0  }
   0xc   :  { %930 = vmatprep.subr.bf16.mxu0 %v1055_v12  ;;  %v1070_v27 = vld [vmem:[%s1383_s1 + $0xb0] sm:$0xff]   ;;  %v1076_v34 = vld [vmem:[%s1383_s1 + $0xb8] sm:$0xff]   ;;  %667 = vmatprep.mubr.bf16.mxu0 %v844_v33  ;;  %v845_v37 = vcombine.low %v16_v36, %v16_v36  ;;  %v846_v38 = vcombine.high %v16_v36, %v16_v36  ;;  %v1080_v39 = vld [vmem:[%s1383_s1 + $0x100] sm:$0xff]  }
   0xd   :  { %951 = vmatpush3.bf16.msra.mxu1 %v1054_v11  ;;  %v1081_v40 = vld [vmem:[%s1383_s1 + $0x1c0] sm:$0xff]   ;;  %v1083_v42 = vld [vmem:[%s1383_s1 + $0x148] sm:$0xff]   ;;  %v1087_v46 = vld [vmem:[%s1383_s1 + $0x150] sm:$0xff]  }
   0xe   :  { %952 = vmatprep.subr.bf16.mxu1 %v1057_v14  ;;  %707 = vmatprep.mubr.bf16.mxu1 %v846_v38  ;;  %v1082_v41 = vld [vmem:[%s1383_s1 + $0x180] sm:$0xff]   ;;  %v1084_v43 = vld [vmem:[%s1383_s1 + $0x108] sm:$0xff]   ;;  %v1088_v47 = vld [vmem:[%s1383_s1 + $0x110] sm:$0xff]  }
   0xf   :  { %931 = vmatpush3.bf16.msra.mxu0 %v1056_v13  ;;  %v1085_v44 = vld [vmem:[%s1383_s1 + $0x1c8] sm:$0xff]   ;;  %v1089_v48 = vld [vmem:[%s1383_s1 + $0x1d0] sm:$0xff]   ;;  %v1091_v50 = vld [vmem:[%s1383_s1 + $0x158] sm:$0xff]  }
  0x10   :  { %932 = vmatprep.subr.bf16.mxu0 %v1059_v16  ;;  %v1086_v45 = vld [vmem:[%s1383_s1 + $0x188] sm:$0xff]   ;;  %v1090_v49 = vld [vmem:[%s1383_s1 + $0x190] sm:$0xff]   ;;  %v1092_v51 = vld [vmem:[%s1383_s1 + $0x118] sm:$0xff]  }
  0x11   :  { %953 = vmatpush3.bf16.msra.mxu1 %v1058_v15  ;;  %v1093_v52 = vld [vmem:[%s1383_s1 + $0x1d8] sm:$0xff]   ;;  %v1095_v54 = vld [vmem:[%s1383_s1 + $0x160] sm:$0xff]   ;;  %v1099_v58 = vld [vmem:[%s1383_s1 + $0x168] sm:$0xff]  }
  0x12   :  { %954 = vmatprep.subr.bf16.mxu1 %v1061_v18  ;;  %v1094_v53 = vld [vmem:[%s1383_s1 + $0x198] sm:$0xff]   ;;  %v1096_v55 = vld [vmem:[%s1383_s1 + $0x120] sm:$0xff]   ;;  %v1100_v59 = vld [vmem:[%s1383_s1 + $0x128] sm:$0xff]  }
  0x13   :  { %933 = vmatpush3.bf16.msra.mxu0 %v1060_v17  ;;  %v1097_v56 = vld [vmem:[%s1383_s1 + $0x1e0] sm:$0xff]   ;;  %v1101_v60 = vld [vmem:[%s1383_s1 + $0x1e8] sm:$0xff]   ;;  %v1103_v62 = vld [vmem:[%s1383_s1 + $0x170] sm:$0xff]  }
  0x14   :  { %934 = vmatprep.subr.bf16.mxu0 %v1063_v20  ;;  %v1098_v57 = vld [vmem:[%s1383_s1 + $0x1a0] sm:$0xff]   ;;  %v1102_v61 = vld [vmem:[%s1383_s1 + $0x1a8] sm:$0xff]   ;;  %v1104_v63 = vld [vmem:[%s1383_s1 + $0x130] sm:$0xff]  }
  0x15   :  { %955 = vmatpush3.bf16.msra.mxu1 %v1062_v19  ;;  %v1105_v0 = vld [vmem:[%s1383_s1 + $0x1f0] sm:$0xff]   ;;  %v1107_v2 = vld [vmem:[%s1383_s1 + $0x178] sm:$0xff]   ;;  %v1115_v13 = vld [vmem:[%s1383_s1 + $0x200] sm:$0xff]  }
  0x16   :  { %956 = vmatprep.subr.bf16.mxu1 %v1065_v22  ;;  %v1106_v1 = vld [vmem:[%s1383_s1 + $0x1b0] sm:$0xff]   ;;  %v1108_v3 = vld [vmem:[%s1383_s1 + $0x138] sm:$0xff]   ;;  %v1116_v14 = vld [vmem:[%s1383_s1 + $0x208] sm:$0xff]  }
  0x17   :  { %935 = vmatpush3.bf16.msra.mxu0 %v1064_v21  ;;  %v1109_v4 = vld [vmem:[%s1383_s1 + $0x1f8] sm:$0xff]   ;;  %v17_v5 = vld [vmem:[%s1384_s0 + $0x10] sm:$0xff]  ;;  %v1119_v17 = vld [vmem:[%s1383_s1 + $0x220] sm:$0xff]  }
  0x18   :  { %936 = vmatprep.subr.bf16.mxu0 %v1067_v24  ;;  %v847_v6 = vcombine.low %v17_v5, %v17_v5  ;;  %v848_v7 = vcombine.high %v17_v5, %v17_v5  ;;  %v1112_v8 = vld [vmem:[%s1383_s1 + $0x1b8] sm:$0xff]   ;;  %v1117_v15 = vld [vmem:[%s1383_s1 + $0x210] sm:$0xff]   ;;  %v1120_v18 = vld [vmem:[%s1383_s1 + $0x228] sm:$0xff]  }
  0x19   :  { %957 = vmatpush3.bf16.msra.mxu1 %v1066_v23  ;;  %v18_v10 = vld [vmem:[%s1384_s0 + $0x18] sm:$0xff]  ;;  %v1121_v19 = vld [vmem:[%s1383_s1 + $0x230] sm:$0xff]   ;;  %v1123_v21 = vld [vmem:[%s1384_s0 + $0x20] ss:$0 sps:$4 sm:$0xff]  }
  0x1a   :  { %958 = vmatprep.subr.bf16.mxu1 %v1069_v26  ;;  %v849_v11 = vcombine.low %v18_v10, %v18_v10  ;;  %v850_v12 = vcombine.high %v18_v10, %v18_v10  ;;  %v1118_v16 = vld [vmem:[%s1383_s1 + $0x218] sm:$0xff]   ;;  %v842_v23 = vld [vmem:[%s1385_s2] ss:$0 sm:$0xff] }
  0x1b   :  { %937 = vmatpush3.bf16.msra.mxu0 %v1068_v25  ;;  %v1122_v20 = vld [vmem:[%s1383_s1 + $0x238] sm:$0xff]  }
  0x1c   :  { %938 = vmatprep.subr.bf16.mxu0 %v1071_v28 }
  0x1d   :  { %959 = vmatpush3.bf16.msra.mxu1 %v1070_v27 }
  0x1e   :  { %960 = vmatprep.subr.bf16.mxu1 %v1073_v30 }
  0x1f   :  { %939 = vmatpush3.bf16.msra.mxu0 %v1072_v29 }
  0x20   :  { %968 = vmatprep.subr.bf16.mxu0 %v1077_v35 }
  0x21   :  { %961 = vmatpush3.bf16.msra.mxu1 %v1076_v34 }
  0x22   :  { %668 = vmatmul.mubr.bf16.vlgmr.msra.gmra.mrb[0].mxu0 %v843_v32  ;;  %990 = vmatprep.subr.bf16.mxu1 %v1081_v40 }
  0x23   :  { %969 = vmatpush3.bf16.msra.mxu0 %v1080_v39  ;;  %747 = vmatprep.mubr.bf16.mxu0 %v848_v7 }
  0x24   :  { %708 = vmatmul.mubr.bf16.vlgmr.msra.gmra.mrb[0].mxu1 %v845_v37  ;;  %970 = vmatprep.subr.bf16.mxu0 %v1083_v42 }
  0x25   :  { %991 = vmatpush3.bf16.msra.mxu1 %v1082_v41  ;;  %787 = vmatprep.mubr.bf16.mxu1 %v850_v12 }
  0x26   :  { %992 = vmatprep.subr.bf16.mxu1 %v1085_v44 }
  0x27   :  { %971 = vmatpush3.bf16.msra.mxu0 %v1084_v43 }
  0x28   :  { %972 = vmatprep.subr.bf16.mxu0 %v1087_v46 }
  0x29   :  { %993 = vmatpush3.bf16.msra.mxu1 %v1086_v45 }
  0x2a   :  { %994 = vmatprep.subr.bf16.mxu1 %v1089_v48 }
  0x2b   :  { %973 = vmatpush3.bf16.msra.mxu0 %v1088_v47 }
  0x2c   :  { %974 = vmatprep.subr.bf16.mxu0 %v1091_v50 }
  0x2d   :  { %995 = vmatpush3.bf16.msra.mxu1 %v1090_v49 }
  0x2e   :  { %996 = vmatprep.subr.bf16.mxu1 %v1093_v52 }
  0x2f   :  { %975 = vmatpush3.bf16.msra.mxu0 %v1092_v51 }
  0x30   :  { %976 = vmatprep.subr.bf16.mxu0 %v1095_v54 }
  0x31   :  { %997 = vmatpush3.bf16.msra.mxu1 %v1094_v53 }
  0x32   :  { %998 = vmatprep.subr.bf16.mxu1 %v1097_v56 }
  0x33   :  { %977 = vmatpush3.bf16.msra.mxu0 %v1096_v55 }
  0x34   :  { %978 = vmatprep.subr.bf16.mxu0 %v1099_v58 }
  0x35   :  { %999 = vmatpush3.bf16.msra.mxu1 %v1098_v57 }
  0x36   :  { %1000 = vmatprep.subr.bf16.mxu1 %v1101_v60 }
  0x37   :  { %979 = vmatpush3.bf16.msra.mxu0 %v1100_v59 }
  0x38   :  { %980 = vmatprep.subr.bf16.mxu0 %v1103_v62 }
  0x39   :  { %1001 = vmatpush3.bf16.msra.mxu1 %v1102_v61 }
  0x3a   :  { %1002 = vmatprep.subr.bf16.mxu1 %v1105_v0 }
  0x3b   :  { %981 = vmatpush3.bf16.msra.mxu0 %v1104_v63 }
  0x3c   :  { %982 = vmatprep.subr.bf16.mxu0 %v1107_v2 }
  0x3d   :  { %1003 = vmatpush3.bf16.msra.mxu1 %v1106_v1 }
  0x3e   :  { %1004 = vmatprep.subr.bf16.mxu1 %v1109_v4 }
  0x3f   :  { %983 = vmatpush3.bf16.msra.mxu0 %v1108_v3 }
  0x40   :  { %1021 = vmatprep.subr.bf16.mxu0 %v1124_v9 }
  0x41   :  { %1005 = vmatpush3.bf16.msra.mxu1 %v1112_v8 }
  0x42   :  { %748 = vmatmul.mubr.bf16.vlgmr.msra.gmra.mrb[4].mxu0 %v847_v6 }
  0x43   :  { %1022 = vmatpush3.bf16.msra.mxu0 %v1115_v13  ;;  %1037 = vmatprep.mubr.msk.bf16.mxu0 %vm1125_vm0, %v1124_v9 }
  0x44   :  { %788 = vmatmul.mubr.bf16.vlgmr.msra.gmra.mrb[4].mxu1 %v849_v11  ;;  %1023 = vmatprep.subr.bf16.mxu0 %v1124_v9 }
  0x47   :  { %1024 = vmatpush3.bf16.msra.mxu0 %v1116_v14 }
  0x48   :  { %1025 = vmatprep.subr.bf16.mxu0 %v1124_v9 }
  0x4b   :  { %1026 = vmatpush3.bf16.msra.mxu0 %v1117_v15 }
  0x4c   :  { %1027 = vmatprep.subr.bf16.mxu0 %v1124_v9 }
  0x4f   :  { %1028 = vmatpush3.bf16.msra.mxu0 %v1118_v16 }
  0x50   :  { %1029 = vmatprep.subr.bf16.mxu0 %v1124_v9 }
  0x53   :  { %1030 = vmatpush3.bf16.msra.mxu0 %v1119_v17 }
  0x54   :  { %1031 = vmatprep.subr.bf16.mxu0 %v1124_v9 }
  0x57   :  { %1032 = vmatpush3.bf16.msra.mxu0 %v1120_v18 }
  0x58   :  { %1033 = vmatprep.subr.bf16.mxu0 %v1124_v9 }
  0x5b   :  { %1034 = vmatpush3.bf16.msra.mxu0 %v1121_v19 }
  0x5c   :  { %1035 = vmatprep.subr.bf16.mxu0 %v1124_v9 }
  0x5f   :  { %1036 = vmatpush3.bf16.msra.mxu0 %v1122_v20 }
  0x62   :  { %1038 = vmatmul.mubr.bf16.vlgmr.msra.gmra.mrb[8].mxu0 %v1123_v21 }
  0xf5   :  { %v940_v22 = vpop.f32.mrb[0].mxu0 }
  0xf6   :  { %v941_v24 = vpop.f32.mrb[1].mxu0 }
  0xf7   :  { %v942_v25 = vadd.f32 %v941_v24, %v940_v22  ;;  %v943_v26 = vpop.f32.mrb[2].mxu0  ;;  %v962_v27 = vpop.f32.mrb[0].mxu1 }
  0xf8   :  { %v944_v28 = vpop.f32.mrb[3].mxu0  ;;  %v963_v29 = vpop.f32.mrb[1].mxu1 }
  0xf9   :  { %v670_v30 = vadd.f32 %v942_v25, %v842_v23  ;;  %v964_v31 = vadd.f32 %v963_v29, %v962_v27  ;;  %v965_v32 = vpop.f32.mrb[2].mxu1 }
  0xfa   :  { %v966_v33 = vpop.f32.mrb[3].mxu1 }
  0xfb   :  { %v710_v34 = vadd.f32 %v964_v31, %v670_v30 }
 0x115   :  { %v984_v35 = vpop.f32.mrb[4].mxu0 }
 0x116   :  { %v985_v36 = vpop.f32.mrb[5].mxu0 }
 0x117   :  { %v986_v37 = vadd.f32 %v985_v36, %v984_v35  ;;  %v987_v38 = vpop.f32.mrb[6].mxu0  ;;  %v1006_v39 = vpop.f32.mrb[4].mxu1 }
 0x118   :  { %v988_v40 = vpop.f32.mrb[7].mxu0  ;;  %v1007_v41 = vpop.f32.mrb[5].mxu1 }
 0x119   :  { %v750_v42 = vadd.f32 %v986_v37, %v710_v34  ;;  %v1008_v43 = vadd.f32 %v1007_v41, %v1006_v39  ;;  %v1009_v44 = vpop.f32.mrb[6].mxu1 }
 0x11a   :  { %v1010_v45 = vpop.f32.mrb[7].mxu1 }
 0x11b   :  { %v790_v46 = vadd.f32 %v1008_v43, %v750_v42 }
 0x135   :  { %v829_v47 = vpop.f32.mrb[8].mxu0 }
 0x136   :  { %v830_v48 = vadd.f32 %v829_v47, %v790_v46  ;;  %v1039_v49 = vpop.f32.mrb[9].mxu0 }
 0x137   :  { %v832_v50 = vpop.f32.mrb[10].mxu0 }
 0x138   :  { %v835_v51 = vmax.f32 %v830_v48, 0.0  ;;  %v1040_v52 = vpop.f32.mrb[11].mxu0 }
 0x13a   :  { %v836_v53 = vpack.c.bf16 %v835_v51, %v835_v51 }
 0x13c   :  { %837 = vst [vmem:[%s1386_s3] sm:$0xf] %v836_v53 }

// kernel: _lambda_.35
= control target key start
LH: loop header
LB: loop body
LE: loop exit
PB: predicated region body
PF: predicated region fallthrough
CT: control target
= control target key end

     0   :  { %vm2224_vm0 = vmmov 0   ;;  %s2743_s3 = inlined_call_operand.vmem [shape: bf16[1152,128], index: 3, kind: input, shape index: {}]   ;;  %s2744_s1 = inlined_call_operand.vmem [shape: bf16[8,1152], index: 1, kind: input, shape index: {}]   ;;  %s2745_s2 = inlined_call_operand.vmem [shape: bf16[1152,128], index: 2, kind: input, shape index: {}]   ;;  %s2746_s0 = inlined_call_operand.vmem [shape: bf16[8,1152], index: 0, kind: input, shape index: {}]   ;;  %s2747_s4 = inlined_call_operand.vmem [shape: f32[1,128], index: 4, kind: input, shape index: {}]   ;;  %s2748_s5 = inlined_call_operand.vmem [shape: bf16[8,128], index: 5, kind: output, shape index: {}]  }
   0x1   :  { %v2061_v0 = vld [vmem:[%s2743_s3 + $0x40] sm:$0xff]   ;;  %v2065_v4 = vld [vmem:[%s2743_s3 + $0x48] sm:$0xff]   ;;  %v2069_v8 = vld [vmem:[%s2743_s3 + $0x50] sm:$0xff]  }
   0x2   :  { %v2062_v1 = vld [vmem:[%s2743_s3 + $0xc0] sm:$0xff]   ;;  %1825 = vmatprep.subr.bf16.mxu0 %v2061_v0  ;;  %v2066_v5 = vld [vmem:[%s2743_s3 + $0xc8] sm:$0xff]   ;;  %v2070_v9 = vld [vmem:[%s2743_s3 + $0xd0] sm:$0xff]  }
   0x3   :  { %v2063_v2 = vld [vmem:[%s2743_s3] sm:$0xff]   ;;  %1847 = vmatprep.subr.bf16.mxu1 %v2062_v1  ;;  %v2067_v6 = vld [vmem:[%s2743_s3 + $0x8] sm:$0xff]   ;;  %v2071_v10 = vld [vmem:[%s2743_s3 + $0x10] sm:$0xff]  }
   0x4   :  { %v2064_v3 = vld [vmem:[%s2743_s3 + $0x80] sm:$0xff]   ;;  %1826 = vmatpush3.bf16.msra.mxu0 %v2063_v2  ;;  %v2068_v7 = vld [vmem:[%s2743_s3 + $0x88] sm:$0xff]   ;;  %v2072_v11 = vld [vmem:[%s2743_s3 + $0x90] sm:$0xff]  }
   0x5   :  { %1848 = vmatpush3.bf16.msra.mxu1 %v2064_v3  ;;  %1827 = vmatprep.subr.bf16.mxu0 %v2065_v4  ;;  %v2073_v12 = vld [vmem:[%s2743_s3 + $0x58] sm:$0xff]   ;;  %v2077_v16 = vld [vmem:[%s2743_s3 + $0x60] sm:$0xff]   ;;  %v2081_v20 = vld [vmem:[%s2743_s3 + $0x68] sm:$0xff]  }
   0x6   :  { %1849 = vmatprep.subr.bf16.mxu1 %v2066_v5  ;;  %v2074_v13 = vld [vmem:[%s2743_s3 + $0xd8] sm:$0xff]   ;;  %v2078_v17 = vld [vmem:[%s2743_s3 + $0xe0] sm:$0xff]   ;;  %v2082_v21 = vld [vmem:[%s2743_s3 + $0xe8] sm:$0xff]  }
   0x7   :  { %v2075_v14 = vld [vmem:[%s2743_s3 + $0x18] sm:$0xff]   ;;  %v2079_v18 = vld [vmem:[%s2743_s3 + $0x20] sm:$0xff]   ;;  %v2083_v22 = vld [vmem:[%s2743_s3 + $0x28] sm:$0xff]  }
   0x8   :  { %1828 = vmatpush3.bf16.msra.mxu0 %v2067_v6  ;;  %v2076_v15 = vld [vmem:[%s2743_s3 + $0x98] sm:$0xff]   ;;  %v2080_v19 = vld [vmem:[%s2743_s3 + $0xa0] sm:$0xff]   ;;  %v2084_v23 = vld [vmem:[%s2743_s3 + $0xa8] sm:$0xff]  }
   0x9   :  { %1850 = vmatpush3.bf16.msra.mxu1 %v2068_v7  ;;  %1829 = vmatprep.subr.bf16.mxu0 %v2069_v8  ;;  %v2085_v24 = vld [vmem:[%s2743_s3 + $0x70] sm:$0xff]   ;;  %v2089_v28 = vld [vmem:[%s2743_s3 + $0x78] sm:$0xff]   ;;  %v170_v32 = vld [vmem:[%s2744_s1] sm:$0xff] }
   0xa   :  { %1851 = vmatprep.subr.bf16.mxu1 %v2070_v9  ;;  %v2086_v25 = vld [vmem:[%s2743_s3 + $0xf0] sm:$0xff]   ;;  %v2090_v29 = vld [vmem:[%s2743_s3 + $0xf8] sm:$0xff]   ;;  %v171_v33 = vld [vmem:[%s2744_s1 + $0x8] sm:$0xff]  ;;  %v1662_v34 = vcombine.low %v170_v32, %v170_v32  ;;  %v1663_v35 = vcombine.high %v170_v32, %v170_v32 }
   0xb   :  { %v2087_v26 = vld [vmem:[%s2743_s3 + $0x30] sm:$0xff]   ;;  %v2091_v30 = vld [vmem:[%s2743_s3 + $0x38] sm:$0xff]   ;;  %v1664_v36 = vcombine.low %v171_v33, %v171_v33  ;;  %v1665_v37 = vcombine.high %v171_v33, %v171_v33  ;;  %v2097_v38 = vld [vmem:[%s2743_s3 + $0x140] sm:$0xff]  }
   0xc   :  { %1830 = vmatpush3.bf16.msra.mxu0 %v2071_v10  ;;  %v2088_v27 = vld [vmem:[%s2743_s3 + $0xb0] sm:$0xff]   ;;  %v2092_v31 = vld [vmem:[%s2743_s3 + $0xb8] sm:$0xff]   ;;  %v2098_v39 = vld [vmem:[%s2743_s3 + $0x1c0] sm:$0xff]   ;;  %815 = vmatprep.mubr.bf16.mxu0 %v1663_v35 }
   0xd   :  { %1852 = vmatpush3.bf16.msra.mxu1 %v2072_v11  ;;  %1831 = vmatprep.subr.bf16.mxu0 %v2073_v12  ;;  %v2099_v40 = vld [vmem:[%s2743_s3 + $0x100] sm:$0xff]   ;;  %v2101_v42 = vld [vmem:[%s2743_s3 + $0x148] sm:$0xff]   ;;  %v2105_v46 = vld [vmem:[%s2743_s3 + $0x150] sm:$0xff]  }
   0xe   :  { %1853 = vmatprep.subr.bf16.mxu1 %v2074_v13  ;;  %855 = vmatprep.mubr.bf16.mxu1 %v1665_v37  ;;  %v2100_v41 = vld [vmem:[%s2743_s3 + $0x180] sm:$0xff]   ;;  %v2102_v43 = vld [vmem:[%s2743_s3 + $0x1c8] sm:$0xff]   ;;  %v2106_v47 = vld [vmem:[%s2743_s3 + $0x1d0] sm:$0xff]   ;;  %v2223_v13 = vmov 0.0  }
   0xf   :  { %v2103_v44 = vld [vmem:[%s2743_s3 + $0x108] sm:$0xff]   ;;  %v2107_v48 = vld [vmem:[%s2743_s3 + $0x110] sm:$0xff]   ;;  %v2109_v50 = vld [vmem:[%s2743_s3 + $0x158] sm:$0xff]  }
  0x10   :  { %1832 = vmatpush3.bf16.msra.mxu0 %v2075_v14  ;;  %v2104_v45 = vld [vmem:[%s2743_s3 + $0x188] sm:$0xff]   ;;  %v2108_v49 = vld [vmem:[%s2743_s3 + $0x190] sm:$0xff]   ;;  %v2110_v51 = vld [vmem:[%s2743_s3 + $0x1d8] sm:$0xff]  }
  0x11   :  { %1854 = vmatpush3.bf16.msra.mxu1 %v2076_v15  ;;  %1833 = vmatprep.subr.bf16.mxu0 %v2077_v16  ;;  %v2111_v52 = vld [vmem:[%s2743_s3 + $0x118] sm:$0xff]   ;;  %v2113_v54 = vld [vmem:[%s2743_s3 + $0x160] sm:$0xff]   ;;  %v2117_v58 = vld [vmem:[%s2743_s3 + $0x168] sm:$0xff]  }
  0x12   :  { %1855 = vmatprep.subr.bf16.mxu1 %v2078_v17  ;;  %v2112_v53 = vld [vmem:[%s2743_s3 + $0x198] sm:$0xff]   ;;  %v2114_v55 = vld [vmem:[%s2743_s3 + $0x1e0] sm:$0xff]   ;;  %v2118_v59 = vld [vmem:[%s2743_s3 + $0x1e8] sm:$0xff]  }
  0x13   :  { %v2115_v56 = vld [vmem:[%s2743_s3 + $0x120] sm:$0xff]   ;;  %v2119_v60 = vld [vmem:[%s2743_s3 + $0x128] sm:$0xff]   ;;  %v2121_v62 = vld [vmem:[%s2743_s3 + $0x170] sm:$0xff]  }
  0x14   :  { %1834 = vmatpush3.bf16.msra.mxu0 %v2079_v18  ;;  %v2116_v57 = vld [vmem:[%s2743_s3 + $0x1a0] sm:$0xff]   ;;  %v2120_v61 = vld [vmem:[%s2743_s3 + $0x1a8] sm:$0xff]   ;;  %v2122_v63 = vld [vmem:[%s2743_s3 + $0x1f0] sm:$0xff]  }
  0x15   :  { %1856 = vmatpush3.bf16.msra.mxu1 %v2080_v19  ;;  %1835 = vmatprep.subr.bf16.mxu0 %v2081_v20  ;;  %v2123_v0 = vld [vmem:[%s2743_s3 + $0x130] sm:$0xff]   ;;  %v2125_v2 = vld [vmem:[%s2743_s3 + $0x178] sm:$0xff]   ;;  %v2133_v12 = vld [vmem:[%s2745_s2 + $0x40] sm:$0xff]  }
  0x16   :  { %1857 = vmatprep.subr.bf16.mxu1 %v2082_v21  ;;  %v2124_v1 = vld [vmem:[%s2743_s3 + $0x1b0] sm:$0xff]   ;;  %v2126_v3 = vld [vmem:[%s2743_s3 + $0x1f8] sm:$0xff]   ;;  %v2134_v14 = vld [vmem:[%s2743_s3 + $0x200] sm:$0xff]  }
  0x17   :  { %v2127_v4 = vld [vmem:[%s2743_s3 + $0x138] sm:$0xff]   ;;  %v172_v6 = vld [vmem:[%s2744_s1 + $0x10] sm:$0xff]  ;;  %v2135_v15 = vld [vmem:[%s2745_s2] sm:$0xff]  }
  0x18   :  { %1836 = vmatpush3.bf16.msra.mxu0 %v2083_v22  ;;  %v2128_v5 = vld [vmem:[%s2743_s3 + $0x1b8] sm:$0xff]   ;;  %v1666_v7 = vcombine.low %v172_v6, %v172_v6  ;;  %v1667_v8 = vcombine.high %v172_v6, %v172_v6  ;;  %v2136_v16 = vld [vmem:[%s2745_s2 + $0x48] sm:$0xff]   ;;  %v2139_v19 = vld [vmem:[%s2745_s2 + $0x50] sm:$0xff]  }
  0x19   :  { %1858 = vmatpush3.bf16.msra.mxu1 %v2084_v23  ;;  %1837 = vmatprep.subr.bf16.mxu0 %v2085_v24  ;;  %v173_v9 = vld [vmem:[%s2744_s1 + $0x18] sm:$0xff]  ;;  %v2137_v17 = vld [vmem:[%s2743_s3 + $0x208] sm:$0xff]   ;;  %v2140_v20 = vld [vmem:[%s2743_s3 + $0x210] sm:$0xff]  }
  0x1a   :  { %1859 = vmatprep.subr.bf16.mxu1 %v2086_v25  ;;  %v1668_v10 = vcombine.low %v173_v9, %v173_v9  ;;  %v1669_v11 = vcombine.high %v173_v9, %v173_v9  ;;  %v2138_v18 = vld [vmem:[%s2745_s2 + $0x8] sm:$0xff]   ;;  %v2141_v21 = vld [vmem:[%s2745_s2 + $0x10] sm:$0xff]   ;;  %v2142_v22 = vld [vmem:[%s2745_s2 + $0x58] sm:$0xff]  }
  0x1b   :  { %v2143_v23 = vld [vmem:[%s2743_s3 + $0x218] sm:$0xff]   ;;  %v2145_v25 = vld [vmem:[%s2745_s2 + $0x60] sm:$0xff]   ;;  %v2152_v32 = vld [vmem:[%s2743_s3 + $0x230] sm:$0xff]  }
  0x1c   :  { %1838 = vmatpush3.bf16.msra.mxu0 %v2087_v26  ;;  %v2144_v24 = vld [vmem:[%s2745_s2 + $0x18] sm:$0xff]   ;;  %v2146_v26 = vld [vmem:[%s2743_s3 + $0x220] sm:$0xff]   ;;  %v23_v9 = vld [vmem:[%s2746_s0 + $0x10] sm:$0xff] }
  0x1d   :  { %1860 = vmatpush3.bf16.msra.mxu1 %v2088_v27  ;;  %1839 = vmatprep.subr.bf16.mxu0 %v2089_v28  ;;  %v2147_v27 = vld [vmem:[%s2745_s2 + $0x20] sm:$0xff]   ;;  %v2148_v28 = vld [vmem:[%s2745_s2 + $0x68] sm:$0xff]   ;;  %v2155_v37 = vld [vmem:[%s2743_s3 + $0x238] sm:$0xff]  }
  0x1e   :  { %1861 = vmatprep.subr.bf16.mxu1 %v2090_v29  ;;  %v2149_v29 = vld [vmem:[%s2743_s3 + $0x228] sm:$0xff]   ;;  %v21_v33 = vld [vmem:[%s2746_s0] sm:$0xff]  ;;  %v2188_v6 = vld [vmem:[%s2745_s2 + $0xf8] sm:$0xff]  }
  0x1f   :  { %v1744_v35 = vcombine.high %v21_v33, %v21_v33 }
  0x20   :  { %1840 = vmatpush3.bf16.msra.mxu0 %v2091_v30  ;;  %v2150_v30 = vld [vmem:[%s2745_s2 + $0x28] sm:$0xff]  }
  0x21   :  { %1862 = vmatpush3.bf16.msra.mxu1 %v2092_v31  ;;  %1869 = vmatprep.subr.bf16.mxu0 %v2097_v38  ;;  %v2151_v31 = vld [vmem:[%s2745_s2 + $0x70] sm:$0xff]   ;;  %v2156_v38 = vld [vmem:[%s2745_s2 + $0x38] sm:$0xff]  }
  0x22   :  { %1891 = vmatprep.subr.bf16.mxu1 %v2098_v39  ;;  %v2160_v39 = vld [vmem:[%s2745_s2 + $0xc0] sm:$0xff]  }
  0x23   :  { %816 = vmatmul.mubr.bf16.vlgmr.msra.gmra.mrb[0].mxu0 %v1662_v34  ;;  %v2153_v34 = vld [vmem:[%s2745_s2 + $0x30] sm:$0xff]  }
  0x24   :  { %856 = vmatmul.mubr.bf16.vlgmr.msra.gmra.mrb[0].mxu1 %v1664_v36  ;;  %1870 = vmatpush3.bf16.msra.mxu0 %v2099_v40  ;;  %v2154_v36 = vld [vmem:[%s2745_s2 + $0x78] sm:$0xff]   ;;  %v2159_v40 = vld [vmem:[%s2744_s1 + $0x20] ss:$0 sps:$4 sm:$0xff]  }
  0x25   :  { %1892 = vmatpush3.bf16.msra.mxu1 %v2100_v41  ;;  %1871 = vmatprep.subr.bf16.mxu0 %v2101_v42  ;;  %v2162_v41 = vld [vmem:[%s2745_s2 + $0x140] sm:$0xff]  }
  0x26   :  { %1893 = vmatprep.subr.bf16.mxu1 %v2102_v43  ;;  %895 = vmatprep.mubr.bf16.mxu0 %v1667_v8  ;;  %v2161_v42 = vld [vmem:[%s2745_s2 + $0x80] sm:$0xff]   ;;  %v1743_v43 = vcombine.low %v21_v33, %v21_v33  ;;  %v2190_v8 = vld [vmem:[%s2745_s2 + $0x178] sm:$0xff]  }
  0x27   :  { %935 = vmatprep.mubr.bf16.mxu1 %v1669_v11  ;;  %v2189_v11 = vld [vmem:[%s2745_s2 + $0xb8] sm:$0xff]  }
  0x28   :  { %1872 = vmatpush3.bf16.msra.mxu0 %v2103_v44  ;;  %v2163_v44 = vld [vmem:[%s2745_s2 + $0x100] sm:$0xff]  }
  0x29   :  { %1894 = vmatpush3.bf16.msra.mxu1 %v2104_v45  ;;  %1873 = vmatprep.subr.bf16.mxu0 %v2105_v46  ;;  %v2164_v45 = vld [vmem:[%s2745_s2 + $0xc8] sm:$0xff]  }
  0x2a   :  { %1895 = vmatprep.subr.bf16.mxu1 %v2106_v47  ;;  %v2166_v46 = vld [vmem:[%s2745_s2 + $0x148] sm:$0xff]  }
  0x2b   :  { %v2165_v47 = vld [vmem:[%s2745_s2 + $0x88] sm:$0xff]  }
  0x2c   :  { %1874 = vmatpush3.bf16.msra.mxu0 %v2107_v48  ;;  %v2167_v48 = vld [vmem:[%s2745_s2 + $0x108] sm:$0xff]  }
  0x2d   :  { %1896 = vmatpush3.bf16.msra.mxu1 %v2108_v49  ;;  %1875 = vmatprep.subr.bf16.mxu0 %v2109_v50  ;;  %v2168_v49 = vld [vmem:[%s2745_s2 + $0xd0] sm:$0xff]  }
  0x2e   :  { %1897 = vmatprep.subr.bf16.mxu1 %v2110_v51  ;;  %v2170_v50 = vld [vmem:[%s2745_s2 + $0x150] sm:$0xff]  }
  0x2f   :  { %v2169_v51 = vld [vmem:[%s2745_s2 + $0x90] sm:$0xff]  }
  0x30   :  { %1876 = vmatpush3.bf16.msra.mxu0 %v2111_v52  ;;  %v2171_v52 = vld [vmem:[%s2745_s2 + $0x110] sm:$0xff]  }
  0x31   :  { %1898 = vmatpush3.bf16.msra.mxu1 %v2112_v53  ;;  %1877 = vmatprep.subr.bf16.mxu0 %v2113_v54  ;;  %v2172_v53 = vld [vmem:[%s2745_s2 + $0xd8] sm:$0xff]  }
  0x32   :  { %1899 = vmatprep.subr.bf16.mxu1 %v2114_v55  ;;  %v2174_v54 = vld [vmem:[%s2745_s2 + $0x158] sm:$0xff]  }
  0x33   :  { %v2173_v55 = vld [vmem:[%s2745_s2 + $0x98] sm:$0xff]  }
  0x34   :  { %1878 = vmatpush3.bf16.msra.mxu0 %v2115_v56  ;;  %v2175_v56 = vld [vmem:[%s2745_s2 + $0x118] sm:$0xff]  }
  0x35   :  { %1900 = vmatpush3.bf16.msra.mxu1 %v2116_v57  ;;  %1879 = vmatprep.subr.bf16.mxu0 %v2117_v58  ;;  %v2176_v57 = vld [vmem:[%s2745_s2 + $0xe0] sm:$0xff]  }
  0x36   :  { %1901 = vmatprep.subr.bf16.mxu1 %v2118_v59  ;;  %v2178_v58 = vld [vmem:[%s2745_s2 + $0x160] sm:$0xff]  }
  0x37   :  { %v2177_v59 = vld [vmem:[%s2745_s2 + $0xa0] sm:$0xff]  }
  0x38   :  { %1880 = vmatpush3.bf16.msra.mxu0 %v2119_v60  ;;  %v2179_v60 = vld [vmem:[%s2745_s2 + $0x120] sm:$0xff]  }
  0x39   :  { %1902 = vmatpush3.bf16.msra.mxu1 %v2120_v61  ;;  %1881 = vmatprep.subr.bf16.mxu0 %v2121_v62  ;;  %v2180_v61 = vld [vmem:[%s2745_s2 + $0xe8] sm:$0xff]  }
  0x3a   :  { %1903 = vmatprep.subr.bf16.mxu1 %v2122_v63  ;;  %v2182_v62 = vld [vmem:[%s2745_s2 + $0x168] sm:$0xff]  }
  0x3b   :  { %v2181_v63 = vld [vmem:[%s2745_s2 + $0xa8] sm:$0xff]  }
  0x3c   :  { %1882 = vmatpush3.bf16.msra.mxu0 %v2123_v0  ;;  %v2183_v0 = vld [vmem:[%s2745_s2 + $0x128] sm:$0xff]  }
  0x3d   :  { %1904 = vmatpush3.bf16.msra.mxu1 %v2124_v1  ;;  %1883 = vmatprep.subr.bf16.mxu0 %v2125_v2  ;;  %v2184_v1 = vld [vmem:[%s2745_s2 + $0xf0] sm:$0xff]  }
  0x3e   :  { %1905 = vmatprep.subr.bf16.mxu1 %v2126_v3  ;;  %v2186_v2 = vld [vmem:[%s2745_s2 + $0x170] sm:$0xff]  }
  0x3f   :  { %v2185_v3 = vld [vmem:[%s2745_s2 + $0xb0] sm:$0xff]  }
  0x40   :  { %1884 = vmatpush3.bf16.msra.mxu0 %v2127_v4  ;;  %v2187_v4 = vld [vmem:[%s2745_s2 + $0x130] sm:$0xff]  }
  0x41   :  { %1906 = vmatpush3.bf16.msra.mxu1 %v2128_v5  ;;  %2019 = vmatprep.subr.bf16.mxu0 %v2223_v13  ;;  %v22_v5 = vld [vmem:[%s2746_s0 + $0x8] sm:$0xff] }
  0x42   :  { %1922 = vmatprep.subr.bf16.mxu1 %v2133_v12  ;;  %v2193_v12 = vld [vmem:[%s2745_s2 + $0x138] sm:$0xff]  }
  0x43   :  { %896 = vmatmul.mubr.bf16.vlgmr.msra.gmra.mrb[4].mxu0 %v1666_v7  ;;  %v1746_v7 = vcombine.high %v22_v5, %v22_v5 }
  0x44   :  { %936 = vmatmul.mubr.bf16.vlgmr.msra.gmra.mrb[4].mxu1 %v1668_v10  ;;  %2020 = vmatpush3.bf16.msra.mxu0 %v2134_v14  ;;  %v1748_v10 = vcombine.high %v23_v9, %v23_v9  ;;  %v2194_v14 = vld [vmem:[%s2745_s2 + $0x1c0] sm:$0xff]  }
  0x45   :  { %1923 = vmatpush3.bf16.msra.mxu1 %v2135_v15  ;;  %2021 = vmatprep.subr.bf16.mxu0 %v2223_v13  ;;  %v1745_v15 = vcombine.low %v22_v5, %v22_v5 }
  0x46   :  { %1924 = vmatprep.subr.bf16.mxu1 %v2136_v16  ;;  %2035 = vmatprep.mubr.msk.bf16.mxu0 %vm2224_vm0, %v2223_v13  ;;  %v1747_v16 = vcombine.low %v23_v9, %v23_v9 }
  0x47   :  { %1479 = vmatprep.mubr.bf16.mxu1 %v1744_v35  ;;  %v2213_v35 = vld [vmem:[%s2745_s2 + $0x228] sm:$0xff]  }
  0x48   :  { %2022 = vmatpush3.bf16.msra.mxu0 %v2137_v17  ;;  %v2197_v17 = vld [vmem:[%s2745_s2 + $0x180] sm:$0xff]  }
  0x49   :  { %1925 = vmatpush3.bf16.msra.mxu1 %v2138_v18  ;;  %2023 = vmatprep.subr.bf16.mxu0 %v2223_v13  ;;  %v2198_v18 = vld [vmem:[%s2745_s2 + $0x200] sm:$0xff]  }
  0x4a   :  { %1926 = vmatprep.subr.bf16.mxu1 %v2139_v19  ;;  %v2199_v19 = vld [vmem:[%s2745_s2 + $0x1c8] sm:$0xff]  }
  0x4c   :  { %2024 = vmatpush3.bf16.msra.mxu0 %v2140_v20  ;;  %v2200_v20 = vld [vmem:[%s2745_s2 + $0x188] sm:$0xff]  }
  0x4d   :  { %1927 = vmatpush3.bf16.msra.mxu1 %v2141_v21  ;;  %2025 = vmatprep.subr.bf16.mxu0 %v2223_v13  ;;  %v2201_v21 = vld [vmem:[%s2745_s2 + $0x208] sm:$0xff]  }
  0x4e   :  { %1928 = vmatprep.subr.bf16.mxu1 %v2142_v22  ;;  %v2202_v22 = vld [vmem:[%s2745_s2 + $0x1d0] sm:$0xff]  }
  0x50   :  { %2026 = vmatpush3.bf16.msra.mxu0 %v2143_v23  ;;  %v2203_v23 = vld [vmem:[%s2745_s2 + $0x190] sm:$0xff]  }
  0x51   :  { %1929 = vmatpush3.bf16.msra.mxu1 %v2144_v24  ;;  %2027 = vmatprep.subr.bf16.mxu0 %v2223_v13  ;;  %v2204_v24 = vld [vmem:[%s2745_s2 + $0x210] sm:$0xff]  }
  0x52   :  { %1930 = vmatprep.subr.bf16.mxu1 %v2145_v25  ;;  %v2205_v25 = vld [vmem:[%s2745_s2 + $0x1d8] sm:$0xff]  }
  0x54   :  { %2028 = vmatpush3.bf16.msra.mxu0 %v2146_v26  ;;  %v2206_v26 = vld [vmem:[%s2745_s2 + $0x198] sm:$0xff]  }
  0x55   :  { %1931 = vmatpush3.bf16.msra.mxu1 %v2147_v27  ;;  %2029 = vmatprep.subr.bf16.mxu0 %v2223_v13  ;;  %v2207_v27 = vld [vmem:[%s2745_s2 + $0x218] sm:$0xff]  }
  0x56   :  { %1932 = vmatprep.subr.bf16.mxu1 %v2148_v28  ;;  %v2208_v28 = vld [vmem:[%s2745_s2 + $0x1e0] sm:$0xff]  }
  0x58   :  { %2030 = vmatpush3.bf16.msra.mxu0 %v2149_v29  ;;  %v2209_v29 = vld [vmem:[%s2745_s2 + $0x1a0] sm:$0xff]  }
  0x59   :  { %1933 = vmatpush3.bf16.msra.mxu1 %v2150_v30  ;;  %2031 = vmatprep.subr.bf16.mxu0 %v2223_v13  ;;  %v2210_v30 = vld [vmem:[%s2745_s2 + $0x220] sm:$0xff]  }
  0x5a   :  { %1934 = vmatprep.subr.bf16.mxu1 %v2151_v31  ;;  %v24_v31 = vld [vmem:[%s2746_s0 + $0x18] sm:$0xff] }
  0x5b   :  { %v1750_v33 = vcombine.high %v24_v31, %v24_v31 }
  0x5c   :  { %2032 = vmatpush3.bf16.msra.mxu0 %v2152_v32  ;;  %v2211_v32 = vld [vmem:[%s2745_s2 + $0x1e8] sm:$0xff]  }
  0x5d   :  { %1935 = vmatpush3.bf16.msra.mxu1 %v2153_v34  ;;  %2033 = vmatprep.subr.bf16.mxu0 %v2223_v13  ;;  %v2212_v34 = vld [vmem:[%s2745_s2 + $0x1a8] sm:$0xff]  }
  0x5e   :  { %1936 = vmatprep.subr.bf16.mxu1 %v2154_v36  ;;  %v2214_v36 = vld [vmem:[%s2745_s2 + $0x1f0] sm:$0xff]  }
  0x60   :  { %2034 = vmatpush3.bf16.msra.mxu0 %v2155_v37  ;;  %v2215_v37 = vld [vmem:[%s2745_s2 + $0x1b0] sm:$0xff]  }
  0x61   :  { %1937 = vmatpush3.bf16.msra.mxu1 %v2156_v38  ;;  %1944 = vmatprep.subr.bf16.mxu0 %v2160_v39  ;;  %v2216_v38 = vld [vmem:[%s2745_s2 + $0x230] sm:$0xff]   ;;  %v2217_v39 = vld [vmem:[%s2745_s2 + $0x1f8] sm:$0xff]  }
  0x62   :  { %1966 = vmatprep.subr.bf16.mxu1 %v2162_v41  ;;  %v2221_v41 = vld [vmem:[%s2745_s2 + $0x238] sm:$0xff]  }
  0x63   :  { %2036 = vmatmul.mubr.bf16.vlgmr.msra.gmra.mrb[8].mxu0 %v2159_v40  ;;  %v2218_v40 = vld [vmem:[%s2745_s2 + $0x1b8] sm:$0xff]  }
  0x64   :  { %1480 = vmatmul.mubr.bf16.vlgmr.msra.gmra.mrb[8].mxu1 %v1743_v43  ;;  %1945 = vmatpush3.bf16.msra.mxu0 %v2161_v42  ;;  %v1749_v42 = vcombine.low %v24_v31, %v24_v31  ;;  %v2222_v43 = vld [vmem:[%s2746_s0 + $0x20] ss:$0 sps:$4 sm:$0xff]  }
  0x65   :  { %1967 = vmatpush3.bf16.msra.mxu1 %v2163_v44  ;;  %1946 = vmatprep.subr.bf16.mxu0 %v2164_v45 }
  0x66   :  { %1968 = vmatprep.subr.bf16.mxu1 %v2166_v46  ;;  %1519 = vmatprep.mubr.bf16.mxu0 %v1746_v7 }
  0x67   :  { %1559 = vmatprep.mubr.bf16.mxu1 %v1748_v10 }
  0x68   :  { %1947 = vmatpush3.bf16.msra.mxu0 %v2165_v47 }
  0x69   :  { %1969 = vmatpush3.bf16.msra.mxu1 %v2167_v48  ;;  %1948 = vmatprep.subr.bf16.mxu0 %v2168_v49 }
  0x6a   :  { %1970 = vmatprep.subr.bf16.mxu1 %v2170_v50 }
  0x6c   :  { %1949 = vmatpush3.bf16.msra.mxu0 %v2169_v51 }
  0x6d   :  { %1971 = vmatpush3.bf16.msra.mxu1 %v2171_v52  ;;  %1950 = vmatprep.subr.bf16.mxu0 %v2172_v53 }
  0x6e   :  { %1972 = vmatprep.subr.bf16.mxu1 %v2174_v54 }
  0x70   :  { %1951 = vmatpush3.bf16.msra.mxu0 %v2173_v55 }
  0x71   :  { %1973 = vmatpush3.bf16.msra.mxu1 %v2175_v56  ;;  %1952 = vmatprep.subr.bf16.mxu0 %v2176_v57 }
  0x72   :  { %1974 = vmatprep.subr.bf16.mxu1 %v2178_v58 }
  0x74   :  { %1953 = vmatpush3.bf16.msra.mxu0 %v2177_v59 }
  0x75   :  { %1975 = vmatpush3.bf16.msra.mxu1 %v2179_v60  ;;  %1954 = vmatprep.subr.bf16.mxu0 %v2180_v61 }
  0x76   :  { %1976 = vmatprep.subr.bf16.mxu1 %v2182_v62 }
  0x78   :  { %1955 = vmatpush3.bf16.msra.mxu0 %v2181_v63 }
  0x79   :  { %1977 = vmatpush3.bf16.msra.mxu1 %v2183_v0  ;;  %1956 = vmatprep.subr.bf16.mxu0 %v2184_v1 }
  0x7a   :  { %1978 = vmatprep.subr.bf16.mxu1 %v2186_v2 }
  0x7c   :  { %1957 = vmatpush3.bf16.msra.mxu0 %v2185_v3 }
  0x7d   :  { %1979 = vmatpush3.bf16.msra.mxu1 %v2187_v4  ;;  %1958 = vmatprep.subr.bf16.mxu0 %v2188_v6 }
  0x7e   :  { %1980 = vmatprep.subr.bf16.mxu1 %v2190_v8 }
  0x80   :  { %1959 = vmatpush3.bf16.msra.mxu0 %v2189_v11 }
  0x81   :  { %1981 = vmatpush3.bf16.msra.mxu1 %v2193_v12  ;;  %1988 = vmatprep.subr.bf16.mxu0 %v2194_v14 }
  0x82   :  { %2039 = vmatprep.subr.bf16.mxu1 %v2223_v13 }
  0x83   :  { %1520 = vmatmul.mubr.bf16.vlgmr.msra.gmra.mrb[12].mxu0 %v1745_v15 }
  0x84   :  { %1560 = vmatmul.mubr.bf16.vlgmr.msra.gmra.mrb[12].mxu1 %v1747_v16  ;;  %1989 = vmatpush3.bf16.msra.mxu0 %v2197_v17 }
  0x85   :  { %2040 = vmatpush3.bf16.msra.mxu1 %v2198_v18  ;;  %1990 = vmatprep.subr.bf16.mxu0 %v2199_v19 }
  0x86   :  { %2041 = vmatprep.subr.bf16.mxu1 %v2223_v13  ;;  %2055 = vmatprep.mubr.msk.bf16.mxu1 %vm2224_vm0, %v2223_v13 }
  0x87   :  { %1599 = vmatprep.mubr.bf16.mxu0 %v1750_v33 }
  0x88   :  { %1991 = vmatpush3.bf16.msra.mxu0 %v2200_v20 }
  0x89   :  { %2042 = vmatpush3.bf16.msra.mxu1 %v2201_v21  ;;  %1992 = vmatprep.subr.bf16.mxu0 %v2202_v22 }
  0x8a   :  { %2043 = vmatprep.subr.bf16.mxu1 %v2223_v13 }
  0x8c   :  { %1993 = vmatpush3.bf16.msra.mxu0 %v2203_v23 }
  0x8d   :  { %2044 = vmatpush3.bf16.msra.mxu1 %v2204_v24  ;;  %1994 = vmatprep.subr.bf16.mxu0 %v2205_v25 }
  0x8e   :  { %2045 = vmatprep.subr.bf16.mxu1 %v2223_v13 }
  0x90   :  { %1995 = vmatpush3.bf16.msra.mxu0 %v2206_v26 }
  0x91   :  { %2046 = vmatpush3.bf16.msra.mxu1 %v2207_v27  ;;  %1996 = vmatprep.subr.bf16.mxu0 %v2208_v28 }
  0x92   :  { %2047 = vmatprep.subr.bf16.mxu1 %v2223_v13 }
  0x94   :  { %1997 = vmatpush3.bf16.msra.mxu0 %v2209_v29 }
  0x95   :  { %2048 = vmatpush3.bf16.msra.mxu1 %v2210_v30  ;;  %1998 = vmatprep.subr.bf16.mxu0 %v2211_v32 }
  0x96   :  { %2049 = vmatprep.subr.bf16.mxu1 %v2223_v13 }
  0x98   :  { %1999 = vmatpush3.bf16.msra.mxu0 %v2212_v34 }
  0x99   :  { %2050 = vmatpush3.bf16.msra.mxu1 %v2213_v35  ;;  %2000 = vmatprep.subr.bf16.mxu0 %v2214_v36  ;;  %v1824_v36 = vld [vmem:[%s2747_s4] ss:$0 sm:$0xff] }
  0x9a   :  { %2051 = vmatprep.subr.bf16.mxu1 %v2223_v13 }
  0x9c   :  { %2001 = vmatpush3.bf16.msra.mxu0 %v2215_v37 }
  0x9d   :  { %2052 = vmatpush3.bf16.msra.mxu1 %v2216_v38  ;;  %2002 = vmatprep.subr.bf16.mxu0 %v2217_v39 }
  0x9e   :  { %2053 = vmatprep.subr.bf16.mxu1 %v2223_v13 }
  0xa0   :  { %2003 = vmatpush3.bf16.msra.mxu0 %v2218_v40 }
  0xa1   :  { %2054 = vmatpush3.bf16.msra.mxu1 %v2221_v41 }
  0xa3   :  { %1600 = vmatmul.mubr.bf16.vlgmr.msra.gmra.mrb[16].mxu0 %v1749_v42 }
  0xa4   :  { %2056 = vmatmul.mubr.bf16.vlgmr.msra.gmra.mrb[16].mxu1 %v2222_v43 }
  0xf6   :  { %v1841_v44 = vpop.f32.mrb[0].mxu0 }
  0xf7   :  { %v1863_v45 = vpop.f32.mrb[0].mxu1  ;;  %v1842_v46 = vpop.f32.mrb[1].mxu0 }
  0xf8   :  { %v1864_v47 = vpop.f32.mrb[1].mxu1  ;;  %v1843_v48 = vadd.f32 %v1842_v46, %v1841_v44  ;;  %v1844_v50 = vpop.f32.mrb[2].mxu0 }
  0xf9   :  { %v1865_v49 = vadd.f32 %v1864_v47, %v1863_v45  ;;  %v1866_v51 = vpop.f32.mrb[2].mxu1  ;;  %v1845_v52 = vpop.f32.mrb[3].mxu0 }
  0xfa   :  { %v1867_v53 = vpop.f32.mrb[3].mxu1 }
  0xfb   :  { %v858_v13 = vadd.f32 %v1865_v49, %v1843_v48 }
 0x116   :  { %v1885_v54 = vpop.f32.mrb[4].mxu0 }
 0x117   :  { %v1907_v55 = vpop.f32.mrb[4].mxu1  ;;  %v1886_v56 = vpop.f32.mrb[5].mxu0 }
 0x118   :  { %v1908_v57 = vpop.f32.mrb[5].mxu1  ;;  %v1887_v58 = vadd.f32 %v1886_v56, %v1885_v54  ;;  %v1888_v59 = vpop.f32.mrb[6].mxu0 }
 0x119   :  { %v1909_v60 = vadd.f32 %v1908_v57, %v1907_v55  ;;  %v1910_v61 = vpop.f32.mrb[6].mxu1  ;;  %v1889_v62 = vpop.f32.mrb[7].mxu0 }
 0x11a   :  { %v1911_v63 = vpop.f32.mrb[7].mxu1  ;;  %v898_v0 = vadd.f32 %v1887_v58, %v858_v13 }
 0x11c   :  { %v938_v1 = vadd.f32 %v1909_v60, %v898_v0 }
 0x136   :  { %v977_v2 = vpop.f32.mrb[8].mxu0 }
 0x137   :  { %v1938_v3 = vpop.f32.mrb[8].mxu1  ;;  %v978_v4 = vadd.f32 %v977_v2, %v938_v1  ;;  %v2037_v5 = vpop.f32.mrb[9].mxu0 }
 0x138   :  { %v1939_v6 = vpop.f32.mrb[9].mxu1  ;;  %v980_v8 = vpop.f32.mrb[10].mxu0 }
 0x139   :  { %v1940_v7 = vadd.f32 %v1939_v6, %v1938_v3  ;;  %v1941_v9 = vpop.f32.mrb[10].mxu1  ;;  %v2038_v10 = vpop.f32.mrb[11].mxu0 }
 0x13a   :  { %v1942_v11 = vpop.f32.mrb[11].mxu1 }
 0x13b   :  { %v1482_v12 = vadd.f32 %v1940_v7, %v978_v4 }
 0x156   :  { %v1960_v14 = vpop.f32.mrb[12].mxu0 }
 0x157   :  { %v1982_v15 = vpop.f32.mrb[12].mxu1  ;;  %v1961_v16 = vpop.f32.mrb[13].mxu0 }
 0x158   :  { %v1983_v17 = vpop.f32.mrb[13].mxu1  ;;  %v1962_v18 = vadd.f32 %v1961_v16, %v1960_v14  ;;  %v1963_v19 = vpop.f32.mrb[14].mxu0 }
 0x159   :  { %v1984_v20 = vadd.f32 %v1983_v17, %v1982_v15  ;;  %v1985_v21 = vpop.f32.mrb[14].mxu1  ;;  %v1964_v22 = vpop.f32.mrb[15].mxu0 }
 0x15a   :  { %v1986_v23 = vpop.f32.mrb[15].mxu1  ;;  %v1522_v24 = vadd.f32 %v1962_v18, %v1482_v12 }
 0x15c   :  { %v1562_v25 = vadd.f32 %v1984_v20, %v1522_v24 }
 0x176   :  { %v2004_v26 = vpop.f32.mrb[16].mxu0 }
 0x177   :  { %v1641_v27 = vpop.f32.mrb[16].mxu1  ;;  %v2005_v28 = vpop.f32.mrb[17].mxu0 }
 0x178   :  { %v2057_v29 = vpop.f32.mrb[17].mxu1  ;;  %v2006_v30 = vadd.f32 %v2005_v28, %v2004_v26  ;;  %v2007_v31 = vpop.f32.mrb[18].mxu0 }
 0x179   :  { %v1644_v32 = vpop.f32.mrb[18].mxu1  ;;  %v2008_v33 = vpop.f32.mrb[19].mxu0 }
 0x17a   :  { %v2058_v34 = vpop.f32.mrb[19].mxu1  ;;  %v1602_v35 = vadd.f32 %v2006_v30, %v1562_v25 }
 0x17c   :  { %v1642_v37 = vadd.f32 %v1641_v27, %v1602_v35 }
 0x17e   :  { %v1654_v38 = vadd.f32 %v1824_v36, %v1642_v37 }
 0x180   :  { %v1655_v39 = vmax.f32 %v1654_v38, 0.0 }
 0x182   :  { %v1656_v40 = vpack.c.bf16 %v1655_v39, %v1655_v39 }
 0x184   :  { %1657 = vst [vmem:[%s2748_s5] sm:$0xf] %v1656_v40 }

// kernel: _lambda_.37
= control target key start
LH: loop header
LB: loop body
LE: loop exit
PB: predicated region body
PF: predicated region fallthrough
CT: control target
= control target key end

     0   :  { %v164_v30 = vlaneseq  ;;  %v1023_v34 = vmov 1966171168   ;;  %s1274_s0 = inlined_call_operand.vmem [shape: bf16[2,512], index: 0, kind: input, shape index: {}]   ;;  %s1275_s1 = inlined_call_operand.vmem [shape: bf16[2,512], index: 1, kind: input, shape index: {}]   ;;  %s1276_s2 = inlined_call_operand.vmem [shape: bf16[512,10], index: 2, kind: input, shape index: {}]   ;;  %s1277_s3 = inlined_call_operand.vmem [shape: bf16[512,10], index: 3, kind: input, shape index: {}]   ;;  %s1278_s4 = inlined_call_operand.vmem [shape: f32[1,10], index: 4, kind: input, shape index: {}]   ;;  %s1279_s5 = inlined_call_operand.hbm [shape: f32[2,10], index: 5, kind: output, shape index: {}]  }
   0x1   :  { %v935_v0 = vld [vmem:[%s1277_s3 + $0x40] sm:$0xff]   ;;  %v939_v4 = vld [vmem:[%s1277_s3 + $0x48] sm:$0xff]   ;;  %v943_v8 = vld [vmem:[%s1277_s3 + $0x50] sm:$0xff]   ;;  %v162_v35 = vunpack.c.l.s4 %v1023_v34 }
   0x2   :  { %v936_v1 = vld [vmem:[%s1277_s3 + $0xc0] sm:$0xff]   ;;  %845 = vmatprep.subr.bf16.mxu0 %v935_v0  ;;  %v940_v5 = vld [vmem:[%s1277_s3 + $0xc8] sm:$0xff]   ;;  %v944_v9 = vld [vmem:[%s1277_s3 + $0xd0] sm:$0xff]   ;;  %v165_v36 = vshrl.u32 %v164_v30, 7 }
   0x3   :  { %v937_v2 = vld [vmem:[%s1277_s3] sm:$0xff]   ;;  %867 = vmatprep.subr.bf16.mxu1 %v936_v1  ;;  %v941_v6 = vld [vmem:[%s1277_s3 + $0x8] sm:$0xff]   ;;  %v945_v10 = vld [vmem:[%s1277_s3 + $0x10] sm:$0xff]   ;;  %v163_v40 = vunpack.c.0.s8 %v162_v35 }
   0x4   :  { %v938_v3 = vld [vmem:[%s1277_s3 + $0x80] sm:$0xff]   ;;  %846 = vmatpush3.bf16.msra.mxu0 %v937_v2  ;;  %v942_v7 = vld [vmem:[%s1277_s3 + $0x88] sm:$0xff]   ;;  %v946_v11 = vld [vmem:[%s1277_s3 + $0x90] sm:$0xff]  }
   0x5   :  { %868 = vmatpush3.bf16.msra.mxu1 %v938_v3  ;;  %847 = vmatprep.subr.bf16.mxu0 %v939_v4  ;;  %v947_v12 = vld [vmem:[%s1277_s3 + $0x58] sm:$0xff]   ;;  %v951_v16 = vld [vmem:[%s1277_s3 + $0x60] sm:$0xff]   ;;  %v955_v20 = vld [vmem:[%s1277_s3 + $0x68] sm:$0xff]   ;;  %v1160_v41 = vsub.s32 %v163_v40, %v165_v36 }
   0x6   :  { %869 = vmatprep.subr.bf16.mxu1 %v940_v5  ;;  %v948_v13 = vld [vmem:[%s1277_s3 + $0xd8] sm:$0xff]   ;;  %v952_v17 = vld [vmem:[%s1277_s3 + $0xe0] sm:$0xff]   ;;  %v956_v21 = vld [vmem:[%s1277_s3 + $0xe8] sm:$0xff]  }
   0x7   :  { %v949_v14 = vld [vmem:[%s1277_s3 + $0x18] sm:$0xff]   ;;  %v953_v18 = vld [vmem:[%s1277_s3 + $0x20] sm:$0xff]   ;;  %v957_v22 = vld [vmem:[%s1277_s3 + $0x28] sm:$0xff]  }
   0x8   :  { %848 = vmatpush3.bf16.msra.mxu0 %v941_v6  ;;  %v950_v15 = vld [vmem:[%s1277_s3 + $0x98] sm:$0xff]   ;;  %v954_v19 = vld [vmem:[%s1277_s3 + $0xa0] sm:$0xff]   ;;  %v958_v23 = vld [vmem:[%s1277_s3 + $0xa8] sm:$0xff]  }
   0x9   :  { %870 = vmatpush3.bf16.msra.mxu1 %v942_v7  ;;  %849 = vmatprep.subr.bf16.mxu0 %v943_v8  ;;  %v959_v24 = vld [vmem:[%s1277_s3 + $0x70] sm:$0xff]   ;;  %v963_v28 = vld [vmem:[%s1277_s3 + $0x78] sm:$0xff]   ;;  %v778_v33 = vld.sshfl [vmem:[%s1275_s1] sm:$0x33 pattern:$0x75316420] }
   0xa   :  { %871 = vmatprep.subr.bf16.mxu1 %v944_v9  ;;  %v960_v25 = vld [vmem:[%s1277_s3 + $0xf0] sm:$0xff]   ;;  %v964_v29 = vld [vmem:[%s1277_s3 + $0xf8] sm:$0xff]   ;;  %v967_v37 = vld [vmem:[%s1276_s2 + $0x40] sm:$0xff]   ;;  %v160_v39 = vcombine.high %v778_v33, %v778_v33  ;;  %v167_v44 = vrot.slane %v778_v33, %v1160_v41 }
   0xb   :  { %v961_v26 = vld [vmem:[%s1277_s3 + $0x30] sm:$0xff]   ;;  %v965_v31 = vld [vmem:[%s1277_s3 + $0x38] sm:$0xff]   ;;  %v968_v38 = vld [vmem:[%s1276_s2 + $0xc0] sm:$0xff]  }
   0xc   :  { %850 = vmatpush3.bf16.msra.mxu0 %v945_v10  ;;  %v962_v27 = vld [vmem:[%s1277_s3 + $0xb0] sm:$0xff]   ;;  %v966_v32 = vld [vmem:[%s1277_s3 + $0xb8] sm:$0xff]   ;;  %v969_v42 = vld [vmem:[%s1276_s2] sm:$0xff]   ;;  %v174_v43 = vrot.slane %v160_v39, %v1160_v41  ;;  %v175_v48 = vcombine.high %v167_v44, %v167_v44 }
   0xd   :  { %872 = vmatpush3.bf16.msra.mxu1 %v946_v11  ;;  %851 = vmatprep.subr.bf16.mxu0 %v947_v12  ;;  %v970_v45 = vld [vmem:[%s1276_s2 + $0x80] sm:$0xff]   ;;  %v971_v46 = vld [vmem:[%s1276_s2 + $0x48] sm:$0xff]   ;;  %v975_v52 = vld [vmem:[%s1276_s2 + $0x50] sm:$0xff]  }
   0xe   :  { %873 = vmatprep.subr.bf16.mxu1 %v948_v13  ;;  %405 = vmatprep.mubr.bf16.mxu0 %v174_v43  ;;  %v176_v47 = vcombine.high %v174_v43, %v174_v43  ;;  %v972_v49 = vld [vmem:[%s1276_s2 + $0xc8] sm:$0xff]   ;;  %v976_v53 = vld [vmem:[%s1276_s2 + $0xd0] sm:$0xff]   ;;  %v979_v56 = vld [vmem:[%s1276_s2 + $0x58] sm:$0xff]  }
   0xf   :  { %v973_v50 = vld [vmem:[%s1276_s2 + $0x8] sm:$0xff]   ;;  %v977_v54 = vld [vmem:[%s1276_s2 + $0x10] sm:$0xff]   ;;  %v980_v57 = vld [vmem:[%s1276_s2 + $0xd8] sm:$0xff]  }
  0x10   :  { %852 = vmatpush3.bf16.msra.mxu0 %v949_v14  ;;  %445 = vmatprep.mubr.bf16.mxu1 %v176_v47  ;;  %v974_v51 = vld [vmem:[%s1276_s2 + $0x88] sm:$0xff]   ;;  %v978_v55 = vld [vmem:[%s1276_s2 + $0x90] sm:$0xff]   ;;  %v981_v58 = vld [vmem:[%s1276_s2 + $0x18] sm:$0xff]  }
  0x11   :  { %874 = vmatpush3.bf16.msra.mxu1 %v950_v15  ;;  %853 = vmatprep.subr.bf16.mxu0 %v951_v16  ;;  %v982_v59 = vld [vmem:[%s1276_s2 + $0x98] sm:$0xff]   ;;  %v983_v60 = vld [vmem:[%s1276_s2 + $0x60] sm:$0xff]   ;;  %v987_v0 = vld [vmem:[%s1276_s2 + $0x68] sm:$0xff]  }
  0x12   :  { %875 = vmatprep.subr.bf16.mxu1 %v952_v17  ;;  %v984_v61 = vld [vmem:[%s1276_s2 + $0xe0] sm:$0xff]   ;;  %v988_v1 = vld [vmem:[%s1276_s2 + $0xe8] sm:$0xff]   ;;  %v991_v4 = vld [vmem:[%s1276_s2 + $0x70] sm:$0xff]  }
  0x13   :  { %v985_v62 = vld [vmem:[%s1276_s2 + $0x20] sm:$0xff]   ;;  %v989_v2 = vld [vmem:[%s1276_s2 + $0x28] sm:$0xff]   ;;  %v992_v5 = vld [vmem:[%s1276_s2 + $0xf0] sm:$0xff]  }
  0x14   :  { %854 = vmatpush3.bf16.msra.mxu0 %v953_v18  ;;  %v986_v63 = vld [vmem:[%s1276_s2 + $0xa0] sm:$0xff]   ;;  %v990_v3 = vld [vmem:[%s1276_s2 + $0xa8] sm:$0xff]   ;;  %v993_v6 = vld [vmem:[%s1276_s2 + $0x30] sm:$0xff]  }
  0x15   :  { %876 = vmatpush3.bf16.msra.mxu1 %v954_v19  ;;  %855 = vmatprep.subr.bf16.mxu0 %v955_v20  ;;  %v994_v7 = vld [vmem:[%s1276_s2 + $0xb0] sm:$0xff]   ;;  %v995_v8 = vld [vmem:[%s1276_s2 + $0x78] sm:$0xff]   ;;  %v811_v9 = vld.sshfl [vmem:[%s1274_s0] sm:$0x33 pattern:$0x75316420] }
  0x16   :  { %877 = vmatprep.subr.bf16.mxu1 %v956_v21 }
  0x18   :  { %856 = vmatpush3.bf16.msra.mxu0 %v957_v22 }
  0x19   :  { %878 = vmatpush3.bf16.msra.mxu1 %v958_v23  ;;  %857 = vmatprep.subr.bf16.mxu0 %v959_v24 }
  0x1a   :  { %879 = vmatprep.subr.bf16.mxu1 %v960_v25 }
  0x1c   :  { %858 = vmatpush3.bf16.msra.mxu0 %v961_v26 }
  0x1d   :  { %880 = vmatpush3.bf16.msra.mxu1 %v962_v27  ;;  %859 = vmatprep.subr.bf16.mxu0 %v963_v28 }
  0x1e   :  { %881 = vmatprep.subr.bf16.mxu1 %v964_v29 }
  0x20   :  { %860 = vmatpush3.bf16.msra.mxu0 %v965_v31 }
  0x21   :  { %882 = vmatpush3.bf16.msra.mxu1 %v966_v32  ;;  %889 = vmatprep.subr.bf16.mxu0 %v967_v37 }
  0x22   :  { %911 = vmatprep.subr.bf16.mxu1 %v968_v38 }
  0x23   :  { %406 = vmatmul.mubr.bf16.vlgmr.msra.gmra.mrb[0].mxu0 %v167_v44 }
  0x24   :  { %890 = vmatpush3.bf16.msra.mxu0 %v969_v42  ;;  %446 = vmatmul.mubr.bf16.vlgmr.msra.gmra.mrb[0].mxu1 %v175_v48 }
  0x25   :  { %891 = vmatprep.subr.bf16.mxu0 %v971_v46  ;;  %912 = vmatpush3.bf16.msra.mxu1 %v970_v45 }
  0x26   :  { %913 = vmatprep.subr.bf16.mxu1 %v972_v49 }
  0x28   :  { %892 = vmatpush3.bf16.msra.mxu0 %v973_v50 }
  0x29   :  { %893 = vmatprep.subr.bf16.mxu0 %v975_v52  ;;  %914 = vmatpush3.bf16.msra.mxu1 %v974_v51 }
  0x2a   :  { %915 = vmatprep.subr.bf16.mxu1 %v976_v53 }
  0x2c   :  { %894 = vmatpush3.bf16.msra.mxu0 %v977_v54 }
  0x2d   :  { %895 = vmatprep.subr.bf16.mxu0 %v979_v56  ;;  %916 = vmatpush3.bf16.msra.mxu1 %v978_v55 }
  0x2e   :  { %917 = vmatprep.subr.bf16.mxu1 %v980_v57 }
  0x30   :  { %896 = vmatpush3.bf16.msra.mxu0 %v981_v58 }
  0x31   :  { %897 = vmatprep.subr.bf16.mxu0 %v983_v60  ;;  %918 = vmatpush3.bf16.msra.mxu1 %v982_v59 }
  0x32   :  { %919 = vmatprep.subr.bf16.mxu1 %v984_v61 }
  0x34   :  { %898 = vmatpush3.bf16.msra.mxu0 %v985_v62 }
  0x35   :  { %899 = vmatprep.subr.bf16.mxu0 %v987_v0  ;;  %920 = vmatpush3.bf16.msra.mxu1 %v986_v63 }
  0x36   :  { %921 = vmatprep.subr.bf16.mxu1 %v988_v1 }
  0x38   :  { %900 = vmatpush3.bf16.msra.mxu0 %v989_v2 }
  0x39   :  { %901 = vmatprep.subr.bf16.mxu0 %v991_v4  ;;  %922 = vmatpush3.bf16.msra.mxu1 %v990_v3 }
  0x3a   :  { %10 = vsyncpa [#allocation3], 0  ;;  %923 = vmatprep.subr.bf16.mxu1 %v992_v5  ;;  %v996_v10 = vld [vmem:[%s1276_s2 + $0xf8] sm:$0xff]   ;;  %v461_v11 = vcombine.high %v811_v9, %v811_v9  ;;  %v468_v14 = vrot.slane %v811_v9, %v1160_v41  ;;  %v844_v40 = vld [vmem:[%s1278_s4] ss:$0 sm:$0xff]  ;;  %s1024_s19 = smov [#allocation2]  }
  0x3b   :  { %v997_v12 = vld [vmem:[%s1276_s2 + $0x38] sm:$0xff]   ;;  %s770_s20 = sshll.u32 %s1024_s19, 4  ;;  %vm762_vm0 = vcmask 74752   ;;  %s771_s20 = int_to_ptr.vmem [resolvable:$true] %s770_s20 }
  0x3c   :  { %902 = vmatpush3.bf16.msra.mxu0 %v993_v6  ;;  %v475_v13 = vrot.slane %v461_v11, %v1160_v41  ;;  %v998_v15 = vld [vmem:[%s1276_s2 + $0xb8] sm:$0xff]   ;;  %v476_v17 = vcombine.high %v468_v14, %v468_v14  ;;  %s999_s21 = scalar_lea.vmem %s771_s20, 32  ;;  %p1004_p1 = scmp.lt.s32.totalorder %s771_s20, %s771_s20 }
  0x3d   :  { %903 = vmatprep.subr.bf16.mxu0 %v995_v8  ;;  %924 = vmatpush3.bf16.msra.mxu1 %v994_v7  ;;  %p1000_p0 = scmp.ne.s32.totalorder %s771_s20, %s999_s21  ;;  %p1005_p2 = scmp.lt.s32.totalorder %s999_s21, %s999_s21 }
  0x3e   :  { %925 = vmatprep.subr.bf16.mxu1 %v996_v10  ;;  %706 = vmatprep.mubr.bf16.mxu0 %v475_v13  ;;  %v477_v16 = vcombine.high %v475_v13, %v475_v13 }
  0x3f   :  { %p1006_p3 = por %p1005_p2, %p1004_p1 }
  0x40   :  { %904 = vmatpush3.bf16.msra.mxu0 %v997_v12  ;;  %746 = vmatprep.mubr.bf16.mxu1 %v477_v16 }
  0x41   :  { %926 = vmatpush3.bf16.msra.mxu1 %v998_v15  ;;  %p1007_p4 = pnand %p1006_p3, %p1000_p0 }
  0x43   :  { %707 = vmatmul.mubr.bf16.vlgmr.msra.gmra.mrb[4].mxu0 %v468_v14 }
  0x44   :  { %747 = vmatmul.mubr.bf16.vlgmr.msra.gmra.mrb[4].mxu1 %v476_v17 }
  0xf6   :  { %v861_v18 = vpop.f32.mrb[0].mxu0 }
  0xf7   :  { %v862_v19 = vpop.f32.mrb[1].mxu0  ;;  %v883_v20 = vpop.f32.mrb[0].mxu1 }
  0xf8   :  { %v863_v21 = vadd.f32 %v862_v19, %v861_v18  ;;  %v864_v22 = vpop.f32.mrb[2].mxu0  ;;  %v884_v23 = vpop.f32.mrb[1].mxu1 }
  0xf9   :  { %v865_v24 = vpop.f32.mrb[3].mxu0  ;;  %v885_v25 = vadd.f32 %v884_v23, %v883_v20  ;;  %v886_v26 = vpop.f32.mrb[2].mxu1 }
  0xfa   :  { %v887_v27 = vpop.f32.mrb[3].mxu1 }
  0xfb   :  { %v448_v28 = vadd.f32 %v885_v25, %v863_v21 }
 0x116   :  { %v905_v29 = vpop.f32.mrb[4].mxu0 }
 0x117   :  { %v906_v30 = vpop.f32.mrb[5].mxu0  ;;  %v927_v31 = vpop.f32.mrb[4].mxu1 }
 0x118   :  { %v907_v32 = vadd.f32 %v906_v30, %v905_v29  ;;  %v908_v33 = vpop.f32.mrb[6].mxu0  ;;  %v928_v34 = vpop.f32.mrb[5].mxu1 }
 0x119   :  { %v909_v35 = vpop.f32.mrb[7].mxu0  ;;  %v929_v37 = vadd.f32 %v928_v34, %v927_v31  ;;  %v930_v38 = vpop.f32.mrb[6].mxu1 }
 0x11a   :  { %v709_v36 = vadd.f32 %v907_v32, %v448_v28  ;;  %v931_v39 = vpop.f32.mrb[7].mxu1 }
 0x11c   :  { %v749_v41 = vadd.f32 %v929_v37, %v709_v36 }
 0x11e   :  { %v761_v42 = vadd.f32 %v844_v40, %v749_v41 }
 0x120   :  { %763 = vst.msk [vmem:[#allocation2] sm:$0x3] %vm762_vm0, %v761_v42 }
 0x121   :  { %1010 = shalt.err (!%p1007_p4)
}
 0x122   :  { %s1011_s24 = scalar_lea.hbm %s1279_s5, 32 }
 0x123   :  { %p1012_p5 = scmp.ne.s32.totalorder %s1279_s5, %s1011_s24  ;;  %p1015_p6 = scmp.lt.u32.totalorder %s1011_s24, %s1279_s5 }
 0x125   :  { %p1017_p7 = pnand %p1015_p6, %p1012_p5 }
 0x127   :  { %1020 = shalt.err (!%p1017_p7)
}
 0x128   :  { %773 = dma.vmem_to_hbm [thread:$0]  %s771_s20, 32, %s1279_s5, [#allocation3]  }
 0x129   :  { %1021 = dma.done.wait [#allocation3], 32  }
 0x12a   :  { %1022 = vsyncadd [#allocation3], 4294967264 }
 0x12b   :  { %777 = vsyncpa [#allocation3], 1 }

</bundles_post_ra>
